<compile_context>
chip_gen: v7x
topology: tpu7x:2x2x1
jax: 0.10.0
libtpu: 0.0.40
codegen_flags: <defaults>
</compile_context>

<pallas_src>
import jax
import jax.numpy as jnp
from jax.experimental import pallas as pl
from jax.experimental.pallas import tpu as pltpu

_HI = jax.lax.Precision.HIGHEST


def nchw_to_nhwc(x):
    return jnp.transpose(x, (0, 2, 3, 1))


def nhwc_to_nchw(x):
    return jnp.transpose(x, (0, 3, 1, 2))


# --------------------------------------------------------------------------
# Fused ASFF kernel factory: one grid step == one batch element.
# --------------------------------------------------------------------------

def _build_asff_kernel(c0_in, c1_in, inter, cc, hw):
    """Returns (kernel_fn, packed_slab_rows) specialized for the given dims."""
    assert 3 * cc <= inter and 3 <= inter, "packed-slab padding assumes 3*cc <= inter"
    o_cw1 = c0_in
    o_caw = o_cw1 + c1_in
    o_wlw = o_caw + 3 * inter
    o_wlx = o_wlw + 3 * inter
    o_bias = o_wlx + inter
    o_u2 = o_bias + 8
    n_rows = o_u2 + hw
    f32 = jnp.float32

    def kernel(x0_ref, x1_ref, x2_ref, w_ref, u4_ref,
               ms0_ref, ms1_ref, ms2_ref, o_ref):
        x0 = x0_ref[0]                        # (16, 256)  level-0 pixels (native)
        x1 = x1_ref[0]                        # (64, 128)  level-1 pixels (native)
        l2 = x2_ref[0]                        # (256, 64)  level-2 pixels (full res)

        # Static views into the packed constant slab (width inter=64, f32).
        cw0 = w_ref[0:c0_in, :]                          # compress_level_0 (BN folded)
        cw1 = w_ref[o_cw1:o_cw1 + c1_in, :]              # compress_level_1 (BN folded)
        caw = tuple(w_ref[o_caw + i * inter:o_caw + (i + 1) * inter, :]
                    for i in range(3))                   # precomposed CA MLPs (64,64)
        wlw = w_ref[o_wlw:o_wlw + 3 * inter, :]          # block-diag weight_level_* (192,64)
        wlx = w_ref[o_wlx:o_wlx + inter, :]              # weight_levels (48,3) zero-padded
        bias = w_ref[o_bias:o_bias + 8, :]               # cb0 / cb1 / wlb / wl_b rows
        u2 = w_ref[o_u2:o_u2 + hw, :]                    # nearest x2 upsample (0/1)
        cb0, cb1 = bias[0:1, :], bias[1:2, :]
        wlb48, wlb3 = bias[2:3, :], bias[3:4, :]

        # compress_level_{0,1}: 1x1 conv + folded BN + ReLU6 at native resolution.
        c0 = jnp.clip(jnp.dot(x0, cw0, preferred_element_type=f32) + cb0, 0.0, 6.0)
        c1 = jnp.clip(jnp.dot(x1, cw1, preferred_element_type=f32) + cb1, 0.0, 6.0)

        # ChannelAttention (fc2(fc1(.)) is linear, relu1 unused upstream) with
        # the MLP precomposed on the wrapper.  Pooling over the NATIVE feature
        # is exact for levels 0/1 because nearest upsample replicates rows.
        cas = []
        for feat, w in ((c0, caw[0]), (c1, caw[1]), (l2, caw[2])):
            pooled = (jnp.mean(feat, axis=0, keepdims=True)
                      + jnp.max(feat, axis=0, keepdims=True))              # (1, 64)
            z = jnp.dot(pooled, w, preferred_element_type=f32)
            cas.append(1.0 / (1.0 + jnp.exp(-z)))                          # (1, 64)

        # Nearest upsample as 0/1 gather matmuls (exact; commutes with the
        # pointwise conv + ReLU6 above).
        l0 = jnp.dot(u4_ref[...], c0, preferred_element_type=f32)          # (256, 64)
        l1 = jnp.dot(u2, c1, preferred_element_type=f32)                   # (256, 64)

        # weight_level_{0,1,2} + weight_levels -> two matmuls (block-diagonal
        # fusion), then softmax over the 3 level logits.
        lvls = jnp.concatenate([l0, l1, l2], axis=-1)                      # (256, 192)
        wv = jnp.clip(jnp.dot(lvls, wlw, preferred_element_type=f32) + wlb48,
                      0.0, 6.0)                                            # (256, 64)
        logits = (jnp.dot(wv, wlx, preferred_element_type=f32) + wlb3)[:, 0:3]
        mx = jnp.max(logits, axis=-1, keepdims=True)
        e = jnp.exp(logits - mx)
        wts = e * pl.reciprocal(jnp.sum(e, axis=-1, keepdims=True), approx=True)

        # CBAM: channel attention * spatial attention * level weight, stored
        # lane-dense per level straight into the (3, 256, 64) output slab.
        natives = (c0, c1, l2)
        fulls = (l0, l1, l2)
        ms_refs = (ms0_ref, ms1_ref, ms2_ref)
        for i in range(3):
            ca = cas[i]
            xca_n = natives[i] * ca                                        # (P_i, 64) native
            # channel avg/max maps at native resolution; the 7x7 conv (zero
            # pad) + upsample are folded into one dense (256, 2*P_i) matrix.
            avg_c = jnp.mean(xca_n, axis=-1, keepdims=True)                # (P_i, 1)
            max_c = jnp.max(xca_n, axis=-1, keepdims=True)                 # (P_i, 1)
            pm = jnp.concatenate([avg_c, max_c], axis=0)                   # (2*P_i, 1)
            sa_logit = jnp.dot(ms_refs[i][...], pm,
                               preferred_element_type=f32)                 # (256, 1)
            sa = 1.0 / (1.0 + jnp.exp(-sa_logit))
            o_ref[0, i, :, :] = fulls[i] * ca * (sa * wts[:, i:i + 1])

    return kernel, n_rows


# --------------------------------------------------------------------------
# Wrapper-side (tiny, one-off) pre-computations
# --------------------------------------------------------------------------

def _upsample_matrix(h_out, w_out, scale):
    """U[p_out, q_in] = 1 iff nearest-upsample source of p_out is q_in."""
    h_in, w_in = h_out // scale, w_out // scale
    r = jnp.arange(h_out)
    c = jnp.arange(w_out)
    src = ((r[:, None] // scale) * w_in + (c[None, :] // scale)).reshape(-1)
    return (src[:, None] == jnp.arange(h_in * w_in)[None, :]).astype(jnp.float32)


def _spatial_conv_matrix(taps, h, w):
    """Dense (HW, HW) matrix of the 7x7 SpatialAttention conv for one pooled
    channel; zero padding baked in.  taps: (49,) kernel values."""
    hw = h * w
    idx = jnp.arange(hw)
    ro, co = (idx // w)[:, None], (idx % w)[:, None]      # output pixel
    ri, ci = (idx // w)[None, :], (idx % w)[None, :]      # input pixel
    dy, dx = ri - ro + 3, ci - co + 3
    valid = (dy >= 0) & (dy < 7) & (dx >= 0) & (dx < 7)
    tap = jnp.clip(dy, 0, 6) * 7 + jnp.clip(dx, 0, 6)
    return jnp.where(valid, taps[tap], 0.0).astype(jnp.float32)


# --------------------------------------------------------------------------
# Forward
# --------------------------------------------------------------------------

def asff_forward(p, x_level_0, x_level_1, x_level_2, use_pallas=True):
    """ASFF(level=2) forward. Inputs/outputs NCHW float32 like the PyTorch module."""
    if not use_pallas:
        return _asff_forward_ref(p, x_level_0, x_level_1, x_level_2)

    n, c0_in, h0, w0 = x_level_0.shape        # (N, 256, 4, 4)
    _, c1_in, h1, w1 = x_level_1.shape        # (N, 128, 8, 8)
    _, c2_in, h2, w2 = x_level_2.shape        # (N,  64, 16, 16)
    hw = h2 * w2
    inter = c2_in                             # 64
    cc = p["wl0_w"].shape[1]                  # 16

    # (pixels, channels) views -- channels on the 128-lane axis.
    f0 = nchw_to_nhwc(x_level_0).reshape(n, h0 * w0, c0_in)
    f1 = nchw_to_nhwc(x_level_1).reshape(n, h1 * w1, c1_in)
    f2 = nchw_to_nhwc(x_level_2).reshape(n, hw, c2_in)

    u4 = _upsample_matrix(h2, w2, h2 // h0)                           # (256, 16)
    u2 = _upsample_matrix(h2, w2, h2 // h1)                           # (256, 64)

    # ChannelAttention MLP precomposed (exact: linear, no bias, relu1 unused).
    caw = [jnp.matmul(p[f"ca{i}_w1"], p[f"ca{i}_w2"], precision=_HI)
           for i in range(3)]                                         # (64, 64) x3

    # weight_level_{0,1,2} as one block-diagonal matrix (192,48) zero-padded to
    # `inter` lanes; weight_levels (48,3) zero-padded into an (inter,inter) block.
    wlw_bd = jnp.zeros((3 * inter, inter), jnp.float32)
    wlb_cat = jnp.zeros((1, inter), jnp.float32)
    for i in range(3):
        wlw_bd = wlw_bd.at[i * inter:(i + 1) * inter, i * cc:(i + 1) * cc].set(p[f"wl{i}_w"])
        wlb_cat = wlb_cat.at[0, i * cc:(i + 1) * cc].set(p[f"wl{i}_b"])
    wlx = jnp.zeros((inter, inter), jnp.float32).at[:3 * cc, :3].set(p["wl_w"])
    wlb3 = jnp.zeros((1, inter), jnp.float32).at[0, :3].set(p["wl_b"])
    bias_block = jnp.concatenate(
        [p["c0_b"].reshape(1, -1), p["c1_b"].reshape(1, -1), wlb_cat, wlb3,
         jnp.zeros((4, inter), jnp.float32)], axis=0)                 # (8, 64)

    # One packed constant slab (single startup DMA, static row slices in-kernel).
    wslab = jnp.concatenate(
        [p["c0_w"], p["c1_w"], caw[0], caw[1], caw[2], wlw_bd, wlx,
         bias_block, u2], axis=0).astype(jnp.float32)                 # (1096, 64)

    # 7x7 spatial-attention conv (zero pad) as dense matrices; the nearest
    # upsample for levels 0/1 is folded in so K shrinks from 256 to 16/64.
    ups = [u4, u2, None]
    ms = []
    for i in range(3):
        ma = _spatial_conv_matrix(p[f"sa{i}_w"][:, 0], h2, w2)
        mm = _spatial_conv_matrix(p[f"sa{i}_w"][:, 1], h2, w2)
        if ups[i] is not None:
            ma = jnp.matmul(ma, ups[i], precision=_HI)
            mm = jnp.matmul(mm, ups[i], precision=_HI)
        ms.append(jnp.concatenate([ma, mm], axis=1))                  # (256, 2*P_i)
    ms0, ms1, ms2 = ms                                                # (256,32)/(256,128)/(256,512)

    kernel, n_rows = _build_asff_kernel(c0_in, c1_in, inter, cc, hw)
    assert wslab.shape == (n_rows, inter), wslab.shape

    # Tiny grids run "arbitrary" so two v7x TensorCores are not each handed a
    # single step plus a private copy of the ~1 MiB constants.
    # TODO(synk): for large batches, tile several images per grid step (B_TILE)
    # to amortize the ~0.35 us/step overhead and fill the MXU M dimension.
    dims = ("arbitrary",) if n < 4 else ("parallel",)

    # Total VMEM (constants ~1 MiB + blocks, double buffered) is ~2.5 MiB ->
    # well within default scoped limits on v5e / v6e / v7x.
    out = pl.pallas_call(
        kernel,
        out_shape=jax.ShapeDtypeStruct((n, 3, hw, inter), jnp.float32),
        grid=(n,),
        in_specs=[
            pl.BlockSpec((1, h0 * w0, c0_in), lambda b: (b, 0, 0)),
            pl.BlockSpec((1, h1 * w1, c1_in), lambda b: (b, 0, 0)),
            pl.BlockSpec((1, hw, c2_in), lambda b: (b, 0, 0)),
            pl.BlockSpec(wslab.shape, lambda b: (0, 0)),
            pl.BlockSpec(u4.shape, lambda b: (0, 0)),
            pl.BlockSpec(ms0.shape, lambda b: (0, 0)),
            pl.BlockSpec(ms1.shape, lambda b: (0, 0)),
            pl.BlockSpec(ms2.shape, lambda b: (0, 0)),
        ],
        out_specs=pl.BlockSpec((1, 3, hw, inter), lambda b: (b, 0, 0, 0)),
        compiler_params=pltpu.CompilerParams(dimension_semantics=dims),
    )(f0, f1, f2, wslab, u4, ms0, ms1, ms2)

    # (N, level, pixel, ch) -> NCHW with channel = inter*level + ch.
    return out.transpose(0, 1, 3, 2).reshape(n, 3 * inter, h2, w2)


# --------------------------------------------------------------------------
# Pure-JAX reference (for correctness check only)
# --------------------------------------------------------------------------

def upsample_nearest(x_nhwc, scale):
    x = jnp.repeat(x_nhwc, scale, axis=1)
    return jnp.repeat(x, scale, axis=2)


def ref_pointwise(x, w, b):
    y = jnp.einsum("nhwc,cd->nhwd", x, w, precision=_HI) + b
    return jnp.clip(y, 0.0, 6.0)


def ref_weights_softmax(x, w, b):
    logits = jnp.einsum("nhwc,cd->nhwd", x, w, precision=_HI) + b
    return jax.nn.softmax(logits, axis=-1)


def ref_channel_attention(x, w1, w2):
    avg = jnp.mean(x, axis=(1, 2))
    mx = jnp.max(x, axis=(1, 2))

    def mlp(v):
        return jnp.einsum("nc,cd->nd",
                          jnp.einsum("nc,cd->nd", v, w1, precision=_HI),
                          w2, precision=_HI)

    return jax.nn.sigmoid(mlp(avg) + mlp(mx))


def ref_cbam_fuse(feat, ca, wmap, saw):
    x1 = feat * ca[:, None, None, :]
    maps = jnp.stack([jnp.mean(x1, -1), jnp.max(x1, -1)], axis=-1)       # (N,H,W,2)
    k = saw.reshape(7, 7, 2, 1)                                          # HWIO
    conv = jax.lax.conv_general_dilated(
        maps, k, (1, 1), [(3, 3), (3, 3)],
        dimension_numbers=("NHWC", "HWIO", "NHWC"), precision=_HI)
    sa = jax.nn.sigmoid(conv)                                            # (N,H,W,1)
    return x1 * sa * wmap[..., None]


def _asff_forward_ref(p, x_level_0, x_level_1, x_level_2):
    f0 = nchw_to_nhwc(x_level_0)
    f1 = nchw_to_nhwc(x_level_1)
    f2 = nchw_to_nhwc(x_level_2)
    level_0_resized = upsample_nearest(ref_pointwise(f0, p["c0_w"], p["c0_b"]), 4)
    level_1_resized = upsample_nearest(ref_pointwise(f1, p["c1_w"], p["c1_b"]), 2)
    level_2_resized = f2
    wv0 = ref_pointwise(level_0_resized, p["wl0_w"], p["wl0_b"])
    wv1 = ref_pointwise(level_1_resized, p["wl1_w"], p["wl1_b"])
    wv2 = ref_pointwise(level_2_resized, p["wl2_w"], p["wl2_b"])
    levels_weight = ref_weights_softmax(
        jnp.concatenate([wv0, wv1, wv2], axis=-1), p["wl_w"], p["wl_b"])
    pieces = []
    for i, feat in enumerate((level_0_resized, level_1_resized, level_2_resized)):
        ca = ref_channel_attention(feat, p[f"ca{i}_w1"], p[f"ca{i}_w2"])
        pieces.append(ref_cbam_fuse(feat, ca, levels_weight[..., i], p[f"sa{i}_w"]))
    return nhwc_to_nchw(jnp.concatenate(pieces, axis=-1))


# --------------------------------------------------------------------------
# Deterministic parameter init (level=2, expansion=1, rfb=False -> compress_c=16)
# --------------------------------------------------------------------------

def init_params(key):
    c0_in, c1_in, inter, cc = 256, 128, 64, 16
    keys = iter(jax.random.split(key, 40))

    def conv_w(cin, cout):
        return jax.random.normal(next(keys), (cin, cout), jnp.float32) / jnp.sqrt(cin)

    def bn(cout):
        g = 1.0 + 0.1 * jax.random.normal(next(keys), (cout,), jnp.float32)
        beta = 0.1 * jax.random.normal(next(keys), (cout,), jnp.float32)
        mean = 0.1 * jax.random.normal(next(keys), (cout,), jnp.float32)
        var = jnp.abs(jax.random.normal(next(keys), (cout,), jnp.float32)) + 0.5
        return g, beta, mean, var

    def fold(w, g, beta, mean, var, eps=1e-5):
        scale = g / jnp.sqrt(var + eps)
        return w * scale[None, :], beta - mean * scale

    p = {}
    p["c0_w"], p["c0_b"] = fold(conv_w(c0_in, inter), *bn(inter))    # compress_level_0
    p["c1_w"], p["c1_b"] = fold(conv_w(c1_in, inter), *bn(inter))    # compress_level_1
    for i in range(3):                                               # weight_level_i
        p[f"wl{i}_w"], p[f"wl{i}_b"] = fold(conv_w(inter, cc), *bn(cc))
    p["wl_w"] = conv_w(3 * cc, 3)                                    # weight_levels
    p["wl_b"] = 0.1 * jax.random.normal(next(keys), (3,), jnp.float32)
    for i in range(3):                                               # CBAM per level
        p[f"ca{i}_w1"] = conv_w(inter, inter // 16)
        p[f"ca{i}_w2"] = conv_w(inter // 16, inter)
        p[f"sa{i}_w"] = jax.random.normal(next(keys), (49, 2), jnp.float32) / jnp.sqrt(98.0)
    return p


# --------------------------------------------------------------------------

if __name__ == "__main__":
    key = jax.random.PRNGKey(0)
    kx0, kx1, kx2, kp = jax.random.split(key, 4)
    # ASFF level=2, expansion=1: dims [256, 128, 64], spatial 4 / 8 / 16
    x_level_0 = jax.random.normal(kx0, (2, 256, 4, 4), jnp.float32)
    x_level_1 = jax.random.normal(kx1, (2, 128, 8, 8), jnp.float32)
    x_level_2 = jax.random.normal(kx2, (2, 64, 16, 16), jnp.float32)
    params = init_params(kp)

    fwd = jax.jit(lambda p, a, b, c: asff_forward(p, a, b, c, use_pallas=True))
    out = fwd(params, x_level_0, x_level_1, x_level_2)
    out = jax.block_until_ready(out)

    assert out.shape == (2, 192, 16, 16), out.shape
    assert out.dtype == jnp.float32

    ref = asff_forward(params, x_level_0, x_level_1, x_level_2, use_pallas=False)
    ref = jax.block_until_ready(ref)
    assert bool(jnp.all(jnp.isfinite(out)))
    # 3e-3 tolerance: the only deliberate approximation vs the HIGHEST-precision
    # reference is the EUP approx reciprocal in the softmax denominator; the
    # precompositions / native-res pooling are exact up to f32 reassociation.
    assert bool(jnp.allclose(out, ref, rtol=3e-3, atol=3e-3)), \
        float(jnp.max(jnp.abs(out - ref)))

    print("KERNEL_OK")
</pallas_src>

<mosaic_0001>
module attributes {stable_mosaic.version = 11 : i64} {
  func.func @kernel(%arg0: i32, %arg1: memref<1x16x256xf32, #tpu.memory_space<vmem>>, %arg2: memref<1x64x128xf32, #tpu.memory_space<vmem>>, %arg3: memref<1x256x64xf32, #tpu.memory_space<vmem>>, %arg4: memref<1096x64xf32, #tpu.memory_space<vmem>>, %arg5: memref<256x16xf32, #tpu.memory_space<vmem>>, %arg6: memref<256x32xf32, #tpu.memory_space<vmem>>, %arg7: memref<256x128xf32, #tpu.memory_space<vmem>>, %arg8: memref<256x512xf32, #tpu.memory_space<vmem>>, %arg9: memref<1x3x256x64xf32, #tpu.memory_space<vmem>>) attributes {dimension_semantics = [#tpu.dimension_semantics<arbitrary>], iteration_bounds = array<i64: 2>, scalar_prefetch = 0 : i64, scratch_operands = 0 : i64, tpu.core_type = #tpu.core_type<tc>, window_params = [{transform_indices = @transform_0, window_bounds = array<i64: 1, 16, 256>}, {transform_indices = @transform_1, window_bounds = array<i64: 1, 64, 128>}, {transform_indices = @transform_2, window_bounds = array<i64: 1, 256, 64>}, {pipeline_mode = #tpu.pipeline_mode<synchronous>, transform_indices = @transform_3, window_bounds = array<i64: 1096, 64>}, {pipeline_mode = #tpu.pipeline_mode<synchronous>, transform_indices = @transform_4, window_bounds = array<i64: 256, 16>}, {pipeline_mode = #tpu.pipeline_mode<synchronous>, transform_indices = @transform_5, window_bounds = array<i64: 256, 32>}, {pipeline_mode = #tpu.pipeline_mode<synchronous>, transform_indices = @transform_6, window_bounds = array<i64: 256, 128>}, {pipeline_mode = #tpu.pipeline_mode<synchronous>, transform_indices = @transform_7, window_bounds = array<i64: 256, 512>}, {transform_indices = @transform_8, window_bounds = array<i64: 1, 3, 256, 64>}]} {
    %c0 = arith.constant 0 : index
    %c0_0 = arith.constant 0 : index
    %c0_1 = arith.constant 0 : index
    %0 = vector.load %arg1[%c0, %c0_0, %c0_1] : memref<1x16x256xf32, #tpu.memory_space<vmem>>, vector<1x16x256xf32>
    %1 = vector.shape_cast %0 : vector<1x16x256xf32> to vector<16x256xf32>
    %c0_2 = arith.constant 0 : index
    %c0_3 = arith.constant 0 : index
    %c0_4 = arith.constant 0 : index
    %2 = vector.load %arg2[%c0_2, %c0_3, %c0_4] : memref<1x64x128xf32, #tpu.memory_space<vmem>>, vector<1x64x128xf32>
    %3 = vector.shape_cast %2 : vector<1x64x128xf32> to vector<64x128xf32>
    %c0_5 = arith.constant 0 : index
    %c0_6 = arith.constant 0 : index
    %c0_7 = arith.constant 0 : index
    %4 = vector.load %arg3[%c0_5, %c0_6, %c0_7] : memref<1x256x64xf32, #tpu.memory_space<vmem>>, vector<1x256x64xf32>
    %5 = vector.shape_cast %4 : vector<1x256x64xf32> to vector<256x64xf32>
    %c0_8 = arith.constant 0 : index
    %c0_9 = arith.constant 0 : index
    %6 = vector.load %arg4[%c0_8, %c0_9] : memref<1096x64xf32, #tpu.memory_space<vmem>>, vector<256x64xf32>
    %c256 = arith.constant 256 : index
    %c0_10 = arith.constant 0 : index
    %7 = vector.load %arg4[%c256, %c0_10] : memref<1096x64xf32, #tpu.memory_space<vmem>>, vector<128x64xf32>
    %c384 = arith.constant 384 : index
    %c0_11 = arith.constant 0 : index
    %8 = vector.load %arg4[%c384, %c0_11] : memref<1096x64xf32, #tpu.memory_space<vmem>>, vector<64x64xf32>
    %c448 = arith.constant 448 : index
    %c0_12 = arith.constant 0 : index
    %9 = vector.load %arg4[%c448, %c0_12] : memref<1096x64xf32, #tpu.memory_space<vmem>>, vector<64x64xf32>
    %c512 = arith.constant 512 : index
    %c0_13 = arith.constant 0 : index
    %10 = vector.load %arg4[%c512, %c0_13] : memref<1096x64xf32, #tpu.memory_space<vmem>>, vector<64x64xf32>
    %c576 = arith.constant 576 : index
    %c0_14 = arith.constant 0 : index
    %11 = vector.load %arg4[%c576, %c0_14] : memref<1096x64xf32, #tpu.memory_space<vmem>>, vector<192x64xf32>
    %c768 = arith.constant 768 : index
    %c0_15 = arith.constant 0 : index
    %12 = vector.load %arg4[%c768, %c0_15] : memref<1096x64xf32, #tpu.memory_space<vmem>>, vector<64x64xf32>
    %c832 = arith.constant 832 : index
    %c0_16 = arith.constant 0 : index
    %13 = vector.load %arg4[%c832, %c0_16] : memref<1096x64xf32, #tpu.memory_space<vmem>>, vector<8x64xf32>
    %c840 = arith.constant 840 : index
    %c0_17 = arith.constant 0 : index
    %14 = vector.load %arg4[%c840, %c0_17] : memref<1096x64xf32, #tpu.memory_space<vmem>>, vector<256x64xf32>
    %15 = vector.extract_strided_slice %13 {offsets = [0, 0], sizes = [1, 64], strides = [1, 1]} : vector<8x64xf32> to vector<1x64xf32>
    %16 = vector.extract_strided_slice %13 {offsets = [1, 0], sizes = [1, 64], strides = [1, 1]} : vector<8x64xf32> to vector<1x64xf32>
    %17 = vector.extract_strided_slice %13 {offsets = [2, 0], sizes = [1, 64], strides = [1, 1]} : vector<8x64xf32> to vector<1x64xf32>
    %18 = vector.extract_strided_slice %13 {offsets = [3, 0], sizes = [1, 64], strides = [1, 1]} : vector<8x64xf32> to vector<1x64xf32>
    %cst = arith.constant dense<0.000000e+00> : vector<16x64xf32>
    %19 = tpu.matmul %1, %6, %cst {dimension_numbers = #tpu.dot_dimension_numbers<[1], [0], [0], [1], [0, 0, 1, 1], [], []>} : vector<16x256xf32>, vector<256x64xf32>, vector<16x64xf32> -> vector<16x64xf32>
    %20 = vector.broadcast %15 : vector<1x64xf32> to vector<16x64xf32>
    %21 = arith.addf %19, %20 : vector<16x64xf32>
    %cst_18 = arith.constant 0.000000e+00 : f32
    %cst_19 = arith.constant 6.000000e+00 : f32
    %22 = vector.broadcast %cst_18 : f32 to vector<16x64xf32>
    %23 = arith.maximumf %22, %21 : vector<16x64xf32>
    %24 = vector.broadcast %cst_19 : f32 to vector<16x64xf32>
    %25 = arith.minimumf %24, %23 : vector<16x64xf32>
    %cst_20 = arith.constant dense<0.000000e+00> : vector<64x64xf32>
    %26 = tpu.matmul %3, %7, %cst_20 {dimension_numbers = #tpu.dot_dimension_numbers<[1], [0], [0], [1], [0, 0, 1, 1], [], []>} : vector<64x128xf32>, vector<128x64xf32>, vector<64x64xf32> -> vector<64x64xf32>
    %27 = vector.broadcast %16 : vector<1x64xf32> to vector<64x64xf32>
    %28 = arith.addf %26, %27 : vector<64x64xf32>
    %cst_21 = arith.constant 0.000000e+00 : f32
    %cst_22 = arith.constant 6.000000e+00 : f32
    %29 = vector.broadcast %cst_21 : f32 to vector<64x64xf32>
    %30 = arith.maximumf %29, %28 : vector<64x64xf32>
    %31 = vector.broadcast %cst_22 : f32 to vector<64x64xf32>
    %32 = arith.minimumf %31, %30 : vector<64x64xf32>
    %cst_23 = arith.constant dense<0.000000e+00> : vector<64xf32>
    %33 = vector.multi_reduction <add>, %25, %cst_23 [0] : vector<16x64xf32> to vector<64xf32>
    %34 = vector.shape_cast %33 : vector<64xf32> to vector<1x64xf32>
    %cst_24 = arith.constant 1.600000e+01 : f32
    %35 = vector.broadcast %cst_24 : f32 to vector<1x64xf32>
    %36 = arith.divf %34, %35 : vector<1x64xf32>
    %cst_25 = arith.constant dense<0xFF800000> : vector<64xf32>
    %37 = vector.multi_reduction <maximumf>, %25, %cst_25 [0] : vector<16x64xf32> to vector<64xf32>
    %38 = vector.shape_cast %37 : vector<64xf32> to vector<1x64xf32>
    %39 = arith.addf %36, %38 : vector<1x64xf32>
    %cst_26 = arith.constant dense<0.000000e+00> : vector<1x64xf32>
    %40 = tpu.matmul %39, %8, %cst_26 {dimension_numbers = #tpu.dot_dimension_numbers<[1], [0], [0], [1], [0, 0, 1, 1], [], []>} : vector<1x64xf32>, vector<64x64xf32>, vector<1x64xf32> -> vector<1x64xf32>
    %cst_27 = arith.constant 0.000000e+00 : f32
    %41 = vector.broadcast %cst_27 : f32 to vector<1x64xf32>
    %42 = arith.subf %41, %40 : vector<1x64xf32>
    %43 = math.exp %42 : vector<1x64xf32>
    %cst_28 = arith.constant 1.000000e+00 : f32
    %44 = vector.broadcast %cst_28 : f32 to vector<1x64xf32>
    %45 = arith.addf %44, %43 : vector<1x64xf32>
    %cst_29 = arith.constant 1.000000e+00 : f32
    %46 = vector.broadcast %cst_29 : f32 to vector<1x64xf32>
    %47 = arith.divf %46, %45 : vector<1x64xf32>
    %cst_30 = arith.constant dense<0.000000e+00> : vector<64xf32>
    %48 = vector.multi_reduction <add>, %32, %cst_30 [0] : vector<64x64xf32> to vector<64xf32>
    %49 = vector.shape_cast %48 : vector<64xf32> to vector<1x64xf32>
    %cst_31 = arith.constant 6.400000e+01 : f32
    %50 = vector.broadcast %cst_31 : f32 to vector<1x64xf32>
    %51 = arith.divf %49, %50 : vector<1x64xf32>
    %cst_32 = arith.constant dense<0xFF800000> : vector<64xf32>
    %52 = vector.multi_reduction <maximumf>, %32, %cst_32 [0] : vector<64x64xf32> to vector<64xf32>
    %53 = vector.shape_cast %52 : vector<64xf32> to vector<1x64xf32>
    %54 = arith.addf %51, %53 : vector<1x64xf32>
    %cst_33 = arith.constant dense<0.000000e+00> : vector<1x64xf32>
    %55 = tpu.matmul %54, %9, %cst_33 {dimension_numbers = #tpu.dot_dimension_numbers<[1], [0], [0], [1], [0, 0, 1, 1], [], []>} : vector<1x64xf32>, vector<64x64xf32>, vector<1x64xf32> -> vector<1x64xf32>
    %cst_34 = arith.constant 0.000000e+00 : f32
    %56 = vector.broadcast %cst_34 : f32 to vector<1x64xf32>
    %57 = arith.subf %56, %55 : vector<1x64xf32>
    %58 = math.exp %57 : vector<1x64xf32>
    %cst_35 = arith.constant 1.000000e+00 : f32
    %59 = vector.broadcast %cst_35 : f32 to vector<1x64xf32>
    %60 = arith.addf %59, %58 : vector<1x64xf32>
    %cst_36 = arith.constant 1.000000e+00 : f32
    %61 = vector.broadcast %cst_36 : f32 to vector<1x64xf32>
    %62 = arith.divf %61, %60 : vector<1x64xf32>
    %cst_37 = arith.constant dense<0.000000e+00> : vector<64xf32>
    %63 = vector.multi_reduction <add>, %5, %cst_37 [0] : vector<256x64xf32> to vector<64xf32>
    %64 = vector.shape_cast %63 : vector<64xf32> to vector<1x64xf32>
    %cst_38 = arith.constant 2.560000e+02 : f32
    %65 = vector.broadcast %cst_38 : f32 to vector<1x64xf32>
    %66 = arith.divf %64, %65 : vector<1x64xf32>
    %cst_39 = arith.constant dense<0xFF800000> : vector<64xf32>
    %67 = vector.multi_reduction <maximumf>, %5, %cst_39 [0] : vector<256x64xf32> to vector<64xf32>
    %68 = vector.shape_cast %67 : vector<64xf32> to vector<1x64xf32>
    %69 = arith.addf %66, %68 : vector<1x64xf32>
    %cst_40 = arith.constant dense<0.000000e+00> : vector<1x64xf32>
    %70 = tpu.matmul %69, %10, %cst_40 {dimension_numbers = #tpu.dot_dimension_numbers<[1], [0], [0], [1], [0, 0, 1, 1], [], []>} : vector<1x64xf32>, vector<64x64xf32>, vector<1x64xf32> -> vector<1x64xf32>
    %cst_41 = arith.constant 0.000000e+00 : f32
    %71 = vector.broadcast %cst_41 : f32 to vector<1x64xf32>
    %72 = arith.subf %71, %70 : vector<1x64xf32>
    %73 = math.exp %72 : vector<1x64xf32>
    %cst_42 = arith.constant 1.000000e+00 : f32
    %74 = vector.broadcast %cst_42 : f32 to vector<1x64xf32>
    %75 = arith.addf %74, %73 : vector<1x64xf32>
    %cst_43 = arith.constant 1.000000e+00 : f32
    %76 = vector.broadcast %cst_43 : f32 to vector<1x64xf32>
    %77 = arith.divf %76, %75 : vector<1x64xf32>
    %c0_44 = arith.constant 0 : index
    %c0_45 = arith.constant 0 : index
    %78 = vector.load %arg5[%c0_44, %c0_45] : memref<256x16xf32, #tpu.memory_space<vmem>>, vector<256x16xf32>
    %cst_46 = arith.constant dense<0.000000e+00> : vector<256x64xf32>
    %79 = tpu.matmul %78, %25, %cst_46 {dimension_numbers = #tpu.dot_dimension_numbers<[1], [0], [0], [1], [0, 0, 1, 1], [], []>} : vector<256x16xf32>, vector<16x64xf32>, vector<256x64xf32> -> vector<256x64xf32>
    %cst_47 = arith.constant dense<0.000000e+00> : vector<256x64xf32>
    %80 = tpu.matmul %14, %32, %cst_47 {dimension_numbers = #tpu.dot_dimension_numbers<[1], [0], [0], [1], [0, 0, 1, 1], [], []>} : vector<256x64xf32>, vector<64x64xf32>, vector<256x64xf32> -> vector<256x64xf32>
    %81 = tpu.concatenate %79, %80, %5 in 1 : vector<256x64xf32>, vector<256x64xf32>, vector<256x64xf32> -> vector<256x192xf32>
    %cst_48 = arith.constant dense<0.000000e+00> : vector<256x64xf32>
    %82 = tpu.matmul %81, %11, %cst_48 {dimension_numbers = #tpu.dot_dimension_numbers<[1], [0], [0], [1], [0, 0, 1, 1], [], []>} : vector<256x192xf32>, vector<192x64xf32>, vector<256x64xf32> -> vector<256x64xf32>
    %83 = vector.broadcast %17 : vector<1x64xf32> to vector<256x64xf32>
    %84 = arith.addf %82, %83 : vector<256x64xf32>
    %cst_49 = arith.constant 0.000000e+00 : f32
    %cst_50 = arith.constant 6.000000e+00 : f32
    %85 = vector.broadcast %cst_49 : f32 to vector<256x64xf32>
    %86 = arith.maximumf %85, %84 : vector<256x64xf32>
    %87 = vector.broadcast %cst_50 : f32 to vector<256x64xf32>
    %88 = arith.minimumf %87, %86 : vector<256x64xf32>
    %cst_51 = arith.constant dense<0.000000e+00> : vector<256x64xf32>
    %89 = tpu.matmul %88, %12, %cst_51 {dimension_numbers = #tpu.dot_dimension_numbers<[1], [0], [0], [1], [0, 0, 1, 1], [], []>} : vector<256x64xf32>, vector<64x64xf32>, vector<256x64xf32> -> vector<256x64xf32>
    %90 = vector.broadcast %18 : vector<1x64xf32> to vector<256x64xf32>
    %91 = arith.addf %89, %90 : vector<256x64xf32>
    %92 = vector.extract_strided_slice %91 {offsets = [0, 0], sizes = [256, 3], strides = [1, 1]} : vector<256x64xf32> to vector<256x3xf32>
    %cst_52 = arith.constant dense<0xFF800000> : vector<256xf32>
    %93 = vector.multi_reduction <maximumf>, %92, %cst_52 [1] : vector<256x3xf32> to vector<256xf32>
    %94 = vector.shape_cast %93 : vector<256xf32> to vector<256x1xf32>
    %95 = vector.broadcast %94 : vector<256x1xf32> to vector<256x3xf32>
    %96 = arith.subf %92, %95 : vector<256x3xf32>
    %97 = math.exp %96 : vector<256x3xf32>
    %cst_53 = arith.constant dense<0.000000e+00> : vector<256xf32>
    %98 = vector.multi_reduction <add>, %97, %cst_53 [1] : vector<256x3xf32> to vector<256xf32>
    %99 = vector.shape_cast %98 : vector<256xf32> to vector<256x1xf32>
    %100 = tpu.reciprocal %99 {approx = true} : vector<256x1xf32> -> vector<256x1xf32>
    %101 = vector.broadcast %100 : vector<256x1xf32> to vector<256x3xf32>
    %102 = arith.mulf %97, %101 : vector<256x3xf32>
    %103 = vector.broadcast %47 : vector<1x64xf32> to vector<16x64xf32>
    %104 = arith.mulf %25, %103 : vector<16x64xf32>
    %cst_54 = arith.constant dense<0.000000e+00> : vector<16xf32>
    %105 = vector.multi_reduction <add>, %104, %cst_54 [1] : vector<16x64xf32> to vector<16xf32>
    %106 = vector.shape_cast %105 : vector<16xf32> to vector<16x1xf32>
    %cst_55 = arith.constant 6.400000e+01 : f32
    %107 = vector.broadcast %cst_55 : f32 to vector<16x1xf32>
    %108 = arith.divf %106, %107 : vector<16x1xf32>
    %cst_56 = arith.constant dense<0xFF800000> : vector<16xf32>
    %109 = vector.multi_reduction <maximumf>, %104, %cst_56 [1] : vector<16x64xf32> to vector<16xf32>
    %110 = vector.shape_cast %109 : vector<16xf32> to vector<16x1xf32>
    %111 = tpu.concatenate %108, %110 in 0 : vector<16x1xf32>, vector<16x1xf32> -> vector<32x1xf32>
    %c0_57 = arith.constant 0 : index
    %c0_58 = arith.constant 0 : index
    %112 = vector.load %arg6[%c0_57, %c0_58] : memref<256x32xf32, #tpu.memory_space<vmem>>, vector<256x32xf32>
    %cst_59 = arith.constant dense<0.000000e+00> : vector<256x1xf32>
    %113 = tpu.matmul %112, %111, %cst_59 {dimension_numbers = #tpu.dot_dimension_numbers<[1], [0], [0], [1], [0, 0, 1, 1], [], []>} : vector<256x32xf32>, vector<32x1xf32>, vector<256x1xf32> -> vector<256x1xf32>
    %cst_60 = arith.constant 0.000000e+00 : f32
    %114 = vector.broadcast %cst_60 : f32 to vector<256x1xf32>
    %115 = arith.subf %114, %113 : vector<256x1xf32>
    %116 = math.exp %115 : vector<256x1xf32>
    %cst_61 = arith.constant 1.000000e+00 : f32
    %117 = vector.broadcast %cst_61 : f32 to vector<256x1xf32>
    %118 = arith.addf %117, %116 : vector<256x1xf32>
    %cst_62 = arith.constant 1.000000e+00 : f32
    %119 = vector.broadcast %cst_62 : f32 to vector<256x1xf32>
    %120 = arith.divf %119, %118 : vector<256x1xf32>
    %121 = vector.broadcast %47 : vector<1x64xf32> to vector<256x64xf32>
    %122 = arith.mulf %79, %121 : vector<256x64xf32>
    %123 = vector.extract_strided_slice %102 {offsets = [0, 0], sizes = [256, 1], strides = [1, 1]} : vector<256x3xf32> to vector<256x1xf32>
    %124 = arith.mulf %120, %123 : vector<256x1xf32>
    %125 = vector.broadcast %124 : vector<256x1xf32> to vector<256x64xf32>
    %126 = arith.mulf %122, %125 : vector<256x64xf32>
    %c0_63 = arith.constant 0 : index
    %c0_64 = arith.constant 0 : index
    %c0_65 = arith.constant 0 : index
    %c0_66 = arith.constant 0 : index
    %127 = vector.load %arg9[%c0_63, %c0_64, %c0_65, %c0_66] : memref<1x3x256x64xf32, #tpu.memory_space<vmem>>, vector<1x1x256x64xf32>
    %128 = vector.shape_cast %127 : vector<1x1x256x64xf32> to vector<256x64xf32>
    %129 = vector.shape_cast %126 : vector<256x64xf32> to vector<1x1x256x64xf32>
    tpu.vector_store %arg9[%c0_63, %c0_64, %c0_65, %c0_66], %129 {strides = array<i32>} : memref<1x3x256x64xf32, #tpu.memory_space<vmem>>, vector<1x1x256x64xf32>,
    %130 = vector.broadcast %62 : vector<1x64xf32> to vector<64x64xf32>
    %131 = arith.mulf %32, %130 : vector<64x64xf32>
    %cst_67 = arith.constant dense<0.000000e+00> : vector<64xf32>
    %132 = vector.multi_reduction <add>, %131, %cst_67 [1] : vector<64x64xf32> to vector<64xf32>
    %133 = vector.shape_cast %132 : vector<64xf32> to vector<64x1xf32>
    %cst_68 = arith.constant 6.400000e+01 : f32
    %134 = vector.broadcast %cst_68 : f32 to vector<64x1xf32>
    %135 = arith.divf %133, %134 : vector<64x1xf32>
    %cst_69 = arith.constant dense<0xFF800000> : vector<64xf32>
    %136 = vector.multi_reduction <maximumf>, %131, %cst_69 [1] : vector<64x64xf32> to vector<64xf32>
    %137 = vector.shape_cast %136 : vector<64xf32> to vector<64x1xf32>
    %138 = tpu.concatenate %135, %137 in 0 : vector<64x1xf32>, vector<64x1xf32> -> vector<128x1xf32>
    %c0_70 = arith.constant 0 : index
    %c0_71 = arith.constant 0 : index
    %139 = vector.load %arg7[%c0_70, %c0_71] : memref<256x128xf32, #tpu.memory_space<vmem>>, vector<256x128xf32>
    %cst_72 = arith.constant dense<0.000000e+00> : vector<256x1xf32>
    %140 = tpu.matmul %139, %138, %cst_72 {dimension_numbers = #tpu.dot_dimension_numbers<[1], [0], [0], [1], [0, 0, 1, 1], [], []>} : vector<256x128xf32>, vector<128x1xf32>, vector<256x1xf32> -> vector<256x1xf32>
    %cst_73 = arith.constant 0.000000e+00 : f32
    %141 = vector.broadcast %cst_73 : f32 to vector<256x1xf32>
    %142 = arith.subf %141, %140 : vector<256x1xf32>
    %143 = math.exp %142 : vector<256x1xf32>
    %cst_74 = arith.constant 1.000000e+00 : f32
    %144 = vector.broadcast %cst_74 : f32 to vector<256x1xf32>
    %145 = arith.addf %144, %143 : vector<256x1xf32>
    %cst_75 = arith.constant 1.000000e+00 : f32
    %146 = vector.broadcast %cst_75 : f32 to vector<256x1xf32>
    %147 = arith.divf %146, %145 : vector<256x1xf32>
    %148 = vector.broadcast %62 : vector<1x64xf32> to vector<256x64xf32>
    %149 = arith.mulf %80, %148 : vector<256x64xf32>
    %150 = vector.extract_strided_slice %102 {offsets = [0, 1], sizes = [256, 1], strides = [1, 1]} : vector<256x3xf32> to vector<256x1xf32>
    %151 = arith.mulf %147, %150 : vector<256x1xf32>
    %152 = vector.broadcast %151 : vector<256x1xf32> to vector<256x64xf32>
    %153 = arith.mulf %149, %152 : vector<256x64xf32>
    %c0_76 = arith.constant 0 : index
    %c1 = arith.constant 1 : index
    %c0_77 = arith.constant 0 : index
    %c0_78 = arith.constant 0 : index
    %154 = vector.load %arg9[%c0_76, %c1, %c0_77, %c0_78] : memref<1x3x256x64xf32, #tpu.memory_space<vmem>>, vector<1x1x256x64xf32>
    %155 = vector.shape_cast %154 : vector<1x1x256x64xf32> to vector<256x64xf32>
    %156 = vector.shape_cast %153 : vector<256x64xf32> to vector<1x1x256x64xf32>
    tpu.vector_store %arg9[%c0_76, %c1, %c0_77, %c0_78], %156 {strides = array<i32>} : memref<1x3x256x64xf32, #tpu.memory_space<vmem>>, vector<1x1x256x64xf32>,
    %157 = vector.broadcast %77 : vector<1x64xf32> to vector<256x64xf32>
    %158 = arith.mulf %5, %157 : vector<256x64xf32>
    %cst_79 = arith.constant dense<0.000000e+00> : vector<256xf32>
    %159 = vector.multi_reduction <add>, %158, %cst_79 [1] : vector<256x64xf32> to vector<256xf32>
    %160 = vector.shape_cast %159 : vector<256xf32> to vector<256x1xf32>
    %cst_80 = arith.constant 6.400000e+01 : f32
    %161 = vector.broadcast %cst_80 : f32 to vector<256x1xf32>
    %162 = arith.divf %160, %161 : vector<256x1xf32>
    %cst_81 = arith.constant dense<0xFF800000> : vector<256xf32>
    %163 = vector.multi_reduction <maximumf>, %158, %cst_81 [1] : vector<256x64xf32> to vector<256xf32>
    %164 = vector.shape_cast %163 : vector<256xf32> to vector<256x1xf32>
    %165 = tpu.concatenate %162, %164 in 0 : vector<256x1xf32>, vector<256x1xf32> -> vector<512x1xf32>
    %c0_82 = arith.constant 0 : index
    %c0_83 = arith.constant 0 : index
    %166 = vector.load %arg8[%c0_82, %c0_83] : memref<256x512xf32, #tpu.memory_space<vmem>>, vector<256x512xf32>
    %cst_84 = arith.constant dense<0.000000e+00> : vector<256x1xf32>
    %167 = tpu.matmul %166, %165, %cst_84 {dimension_numbers = #tpu.dot_dimension_numbers<[1], [0], [0], [1], [0, 0, 1, 1], [], []>} : vector<256x512xf32>, vector<512x1xf32>, vector<256x1xf32> -> vector<256x1xf32>
    %cst_85 = arith.constant 0.000000e+00 : f32
    %168 = vector.broadcast %cst_85 : f32 to vector<256x1xf32>
    %169 = arith.subf %168, %167 : vector<256x1xf32>
    %170 = math.exp %169 : vector<256x1xf32>
    %cst_86 = arith.constant 1.000000e+00 : f32
    %171 = vector.broadcast %cst_86 : f32 to vector<256x1xf32>
    %172 = arith.addf %171, %170 : vector<256x1xf32>
    %cst_87 = arith.constant 1.000000e+00 : f32
    %173 = vector.broadcast %cst_87 : f32 to vector<256x1xf32>
    %174 = arith.divf %173, %172 : vector<256x1xf32>
    %175 = vector.broadcast %77 : vector<1x64xf32> to vector<256x64xf32>
    %176 = arith.mulf %5, %175 : vector<256x64xf32>
    %177 = vector.extract_strided_slice %102 {offsets = [0, 2], sizes = [256, 1], strides = [1, 1]} : vector<256x3xf32> to vector<256x1xf32>
    %178 = arith.mulf %174, %177 : vector<256x1xf32>
    %179 = vector.broadcast %178 : vector<256x1xf32> to vector<256x64xf32>
    %180 = arith.mulf %176, %179 : vector<256x64xf32>
    %c0_88 = arith.constant 0 : index
    %c2 = arith.constant 2 : index
    %c0_89 = arith.constant 0 : index
    %c0_90 = arith.constant 0 : index
    %181 = vector.load %arg9[%c0_88, %c2, %c0_89, %c0_90] : memref<1x3x256x64xf32, #tpu.memory_space<vmem>>, vector<1x1x256x64xf32>
    %182 = vector.shape_cast %181 : vector<1x1x256x64xf32> to vector<256x64xf32>
    %183 = vector.shape_cast %180 : vector<256x64xf32> to vector<1x1x256x64xf32>
    tpu.vector_store %arg9[%c0_88, %c2, %c0_89, %c0_90], %183 {strides = array<i32>} : memref<1x3x256x64xf32, #tpu.memory_space<vmem>>, vector<1x1x256x64xf32>,
    return
  }
  func.func @transform_0(%arg0: i32) -> (i32, i32, i32) {
    %c0_i32 = arith.constant 0 : i32
    %c0_i32_0 = arith.constant 0 : i32
    %c0_i32_1 = arith.constant 0 : i32
    return %arg0, %c0_i32, %c0_i32_0 : i32, i32, i32
  }
  func.func @transform_1(%arg0: i32) -> (i32, i32, i32) {
    %c0_i32 = arith.constant 0 : i32
    %c0_i32_0 = arith.constant 0 : i32
    %c0_i32_1 = arith.constant 0 : i32
    return %arg0, %c0_i32, %c0_i32_0 : i32, i32, i32
  }
  func.func @transform_2(%arg0: i32) -> (i32, i32, i32) {
    %c0_i32 = arith.constant 0 : i32
    %c0_i32_0 = arith.constant 0 : i32
    %c0_i32_1 = arith.constant 0 : i32
    return %arg0, %c0_i32, %c0_i32_0 : i32, i32, i32
  }
  func.func @transform_3(%arg0: i32) -> (i32, i32) {
    %c0_i32 = arith.constant 0 : i32
    %c0_i32_0 = arith.constant 0 : i32
    %c0_i32_1 = arith.constant 0 : i32
    return %c0_i32, %c0_i32_0 : i32, i32
  }
  func.func @transform_4(%arg0: i32) -> (i32, i32) {
    %c0_i32 = arith.constant 0 : i32
    %c0_i32_0 = arith.constant 0 : i32
    %c0_i32_1 = arith.constant 0 : i32
    return %c0_i32, %c0_i32_0 : i32, i32
  }
  func.func @transform_5(%arg0: i32) -> (i32, i32) {
    %c0_i32 = arith.constant 0 : i32
    %c0_i32_0 = arith.constant 0 : i32
    %c0_i32_1 = arith.constant 0 : i32
    return %c0_i32, %c0_i32_0 : i32, i32
  }
  func.func @transform_6(%arg0: i32) -> (i32, i32) {
    %c0_i32 = arith.constant 0 : i32
    %c0_i32_0 = arith.constant 0 : i32
    %c0_i32_1 = arith.constant 0 : i32
    return %c0_i32, %c0_i32_0 : i32, i32
  }
  func.func @transform_7(%arg0: i32) -> (i32, i32) {
    %c0_i32 = arith.constant 0 : i32
    %c0_i32_0 = arith.constant 0 : i32
    %c0_i32_1 = arith.constant 0 : i32
    return %c0_i32, %c0_i32_0 : i32, i32
  }
  func.func @transform_8(%arg0: i32) -> (i32, i32, i32, i32) {
    %c0_i32 = arith.constant 0 : i32
    %c0_i32_0 = arith.constant 0 : i32
    %c0_i32_1 = arith.constant 0 : i32
    %c0_i32_2 = arith.constant 0 : i32
    return %arg0, %c0_i32, %c0_i32_0, %c0_i32_1 : i32, i32, i32, i32
  }
}

</mosaic_0001>

<bundles_post_ra>
// kernel: _lambda_.1
= control target key start
LH: loop header
LB: loop body
LE: loop exit
PB: predicated region body
PF: predicated region fallthrough
CT: control target
= control target key end

     0   :  { %s8371_s27 = smov 0   ;;  %s12299_s0 = inlined_call_operand.vmem [shape: f32[2,16,256], index: 0, kind: input, shape index: {}]   ;;  %s12300_s1 = inlined_call_operand.vmem [shape: f32[2,64,128], index: 1, kind: input, shape index: {}]   ;;  %s12301_s2 = inlined_call_operand.vmem [shape: f32[2,256,64], index: 2, kind: input, shape index: {}]   ;;  %s12302_s3 = inlined_call_operand.vmem [shape: f32[1096,64], index: 3, kind: input, shape index: {}]   ;;  %s12303_s4 = inlined_call_operand.vmem [shape: f32[256,16], index: 4, kind: input, shape index: {}]   ;;  %s12304_s5 = inlined_call_operand.vmem [shape: f32[256,32], index: 5, kind: input, shape index: {}]   ;;  %s12305_s6 = inlined_call_operand.vmem [shape: f32[256,128], index: 6, kind: input, shape index: {}]   ;;  %s12306_s7 = inlined_call_operand.vmem [shape: f32[256,512], index: 7, kind: input, shape index: {}]   ;;  %s12307_s8 = inlined_call_operand.vmem [shape: f32[2,3,256,64], index: 8, kind: output, shape index: {}]  }
   0x1 LB: > { %s6332_s28 = sadd.s32 4294967295, %s8317_s27   ;;  %p6336_p0 = scmp.ge.s32.totalorder %s8317_s27, 1  ;;  %s8317_s27 = sphi %s8371_s27, %s18_s27  }
   0x2   : > { %p282_p1 = scmp.lt.s32.totalorder %s8317_s27, 3 }
   0x4   : > { %p283_p2 = pnand %p6336_p0, %p282_p1 }
   0x6   : > { %286 = sbr.rel (%p283_p2) target bundleno = 1881 (0x759), region = 52 }
   0xd   : > { %v406_v0 = vld [vmem:[%s12302_s3 + $0x80] sm:$0xff]  ;;  %v407_v1 = vld [vmem:[%s12302_s3 + $0x88] sm:$0xff]  ;;  %v408_v9 = vld [vmem:[%s12302_s3 + $0x90] sm:$0xff]  ;;  %p8408_p3 = scmp.lt.s32.totalorder %s6332_s28, 1  ;;  %vm735_vm0 = vcmask 523264   ;;  %vm8320_vm1 = vmmov 0  }
   0xe   : > { %v422_v2 = vld [vmem:[%s12302_s3 + $0x100] sm:$0xff]  ;;  %v7280_v3 = vpack.c.bf16 %v407_v1, %v406_v0  ;;  %v423_v4 = vld [vmem:[%s12302_s3 + $0x108] sm:$0xff]  ;;  %v409_v10 = vld [vmem:[%s12302_s3 + $0x98] sm:$0xff]  ;;  %vm1212_vm2 = vcmask 130048   ;;  %s8322_s17 = smov 64   ;;  %vm3134_vm3 = vcmask 261120  }
   0xf   : > { %v390_v5 = vld [vmem:[%s12302_s3] sm:$0xff]  ;;  %v391_v6 = vld [vmem:[%s12302_s3 + $0x8] sm:$0xff]  ;;  %v7312_v7 = vpack.c.bf16 %v423_v4, %v422_v2  ;;  %v424_v11 = vld [vmem:[%s12302_s3 + $0x110] sm:$0xff]  ;;  %v7284_v12 = vpack.c.bf16 %v409_v10, %v408_v9  ;;  %s12715_s28 = smov (!%p8408_p3, %s6332_s28), 1  ;;  %vm2729_vm4 = vcmask 23552   ;;  %s8324_s18 = smov 126  }
  0x10   : > { %v7282_v8 = vpack.c.bf16 %v391_v6, %v390_v5  ;;  %7281 = vmatprep.subr.bf16.mxu0 %v7280_v3  ;;  %v425_v13 = vld [vmem:[%s12302_s3 + $0x118] sm:$0xff]  ;;  %v392_v14 = vld [vmem:[%s12302_s3 + $0x10] sm:$0xff]  ;;  %v410_v18 = vld [vmem:[%s12302_s3 + $0xa0] sm:$0xff]  ;;  %s6573_s20 = sshll.u32 %s12715_s28, 5  ;;  %s6574_s21 = sshll.u32 %s12715_s28, 6 }
  0x11   : > { %v393_v15 = vld [vmem:[%s12302_s3 + $0x18] sm:$0xff]  ;;  %7313 = vmatprep.subr.bf16.mxu1 %v7312_v7  ;;  %v7316_v16 = vpack.c.bf16 %v425_v13, %v424_v11  ;;  %v411_v19 = vld [vmem:[%s12302_s3 + $0xa8] sm:$0xff]  ;;  %v426_v20 = vld [vmem:[%s12302_s3 + $0x120] sm:$0xff]  ;;  %s8486_s13 = scalar_lea.vmem %s12299_s0, %s6573_s20  ;;  %s8491_s15 = scalar_lea.vmem %s12300_s1, %s6574_s21 }
  0x12   : > { %7283 = vmatpush3.bf16.msra.mxu0 %v7282_v8  ;;  %v7286_v17 = vpack.c.bf16 %v393_v15, %v392_v14  ;;  %7315 = vmatpush3.bf16.msra.mxu1 %v7312_v7  ;;  %v7288_v21 = vpack.c.bf16 %v411_v19, %v410_v18  ;;  %v427_v22 = vld [vmem:[%s12302_s3 + $0x128] sm:$0xff]  ;;  %v394_v23 = vld [vmem:[%s12302_s3 + $0x20] sm:$0xff]  ;;  %v412_v26 = vld [vmem:[%s12302_s3 + $0xb0] sm:$0xff]  ;;  %s6575_s16 = sshll.u32 %s12715_s28, 8  ;;  %s8325_s22 = smov 127  }
  0x13   : > { %7285 = vmatprep.subr.bf16.mxu0 %v7284_v12  ;;  %v395_v24 = vld [vmem:[%s12302_s3 + $0x28] sm:$0xff]  ;;  %7317 = vmatprep.subr.bf16.mxu1 %v7316_v16  ;;  %v7320_v25 = vpack.c.bf16 %v427_v22, %v426_v20  ;;  %v413_v27 = vld [vmem:[%s12302_s3 + $0xb8] sm:$0xff]  ;;  %v428_v28 = vld [vmem:[%s12302_s3 + $0x130] sm:$0xff]  ;;  %s8563_s19 = scalar_lea.vmem %s12301_s2, %s6575_s16 }
  0x14   : > { %v429_v29 = vld [vmem:[%s12302_s3 + $0x138] sm:$0xff]  ;;  %v7290_v30 = vpack.c.bf16 %v395_v24, %v394_v23  ;;  %v7292_v31 = vpack.c.bf16 %v413_v27, %v412_v26  ;;  %v396_v32 = vld [vmem:[%s12302_s3 + $0x30] sm:$0xff]  ;;  %v414_v35 = vld [vmem:[%s12302_s3 + $0xc0] sm:$0xff]  ;;  %v527_v26 = vlaneseq }
  0x15   : > { %v397_v33 = vld [vmem:[%s12302_s3 + $0x38] sm:$0xff]  ;;  %v7324_v34 = vpack.c.bf16 %v429_v29, %v428_v28  ;;  %v415_v36 = vld [vmem:[%s12302_s3 + $0xc8] sm:$0xff]  ;;  %v430_v37 = vld [vmem:[%s12302_s3 + $0x140] sm:$0xff] }
  0x16   : > { %7287 = vmatpush3.bf16.msra.mxu0 %v7286_v17  ;;  %7319 = vmatpush3.bf16.msra.mxu1 %v7316_v16  ;;  %v431_v38 = vld [vmem:[%s12302_s3 + $0x148] sm:$0xff]  ;;  %v7294_v39 = vpack.c.bf16 %v397_v33, %v396_v32  ;;  %v7296_v40 = vpack.c.bf16 %v415_v36, %v414_v35  ;;  %v398_v41 = vld [vmem:[%s12302_s3 + $0x40] sm:$0xff]  ;;  %v416_v44 = vld [vmem:[%s12302_s3 + $0xd0] sm:$0xff]  ;;  %v8593_v33 = vshrl.u32 %v527_v26, 7 }
  0x17   : > { %7289 = vmatprep.subr.bf16.mxu0 %v7288_v21  ;;  %7321 = vmatprep.subr.bf16.mxu1 %v7320_v25  ;;  %v399_v42 = vld [vmem:[%s12302_s3 + $0x48] sm:$0xff]  ;;  %v7328_v43 = vpack.c.bf16 %v431_v38, %v430_v37  ;;  %v417_v45 = vld [vmem:[%s12302_s3 + $0xd8] sm:$0xff]  ;;  %v432_v46 = vld [vmem:[%s12302_s3 + $0x150] sm:$0xff] }
  0x18   : > { %v433_v47 = vld [vmem:[%s12302_s3 + $0x158] sm:$0xff]  ;;  %v7298_v48 = vpack.c.bf16 %v399_v42, %v398_v41  ;;  %v347_v49 = vld [vmem:[%s8486_s13 + $0x8] sm:$0xff]  ;;  %v350_v50 = vld [vmem:[%s8491_s15] sm:$0xff]  ;;  %v7300_v51 = vpack.c.bf16 %v417_v45, %v416_v44  ;;  %v2017_v36 = vsub.s32 2, %v8593_v33  ;;  %v2406_v37 = vsub.s32 3, %v8593_v33 }
  0x19   : > { %v400_v52 = vld [vmem:[%s12302_s3 + $0x50] sm:$0xff]  ;;  %v401_v53 = vld [vmem:[%s12302_s3 + $0x58] sm:$0xff]  ;;  %v7332_v54 = vpack.c.bf16 %v433_v47, %v432_v46  ;;  %v418_v55 = vld [vmem:[%s12302_s3 + $0xe0] sm:$0xff]  ;;  %595 = vmatprep.mubr.f32.mxu0 %v347_v49  ;;  %6895 = vmatprep.mubr.f32.mxu1 %v350_v50 }
  0x1a   : > { %7291 = vmatpush3.bf16.msra.mxu0 %v7290_v30  ;;  %7323 = vmatpush3.bf16.msra.mxu1 %v7320_v25  ;;  %v419_v56 = vld [vmem:[%s12302_s3 + $0xe8] sm:$0xff]  ;;  %v434_v57 = vld [vmem:[%s12302_s3 + $0x160] sm:$0xff]  ;;  %v7302_v59 = vpack.c.bf16 %v401_v53, %v400_v52  ;;  %v420_v0 = vld [vmem:[%s12302_s3 + $0xf0] sm:$0xff]  ;;  %v12308_v25 = vmov 0.0|0.0  }
  0x1b   : > { %7293 = vmatprep.subr.bf16.mxu0 %v7292_v31  ;;  %7325 = vmatprep.subr.bf16.mxu1 %v7324_v34  ;;  %v435_v58 = vld [vmem:[%s12302_s3 + $0x168] sm:$0xff]  ;;  %v7304_v60 = vpack.c.bf16 %v419_v56, %v418_v55  ;;  %v402_v61 = vld [vmem:[%s12302_s3 + $0x60] sm:$0xff]  ;;  %v421_v1 = vld [vmem:[%s12302_s3 + $0xf8] sm:$0xff] }
  0x1c   : > { %v403_v62 = vld [vmem:[%s12302_s3 + $0x68] sm:$0xff]  ;;  %v7336_v63 = vpack.c.bf16 %v435_v58, %v434_v57  ;;  %v436_v2 = vld [vmem:[%s12302_s3 + $0x170] sm:$0xff]  ;;  %v437_v3 = vld [vmem:[%s12302_s3 + $0x178] sm:$0xff]  ;;  %v7308_v5 = vpack.c.bf16 %v421_v1, %v420_v0 }
  0x1d   : > { %v7306_v4 = vpack.c.bf16 %v403_v62, %v402_v61  ;;  %v404_v6 = vld [vmem:[%s12302_s3 + $0x70] sm:$0xff]  ;;  %v405_v7 = vld [vmem:[%s12302_s3 + $0x78] sm:$0xff]  ;;  %v7340_v8 = vpack.c.bf16 %v437_v3, %v436_v2  ;;  %v346_v10 = vld [vmem:[%s8486_s13] sm:$0xff] }
  0x1e   : > { %7295 = vmatpush3.bf16.msra.mxu0 %v7294_v39  ;;  %7327 = vmatpush3.bf16.msra.mxu1 %v7324_v34  ;;  %v7310_v9 = vpack.c.bf16 %v405_v7, %v404_v6  ;;  %v351_v11 = vld [vmem:[%s8491_s15 + $0x8] sm:$0xff]  ;;  %v349_v12 = vld [vmem:[%s8486_s13 + $0x18] sm:$0xff]  ;;  %v352_v13 = vld [vmem:[%s8491_s15 + $0x10] sm:$0xff] }
  0x1f   : > { %7297 = vmatprep.subr.bf16.mxu0 %v7296_v40  ;;  %7329 = vmatprep.subr.bf16.mxu1 %v7328_v43  ;;  %v348_v14 = vld [vmem:[%s8486_s13 + $0x10] sm:$0xff]  ;;  %v353_v15 = vld [vmem:[%s8491_s15 + $0x18] sm:$0xff]  ;;  %v354_v16 = vld [vmem:[%s8491_s15 + $0x20] sm:$0xff]  ;;  %s7657_s13 = smul.u32 768, %s12715_s28 }
  0x20   : > { %v355_v17 = vld [vmem:[%s8491_s15 + $0x28] sm:$0xff]  ;;  %v356_v18 = vld [vmem:[%s8491_s15 + $0x30] sm:$0xff]  ;;  %v357_v19 = vld [vmem:[%s8491_s15 + $0x38] sm:$0xff] }
  0x21   : > { %v446_v20 = vld [vmem:[%s12302_s3 + $0x1c0] sm:$0xff]  ;;  %v447_v21 = vld [vmem:[%s12302_s3 + $0x1c8] sm:$0xff]  ;;  %v448_v27 = vld [vmem:[%s12302_s3 + $0x1d0] sm:$0xff]  ;;  %s11765_s23 = scalar_lea.vmem %s12307_s8, %s7657_s13 }
  0x22   : > { %7299 = vmatpush3.bf16.msra.mxu0 %v7298_v48  ;;  %7331 = vmatpush3.bf16.msra.mxu1 %v7328_v43  ;;  %v7357_v22 = vpack.c.bf16 %v447_v21, %v446_v20  ;;  %v8572_v23 = vld [vmem:[%s8563_s19] sm:$0xff]  ;;  %v8575_v24 = vld [vmem:[%s8563_s19 + $0x8] sm:$0xff]  ;;  %v449_v28 = vld [vmem:[%s12302_s3 + $0x1d8] sm:$0xff] }
  0x23   : > { %7301 = vmatprep.subr.bf16.mxu0 %v7300_v51  ;;  %7333 = vmatprep.subr.bf16.mxu1 %v7332_v54  ;;  %v960_v29 = vsel %vm735_vm0, %v8572_v23, 0.0  ;;  %v961_v30 = vsel %vm735_vm0, %v8575_v24, 0.0  ;;  %v7360_v31 = vpack.c.bf16 %v449_v28, %v448_v27  ;;  %v8591_v32 = vld [vmem:[%s8563_s19 + $0x10] sm:$0xff]  ;;  %v450_v38 = vld [vmem:[%s12302_s3 + $0x1e0] sm:$0xff]  ;;  %v451_v39 = vld [vmem:[%s12302_s3 + $0x1e8] sm:$0xff] }
  0x24   : > { %v962_v34 = vadd.f32 %v961_v30, %v960_v29  ;;  %v963_v35 = vsel %vm735_vm0, %v8591_v32, 0.0  ;;  %v8607_v40 = vld [vmem:[%s8563_s19 + $0x18] sm:$0xff]  ;;  %v8612_v41 = vld [vmem:[%s12302_s3 + $0x340] sm:$0xff]  ;;  %v7363_v42 = vpack.c.bf16 %v451_v39, %v450_v38  ;;  %v452_v48 = vld [vmem:[%s12302_s3 + $0x1f0] sm:$0xff] }
  0x25   : > { %v8615_v43 = vrot.slane %v8612_v41, %v2017_v36  ;;  %v8618_v44 = vrot.slane %v8612_v41, %v2406_v37  ;;  %v965_v46 = vsel %vm735_vm0, %v8607_v40, 0.0  ;;  %v8624_v47 = vld [vmem:[%s8563_s19 + $0x20] sm:$0xff]  ;;  %v453_v49 = vld [vmem:[%s12302_s3 + $0x1f8] sm:$0xff]  ;;  %v8635_v53 = vld [vmem:[%s8563_s19 + $0x28] sm:$0xff] }
  0x26   : > { %7303 = vmatpush3.bf16.msra.mxu0 %v7302_v59  ;;  %7335 = vmatpush3.bf16.msra.mxu1 %v7332_v54  ;;  %v964_v45 = vadd.f32 %v963_v35, %v962_v34  ;;  %v7366_v50 = vpack.c.bf16 %v453_v49, %v452_v48  ;;  %v967_v52 = vsel %vm735_vm0, %v8624_v47, 0.0  ;;  %v438_v54 = vld [vmem:[%s12302_s3 + $0x180] sm:$0xff]  ;;  %v439_v55 = vld [vmem:[%s12302_s3 + $0x188] sm:$0xff]  ;;  %v969_v58 = vsel %vm735_vm0, %v8635_v53, 0.0  ;;  %v8646_v59 = vld [vmem:[%s8563_s19 + $0x30] sm:$0xff] }
  0x27   : > { %7305 = vmatprep.subr.bf16.mxu0 %v7304_v60  ;;  %7337 = vmatprep.subr.bf16.mxu1 %v7336_v63  ;;  %12363 = vst [vmem:[#allocation2_spill] sm:$0xff] %v8615_v43  ;;  %12364 = vst [vmem:[#allocation3_spill] sm:$0xff] %v8618_v44  ;;  %v7345_v57 = vpack.c.bf16 %v439_v55, %v438_v54  ;;  %v440_v60 = vld [vmem:[%s12302_s3 + $0x190] sm:$0xff]  ;;  %v441_v61 = vld [vmem:[%s12302_s3 + $0x198] sm:$0xff]  ;;  %v971_v0 = vsel %vm735_vm0, %v8646_v59, 0.0 }
  0x28   : > { %v966_v51 = vadd.f32 %v965_v46, %v964_v45  ;;  %v8658_v1 = vld [vmem:[%s8563_s19 + $0x38] sm:$0xff]  ;;  %v442_v2 = vld [vmem:[%s12302_s3 + $0x1a0] sm:$0xff]  ;;  %v443_v3 = vld [vmem:[%s12302_s3 + $0x1a8] sm:$0xff] }
  0x29   : > { %v973_v6 = vsel %vm735_vm0, %v8658_v1, 0.0  ;;  %v8670_v7 = vld [vmem:[%s8563_s19 + $0x40] sm:$0xff]  ;;  %v369_v20 = vld [vmem:[%s8563_s19 + $0x58] sm:$0xff]  ;;  %v8704_v29 = vld [vmem:[%s8563_s19 + $0x68] sm:$0xff] }
  0x2a   : > { %7307 = vmatpush3.bf16.msra.mxu0 %v7306_v4  ;;  %7339 = vmatpush3.bf16.msra.mxu1 %v7336_v63  ;;  %v968_v56 = vadd.f32 %v967_v52, %v966_v51  ;;  %v7348_v63 = vpack.c.bf16 %v441_v61, %v440_v60  ;;  %v8699_v26 = vld [vmem:[%s8563_s19 + $0x60] sm:$0xff]  ;;  %v372_v34 = vld [vmem:[%s8563_s19 + $0x70] sm:$0xff]  ;;  %v373_v37 = vld [vmem:[%s8563_s19 + $0x78] sm:$0xff] }
  0x2b   : > { %7309 = vmatprep.subr.bf16.mxu0 %v7308_v5  ;;  %7341 = vmatprep.subr.bf16.mxu1 %v7340_v8  ;;  %v7351_v5 = vpack.c.bf16 %v443_v3, %v442_v2  ;;  %v983_v28 = vsel %vm735_vm0, %v8699_v26, 0.0  ;;  %v987_v36 = vsel %vm735_vm0, %v372_v34, 0.0  ;;  %v989_v39 = vsel %vm735_vm0, %v373_v37, 0.0  ;;  %v8718_v48 = vld [vmem:[%s8563_s19 + $0x88] sm:$0xff]  ;;  %v376_v51 = vld [vmem:[%s8563_s19 + $0x90] sm:$0xff]  ;;  %v377_v55 = vld [vmem:[%s8563_s19 + $0x98] sm:$0xff] }
  0x2c   : > { %v970_v62 = vadd.f32 %v969_v58, %v968_v56  ;;  %v995_v54 = vsel %vm735_vm0, %v376_v51, 0.0  ;;  %v8727_v58 = vld [vmem:[%s8563_s19 + $0xa0] sm:$0xff]  ;;  %v380_v2 = vld [vmem:[%s8563_s19 + $0xb0] sm:$0xff] }
  0x2d   : > { %v999_v61 = vsel %vm735_vm0, %v8727_v58, 0.0  ;;  %v9698_v44 = vld [vmem:[%s8563_s19 + $0x30] sm:$0xff] }
  0x2e   : > { %7311 = vmatpush3.bf16.msra.mxu0 %v7310_v9  ;;  %7343 = vmatpush3.bf16.msra.mxu1 %v7340_v8  ;;  %v972_v4 = vadd.f32 %v971_v0, %v970_v62  ;;  %v444_v8 = vld [vmem:[%s12302_s3 + $0x1b0] sm:$0xff]  ;;  %v445_v9 = vld [vmem:[%s12302_s3 + $0x1b8] sm:$0xff]  ;;  %v379_v62 = vld [vmem:[%s8563_s19 + $0xa8] sm:$0xff] }
  0x2f   : > { %7356 = vmatprep.subr.bf16.mxu1 %v12308_v25  ;;  %7344 = vmatprep.subr.bf16.mxu0 %v12308_v25  ;;  %v1001_v0 = vsel %vm735_vm0, %v379_v62, 0.0 }
  0x31   : > { %596 = vmatmul.mubr.f32.vlgmr.msra.gmra.mrb[0].mxu0 %v346_v10  ;;  %6896 = vmatmul.mubr.f32.vlgmr.msra.gmra.mrb[0].mxu1 %v351_v11  ;;  %v974_v10 = vadd.f32 %v973_v6, %v972_v4  ;;  %v7354_v11 = vpack.c.bf16 %v445_v9, %v444_v8  ;;  %v1003_v4 = vsel %vm735_vm0, %v380_v2, 0.0  ;;  %v8737_v8 = vld [vmem:[%s8563_s19 + $0xc0] sm:$0xff] }
  0x32   : > { %600 = vmatprep.mubr.f32.mxu0 %v349_v12  ;;  %6898 = vmatprep.mubr.f32.mxu1 %v352_v13  ;;  %v975_v12 = vsel %vm735_vm0, %v8670_v7, 0.0  ;;  %v8682_v13 = vld [vmem:[%s8563_s19 + $0x48] sm:$0xff] }
  0x33   : > { %7358 = vmatpush3.bf16.msra.mxu1 %v7357_v22  ;;  %7346 = vmatpush3.bf16.msra.mxu0 %v7345_v57  ;;  %v981_v22 = vsel %vm735_vm0, %v369_v20, 0.0  ;;  %v997_v57 = vsel %vm735_vm0, %v377_v55, 0.0 }
  0x34   : > { %7359 = vmatprep.subr.bf16.mxu1 %v12308_v25  ;;  %7347 = vmatprep.subr.bf16.mxu0 %v12308_v25 }
  0x35   : > { %601 = vmatmul.mubr.f32.gmra.mrb[2].mxu0 %v348_v14  ;;  %6899 = vmatmul.mubr.f32.gmra.mrb[2].mxu1 %v353_v15  ;;  %v976_v14 = vadd.f32 %v975_v12, %v974_v10  ;;  %v977_v15 = vsel %vm735_vm0, %v8682_v13, 0.0  ;;  %v383_v12 = vld [vmem:[%s8563_s19 + $0xc8] sm:$0xff] }
  0x36   : > { %6901 = vmatprep.mubr.f32.mxu1 %v354_v16  ;;  %v8321_v16 = vmov 0.0  }
  0x37   : > { %7361 = vmatpush3.bf16.msra.mxu1 %v7360_v31  ;;  %7349 = vmatpush3.bf16.msra.mxu0 %v7348_v63  ;;  %v985_v31 = vsel %vm735_vm0, %v8704_v29, 0.0 }
  0x38   : > { %7362 = vmatprep.subr.bf16.mxu1 %v12308_v25  ;;  %7350 = vmatprep.subr.bf16.mxu0 %v12308_v25 }
  0x39   : > { %6902 = vmatmul.mubr.f32.gmra.mrb[4].mxu1 %v355_v17  ;;  %6923 = vmatprep.mubr.msk.f32.mxu0 %vm8320_vm1, %v8321_v16  ;;  %v8692_v17 = vld [vmem:[%s8563_s19 + $0x50] sm:$0xff] }
  0x3a   : > { %6904 = vmatprep.mubr.f32.mxu1 %v356_v18  ;;  %v978_v18 = vadd.f32 %v977_v15, %v976_v14  ;;  %v1031_v14 = vsel %vm735_vm0, %v8572_v23, -inf  ;;  %v1032_v15 = vsel %vm735_vm0, %v8575_v24, -inf }
  0x3b   : > { %7364 = vmatpush3.bf16.msra.mxu1 %v7363_v42  ;;  %7352 = vmatpush3.bf16.msra.mxu0 %v7351_v5  ;;  %v8713_v42 = vld [vmem:[%s8563_s19 + $0x80] sm:$0xff]  ;;  %v381_v5 = vld [vmem:[%s8563_s19 + $0xb8] sm:$0xff] }
  0x3c   : > { %7365 = vmatprep.subr.bf16.mxu1 %v12308_v25  ;;  %7353 = vmatprep.subr.bf16.mxu0 %v12308_v25  ;;  %v991_v46 = vsel %vm735_vm0, %v8713_v42, 0.0  ;;  %v1005_v9 = vsel %vm735_vm0, %v381_v5, 0.0 }
  0x3d   : > { %6905 = vmatmul.mubr.f32.gmra.mrb[6].mxu1 %v357_v19  ;;  %v979_v19 = vsel %vm735_vm0, %v8692_v17, 0.0 }
  0x3e   : > { %6942 = vmatprep.mubr.msk.f32.mxu1 %vm8320_vm1, %v8321_v16  ;;  %v980_v21 = vadd.f32 %v979_v19, %v978_v18  ;;  %v1033_v18 = vsel %vm735_vm0, %v8591_v32, -inf  ;;  %v1034_v19 = vsel %vm735_vm0, %v8607_v40, -inf  ;;  %v384_v32 = vld [vmem:[%s8563_s19 + $0xd0] sm:$0xff] }
  0x3f   : > { %7367 = vmatpush3.bf16.msra.mxu1 %v7366_v50  ;;  %7355 = vmatpush3.bf16.msra.mxu0 %v7354_v11  ;;  %v993_v50 = vsel %vm735_vm0, %v8718_v48, 0.0  ;;  %v1007_v11 = vsel %vm735_vm0, %v8737_v8, 0.0 }
  0x40   : > { %7368 = vmatprep.subr.bf16.mxu0 %v12308_v25  ;;  %v982_v27 = vadd.f32 %v981_v22, %v980_v21  ;;  %v1035_v21 = vsel %vm735_vm0, %v8624_v47, -inf  ;;  %v1037_v22 = vsel %vm735_vm0, %v8635_v53, -inf  ;;  %v1043_v47 = vsel %vm735_vm0, %v8670_v7, -inf }
  0x41   : > { %v1045_v53 = vsel %vm735_vm0, %v8682_v13, -inf  ;;  %v1051_v7 = vsel %vm735_vm0, %v8699_v26, -inf  ;;  %v1053_v13 = vsel %vm735_vm0, %v8704_v29, -inf  ;;  %v1061_v26 = vsel %vm735_vm0, %v8718_v48, -inf }
  0x42   : > { %v984_v30 = vadd.f32 %v983_v28, %v982_v27  ;;  %v1039_v27 = vsel %vm735_vm0, %v8646_v59, -inf  ;;  %v1041_v28 = vsel %vm735_vm0, %v8658_v1, -inf  ;;  %v1047_v59 = vsel %vm735_vm0, %v8692_v17, -inf }
  0x43   : > { %v1040_v40 = vmax.f32 %v1033_v18, %v1039_v27  ;;  %v1049_v1 = vsel %vm735_vm0, %v369_v20, -inf  ;;  %v1057_v17 = vsel %vm735_vm0, %v373_v37, -inf  ;;  %v1063_v29 = vsel %vm735_vm0, %v376_v51, -inf }
  0x44   : > { %v986_v35 = vadd.f32 %v985_v31, %v984_v30  ;;  %v1009_v30 = vsel %vm735_vm0, %v383_v12, 0.0  ;;  %v1036_v31 = vmax.f32 %v1031_v14, %v1035_v21  ;;  %v1071_v48 = vsel %vm735_vm0, %v380_v2, -inf  ;;  %v389_v2 = vld [vmem:[%s8563_s19 + $0xf8] sm:$0xff] }
  0x45   : > { %v1073_v51 = vsel %vm735_vm0, %v381_v5, -inf  ;;  %v612_v5 = vsub.s32 1, %v8593_v33 }
  0x46   : > { %v988_v38 = vadd.f32 %v987_v36, %v986_v35  ;;  %v1038_v35 = vmax.f32 %v1032_v15, %v1037_v22  ;;  %v1042_v36 = vmax.f32 %v1034_v19, %v1041_v28  ;;  %v1069_v15 = vsel %vm735_vm0, %v379_v62, -inf  ;;  %v388_v19 = vld [vmem:[%s8563_s19 + $0xf0] sm:$0xff] }
  0x48   : > { %v990_v45 = vadd.f32 %v989_v39, %v988_v38  ;;  %v1011_v39 = vsel %vm735_vm0, %v384_v32, 0.0 }
  0x4a   : > { %v992_v49 = vadd.f32 %v991_v46, %v990_v45  ;;  %v385_v45 = vld [vmem:[%s8563_s19 + $0xd8] sm:$0xff]  ;;  %v1044_v46 = vmax.f32 %v1036_v31, %v1043_v47 }
  0x4b   : > { %v1081_v62 = vsel %vm735_vm0, %v385_v45, -inf }
  0x4c   : > { %v994_v52 = vadd.f32 %v993_v50, %v992_v49  ;;  %v1046_v49 = vmax.f32 %v1038_v35, %v1045_v53  ;;  %v1048_v50 = vmax.f32 %v1040_v40, %v1047_v59  ;;  %v1019_v35 = vsel %vm735_vm0, %v388_v19, 0.0 }
  0x4e   : > { %v996_v56 = vadd.f32 %v995_v54, %v994_v52  ;;  %v1050_v52 = vmax.f32 %v1042_v36, %v1049_v1  ;;  %v1055_v54 = vsel %vm735_vm0, %v372_v34, -inf  ;;  %v1065_v34 = vsel %vm735_vm0, %v377_v55, -inf }
  0x4f   : > { %v8806_v1 = vsub.s32 0, %v8593_v33 }
  0x50   : > { %v998_v60 = vadd.f32 %v997_v57, %v996_v56  ;;  %v1013_v56 = vsel %vm735_vm0, %v385_v45, 0.0  ;;  %v386_v57 = vld [vmem:[%s8563_s19 + $0xe0] sm:$0xff] }
  0x51   : > { %v1083_v59 = vsel %vm735_vm0, %v386_v57, -inf }
  0x52   : > { %v1000_v63 = vadd.f32 %v999_v61, %v998_v60  ;;  %v1052_v60 = vmax.f32 %v1044_v46, %v1051_v7  ;;  %v1054_v61 = vmax.f32 %v1046_v49, %v1053_v13  ;;  %v530_v13 = vrot.slane %v8612_v41, %v8806_v1 }
  0x54   : > { %v1002_v3 = vadd.f32 %v1001_v0, %v1000_v63  ;;  %v1056_v63 = vmax.f32 %v1048_v50, %v1055_v54  ;;  %v1058_v0 = vmax.f32 %v1050_v52, %v1057_v17  ;;  %v613_v50 = vrot.slane %v8612_v41, %v612_v5 }
  0x55   : > { %v1021_v52 = vsel %vm735_vm0, %v389_v2, 0.0 }
  0x56   : > { %v1004_v6 = vadd.f32 %v1003_v4, %v1002_v3  ;;  %v1059_v3 = vsel %vm735_vm0, %v8713_v42, -inf  ;;  %v1015_v4 = vsel %vm735_vm0, %v386_v57, 0.0  ;;  %v1066_v14 = vmax.f32 %v1058_v0, %v1065_v34 }
  0x57   : > { %v1067_v42 = vsel %vm735_vm0, %v8727_v58, -inf  ;;  %v1079_v58 = vsel %vm735_vm0, %v384_v32, -inf  ;;  %v1089_v32 = vsel %vm735_vm0, %v389_v2, -inf }
  0x58   : > { %v1006_v10 = vadd.f32 %v1005_v9, %v1004_v6  ;;  %v387_v6 = vld [vmem:[%s8563_s19 + $0xe8] sm:$0xff]  ;;  %v1060_v9 = vmax.f32 %v1052_v60, %v1059_v3  ;;  %v1074_v28 = vmax.f32 %v1066_v14, %v1073_v51 }
  0x59   : > { %v1017_v55 = vsel %vm735_vm0, %v387_v6, 0.0 }
  0x5a   : > { %v1008_v24 = vadd.f32 %v1007_v11, %v1006_v10  ;;  %v1062_v10 = vmax.f32 %v1054_v61, %v1061_v26  ;;  %v1064_v11 = vmax.f32 %v1056_v63, %v1063_v29  ;;  %v1068_v21 = vmax.f32 %v1060_v9, %v1067_v42 }
  0x5b   : > { %v1082_v53 = vmax.f32 %v1074_v28, %v1081_v62 }
  0x5c   : > { %v1010_v38 = vadd.f32 %v1009_v30, %v1008_v24  ;;  %v1070_v22 = vmax.f32 %v1062_v10, %v1069_v15  ;;  %v1072_v27 = vmax.f32 %v1064_v11, %v1071_v48  ;;  %v1075_v24 = vsel %vm735_vm0, %v8737_v8, -inf }
  0x5d   : > { %v1077_v30 = vsel %vm735_vm0, %v383_v12, -inf  ;;  %v1076_v40 = vmax.f32 %v1068_v21, %v1075_v24  ;;  %v1085_v8 = vsel %vm735_vm0, %v387_v6, -inf  ;;  %v1087_v12 = vsel %vm735_vm0, %v388_v19, -inf }
  0x5e   : > { %v1012_v20 = vadd.f32 %v1011_v39, %v1010_v38  ;;  %v1078_v36 = vmax.f32 %v1070_v22, %v1077_v30  ;;  %v1080_v47 = vmax.f32 %v1072_v27, %v1079_v58  ;;  %v1090_v49 = vmax.f32 %v1082_v53, %v1089_v32 }
  0x5f   : > { %v1084_v39 = vmax.f32 %v1076_v40, %v1083_v59 }
  0x60   : > { %v1014_v37 = vadd.f32 %v1013_v56, %v1012_v20  ;;  %v1086_v45 = vmax.f32 %v1078_v36, %v1085_v8  ;;  %v1088_v46 = vmax.f32 %v1080_v47, %v1087_v12 }
  0x62   : > { %v1016_v18 = vadd.f32 %v1015_v4, %v1014_v37  ;;  %v1091_v56 = vmax.f32 %v1084_v39, %v1086_v45  ;;  %v1092_v57 = vmax.f32 %v1088_v46, %v1090_v49 }
  0x64   : > { %v1018_v31 = vadd.f32 %v1017_v55, %v1016_v18  ;;  %v8812_v6 = vmax.f32 %v1091_v56, %v1092_v57 }
  0x66   : > { %v1020_v38 = vadd.f32 %v1019_v35, %v1018_v31  ;;  %v1094_v58 = vrot.slane %v8812_v6, 4 }
  0x68   : > { %v1022_v20 = vadd.f32 %v1021_v52, %v1020_v38 }
  0x6a   : > { %v1023_v4 = vrot.slane %v1022_v20, 4 }
  0x6c   : > { %v8826_v30 = vadd.f32 %v1023_v4, %v1022_v20 }
 0x104   : > { %v6608_v7 = vpop.f32.mrb[0].mxu0  ;;  %v6897_v17 = vpop.f32.mrb[0].mxu1 }
 0x105   : > { %v6609_v54 = vpop.f32.mrb[1].mxu0  ;;  %v686_v60 = vadd.f32 %v6897_v17, %v613_v50  ;;  %v680_v61 = vpop.f32.mrb[1].mxu1 }
 0x106   : > { %v6610_v33 = vadd.f32 %v6609_v54, %v6608_v7  ;;  %v681_v63 = vadd.f32 %v680_v61, %v613_v50 }
 0x107   : > { %v720_v3 = vmax.f32 %v686_v60, 0.0 }
 0x108   : > { %v598_v0 = vadd.f32 %v6610_v33, %v530_v13  ;;  %v6611_v26 = vpop.f32.mrb[2].mxu0  ;;  %v719_v29 = vmax.f32 %v681_v63, 0.0  ;;  %v6900_v34 = vpop.f32.mrb[2].mxu1 }
 0x109   : > { %v6612_v37 = vpop.f32.mrb[3].mxu0  ;;  %v8814_v41 = vmin.f32 %v720_v3, 6.0  ;;  %v696_v10 = vadd.f32 %v6900_v34, %v613_v50  ;;  %v690_v14 = vpop.f32.mrb[3].mxu1 }
 0x10a   : > { %v606_v9 = vmax.f32 %v598_v0, 0.0  ;;  %v6613_v11 = vadd.f32 %v6612_v37, %v6611_v26  ;;  %v8816_v42 = vmin.f32 %v719_v29, 6.0  ;;  %v691_v15 = vadd.f32 %v690_v14, %v613_v50 }
 0x10b   : > { %v837_v51 = vsel %vm735_vm0, %v8814_v41, 0.0  ;;  %v722_v18 = vmax.f32 %v696_v10, 0.0  ;;  %v860_v36 = vsel %vm735_vm0, %v8814_v41, -inf }
 0x10c   : > { %v8818_v48 = vmin.f32 %v606_v9, 6.0  ;;  %v836_v55 = vsel %vm735_vm0, %v8816_v42, 0.0  ;;  %v603_v19 = vadd.f32 %v6613_v11, %v530_v13  ;;  %v721_v21 = vmax.f32 %v691_v15, 0.0  ;;  %v6903_v22 = vpop.f32.mrb[4].mxu1 }
 0x10d   : > { %v838_v27 = vadd.f32 %v837_v51, %v836_v55  ;;  %v8824_v28 = vmin.f32 %v722_v18, 6.0  ;;  %v700_v24 = vpop.f32.mrb[5].mxu1  ;;  %v706_v5 = vadd.f32 %v6903_v22, %v613_v50  ;;  %v859_v47 = vsel %vm735_vm0, %v8816_v42, -inf }
 0x10e   : > { %v607_v62 = vmax.f32 %v603_v19, 0.0  ;;  %v8829_v2 = vmin.f32 %v721_v21, 6.0  ;;  %v701_v31 = vadd.f32 %v700_v24, %v613_v50  ;;  %v736_v35 = vsel %vm735_vm0, %v8818_v48, 0.0 }
 0x10f   : > { %v747_v40 = vsel %vm735_vm0, %v8818_v48, -inf  ;;  %v841_v53 = vsel %vm735_vm0, %v8824_v28, 0.0  ;;  %v724_v12 = vmax.f32 %v706_v5, 0.0  ;;  %v862_v38 = vsel %vm735_vm0, %v8824_v28, -inf }
 0x110   : > { %v8841_v59 = vmin.f32 %v607_v62, 6.0  ;;  %v839_v8 = vsel %vm735_vm0, %v8829_v2, 0.0  ;;  %v6906_v32 = vpop.f32.mrb[6].mxu1  ;;  %v723_v45 = vmax.f32 %v701_v31, 0.0  ;;  %v861_v15 = vsel %vm735_vm0, %v8829_v2, -inf }
 0x111   : > { %v840_v39 = vadd.f32 %v839_v8, %v838_v27  ;;  %v716_v46 = vadd.f32 %v6906_v32, %v613_v50  ;;  %v710_v49 = vpop.f32.mrb[7].mxu1  ;;  %v8851_v13 = vmin.f32 %v724_v12, 6.0  ;;  %v1095_v32 = vmax.f32 %v8812_v6, %v1094_v58 }
 0x112   : > { %v737_v52 = vsel %vm735_vm0, %v8841_v59, 0.0  ;;  %v748_v7 = vsel %vm735_vm0, %v8841_v59, -inf  ;;  %v711_v54 = vadd.f32 %v710_v49, %v613_v50  ;;  %v8853_v56 = vmin.f32 %v723_v45, 6.0  ;;  %v455_v49 = vld [vmem:[%s12302_s3 + $0x208] sm:$0xff] }
 0x113   : > { %v738_v17 = vadd.f32 %v737_v52, %v736_v35  ;;  %v749_v20 = vmax.f32 %v747_v40, %v748_v7  ;;  %v842_v57 = vadd.f32 %v841_v53, %v840_v39  ;;  %v845_v33 = vsel %vm735_vm0, %v8851_v13, 0.0 }
 0x114   : > { %v865_v60 = vsel %vm735_vm0, %v8851_v13, -inf  ;;  %v726_v61 = vmax.f32 %v716_v46, 0.0  ;;  %v725_v63 = vmax.f32 %v711_v54, 0.0  ;;  %v843_v29 = vsel %vm735_vm0, %v8853_v56, 0.0  ;;  %v454_v46 = vld [vmem:[%s12302_s3 + $0x200] sm:$0xff] }
 0x115   : > { %v739_v0 = vrot.slane %v738_v17, 4  ;;  %v750_v3 = vrot.slane %v749_v20, 4  ;;  %v866_v26 = vmax.f32 %v860_v36, %v865_v60  ;;  %v844_v50 = vadd.f32 %v843_v29, %v842_v57 }
 0x116   : > { %v863_v34 = vsel %vm735_vm0, %v8853_v56, -inf  ;;  %v8863_v37 = vmin.f32 %v726_v61, 6.0  ;;  %v8865_v4 = vmin.f32 %v725_v63, 6.0  ;;  %v8869_v14 = vpack.c.bf16 %v8841_v59, %v8818_v48  ;;  %v456_v61 = vld [vmem:[%s12302_s3 + $0x210] sm:$0xff]  ;;  %v457_v63 = vld [vmem:[%s12302_s3 + $0x218] sm:$0xff] }
 0x117   : > { %v740_v9 = vadd.f32 %v739_v0, %v738_v17  ;;  %v751_v10 = vmax.f32 %v749_v20, %v750_v3  ;;  %v864_v11 = vmax.f32 %v859_v47, %v863_v34  ;;  %v846_v18 = vadd.f32 %v845_v33, %v844_v50 }
 0x118   : > { %v869_v51 = vsel %vm735_vm0, %v8863_v37, -inf  ;;  %v847_v55 = vsel %vm735_vm0, %v8865_v4, 0.0  ;;  %v849_v22 = vsel %vm735_vm0, %v8863_v37, 0.0  ;;  %7381 = vmatprep.subr.bf16.mxu1 %v8869_v14  ;;  %v867_v62 = vsel %vm735_vm0, %v8865_v4, -inf }
 0x119   : > { %v741_v19 = vrot.slane %v740_v9, 2  ;;  %v752_v21 = vrot.slane %v751_v10, 2  ;;  %v870_v27 = vmax.f32 %v862_v38, %v869_v51  ;;  %v848_v24 = vadd.f32 %v847_v55, %v846_v18 }
 0x11a   : > { %v871_v35 = vmax.f32 %v864_v11, %v866_v26  ;;  %v868_v40 = vmax.f32 %v861_v15, %v867_v62  ;;  %v1025_v47 = vrot.slane %v8826_v30, 2  ;;  %v1096_v57 = vrot.slane %v1095_v32, 2 }
 0x11b   : > { %v742_v5 = vadd.f32 %v741_v19, %v740_v9  ;;  %v753_v31 = vmax.f32 %v751_v10, %v752_v21  ;;  %v850_v36 = vadd.f32 %v849_v22, %v848_v24  ;;  %v7369_v6 = vpack.c.bf16 %v455_v49, %v454_v46  ;;  %v458_v9 = vld [vmem:[%s12302_s3 + $0x220] sm:$0xff]  ;;  %v459_v10 = vld [vmem:[%s12302_s3 + $0x228] sm:$0xff]  ;;  %v460_v21 = vld [vmem:[%s12302_s3 + $0x230] sm:$0xff] }
 0x11c   : > { %v872_v12 = vmax.f32 %v868_v40, %v870_v27  ;;  %v1026_v7 = vadd.f32 %v1025_v47, %v8826_v30  ;;  %v1097_v26 = vmax.f32 %v1095_v32, %v1096_v57  ;;  %v7372_v50 = vpack.c.bf16 %v457_v63, %v456_v61  ;;  %v461_v22 = vld [vmem:[%s12302_s3 + $0x238] sm:$0xff]  ;;  %v1180_v24 = vld [vmem:[%s12303_s4] sm:$0xff]  ;;  %v1181_v40 = vld [vmem:[%s12303_s4 + $0x8] sm:$0xff] }
 0x11d   : > { %v743_v53 = vrot.slane %v742_v5, 1  ;;  %v754_v8 = vrot.slane %v753_v31, 1  ;;  %v851_v38 = vrot.slane %v850_v36, 4  ;;  %v7375_v19 = vpack.c.bf16 %v459_v10, %v458_v9  ;;  %v1182_v47 = vld [vmem:[%s12303_s4 + $0x10] sm:$0xff]  ;;  %v1187_v46 = vld [vmem:[%s12303_s4 + $0x38] sm:$0xff]  ;;  %v1188_v49 = vld [vmem:[%s12303_s4 + $0x40] sm:$0xff] }
 0x11e   : > { %v873_v45 = vmax.f32 %v871_v35, %v872_v12  ;;  %v1027_v30 = vrot.slane %v1026_v7, 1  ;;  %v1098_v18 = vrot.slane %v1097_v26, 1  ;;  %v7384_v35 = vpack.c.bf16 %v8814_v41, %v8816_v42  ;;  %v1184_v12 = vld [vmem:[%s12303_s4 + $0x20] sm:$0xff]  ;;  %v500_v61 = vld [vmem:[%s12302_s3 + $0x370] sm:$0xff]  ;;  %v501_v63 = vld [vmem:[%s12302_s3 + $0x378] sm:$0xff] }
 0x11f   : > { %v744_v39 = vadd.f32 %v743_v53, %v742_v5  ;;  %v852_v52 = vadd.f32 %v851_v38, %v850_v36  ;;  %v755_v17 = vmax.f32 %v753_v31, %v754_v8  ;;  %v7378_v31 = vpack.c.bf16 %v461_v22, %v460_v21  ;;  %v495_v53 = vld [vmem:[%s12302_s3 + $0x348] sm:$0xff]  ;;  %v1183_v8 = vld [vmem:[%s12303_s4 + $0x18] sm:$0xff]  ;;  %v1192_v57 = vld [vmem:[%s12303_s4 + $0x60] sm:$0xff] }
 0x120   : > { %v874_v20 = vrot.slane %v873_v45, 4  ;;  %v1028_v51 = vadd.f32 %v1027_v30, %v1026_v7  ;;  %v1099_v5 = vmax.f32 %v1097_v26, %v1098_v18  ;;  %v7392_v32 = vpack.c.bf16 %v8851_v13, %v8853_v56  ;;  %v1185_v38 = vld [vmem:[%s12303_s4 + $0x28] sm:$0xff]  ;;  %v1190_v7 = vld [vmem:[%s12303_s4 + $0x50] sm:$0xff]  ;;  %v502_v30 = vld [vmem:[%s12302_s3 + $0x380] sm:$0xff] }
 0x121   : > { %v746_v54 = vmul.f32 0.0625, %v744_v39  ;;  %v853_v33 = vrot.slane %v852_v52, 2  ;;  %v1186_v39 = vld [vmem:[%s12303_s4 + $0x30] sm:$0xff]  ;;  %v503_v26 = vld [vmem:[%s12302_s3 + $0x388] sm:$0xff]  ;;  %v505_v9 = vld [vmem:[%s12302_s3 + $0x398] sm:$0xff] }
 0x122   : > { %v875_v58 = vmax.f32 %v873_v45, %v874_v20  ;;  %v1030_v62 = vmul.f32 0.00390625, %v1028_v51  ;;  %v7396_v45 = vpack.c.bf16 %v8863_v37, %v8865_v4  ;;  %v1191_v20 = vld [vmem:[%s12303_s4 + $0x58] sm:$0xff]  ;;  %v507_v51 = vld [vmem:[%s12302_s3 + $0x3a8] sm:$0xff]  ;;  %v1204_v22 = vld [vmem:[%s12303_s4 + $0xc0] sm:$0xff] }
 0x123   : > { %v756_v60 = vadd.f32 %v755_v17, %v746_v54  ;;  %v854_v0 = vadd.f32 %v853_v33, %v852_v52  ;;  %v1189_v52 = vld [vmem:[%s12303_s4 + $0x48] sm:$0xff]  ;;  %v496_v54 = vld [vmem:[%s12302_s3 + $0x350] sm:$0xff]  ;;  %v497_v17 = vld [vmem:[%s12302_s3 + $0x358] sm:$0xff] }
 0x124   : > { %v876_v3 = vrot.slane %v875_v58, 2  ;;  %v1100_v36 = vadd.f32 %v1099_v5, %v1030_v62  ;;  %v498_v33 = vld [vmem:[%s12302_s3 + $0x360] sm:$0xff]  ;;  %v1199_v10 = vld [vmem:[%s12303_s4 + $0x98] sm:$0xff]  ;;  %v1201_v18 = vld [vmem:[%s12303_s4 + $0xa8] sm:$0xff] }
 0x125   : > { %6924 = vmatmul.mubr.msk.f32.vlgmr.msra.gmra.mrb[4].mxu0 %vm735_vm0, %v756_v60  ;;  %v855_v29 = vrot.slane %v854_v0, 1  ;;  %v1194_v60 = vld [vmem:[%s12303_s4 + $0x70] sm:$0xff]  ;;  %v1203_v21 = vld [vmem:[%s12303_s4 + $0xb8] sm:$0xff]  ;;  %v1205_v62 = vld [vmem:[%s12303_s4 + $0xc8] sm:$0xff] }
 0x126   : > { %7370 = vmatpush3.bf16.msra.mxu0 %v7369_v6  ;;  %6961 = vmatprep.mubr.msk.f32.mxu0 %vm8320_vm1, %v8321_v16  ;;  %v877_v34 = vmax.f32 %v875_v58, %v876_v3  ;;  %v499_v6 = vld [vmem:[%s12302_s3 + $0x368] sm:$0xff]  ;;  %v1196_v3 = vld [vmem:[%s12303_s4 + $0x80] sm:$0xff]  ;;  %v1206_v5 = vld [vmem:[%s12303_s4 + $0xd0] sm:$0xff] }
 0x127   : > { %7371 = vmatprep.subr.bf16.mxu0 %v12308_v25  ;;  %v856_v11 = vadd.f32 %v855_v29, %v854_v0  ;;  %v1193_v58 = vld [vmem:[%s12303_s4 + $0x68] sm:$0xff]  ;;  %v1195_v0 = vld [vmem:[%s12303_s4 + $0x78] sm:$0xff] }
 0x128   : > { %v878_v15 = vrot.slane %v877_v34, 1  ;;  %v1197_v29 = vld [vmem:[%s12303_s4 + $0x88] sm:$0xff] }
 0x129   : > { %v858_v55 = vmul.f32 0.015625, %v856_v11  ;;  %v1200_v11 = vld [vmem:[%s12303_s4 + $0xa0] sm:$0xff] }
 0x12a   : > { %7373 = vmatpush3.bf16.msra.mxu0 %v7372_v50  ;;  %v879_v16 = vmax.f32 %v877_v34, %v878_v15  ;;  %v1198_v50 = vld [vmem:[%s12303_s4 + $0x90] sm:$0xff]  ;;  %v506_v15 = vld [vmem:[%s12302_s3 + $0x3a0] sm:$0xff] }
 0x12b   : > { %7374 = vmatprep.subr.bf16.mxu0 %v12308_v25  ;;  %v504_v34 = vld [vmem:[%s12302_s3 + $0x390] sm:$0xff] }
 0x12c   : > { %v880_v27 = vadd.f32 %v879_v16, %v858_v55  ;;  %v1202_v55 = vld [vmem:[%s12303_s4 + $0xb0] sm:$0xff]  ;;  %v509_v16 = vld [vmem:[%s12302_s3 + $0x3b8] sm:$0xff] }
 0x12e   : > { %7376 = vmatpush3.bf16.msra.mxu0 %v7375_v19  ;;  %6943 = vmatmul.mubr.msk.f32.vlgmr.msra.gmra.mrb[8].mxu1 %vm735_vm0, %v880_v27  ;;  %v508_v19 = vld [vmem:[%s12302_s3 + $0x3b0] sm:$0xff]  ;;  %v510_v27 = vld [vmem:[%s12302_s3 + $0x3c0] sm:$0xff] }
 0x12f   : > { %7377 = vmatprep.subr.bf16.mxu0 %v12308_v25  ;;  %7383 = vmatpush3.bf16.msra.mxu1 %v8869_v14  ;;  %v7388_v14 = vpack.c.bf16 %v8824_v28, %v8829_v2 }
 0x130   : > { %6968 = vmatprep.mubr.msk.f32.mxu1 %vm1212_vm2, %v1180_v24  ;;  %7400 = vmatprep.subr.bf16.mxu1 %v12308_v25  ;;  %v511_v24 = vld [vmem:[%s12302_s3 + $0x3c8] sm:$0xff] }
 0x132   : > { %7379 = vmatpush3.bf16.msra.mxu0 %v7378_v31  ;;  %6969 = vmatmul.mubr.msk.f32.vlgmr.msra.gmra.mrb[10].mxu1 %vm1212_vm2, %v1181_v40  ;;  %v512_v31 = vld [vmem:[%s12302_s3 + $0x3d0] sm:$0xff]  ;;  %v1207_v40 = vld [vmem:[%s12303_s4 + $0xd8] sm:$0xff] }
 0x133   : > { %7385 = vmatprep.subr.bf16.mxu0 %v7384_v35  ;;  %6971 = vmatprep.mubr.msk.f32.mxu1 %vm1212_vm2, %v1182_v47  ;;  %v514_v47 = vld [vmem:[%s12302_s3 + $0x3e0] sm:$0xff] }
 0x135   : > { %6962 = vmatmul.mubr.msk.f32.vlgmr.msra.gmra.mrb[6].mxu0 %vm735_vm0, %v1100_v36  ;;  %v1208_v36 = vld [vmem:[%s12303_s4 + $0xe0] sm:$0xff] }
 0x136   : > { %7387 = vmatpush3.bf16.msra.mxu0 %v7384_v35  ;;  %7032 = vmatprep.mubr.msk.f32.mxu0 %vm735_vm0, %v495_v53  ;;  %v513_v35 = vld [vmem:[%s12302_s3 + $0x3d8] sm:$0xff]  ;;  %v1209_v53 = vld [vmem:[%s12303_s4 + $0xe8] sm:$0xff] }
 0x137   : > { %6972 = vmatmul.mubr.msk.f32.gmra.mrb[12].mxu1 %vm1212_vm2, %v1183_v8  ;;  %7389 = vmatprep.subr.bf16.mxu0 %v7388_v14  ;;  %v1210_v8 = vld [vmem:[%s12303_s4 + $0xf0] sm:$0xff] }
 0x138   : > { %6974 = vmatprep.mubr.msk.f32.mxu1 %vm1212_vm2, %v1184_v12  ;;  %v516_v12 = vld [vmem:[%s12302_s3 + $0x3f0] sm:$0xff] }
 0x13a   : > { %7391 = vmatpush3.bf16.msra.mxu0 %v7388_v14  ;;  %v515_v14 = vld [vmem:[%s12302_s3 + $0x3e8] sm:$0xff] }
 0x13b   : > { %6975 = vmatmul.mubr.msk.f32.gmra.mrb[14].mxu1 %vm1212_vm2, %v1185_v38  ;;  %7393 = vmatprep.subr.bf16.mxu0 %v7392_v32  ;;  %v1211_v38 = vld [vmem:[%s12303_s4 + $0xf8] sm:$0xff] }
 0x13c   : > { %6977 = vmatprep.mubr.msk.f32.mxu1 %vm1212_vm2, %v1186_v39  ;;  %v518_v39 = vld [vmem:[%s12302_s3 + $0x400] sm:$0xff] }
 0x13e   : > { %7395 = vmatpush3.bf16.msra.mxu0 %v7392_v32  ;;  %v517_v32 = vld [vmem:[%s12302_s3 + $0x3f8] sm:$0xff] }
 0x13f   : > { %6978 = vmatmul.mubr.msk.f32.gmra.mrb[16].mxu1 %vm1212_vm2, %v1187_v46  ;;  %7397 = vmatprep.subr.bf16.mxu0 %v7396_v45  ;;  %v520_v46 = vld [vmem:[%s12302_s3 + $0x410] sm:$0xff] }
 0x140   : > { %6980 = vmatprep.mubr.msk.f32.mxu1 %vm1212_vm2, %v1188_v49  ;;  %v521_v49 = vld [vmem:[%s12302_s3 + $0x418] sm:$0xff] }
 0x142   : > { %7399 = vmatpush3.bf16.msra.mxu0 %v7396_v45  ;;  %v519_v45 = vld [vmem:[%s12302_s3 + $0x408] sm:$0xff] }
 0x143   : > { %6981 = vmatmul.mubr.msk.f32.gmra.mrb[18].mxu1 %vm1212_vm2, %v1189_v52  ;;  %v523_v52 = vld [vmem:[%s12302_s3 + $0x428] sm:$0xff] }
 0x144   : > { %6983 = vmatprep.mubr.msk.f32.mxu1 %vm1212_vm2, %v1190_v7  ;;  %v524_v7 = vld [vmem:[%s12302_s3 + $0x430] sm:$0xff] }
 0x145   : > { %7033 = vmatmul.mubr.msk.f32.vlgmr.msra.gmra.mrb[8].mxu0 %vm735_vm0, %v496_v54  ;;  %v525_v54 = vld [vmem:[%s12302_s3 + $0x438] sm:$0xff] }
 0x146   : > { %7035 = vmatprep.mubr.msk.f32.mxu0 %vm735_vm0, %v497_v17  ;;  %v526_v17 = vld [vmem:[%s12302_s3 + $0x440] sm:$0xff] }
 0x147   : > { %6984 = vmatmul.mubr.msk.f32.gmra.mrb[20].mxu1 %vm1212_vm2, %v1191_v20  ;;  %v462_v20 = vld [vmem:[%s12302_s3 + $0x240] sm:$0xff] }
 0x148   : > { %6986 = vmatprep.mubr.msk.f32.mxu1 %vm1212_vm2, %v1192_v57  ;;  %v463_v57 = vld [vmem:[%s12302_s3 + $0x248] sm:$0xff] }
 0x149   : > { %7036 = vmatmul.mubr.msk.f32.gmra.mrb[10].mxu0 %vm735_vm0, %v498_v33  ;;  %v7401_v33 = vpack.c.bf16 %v463_v57, %v462_v20  ;;  %v485_v20 = vld [vmem:[%s12302_s3 + $0x2f8] sm:$0xff] }
 0x14a   : > { %7038 = vmatprep.mubr.msk.f32.mxu0 %vm735_vm0, %v499_v6  ;;  %v464_v6 = vld [vmem:[%s12302_s3 + $0x250] sm:$0xff] }
 0x14b   : > { %6987 = vmatmul.mubr.msk.f32.gmra.mrb[22].mxu1 %vm1212_vm2, %v1193_v58  ;;  %v465_v58 = vld [vmem:[%s12302_s3 + $0x258] sm:$0xff] }
 0x14c   : > { %6989 = vmatprep.mubr.msk.f32.mxu1 %vm1212_vm2, %v1194_v60  ;;  %7402 = vmatpush1.bf16.msra.mxu1 %v7401_v33  ;;  %v7404_v60 = vpack.c.bf16 %v465_v58, %v464_v6 }
 0x14d   : > { %7039 = vmatmul.mubr.msk.f32.gmra.mrb[12].mxu0 %vm735_vm0, %v500_v61  ;;  %7403 = vmatprep.subr.bf16.mxu1 %v12308_v25  ;;  %v466_v61 = vld [vmem:[%s12302_s3 + $0x260] sm:$0xff] }
 0x14e   : > { %7041 = vmatprep.mubr.msk.f32.mxu0 %vm735_vm0, %v501_v63  ;;  %v467_v63 = vld [vmem:[%s12302_s3 + $0x268] sm:$0xff] }
 0x14f   : > { %6990 = vmatmul.mubr.msk.f32.gmra.mrb[24].mxu1 %vm1212_vm2, %v1195_v0  ;;  %v7407_v0 = vpack.c.bf16 %v467_v63, %v466_v61 }
 0x150   : > { %6992 = vmatprep.mubr.msk.f32.mxu1 %vm1212_vm2, %v1196_v3  ;;  %7405 = vmatpush1.bf16.msra.mxu1 %v7404_v60  ;;  %v468_v3 = vld [vmem:[%s12302_s3 + $0x270] sm:$0xff] }
 0x151   : > { %7042 = vmatmul.mubr.msk.f32.gmra.mrb[14].mxu0 %vm735_vm0, %v502_v30  ;;  %7406 = vmatprep.subr.bf16.mxu1 %v12308_v25  ;;  %v469_v30 = vld [vmem:[%s12302_s3 + $0x278] sm:$0xff] }
 0x152   : > { %7044 = vmatprep.mubr.msk.f32.mxu0 %vm735_vm0, %v503_v26  ;;  %v7410_v26 = vpack.c.bf16 %v469_v30, %v468_v3 }
 0x153   : > { %6993 = vmatmul.mubr.msk.f32.gmra.mrb[26].mxu1 %vm1212_vm2, %v1197_v29  ;;  %v470_v29 = vld [vmem:[%s12302_s3 + $0x280] sm:$0xff] }
 0x154   : > { %6995 = vmatprep.mubr.msk.f32.mxu1 %vm1212_vm2, %v1198_v50  ;;  %7408 = vmatpush1.bf16.msra.mxu1 %v7407_v0  ;;  %v471_v50 = vld [vmem:[%s12302_s3 + $0x288] sm:$0xff] }
 0x155   : > { %7045 = vmatmul.mubr.msk.f32.gmra.mrb[16].mxu0 %vm735_vm0, %v504_v34  ;;  %7409 = vmatprep.subr.bf16.mxu1 %v12308_v25  ;;  %v7413_v34 = vpack.c.bf16 %v471_v50, %v470_v29 }
 0x156   : > { %7047 = vmatprep.mubr.msk.f32.mxu0 %vm735_vm0, %v505_v9  ;;  %v472_v9 = vld [vmem:[%s12302_s3 + $0x290] sm:$0xff] }
 0x157   : > { %6996 = vmatmul.mubr.msk.f32.gmra.mrb[28].mxu1 %vm1212_vm2, %v1199_v10  ;;  %v473_v10 = vld [vmem:[%s12302_s3 + $0x298] sm:$0xff] }
 0x158   : > { %6998 = vmatprep.mubr.msk.f32.mxu1 %vm1212_vm2, %v1200_v11  ;;  %7411 = vmatpush1.bf16.msra.mxu1 %v7410_v26  ;;  %v7416_v11 = vpack.c.bf16 %v473_v10, %v472_v9 }
 0x159   : > { %7048 = vmatmul.mubr.msk.f32.gmra.mrb[18].mxu0 %vm735_vm0, %v506_v15  ;;  %7412 = vmatprep.subr.bf16.mxu1 %v12308_v25  ;;  %v474_v15 = vld [vmem:[%s12302_s3 + $0x2a0] sm:$0xff] }
 0x15a   : > { %7050 = vmatprep.mubr.msk.f32.mxu0 %vm735_vm0, %v507_v51  ;;  %v475_v51 = vld [vmem:[%s12302_s3 + $0x2a8] sm:$0xff] }
 0x15b   : > { %6999 = vmatmul.mubr.msk.f32.gmra.mrb[30].mxu1 %vm1212_vm2, %v1201_v18  ;;  %v7419_v18 = vpack.c.bf16 %v475_v51, %v474_v15 }
 0x15c   : > { %7001 = vmatprep.mubr.msk.f32.mxu1 %vm1212_vm2, %v1202_v55  ;;  %7414 = vmatpush1.bf16.msra.mxu1 %v7413_v34  ;;  %v476_v55 = vld [vmem:[%s12302_s3 + $0x2b0] sm:$0xff] }
 0x15d   : > { %7051 = vmatmul.mubr.msk.f32.gmra.mrb[20].mxu0 %vm735_vm0, %v508_v19  ;;  %7415 = vmatprep.subr.bf16.mxu1 %v12308_v25  ;;  %v477_v19 = vld [vmem:[%s12302_s3 + $0x2b8] sm:$0xff] }
 0x15e   : > { %7053 = vmatprep.mubr.msk.f32.mxu0 %vm735_vm0, %v509_v16 }
 0x15f   : > { %7002 = vmatmul.mubr.msk.f32.gmra.mrb[32].mxu1 %vm1212_vm2, %v1203_v21  ;;  %v7422_v21 = vpack.c.bf16 %v477_v19, %v476_v55 }
 0x160   : > { %7004 = vmatprep.mubr.msk.f32.mxu1 %vm1212_vm2, %v1204_v22  ;;  %7417 = vmatpush1.bf16.msra.mxu1 %v7416_v11 }
 0x161   : > { %7054 = vmatmul.mubr.msk.f32.gmra.mrb[22].mxu0 %vm735_vm0, %v510_v27  ;;  %7418 = vmatprep.subr.bf16.mxu1 %v12308_v25 }
 0x162   : > { %7056 = vmatprep.mubr.msk.f32.mxu0 %vm735_vm0, %v511_v24 }
 0x163   : > { %7005 = vmatmul.mubr.msk.f32.gmra.mrb[34].mxu1 %vm1212_vm2, %v1205_v62  ;;  %v478_v62 = vld [vmem:[%s12302_s3 + $0x2c0] sm:$0xff] }
 0x164   : > { %7007 = vmatprep.mubr.msk.f32.mxu1 %vm1212_vm2, %v1206_v5  ;;  %7420 = vmatpush1.bf16.msra.mxu1 %v7419_v18  ;;  %v479_v5 = vld [vmem:[%s12302_s3 + $0x2c8] sm:$0xff] }
 0x165   : > { %7057 = vmatmul.mubr.msk.f32.gmra.mrb[24].mxu0 %vm735_vm0, %v512_v31  ;;  %7421 = vmatprep.subr.bf16.mxu1 %v12308_v25  ;;  %v7425_v31 = vpack.c.bf16 %v479_v5, %v478_v62 }
 0x166   : > { %7059 = vmatprep.mubr.msk.f32.mxu0 %vm735_vm0, %v513_v35  ;;  %v480_v35 = vld [vmem:[%s12302_s3 + $0x2d0] sm:$0xff] }
 0x167   : > { %7008 = vmatmul.mubr.msk.f32.gmra.mrb[36].mxu1 %vm1212_vm2, %v1207_v40  ;;  %v481_v40 = vld [vmem:[%s12302_s3 + $0x2d8] sm:$0xff] }
 0x168   : > { %7010 = vmatprep.mubr.msk.f32.mxu1 %vm1212_vm2, %v1208_v36  ;;  %7423 = vmatpush1.bf16.msra.mxu1 %v7422_v21  ;;  %v7428_v36 = vpack.c.bf16 %v481_v40, %v480_v35 }
 0x169   : > { %7060 = vmatmul.mubr.msk.f32.gmra.mrb[26].mxu0 %vm735_vm0, %v514_v47  ;;  %7424 = vmatprep.subr.bf16.mxu1 %v12308_v25 }
 0x16a   : > { %7062 = vmatprep.mubr.msk.f32.mxu0 %vm735_vm0, %v515_v14 }
 0x16b   : > { %7011 = vmatmul.mubr.msk.f32.gmra.mrb[38].mxu1 %vm1212_vm2, %v1209_v53 }
 0x16c   : > { %7013 = vmatprep.mubr.msk.f32.mxu1 %vm1212_vm2, %v1210_v8  ;;  %7426 = vmatpush1.bf16.msra.mxu1 %v7425_v31 }
 0x16d   : > { %7063 = vmatmul.mubr.msk.f32.gmra.mrb[28].mxu0 %vm735_vm0, %v516_v12  ;;  %7427 = vmatprep.subr.bf16.mxu1 %v12308_v25 }
 0x16e   : > { %7065 = vmatprep.mubr.msk.f32.mxu0 %vm735_vm0, %v517_v32 }
 0x16f   : > { %7014 = vmatmul.mubr.msk.f32.gmra.mrb[40].mxu1 %vm1212_vm2, %v1211_v38 }
 0x170   : > { %6411 = vmatprep.mubr.msk.f32.mxu1 %vm735_vm0, %v8572_v23  ;;  %v522_v23 = vld [vmem:[%s12302_s3 + $0x420] sm:$0xff]  ;;  %7429 = vmatpush1.bf16.msra.mxu1 %v7428_v36 }
 0x171   : > { %7066 = vmatmul.mubr.msk.f32.gmra.mrb[30].mxu0 %vm735_vm0, %v518_v39  ;;  %7430 = vmatprep.subr.bf16.mxu1 %v12308_v25  ;;  %v482_v39 = vld [vmem:[%s12302_s3 + $0x2e0] sm:$0xff] }
 0x172   : > { %7068 = vmatprep.mubr.msk.f32.mxu0 %vm735_vm0, %v519_v45  ;;  %v483_v45 = vld [vmem:[%s12302_s3 + $0x2e8] sm:$0xff] }
 0x175   : > { %7069 = vmatmul.mubr.msk.f32.gmra.mrb[32].mxu0 %vm735_vm0, %v520_v46 }
 0x176   : > { %7071 = vmatprep.mubr.msk.f32.mxu0 %vm735_vm0, %v521_v49 }
 0x179   : > { %7072 = vmatmul.mubr.msk.f32.gmra.mrb[34].mxu0 %vm735_vm0, %v522_v23  ;;  %v7431_v23 = vpack.c.bf16 %v483_v45, %v482_v39 }
 0x17a   : > { %7074 = vmatprep.mubr.msk.f32.mxu0 %vm735_vm0, %v523_v52 }
 0x17b   : > { %7432 = vmatpush1.bf16.msra.mxu1 %v7431_v23 }
 0x17c   : > { %7433 = vmatprep.subr.bf16.mxu1 %v12308_v25 }
 0x17d   : > { %7075 = vmatmul.mubr.msk.f32.gmra.mrb[36].mxu0 %vm735_vm0, %v524_v7 }
 0x17e   : > { %7077 = vmatprep.mubr.msk.f32.mxu0 %vm735_vm0, %v525_v54 }
 0x181   : > { %7078 = vmatmul.mubr.msk.f32.gmra.mrb[38].mxu0 %vm735_vm0, %v526_v17  ;;  %v484_v17 = vld [vmem:[%s12302_s3 + $0x2f0] sm:$0xff] }
 0x182   : > { %v7434_v57 = vpack.c.bf16 %v485_v20, %v484_v17 }
 0x184   : > { %7435 = vmatpush1.bf16.msra.mxu1 %v7434_v57 }
 0x1f8   : > { %v826_v16 = vpop.f32.mrb[4].mxu0 }
 0x1f9   : > { %v830_v22 = vsub.f32 0.0, %v826_v16  ;;  %v6925_v27 = vpop.f32.mrb[5].mxu0 }
 0x1fb   : > { %v831_v24 = vmul.f32 1.442695, %v830_v22 }
 0x1fd   : > { %7755 = vpow2.f32 %v831_v24 }
 0x201   : > { %v950_v47 = vpop.f32.mrb[8].mxu1 }
 0x202   : > { %v954_v14 = vsub.f32 0.0, %v950_v47  ;;  %v6944_v53 = vpop.f32.mrb[9].mxu1 }
 0x204   : > { %v955_v8 = vmul.f32 1.442695, %v954_v14 }
 0x205   : > { %v9257_v12 = vpop.f32.mrb[10].mxu1 }
 0x206   : > { %7757 = vpow2.f32 %v955_v8  ;;  %v9259_v38 = vpop.f32.mrb[11].mxu1 }
 0x207   : > { %v7756_v32 = vpop.eup %7755 }
 0x208   : > { %v833_v46 = vadd.f32 1.0, %v7756_v32  ;;  %v9267_v49 = vpop.f32.mrb[6].mxu0 }
 0x209   : > { %v6963_v52 = vpop.f32.mrb[7].mxu0 }
 0x20a   : > { %7759 = vrcp.f32 %v833_v46  ;;  %v9269_v7 = vpop.f32.mrb[12].mxu1 }
 0x20b   : > { %v9271_v54 = vpop.f32.mrb[13].mxu1 }
 0x20e   : > { %v9280_v33 = vpop.f32.mrb[14].mxu1 }
 0x20f   : > { %v9282_v6 = vpop.f32.mrb[15].mxu1 }
 0x210   : > { %v7758_v58 = vpop.eup %7757 }
 0x211   : > { %v957_v60 = vadd.f32 1.0, %v7758_v58 }
 0x212   : > { %v9284_v61 = vpop.f32.mrb[16].mxu1 }
 0x213   : > { %v9286_v63 = vpop.f32.mrb[17].mxu1  ;;  %7761 = vrcp.f32 %v957_v60 }
 0x214   : > { %v7760_v0 = vpop.eup %7759 }
 0x215   : > { %v9289_v3 = vrot.slane %v7760_v0, %v8806_v1 }
 0x216   : > { %v9291_v30 = vpop.f32.mrb[18].mxu1 }
 0x217   : > { %v9295_v26 = vmul.f32 %v9257_v12, %v9289_v3  ;;  %v9299_v29 = vmul.f32 %v9289_v3, %v9259_v38  ;;  %v9303_v50 = vmul.f32 %v9269_v7, %v9289_v3  ;;  %v9307_v34 = vmul.f32 %v9289_v3, %v9271_v54  ;;  %v9309_v9 = vpop.f32.mrb[19].mxu1 }
 0x218   : > { %v9313_v10 = vmul.f32 %v9280_v33, %v9289_v3  ;;  %v9317_v11 = vmul.f32 %v9289_v3, %v9282_v6  ;;  %v9321_v15 = vmul.f32 %v9284_v61, %v9289_v3  ;;  %v7034_v51 = vpop.f32.mrb[8].mxu0  ;;  %v9325_v18 = vmul.f32 %v9289_v3, %v9286_v63 }
 0x219   : > { %12365 = vst [vmem:[#allocation4_spill] sm:$0xff] %v9295_v26  ;;  %12366 = vst [vmem:[#allocation5_spill] sm:$0xff] %v9299_v29  ;;  %v9329_v55 = vmul.f32 %v9291_v30, %v9289_v3  ;;  %v9333_v19 = vmul.f32 %v9289_v3, %v9309_v9  ;;  %v1696_v16 = vpop.f32.mrb[9].mxu0  ;;  %v9689_v29 = vld [vmem:[%s8563_s19 + $0x38] sm:$0xff] }
 0x21a   : > { %12367 = vst [vmem:[#allocation6_spill] sm:$0xff] %v9303_v50  ;;  %12368 = vst [vmem:[#allocation7_spill] sm:$0xff] %v9307_v34  ;;  %v9335_v21 = vpop.f32.mrb[20].mxu1  ;;  %v7673_v22 = vpack.i.bf16 %v7034_v51, %v1696_v16 }
 0x21b   : > { %12369 = vst [vmem:[#allocation8_spill] sm:$0xff] %v9313_v10  ;;  %12370 = vst [vmem:[#allocation9_spill] sm:$0xff] %v9317_v11  ;;  %v9339_v27 = vmul.f32 %v9335_v21, %v9289_v3  ;;  %v9341_v24 = vpop.f32.mrb[21].mxu1 }
 0x21c   : > { %12371 = vst [vmem:[#allocation10_spill] sm:$0xff] %v9321_v15  ;;  %12372 = vst [vmem:[#allocation11_spill] sm:$0xff] %v9325_v18  ;;  %v9345_v62 = vmul.f32 %v9289_v3, %v9341_v24  ;;  %7674 = vrot.lane.b32.xlu0 %v7673_v22, %s8322_s17  ;;  %v7037_v5 = vpop.f32.mrb[10].mxu0 }
 0x21d   : > { %12373 = vst [vmem:[#allocation12_spill] sm:$0xff] %v9329_v55  ;;  %12374 = vst [vmem:[#allocation13_spill] sm:$0xff] %v9333_v19  ;;  %v1706_v31 = vpop.f32.mrb[11].mxu0  ;;  %v7762_v35 = vpop.eup %7761 }
 0x21e   : > { %12375 = vst [vmem:[#allocation14_spill] sm:$0xff] %v9339_v27  ;;  %12376 = vst [vmem:[#allocation15_spill] sm:$0xff] %v9345_v62  ;;  %v9348_v40 = vpop.f32.mrb[22].mxu1  ;;  %v7678_v36 = vpack.i.bf16 %v7037_v5, %v1706_v31  ;;  %v9351_v47 = vrot.slane %v7762_v35, %v8806_v1 }
 0x21f   : > { %v9355_v14 = vmul.f32 %v9348_v40, %v9289_v3  ;;  %v9357_v53 = vpop.f32.mrb[23].mxu1 }
 0x220   : > { %v9361_v8 = vmul.f32 %v9289_v3, %v9357_v53  ;;  %7679 = vrot.lane.b32.xlu0 %v7678_v36, %s8322_s17  ;;  %v7040_v32 = vpop.f32.mrb[12].mxu0  ;;  %v9365_v39 = vmul.f32 %v7034_v51, %v9351_v47  ;;  %v9368_v45 = vmul.f32 %v9351_v47, %v1696_v16  ;;  %v9371_v46 = vmul.f32 %v7037_v5, %v9351_v47 }
 0x221   : > { %12377 = vst [vmem:[#allocation16_spill] sm:$0xff] %v9355_v14  ;;  %v9374_v23 = vmul.f32 %v9351_v47, %v1706_v31  ;;  %v1716_v52 = vpop.f32.mrb[13].mxu0  ;;  %v9379_v20 = vmul.f32 %v7040_v32, %v9351_v47  ;;  %v9672_v50 = vmul.f32 %v9351_v47, %v8824_v28  ;;  %v9678_v26 = vmul.f32 %v9351_v47, %v8829_v2  ;;  %v493_v28 = vld [vmem:[%s12302_s3 + $0x338] sm:$0xff] }
 0x222   : > { %12378 = vst [vmem:[#allocation17_spill] sm:$0xff] %v9361_v8  ;;  %12379 = vst [vmem:[#allocation18_spill] sm:$0xff] %v9365_v39  ;;  %v9376_v17 = vpop.f32.mrb[24].mxu1  ;;  %v9382_v57 = vmul.f32 %v9351_v47, %v1716_v52  ;;  %v7683_v58 = vpack.i.bf16 %v7040_v32, %v1716_v52 }
 0x223   : > { %12380 = vst [vmem:[#allocation19_spill] sm:$0xff] %v9368_v45  ;;  %12381 = vst [vmem:[#allocation20_spill] sm:$0xff] %v9371_v46  ;;  %v9386_v60 = vmul.f32 %v9376_v17, %v9289_v3  ;;  %v9388_v0 = vpop.f32.mrb[25].mxu1 }
 0x224   : > { %12382 = vst [vmem:[#allocation21_spill] sm:$0xff] %v9374_v23  ;;  %12383 = vst [vmem:[#allocation22_spill] sm:$0xff] %v9379_v20  ;;  %v9392_v51 = vmul.f32 %v9289_v3, %v9388_v0  ;;  %v7043_v16 = vpop.f32.mrb[14].mxu0  ;;  %7684 = vrot.lane.b32.xlu1 %v7683_v58, %s8322_s17 }
 0x225   : > { %12384 = vst [vmem:[#allocation23_spill] sm:$0xff] %v9382_v57  ;;  %12385 = vst [vmem:[#allocation24_spill] sm:$0xff] %v9386_v60  ;;  %v9396_v22 = vmul.f32 %v7043_v16, %v9351_v47  ;;  %v1726_v5 = vpop.f32.mrb[15].mxu0 }
 0x226   : > { %12386 = vst [vmem:[#allocation25_spill] sm:$0xff] %v9392_v51  ;;  %v9398_v31 = vpop.f32.mrb[26].mxu1  ;;  %v7688_v35 = vpack.i.bf16 %v7043_v16, %v1726_v5  ;;  %v9401_v36 = vmul.f32 %v9351_v47, %v1726_v5 }
 0x227   : > { %12387 = vst [vmem:[#allocation26_spill] sm:$0xff] %v9396_v22  ;;  %v9405_v32 = vmul.f32 %v9398_v31, %v9289_v3  ;;  %v9407_v52 = vpop.f32.mrb[27].mxu1 }
 0x228   : > { %12388 = vst [vmem:[#allocation27_spill] sm:$0xff] %v9401_v36  ;;  %v9411_v25 = vmul.f32 %v9289_v3, %v9407_v52  ;;  %v7046_v58 = vpop.f32.mrb[16].mxu0  ;;  %7689 = vrot.lane.b32.xlu1 %v7688_v35, %s8322_s17 }
 0x229   : > { %12389 = vst [vmem:[#allocation28_spill] sm:$0xff] %v9405_v32  ;;  %v9415_v22 = vmul.f32 %v7046_v58, %v9351_v47  ;;  %v1736_v16 = vpop.f32.mrb[17].mxu0 }
 0x22a   : > { %12390 = vst [vmem:[#allocation29_spill] sm:$0xff] %v9411_v25  ;;  %v9417_v20 = vpop.f32.mrb[28].mxu1  ;;  %v7693_v5 = vpack.i.bf16 %v7046_v58, %v1736_v16  ;;  %v9420_v46 = vmul.f32 %v9351_v47, %v1736_v16 }
 0x22b   : > { %12391 = vst [vmem:[#allocation30_spill] sm:$0xff] %v9415_v22  ;;  %v9424_v39 = vmul.f32 %v9417_v20, %v9289_v3  ;;  %v9426_v36 = vpop.f32.mrb[29].mxu1 }
 0x22c   : > { %12392 = vst [vmem:[#allocation31_spill] sm:$0xff] %v9420_v46  ;;  %v9430_v57 = vmul.f32 %v9289_v3, %v9426_v36  ;;  %v7049_v35 = vpop.f32.mrb[18].mxu0  ;;  %7694 = vrot.lane.b32.xlu0 %v7693_v5, %s8322_s17 }
 0x22d   : > { %12393 = vst [vmem:[#allocation32_spill] sm:$0xff] %v9424_v39  ;;  %v9434_v22 = vmul.f32 %v7049_v35, %v9351_v47  ;;  %v1746_v58 = vpop.f32.mrb[19].mxu0 }
 0x22e   : > { %12394 = vst [vmem:[#allocation33_spill] sm:$0xff] %v9430_v57  ;;  %v9436_v23 = vpop.f32.mrb[30].mxu1  ;;  %v7698_v16 = vpack.i.bf16 %v7049_v35, %v1746_v58  ;;  %v9439_v46 = vmul.f32 %v9351_v47, %v1746_v58 }
 0x22f   : > { %12395 = vst [vmem:[#allocation34_spill] sm:$0xff] %v9434_v22  ;;  %v9443_v45 = vmul.f32 %v9436_v23, %v9289_v3  ;;  %v9445_v39 = vpop.f32.mrb[31].mxu1 }
 0x230   : > { %12396 = vst [vmem:[#allocation35_spill] sm:$0xff] %v9439_v46  ;;  %v9449_v32 = vmul.f32 %v9289_v3, %v9445_v39  ;;  %v7052_v5 = vpop.f32.mrb[20].mxu0  ;;  %7699 = vrot.lane.b32.xlu1 %v7698_v16, %s8322_s17 }
 0x231   : > { %12397 = vst [vmem:[#allocation36_spill] sm:$0xff] %v9443_v45  ;;  %v9453_v22 = vmul.f32 %v7052_v5, %v9351_v47  ;;  %v1756_v35 = vpop.f32.mrb[21].mxu0 }
 0x232   : > { %12398 = vst [vmem:[#allocation37_spill] sm:$0xff] %v9449_v32  ;;  %v9455_v60 = vpop.f32.mrb[32].mxu1  ;;  %v7703_v58 = vpack.i.bf16 %v7052_v5, %v1756_v35  ;;  %v9458_v46 = vmul.f32 %v9351_v47, %v1756_v35 }
 0x233   : > { %12399 = vst [vmem:[#allocation38_spill] sm:$0xff] %v9453_v22  ;;  %v9462_v45 = vmul.f32 %v9455_v60, %v9289_v3  ;;  %v9464_v14 = vpop.f32.mrb[33].mxu1 }
 0x234   : > { %12400 = vst [vmem:[#allocation39_spill] sm:$0xff] %v9458_v46  ;;  %v9468_v32 = vmul.f32 %v9289_v3, %v9464_v14  ;;  %v7055_v16 = vpop.f32.mrb[22].mxu0  ;;  %7704 = vrot.lane.b32.xlu0 %v7703_v58, %s8322_s17 }
 0x235   : > { %12401 = vst [vmem:[#allocation40_spill] sm:$0xff] %v9462_v45  ;;  %v9472_v22 = vmul.f32 %v7055_v16, %v9351_v47  ;;  %v1766_v5 = vpop.f32.mrb[23].mxu0 }
 0x236   : > { %12402 = vst [vmem:[#allocation41_spill] sm:$0xff] %v9468_v32  ;;  %v9474_v57 = vpop.f32.mrb[34].mxu1  ;;  %v7708_v35 = vpack.i.bf16 %v7055_v16, %v1766_v5  ;;  %v9477_v46 = vmul.f32 %v9351_v47, %v1766_v5 }
 0x237   : > { %12403 = vst [vmem:[#allocation42_spill] sm:$0xff] %v9472_v22  ;;  %v9481_v45 = vmul.f32 %v9474_v57, %v9289_v3  ;;  %v9483_v27 = vpop.f32.mrb[35].mxu1 }
 0x238   : > { %12404 = vst [vmem:[#allocation43_spill] sm:$0xff] %v9477_v46  ;;  %v9487_v32 = vmul.f32 %v9289_v3, %v9483_v27  ;;  %v7058_v58 = vpop.f32.mrb[24].mxu0  ;;  %7709 = vrot.lane.b32.xlu1 %v7708_v35, %s8322_s17 }
 0x239   : > { %12405 = vst [vmem:[#allocation44_spill] sm:$0xff] %v9481_v45  ;;  %v9491_v22 = vmul.f32 %v7058_v58, %v9351_v47  ;;  %v1776_v16 = vpop.f32.mrb[25].mxu0 }
 0x23a   : > { %12406 = vst [vmem:[#allocation45_spill] sm:$0xff] %v9487_v32  ;;  %v9493_v25 = vpop.f32.mrb[36].mxu1  ;;  %v7713_v5 = vpack.i.bf16 %v7058_v58, %v1776_v16  ;;  %v9496_v46 = vmul.f32 %v9351_v47, %v1776_v16 }
 0x23b   : > { %12407 = vst [vmem:[#allocation46_spill] sm:$0xff] %v9491_v22  ;;  %v9500_v45 = vmul.f32 %v9493_v25, %v9289_v3  ;;  %v9502_v19 = vpop.f32.mrb[37].mxu1 }
 0x23c   : > { %12408 = vst [vmem:[#allocation47_spill] sm:$0xff] %v9496_v46  ;;  %v9506_v32 = vmul.f32 %v9289_v3, %v9502_v19  ;;  %v7061_v35 = vpop.f32.mrb[26].mxu0  ;;  %7714 = vrot.lane.b32.xlu0 %v7713_v5, %s8322_s17 }
 0x23d   : > { %12409 = vst [vmem:[#allocation48_spill] sm:$0xff] %v9500_v45  ;;  %v9510_v22 = vmul.f32 %v7061_v35, %v9351_v47  ;;  %v1786_v58 = vpop.f32.mrb[27].mxu0 }
 0x23e   : > { %12410 = vst [vmem:[#allocation49_spill] sm:$0xff] %v9506_v32  ;;  %v9512_v51 = vpop.f32.mrb[38].mxu1  ;;  %v7718_v16 = vpack.i.bf16 %v7061_v35, %v1786_v58  ;;  %v9515_v46 = vmul.f32 %v9351_v47, %v1786_v58 }
 0x23f   : > { %12411 = vst [vmem:[#allocation50_spill] sm:$0xff] %v9510_v22  ;;  %v9519_v45 = vmul.f32 %v9512_v51, %v9289_v3  ;;  %v9521_v55 = vpop.f32.mrb[39].mxu1 }
 0x240   : > { %12412 = vst [vmem:[#allocation51_spill] sm:$0xff] %v9515_v46  ;;  %v9525_v32 = vmul.f32 %v9289_v3, %v9521_v55  ;;  %v7064_v5 = vpop.f32.mrb[28].mxu0  ;;  %7719 = vrot.lane.b32.xlu1 %v7718_v16, %s8322_s17 }
 0x241   : > { %12413 = vst [vmem:[#allocation52_spill] sm:$0xff] %v9519_v45  ;;  %v9529_v22 = vmul.f32 %v7064_v5, %v9351_v47  ;;  %v1796_v35 = vpop.f32.mrb[29].mxu0 }
 0x242   : > { %12414 = vst [vmem:[#allocation53_spill] sm:$0xff] %v9525_v32  ;;  %v9531_v8 = vpop.f32.mrb[40].mxu1  ;;  %v7723_v58 = vpack.i.bf16 %v7064_v5, %v1796_v35  ;;  %v9534_v46 = vmul.f32 %v9351_v47, %v1796_v35 }
 0x243   : > { %12415 = vst [vmem:[#allocation54_spill] sm:$0xff] %v9529_v22  ;;  %12416 = vst [vmem:[#allocation55_spill] sm:$0xff] %v9531_v8  ;;  %v9538_v45 = vmul.f32 %v9531_v8, %v9289_v3  ;;  %v9540_v18 = vpop.f32.mrb[41].mxu1 }
 0x244   : > { %12417 = vst [vmem:[#allocation56_spill] sm:$0xff] %v9534_v46  ;;  %12419 = vst [vmem:[#allocation58_spill] sm:$0xff] %v9540_v18  ;;  %v9544_v32 = vmul.f32 %v9289_v3, %v9540_v18  ;;  %v7067_v16 = vpop.f32.mrb[30].mxu0  ;;  %7724 = vrot.lane.b32.xlu0 %v7723_v58, %s8322_s17  ;;  %v1174_v58 = vsub.f32 0.0, %v9267_v49  ;;  %v9710_v18 = vmul.f32 %v9351_v47, %v8851_v13 }
 0x245   : > { %12418 = vst [vmem:[#allocation57_spill] sm:$0xff] %v9538_v45  ;;  %v9548_v22 = vmul.f32 %v7067_v16, %v9351_v47  ;;  %v1806_v5 = vpop.f32.mrb[31].mxu0 }
 0x246   : > { %12420 = vst [vmem:[#allocation59_spill] sm:$0xff] %v9544_v32  ;;  %v7728_v15 = vpack.i.bf16 %v7067_v16, %v1806_v5  ;;  %v9551_v35 = vmul.f32 %v9351_v47, %v1806_v5  ;;  %v3963_v13 = vsel %vm735_vm0, %v9710_v18, 0.0 }
 0x247   : > { %12421 = vst [vmem:[#allocation60_spill] sm:$0xff] %v9548_v22 }
 0x248   : > { %12422 = vst [vmem:[#allocation61_spill] sm:$0xff] %v9551_v35  ;;  %v7070_v46 = vpop.f32.mrb[32].mxu0  ;;  %7729 = vrot.lane.b32.xlu1 %v7728_v15, %s8322_s17  ;;  %v1175_v35 = vmul.f32 1.442695, %v1174_v58 }
 0x249   : > { %v9555_v45 = vmul.f32 %v7070_v46, %v9351_v47  ;;  %v1816_v62 = vpop.f32.mrb[33].mxu0 }
 0x24a   : > { %v7733_v11 = vpack.i.bf16 %v7070_v46, %v1816_v62  ;;  %v9558_v32 = vmul.f32 %v9351_v47, %v1816_v62  ;;  %7763 = vpow2.f32 %v1175_v35  ;;  %v3087_v35 = vmul.f32 %v9289_v3, %v8841_v59 }
 0x24b   : > { %12423 = vst [vmem:[#allocation62_spill] sm:$0xff] %v9555_v45 }
 0x24c   : > { %12424 = vst [vmem:[#allocation63_spill] sm:$0xff] %v9558_v32  ;;  %v7073_v10 = vpop.f32.mrb[34].mxu0  ;;  %7734 = vrot.lane.b32.xlu0 %v7733_v11, %s8322_s17 }
 0x24d   : > { %v9563_v16 = vmul.f32 %v7073_v10, %v9351_v47  ;;  %v1826_v5 = vpop.f32.mrb[35].mxu0 }
 0x24e   : > { %v7738_v22 = vpack.i.bf16 %v7073_v10, %v1826_v5  ;;  %v9566_v15 = vmul.f32 %v9351_v47, %v1826_v5 }
 0x24f   : > { %12425 = vst [vmem:[#allocation64_spill] sm:$0xff] %v9563_v16 }
 0x250   : > { %12426 = vst [vmem:[#allocation65_spill] sm:$0xff] %v9566_v15  ;;  %v7076_v45 = vpop.f32.mrb[36].mxu0  ;;  %7739 = vrot.lane.b32.xlu1 %v7738_v22, %s8322_s17  ;;  %v9656_v15 = vld [vmem:[%s8563_s19 + $0x20] sm:$0xff] }
 0x251   : > { %v9570_v62 = vmul.f32 %v7076_v45, %v9351_v47  ;;  %v1836_v46 = vpop.f32.mrb[37].mxu0 }
 0x252   : > { %v7743_v49 = vpack.i.bf16 %v7076_v45, %v1836_v46  ;;  %v9573_v32 = vmul.f32 %v9351_v47, %v1836_v46 }
 0x253   : > { %12427 = vst [vmem:[#allocation66_spill] sm:$0xff] %v9570_v62 }
 0x254   : > { %12428 = vst [vmem:[#allocation67_spill] sm:$0xff] %v9573_v32  ;;  %7744 = vrot.lane.b32.xlu0 %v7743_v49, %s8322_s17  ;;  %v7079_v10 = vpop.f32.mrb[38].mxu0  ;;  %v7764_v45 = vpop.eup %7763  ;;  %v9636_v32 = vmul.f32 %v9351_v47, %v8816_v42 }
 0x255   : > { %v9577_v11 = vmul.f32 %v7079_v10, %v9351_v47  ;;  %v1846_v58 = vpop.f32.mrb[39].mxu0  ;;  %v1177_v62 = vadd.f32 1.0, %v7764_v45  ;;  %v9599_v45 = vld [vmem:[%s8563_s19 + $0x10] sm:$0xff] }
 0x256   : > { %v7748_v5 = vpack.i.bf16 %v7079_v10, %v1846_v58  ;;  %v9580_v22 = vmul.f32 %v9351_v47, %v1846_v58  ;;  %v3099_v10 = vsel %vm735_vm0, %v3087_v35, -inf  ;;  %v8279_v58 = vld [vmem:[%s8563_s19] sm:$0xff] }
 0x257   : > { %12429 = vst [vmem:[#allocation68_spill] sm:$0xff] %v9577_v11  ;;  %7765 = vrcp.f32 %v1177_v62  ;;  %v3091_v11 = vsel %vm735_vm0, %v3087_v35, 0.0  ;;  %v3086_v62 = vmul.f32 %v9289_v3, %v8818_v48 }
 0x258   : > { %12430 = vst [vmem:[#allocation69_spill] sm:$0xff] %v9580_v22  ;;  %7749 = vrot.lane.b32.xlu1 %v7748_v5, %s8322_s17 }
 0x259   : > { %v3096_v3 = vsel %vm735_vm0, %v3086_v62, -inf }
 0x261   : > { %v7766_v46 = vpop.eup %7765 }
 0x262   : > { %v9586_v49 = vrot.slane %v7766_v46, %v8806_v1  ;;  %v9609_v46 = vld [vmem:[%s8563_s19 + $0x18] sm:$0xff] }
 0x264   : > { %v9592_v5 = vmul.f32 %v8279_v58, %v9586_v49  ;;  %v9603_v1 = vmul.f32 %v9599_v45, %v9586_v49  ;;  %v9613_v48 = vmul.f32 %v9609_v46, %v9586_v49  ;;  %v9693_v2 = vmul.f32 %v9689_v29, %v9586_v49 }
 0x266   : > { %12431 = vst [vmem:[#allocation70_spill] sm:$0xff] %v9592_v5  ;;  %v4906_v59 = vsel %vm735_vm0, %v9592_v5, 0.0  ;;  %12432 = vst [vmem:[#allocation71_spill] sm:$0xff] %v9603_v1  ;;  %v4912_v35 = vsel %vm735_vm0, %v9603_v1, 0.0 }
 0x267   : > { %12433 = vst [vmem:[#allocation72_spill] sm:$0xff] %v9613_v48  ;;  %12437 = vst [vmem:[#allocation76_spill] sm:$0xff] %v9693_v2 }
 0x273   : > { %3092 = vadd.xlane.f32.xlu0 %v3091_v11  ;;  %v3088_v11 = vsel %vm735_vm0, %v3086_v62, 0.0  ;;  %v9630_v62 = vmul.f32 %v9351_v47, %v8814_v41  ;;  %v489_v41 = vld [vmem:[%s12302_s3 + $0x318] sm:$0xff] }
 0x277   : > { %3100 = vmax.xlane.f32.xlu0 %v3099_v10  ;;  %v8282_v10 = vld [vmem:[%s8563_s19 + $0x8] sm:$0xff] }
 0x278   : > { %v9618_v58 = vmul.f32 %v8282_v10, %v9586_v49 }
 0x27a   : > { %12434 = vst [vmem:[#allocation73_spill] sm:$0xff] %v9618_v58  ;;  %v4909_v22 = vsel %vm735_vm0, %v9618_v58, 0.0 }
 0x27b   : > { %4907 = vadd.xlane.f32.xlu0 %v4906_v59  ;;  %v486_v59 = vld [vmem:[%s12302_s3 + $0x300] sm:$0xff] }
 0x27c   : > { %3089 = vadd.xlane.f32.xlu1 %v3088_v11  ;;  %v487_v11 = vld [vmem:[%s12302_s3 + $0x308] sm:$0xff] }
 0x27d   : > { %v7436_v16 = vpack.c.bf16 %v487_v11, %v486_v59  ;;  %v3951_v11 = vsel %vm735_vm0, %v9630_v62, 0.0 }
 0x27f   : > { %4913 = vadd.xlane.f32.xlu0 %v4912_v35  ;;  %v4915_v35 = vsel %vm735_vm0, %v9613_v48, 0.0  ;;  %7437 = vmatprep.subr.bf16.mxu0 %v7436_v16 }
 0x280   : > { %3097 = vmax.xlane.f32.xlu1 %v3096_v3  ;;  %7439 = vmatpush3.bf16.msra.mxu0 %v7436_v16  ;;  %v488_v3 = vld [vmem:[%s12302_s3 + $0x310] sm:$0xff]  ;;  %v3948_v16 = vsel %vm735_vm0, %v9636_v32, 0.0 }
 0x281   : > { %v7440_v59 = vpack.c.bf16 %v489_v41, %v488_v3  ;;  %v490_v3 = vld [vmem:[%s12302_s3 + $0x320] sm:$0xff]  ;;  %v491_v41 = vld [vmem:[%s12302_s3 + $0x328] sm:$0xff] }
 0x283   : > { %4916 = vadd.xlane.f32.xlu0 %v4915_v35  ;;  %v9647_v35 = vld [vmem:[%s8563_s19 + $0x28] sm:$0xff]  ;;  %7441 = vmatprep.subr.bf16.mxu0 %v7440_v59 }
 0x284   : > { %4910 = vadd.xlane.f32.xlu1 %v4909_v22  ;;  %v9651_v42 = vmul.f32 %v9647_v35, %v9586_v49  ;;  %v9660_v22 = vmul.f32 %v9656_v15, %v9586_v49  ;;  %7443 = vmatpush3.bf16.msra.mxu0 %v7440_v59 }
 0x286   : > { %12435 = vst [vmem:[#allocation74_spill] sm:$0xff] %v9651_v42  ;;  %12436 = vst [vmem:[#allocation75_spill] sm:$0xff] %v9660_v22  ;;  %v4921_v34 = vsel %vm735_vm0, %v9651_v42, 0.0  ;;  %v4918_v59 = vsel %vm735_vm0, %v9660_v22, 0.0 }
 0x287   : > { %3952 = vadd.xlane.f32.xlu0 %v3951_v11  ;;  %v7444_v11 = vpack.c.bf16 %v491_v41, %v490_v3 }
 0x288   : > { %3949 = vadd.xlane.f32.xlu1 %v3948_v16  ;;  %v492_v16 = vld [vmem:[%s12302_s3 + $0x330] sm:$0xff] }
 0x289   : > { %7445 = vmatprep.subr.bf16.mxu0 %v7444_v11  ;;  %v7448_v3 = vpack.c.bf16 %v493_v28, %v492_v16  ;;  %v9702_v16 = vmul.f32 %v9698_v44, %v9586_v49 }
 0x28a   : > { %7447 = vmatpush3.bf16.msra.mxu0 %v7444_v11 }
 0x28b   : > { %4922 = vadd.xlane.f32.xlu0 %v4921_v34  ;;  %v3957_v34 = vsel %vm735_vm0, %v9672_v50, 0.0  ;;  %12438 = vst [vmem:[#allocation77_spill] sm:$0xff] %v9702_v16  ;;  %7449 = vmatprep.subr.bf16.mxu0 %v7448_v3 }
 0x28c   : > { %4919 = vadd.xlane.f32.xlu1 %v4918_v59  ;;  %v3954_v59 = vsel %vm735_vm0, %v9678_v26, 0.0 }
 0x28e   : > { %v7675_v41 = vpop.permute.xlu0 %7674  ;;  %7451 = vmatpush3.bf16.msra.mxu0 %v7448_v3 }
 0x28f   : > { %v7676_v11 = vunpack.i.l.bf16 %v7675_v41  ;;  %3958 = vadd.xlane.f32.xlu0 %v3957_v34  ;;  %v7677_v28 = vunpack.i.h.bf16 %v7675_v41  ;;  %v4927_v34 = vsel %vm735_vm0, %v9693_v2, 0.0  ;;  %v9724_v41 = vld [vmem:[%s8563_s19 + $0x48] sm:$0xff] }
 0x290   : > { %3955 = vadd.xlane.f32.xlu1 %v3954_v59  ;;  %v4924_v59 = vsel %vm735_vm0, %v9702_v16, 0.0 }
 0x291   : > { %v1983_v43 = vsel %vm735_vm0, %v9259_v38, %v7676_v11  ;;  %v9717_v38 = vmul.f32 %v9351_v47, %v8853_v56  ;;  %v9728_v11 = vmul.f32 %v9724_v41, %v9586_v49 }
 0x292   : > { %2180 = vmatmul.mubr.f32.vlgmr.msra.gmra.mrb[42].mxu1 %v1983_v43  ;;  %v7680_v8 = vpop.permute.xlu0 %7679  ;;  %v1984_v43 = vsel %vm735_vm0, %v9257_v12, %v7677_v28  ;;  %v9737_v28 = vld [vmem:[%s8563_s19 + $0x40] sm:$0xff] }
 0x293   : > { %4928 = vadd.xlane.f32.xlu0 %v4927_v34  ;;  %6412 = vmatprep.mubr.msk.f32.mxu1 %vm735_vm0, %v8282_v10  ;;  %v7681_v3 = vunpack.i.l.bf16 %v7680_v8  ;;  %12439 = vst [vmem:[#allocation78_spill] sm:$0xff] %v9728_v11  ;;  %v7682_v10 = vunpack.i.h.bf16 %v7680_v8  ;;  %v3960_v56 = vsel %vm735_vm0, %v9717_v38, 0.0  ;;  %v9741_v34 = vmul.f32 %v9737_v28, %v9586_v49 }
 0x294   : > { %4925 = vadd.xlane.f32.xlu1 %v4924_v59  ;;  %v4933_v8 = vsel %vm735_vm0, %v9728_v11, 0.0 }
 0x295   : > { %v1985_v12 = vsel %vm735_vm0, %v9271_v54, %v7681_v3  ;;  %12440 = vst [vmem:[#allocation79_spill] sm:$0xff] %v9741_v34  ;;  %v4930_v54 = vsel %vm735_vm0, %v9741_v34, 0.0 }
 0x296   : > { %2185 = vmatmul.mubr.f32.gmra.mrb[44].mxu1 %v1984_v43  ;;  %v7685_v59 = vpop.permute.xlu1 %7684  ;;  %v9747_v43 = vmul.f32 %v9351_v47, %v8863_v37 }
 0x297   : > { %3964 = vadd.xlane.f32.xlu0 %v3963_v13  ;;  %6413 = vmatprep.mubr.msk.f32.mxu1 %vm735_vm0, %v9599_v45  ;;  %v1986_v45 = vsel %vm735_vm0, %v9269_v7, %v7682_v10  ;;  %v7686_v3 = vunpack.i.l.bf16 %v7685_v59  ;;  %v9757_v13 = vmul.f32 %v9351_v47, %v8865_v4  ;;  %v8290_v47 = vld [vmem:[%s8563_s19 + $0x50] sm:$0xff] }
 0x298   : > { %3961 = vadd.xlane.f32.xlu1 %v3960_v56  ;;  %v3969_v37 = vsel %vm735_vm0, %v9747_v43, 0.0  ;;  %v9762_v56 = vld [vmem:[%s8563_s19 + $0x58] sm:$0xff]  ;;  %v9776_v10 = vmul.f32 %v8290_v47, %v9586_v49 }
 0x299   : > { %v3966_v7 = vsel %vm735_vm0, %v9757_v13, 0.0  ;;  %v1987_v4 = vsel %vm735_vm0, %v9282_v6, %v7686_v3  ;;  %v9789_v3 = vld [vmem:[%s8563_s19 + $0x68] sm:$0xff] }
 0x29a   : > { %2190 = vmatmul.mubr.f32.gmra.mrb[46].mxu1 %v1985_v12  ;;  %v9766_v12 = vmul.f32 %v9762_v56, %v9586_v49  ;;  %12442 = vst [vmem:[#allocation81_spill] sm:$0xff] %v9776_v10 }
 0x29b   : > { %4934 = vadd.xlane.f32.xlu0 %v4933_v8  ;;  %6414 = vmatprep.mubr.msk.f32.mxu1 %vm735_vm0, %v9609_v46  ;;  %v7687_v46 = vunpack.i.h.bf16 %v7685_v59  ;;  %v7690_v8 = vpop.permute.xlu1 %7689 }
 0x29c   : > { %4931 = vadd.xlane.f32.xlu1 %v4930_v54  ;;  %12441 = vst [vmem:[#allocation80_spill] sm:$0xff] %v9766_v12  ;;  %v4939_v59 = vsel %vm735_vm0, %v9766_v12, 0.0  ;;  %v4936_v54 = vsel %vm735_vm0, %v9776_v10, 0.0 }
 0x29d   : > { %v1988_v6 = vsel %vm735_vm0, %v9280_v33, %v7687_v46  ;;  %v8292_v46 = vld [vmem:[%s8563_s19 + $0x60] sm:$0xff] }
 0x29e   : > { %2195 = vmatmul.mubr.f32.gmra.mrb[48].mxu1 %v1986_v45  ;;  %v3983_v45 = vsel %vm735_vm0, %v9630_v62, -inf  ;;  %v9803_v62 = vmul.f32 %v8292_v46, %v9586_v49 }
 0x29f   : > { %3970 = vadd.xlane.f32.xlu0 %v3969_v37  ;;  %6415 = vmatprep.mubr.msk.f32.mxu1 %vm735_vm0, %v9656_v15  ;;  %v7691_v15 = vunpack.i.l.bf16 %v7690_v8  ;;  %v9793_v37 = vmul.f32 %v9789_v3, %v9586_v49 }
 0x2a0   : > { %3967 = vadd.xlane.f32.xlu1 %v3966_v7  ;;  %v7692_v7 = vunpack.i.h.bf16 %v7690_v8  ;;  %12444 = vst [vmem:[#allocation83_spill] sm:$0xff] %v9803_v62 }
 0x2a1   : > { %12443 = vst [vmem:[#allocation82_spill] sm:$0xff] %v9793_v37  ;;  %v1989_v33 = vsel %vm735_vm0, %v9286_v63, %v7691_v15  ;;  %v4945_v8 = vsel %vm735_vm0, %v9793_v37, 0.0 }
 0x2a2   : > { %2200 = vmatmul.mubr.f32.gmra.mrb[50].mxu1 %v1987_v4  ;;  %v7695_v4 = vpop.permute.xlu0 %7694 }
 0x2a3   : > { %4940 = vadd.xlane.f32.xlu0 %v4939_v59  ;;  %6416 = vmatprep.mubr.msk.f32.mxu1 %vm735_vm0, %v9647_v35  ;;  %v3980_v35 = vsel %vm735_vm0, %v9636_v32, -inf  ;;  %v4942_v32 = vsel %vm735_vm0, %v9803_v62, 0.0  ;;  %v7696_v63 = vunpack.i.l.bf16 %v7695_v4  ;;  %v3989_v59 = vsel %vm735_vm0, %v9672_v50, -inf }
 0x2a4   : > { %4937 = vadd.xlane.f32.xlu1 %v4936_v54  ;;  %v9816_v54 = vld [vmem:[%s8563_s19 + $0x78] sm:$0xff]  ;;  %v7697_v15 = vunpack.i.h.bf16 %v7695_v4  ;;  %v9846_v4 = vld [vmem:[%s8563_s19 + $0x88] sm:$0xff] }
 0x2a6   : > { %2205 = vmatmul.mubr.f32.gmra.mrb[52].mxu1 %v1988_v6  ;;  %v9820_v6 = vmul.f32 %v9816_v54, %v9586_v49 }
 0x2a7   : > { %3984 = vmax.xlane.f32.xlu0 %v3983_v45  ;;  %6417 = vmatprep.mubr.msk.f32.mxu1 %vm735_vm0, %v9698_v44  ;;  %v1990_v44 = vsel %vm735_vm0, %v9284_v61, %v7692_v7  ;;  %v1991_v61 = vsel %vm735_vm0, %v9309_v9, %v7696_v63  ;;  %v9829_v45 = vld [vmem:[%s8563_s19 + $0x70] sm:$0xff]  ;;  %v7700_v7 = vpop.permute.xlu1 %7699  ;;  %v1992_v9 = vsel %vm735_vm0, %v9291_v30, %v7697_v15  ;;  %v7705_v63 = vpop.permute.xlu0 %7704  ;;  %v4001_v15 = vsel %vm735_vm0, %v9747_v43, -inf }
 0x2a8   : > { %3981 = vmax.xlane.f32.xlu1 %v3980_v35  ;;  %12445 = vst [vmem:[#allocation84_spill] sm:$0xff] %v9820_v6  ;;  %v9833_v50 = vmul.f32 %v9829_v45, %v9586_v49  ;;  %v4951_v35 = vsel %vm735_vm0, %v9820_v6, 0.0 }
 0x2aa   : > { %2210 = vmatmul.mubr.f32.gmra.mrb[54].mxu1 %v1989_v33  ;;  %12446 = vst [vmem:[#allocation85_spill] sm:$0xff] %v9833_v50  ;;  %v3995_v33 = vsel %vm735_vm0, %v9710_v18, -inf }
 0x2ab   : > { %4946 = vadd.xlane.f32.xlu0 %v4945_v8  ;;  %6418 = vmatprep.mubr.msk.f32.mxu1 %vm735_vm0, %v9689_v29  ;;  %v3986_v29 = vsel %vm735_vm0, %v9678_v26, -inf  ;;  %v4948_v26 = vsel %vm735_vm0, %v9833_v50, 0.0  ;;  %v9850_v8 = vmul.f32 %v9846_v4, %v9586_v49 }
 0x2ac   : > { %4943 = vadd.xlane.f32.xlu1 %v4942_v32  ;;  %v7702_v32 = vunpack.i.h.bf16 %v7700_v7 }
 0x2ad   : > { %12447 = vst [vmem:[#allocation86_spill] sm:$0xff] %v9850_v8 }
 0x2ae   : > { %2215 = vmatmul.mubr.f32.gmra.mrb[56].mxu1 %v1990_v44  ;;  %v9858_v44 = vld [vmem:[%s8563_s19 + $0x80] sm:$0xff] }
 0x2af   : > { %3990 = vmax.xlane.f32.xlu0 %v3989_v59  ;;  %6419 = vmatprep.mubr.msk.f32.mxu1 %vm735_vm0, %v9737_v28  ;;  %v7701_v28 = vunpack.i.l.bf16 %v7700_v7  ;;  %v9862_v18 = vmul.f32 %v9858_v44, %v9586_v49  ;;  %v4957_v59 = vsel %vm735_vm0, %v9850_v8, 0.0  ;;  %v7707_v7 = vunpack.i.h.bf16 %v7705_v63 }
 0x2b0   : > { %3987 = vmax.xlane.f32.xlu1 %v3986_v29  ;;  %v9875_v29 = vld [vmem:[%s8563_s19 + $0x98] sm:$0xff] }
 0x2b1   : > { %v1993_v30 = vsel %vm735_vm0, %v9341_v24, %v7701_v28  ;;  %12448 = vst [vmem:[#allocation87_spill] sm:$0xff] %v9862_v18  ;;  %v1994_v24 = vsel %vm735_vm0, %v9335_v21, %v7702_v32  ;;  %v9896_v28 = vld [vmem:[%s8563_s19 + $0xa8] sm:$0xff]  ;;  %v9909_v32 = vld [vmem:[%s8563_s19 + $0xa0] sm:$0xff] }
 0x2b2   : > { %2220 = vmatmul.mubr.f32.gmra.mrb[58].mxu1 %v1991_v61  ;;  %v9879_v61 = vmul.f32 %v9875_v29, %v9586_v49 }
 0x2b3   : > { %4952 = vadd.xlane.f32.xlu0 %v4951_v35  ;;  %6420 = vmatprep.mubr.msk.f32.mxu1 %vm735_vm0, %v9724_v41  ;;  %v3992_v41 = vsel %vm735_vm0, %v9717_v38, -inf  ;;  %v4954_v38 = vsel %vm735_vm0, %v9862_v18, 0.0  ;;  %v9887_v35 = vld [vmem:[%s8563_s19 + $0x90] sm:$0xff] }
 0x2b4   : > { %4949 = vadd.xlane.f32.xlu1 %v4948_v26  ;;  %12449 = vst [vmem:[#allocation88_spill] sm:$0xff] %v9879_v61  ;;  %v9891_v43 = vmul.f32 %v9887_v35, %v9586_v49  ;;  %v7710_v26 = vpop.permute.xlu1 %7709 }
 0x2b6   : > { %2225 = vmatmul.mubr.f32.gmra.mrb[60].mxu1 %v1992_v9  ;;  %12450 = vst [vmem:[#allocation89_spill] sm:$0xff] %v9891_v43  ;;  %v4963_v9 = vsel %vm735_vm0, %v9879_v61, 0.0 }
 0x2b7   : > { %3996 = vmax.xlane.f32.xlu0 %v3995_v33  ;;  %6421 = vmatprep.mubr.msk.f32.mxu1 %vm735_vm0, %v8290_v47  ;;  %v7706_v47 = vunpack.i.l.bf16 %v7705_v63  ;;  %v7711_v33 = vunpack.i.l.bf16 %v7710_v26  ;;  %v7712_v63 = vunpack.i.h.bf16 %v7710_v26 }
 0x2b8   : > { %3993 = vmax.xlane.f32.xlu1 %v3992_v41  ;;  %v9913_v41 = vmul.f32 %v9909_v32, %v9586_v49 }
 0x2b9   : > { %v1995_v21 = vsel %vm735_vm0, %v9357_v53, %v7706_v47  ;;  %v4960_v53 = vsel %vm735_vm0, %v9891_v43, 0.0 }
 0x2ba   : > { %2230 = vmatmul.mubr.f32.gmra.mrb[62].mxu1 %v1993_v30  ;;  %12452 = vst [vmem:[#allocation91_spill] sm:$0xff] %v9913_v41 }
 0x2bb   : > { %4958 = vadd.xlane.f32.xlu0 %v4957_v59  ;;  %6422 = vmatprep.mubr.msk.f32.mxu1 %vm735_vm0, %v9762_v56  ;;  %v3998_v56 = vsel %vm735_vm0, %v9757_v13, -inf  ;;  %v9900_v13 = vmul.f32 %v9896_v28, %v9586_v49  ;;  %v7715_v59 = vpop.permute.xlu0 %7714 }
 0x2bc   : > { %4955 = vadd.xlane.f32.xlu1 %v4954_v38  ;;  %v5037_v38 = vsel %vm735_vm0, %v9618_v58, -inf  ;;  %v7717_v26 = vunpack.i.h.bf16 %v7715_v59 }
 0x2bd   : > { %12451 = vst [vmem:[#allocation90_spill] sm:$0xff] %v9900_v13  ;;  %v4969_v30 = vsel %vm735_vm0, %v9900_v13, 0.0 }
 0x2be   : > { %2235 = vmatmul.mubr.f32.gmra.mrb[64].mxu1 %v1994_v24  ;;  %v9926_v24 = vld [vmem:[%s8563_s19 + $0xb8] sm:$0xff] }
 0x2bf   : > { %4002 = vmax.xlane.f32.xlu0 %v4001_v15  ;;  %6423 = vmatprep.mubr.msk.f32.mxu1 %vm735_vm0, %v8292_v46  ;;  %v1996_v46 = vsel %vm735_vm0, %v9348_v40, %v7707_v7  ;;  %v1997_v40 = vsel %vm735_vm0, %v9388_v0, %v7711_v33  ;;  %v9930_v47 = vmul.f32 %v9926_v24, %v9586_v49  ;;  %v5034_v15 = vsel %vm735_vm0, %v9592_v5, -inf  ;;  %v9939_v7 = vld [vmem:[%s8563_s19 + $0xb0] sm:$0xff] }
 0x2c0   : > { %3999 = vmax.xlane.f32.xlu1 %v3998_v56  ;;  %v1998_v0 = vsel %vm735_vm0, %v9376_v17, %v7712_v63  ;;  %v9943_v56 = vmul.f32 %v9939_v7, %v9586_v49  ;;  %v9969_v63 = vld [vmem:[%s8563_s19 + $0xc0] sm:$0xff] }
 0x2c1   : > { %12453 = vst [vmem:[#allocation92_spill] sm:$0xff] %v9930_v47 }
 0x2c2   : > { %2240 = vmatmul.mubr.f32.gmra.mrb[66].mxu1 %v1995_v21  ;;  %12454 = vst [vmem:[#allocation93_spill] sm:$0xff] %v9943_v56  ;;  %v4975_v21 = vsel %vm735_vm0, %v9930_v47, 0.0 }
 0x2c3   : > { %4964 = vadd.xlane.f32.xlu0 %v4963_v9  ;;  %6424 = vmatprep.mubr.msk.f32.mxu1 %vm735_vm0, %v9789_v3  ;;  %v4966_v3 = vsel %vm735_vm0, %v9913_v41, 0.0  ;;  %v7720_v9 = vpop.permute.xlu1 %7719 }
 0x2c4   : > { %4961 = vadd.xlane.f32.xlu1 %v4960_v53  ;;  %v5043_v53 = vsel %vm735_vm0, %v9613_v48, -inf }
 0x2c6   : > { %2245 = vmatmul.mubr.f32.gmra.mrb[68].mxu1 %v1996_v46  ;;  %v9956_v46 = vld [vmem:[%s8563_s19 + $0xc8] sm:$0xff] }
 0x2c7   : > { %4970 = vadd.xlane.f32.xlu0 %v4969_v30  ;;  %6425 = vmatprep.mubr.msk.f32.mxu1 %vm735_vm0, %v9829_v45  ;;  %v7716_v45 = vunpack.i.l.bf16 %v7715_v59  ;;  %v9960_v33 = vmul.f32 %v9956_v46, %v9586_v49  ;;  %v5040_v30 = vsel %vm735_vm0, %v9603_v1, -inf  ;;  %v7722_v59 = vunpack.i.h.bf16 %v7720_v9 }
 0x2c8   : > { %4967 = vadd.xlane.f32.xlu1 %v4966_v3  ;;  %v9973_v3 = vmul.f32 %v9969_v63, %v9586_v49 }
 0x2c9   : > { %v1999_v17 = vsel %vm735_vm0, %v9407_v52, %v7716_v45  ;;  %12455 = vst [vmem:[#allocation94_spill] sm:$0xff] %v9960_v33  ;;  %v2000_v52 = vsel %vm735_vm0, %v9398_v31, %v7717_v26  ;;  %v9999_v26 = vld [vmem:[%s8563_s19 + $0xd0] sm:$0xff] }
 0x2ca   : > { %2250 = vmatmul.mubr.f32.gmra.mrb[70].mxu1 %v1997_v40  ;;  %12456 = vst [vmem:[#allocation95_spill] sm:$0xff] %v9973_v3  ;;  %v4981_v40 = vsel %vm735_vm0, %v9960_v33, 0.0 }
 0x2cb   : > { %5038 = vmax.xlane.f32.xlu0 %v5037_v38  ;;  %6426 = vmatprep.mubr.msk.f32.mxu1 %vm735_vm0, %v9816_v54  ;;  %v4972_v54 = vsel %vm735_vm0, %v9943_v56, 0.0  ;;  %v7725_v38 = vpop.permute.xlu0 %7724 }
 0x2cc   : > { %5035 = vmax.xlane.f32.xlu1 %v5034_v15  ;;  %v5049_v15 = vsel %vm735_vm0, %v9651_v42, -inf }
 0x2ce   : > { %2255 = vmatmul.mubr.f32.gmra.mrb[72].mxu1 %v1998_v0  ;;  %v9986_v0 = vld [vmem:[%s8563_s19 + $0xd8] sm:$0xff] }
 0x2cf   : > { %4976 = vadd.xlane.f32.xlu0 %v4975_v21  ;;  %6427 = vmatprep.mubr.msk.f32.mxu1 %vm735_vm0, %v9858_v44  ;;  %v7721_v44 = vunpack.i.l.bf16 %v7720_v9  ;;  %v9990_v45 = vmul.f32 %v9986_v0, %v9586_v49  ;;  %v5046_v21 = vsel %vm735_vm0, %v9660_v22, -inf  ;;  %v7727_v9 = vunpack.i.h.bf16 %v7725_v38 }
 0x2d0   : > { %4973 = vadd.xlane.f32.xlu1 %v4972_v54  ;;  %v10003_v54 = vmul.f32 %v9999_v26, %v9586_v49 }
 0x2d1   : > { %v2001_v31 = vsel %vm735_vm0, %v9426_v36, %v7721_v44  ;;  %12457 = vst [vmem:[#allocation96_spill] sm:$0xff] %v9990_v45  ;;  %v2002_v36 = vsel %vm735_vm0, %v9417_v20, %v7722_v59  ;;  %v10029_v59 = vld [vmem:[%s8563_s19 + $0xe0] sm:$0xff] }
 0x2d2   : > { %2260 = vmatmul.mubr.f32.gmra.mrb[74].mxu1 %v1999_v17  ;;  %12458 = vst [vmem:[#allocation97_spill] sm:$0xff] %v10003_v54  ;;  %v4987_v17 = vsel %vm735_vm0, %v9990_v45, 0.0 }
 0x2d3   : > { %5044 = vmax.xlane.f32.xlu0 %v5043_v53  ;;  %6428 = vmatprep.mubr.msk.f32.mxu1 %vm735_vm0, %v9846_v4  ;;  %v4978_v4 = vsel %vm735_vm0, %v9973_v3, 0.0  ;;  %v7730_v53 = vpop.permute.xlu1 %7729 }
 0x2d4   : > { %5041 = vmax.xlane.f32.xlu1 %v5040_v30  ;;  %v5055_v30 = vsel %vm735_vm0, %v9693_v2, -inf }
 0x2d6   : > { %2265 = vmatmul.mubr.f32.gmra.mrb[76].mxu1 %v2000_v52  ;;  %v10016_v52 = vld [vmem:[%s8563_s19 + $0xe8] sm:$0xff] }
 0x2d7   : > { %4982 = vadd.xlane.f32.xlu0 %v4981_v40  ;;  %6429 = vmatprep.mubr.msk.f32.mxu1 %vm735_vm0, %v9887_v35  ;;  %v7726_v35 = vunpack.i.l.bf16 %v7725_v38  ;;  %v10020_v44 = vmul.f32 %v10016_v52, %v9586_v49  ;;  %v5052_v40 = vsel %vm735_vm0, %v9702_v16, -inf  ;;  %v7732_v38 = vunpack.i.h.bf16 %v7730_v53 }
 0x2d8   : > { %4979 = vadd.xlane.f32.xlu1 %v4978_v4  ;;  %v10033_v4 = vmul.f32 %v10029_v59, %v9586_v49 }
 0x2d9   : > { %v2003_v20 = vsel %vm735_vm0, %v9445_v39, %v7726_v35  ;;  %12459 = vst [vmem:[#allocation98_spill] sm:$0xff] %v10020_v44  ;;  %v2004_v39 = vsel %vm735_vm0, %v9436_v23, %v7727_v9  ;;  %v8310_v9 = vld [vmem:[%s8563_s19 + $0xf0] sm:$0xff] }
 0x2da   : > { %2270 = vmatmul.mubr.f32.gmra.mrb[78].mxu1 %v2001_v31  ;;  %12460 = vst [vmem:[#allocation99_spill] sm:$0xff] %v10033_v4  ;;  %v4993_v31 = vsel %vm735_vm0, %v10020_v44, 0.0 }
 0x2db   : > { %5050 = vmax.xlane.f32.xlu0 %v5049_v15  ;;  %6430 = vmatprep.mubr.msk.f32.mxu1 %vm735_vm0, %v9875_v29  ;;  %v4984_v29 = vsel %vm735_vm0, %v10003_v54, 0.0  ;;  %v7735_v15 = vpop.permute.xlu0 %7734 }
 0x2dc   : > { %5047 = vmax.xlane.f32.xlu1 %v5046_v21  ;;  %v5061_v21 = vsel %vm735_vm0, %v9728_v11, -inf }
 0x2de   : > { %2275 = vmatmul.mubr.f32.gmra.mrb[80].mxu1 %v2002_v36  ;;  %v10046_v36 = vld [vmem:[%s8563_s19 + $0xf8] sm:$0xff] }
 0x2df   : > { %4988 = vadd.xlane.f32.xlu0 %v4987_v17  ;;  %6431 = vmatprep.mubr.msk.f32.mxu1 %vm735_vm0, %v9909_v32  ;;  %v7731_v32 = vunpack.i.l.bf16 %v7730_v53  ;;  %v10050_v35 = vmul.f32 %v10046_v36, %v9586_v49  ;;  %v5058_v17 = vsel %vm735_vm0, %v9741_v34, -inf  ;;  %v7737_v53 = vunpack.i.h.bf16 %v7735_v15 }
 0x2e0   : > { %4985 = vadd.xlane.f32.xlu1 %v4984_v29  ;;  %v10060_v29 = vmul.f32 %v8310_v9, %v9586_v49  ;;  %v5067_v49 = vsel %vm735_vm0, %v9766_v12, -inf }
 0x2e1   : > { %v2005_v23 = vsel %vm735_vm0, %v9464_v14, %v7731_v32  ;;  %12461 = vst [vmem:[#allocation100_spill] sm:$0xff] %v10050_v35  ;;  %v2006_v14 = vsel %vm735_vm0, %v9455_v60, %v7732_v38  ;;  %v7745_v38 = vpop.permute.xlu0 %7744 }
 0x2e2   : > { %2280 = vmatmul.mubr.f32.gmra.mrb[82].mxu1 %v2003_v20  ;;  %12462 = vst [vmem:[#allocation101_spill] sm:$0xff] %v10060_v29  ;;  %v4999_v20 = vsel %vm735_vm0, %v10050_v35, 0.0 }
 0x2e3   : > { %5056 = vmax.xlane.f32.xlu0 %v5055_v30  ;;  %6432 = vmatprep.mubr.msk.f32.mxu1 %vm735_vm0, %v9896_v28  ;;  %v4990_v28 = vsel %vm735_vm0, %v10033_v4, 0.0  ;;  %v4996_v30 = vsel %vm735_vm0, %v10060_v29, 0.0 }
 0x2e4   : > { %5053 = vmax.xlane.f32.xlu1 %v5052_v40  ;;  %v5064_v40 = vsel %vm735_vm0, %v9776_v10, -inf }
 0x2e6   : > { %2285 = vmatmul.mubr.f32.gmra.mrb[84].mxu1 %v2004_v39  ;;  %v2008_v39 = vsel %vm735_vm0, %v9474_v57, %v7737_v53  ;;  %v5079_v57 = vsel %vm735_vm0, %v9820_v6, -inf }
 0x2e7   : > { %4994 = vadd.xlane.f32.xlu0 %v4993_v31  ;;  %6433 = vmatprep.mubr.msk.f32.mxu1 %vm735_vm0, %v9939_v7  ;;  %v7736_v7 = vunpack.i.l.bf16 %v7735_v15  ;;  %v5070_v31 = vsel %vm735_vm0, %v9803_v62, -inf  ;;  %v7747_v15 = vunpack.i.h.bf16 %v7745_v38 }
 0x2e8   : > { %4991 = vadd.xlane.f32.xlu1 %v4990_v28  ;;  %v7746_v28 = vunpack.i.l.bf16 %v7745_v38 }
 0x2e9   : > { %v2007_v60 = vsel %vm735_vm0, %v9483_v27, %v7736_v7  ;;  %v5073_v27 = vsel %vm735_vm0, %v9793_v37, -inf  ;;  %v5088_v7 = vsel %vm735_vm0, %v9891_v43, -inf }
 0x2ea   : > { %2290 = vmatmul.mubr.f32.gmra.mrb[86].mxu1 %v2005_v23  ;;  %v5076_v23 = vsel %vm735_vm0, %v9833_v50, -inf }
 0x2eb   : > { %5062 = vmax.xlane.f32.xlu0 %v5061_v21  ;;  %6434 = vmatprep.mubr.msk.f32.mxu1 %vm735_vm0, %v9926_v24  ;;  %v7740_v24 = vpop.permute.xlu1 %7739  ;;  %v5082_v21 = vsel %vm735_vm0, %v9862_v18, -inf }
 0x2ec   : > { %5059 = vmax.xlane.f32.xlu1 %v5058_v17  ;;  %v7742_v32 = vunpack.i.h.bf16 %v7740_v24  ;;  %v2011_v17 = vsel %vm735_vm0, %v9521_v55, %v7746_v28  ;;  %v5097_v55 = vsel %vm735_vm0, %v9900_v13, -inf  ;;  %v5106_v28 = vsel %vm735_vm0, %v9973_v3, -inf }
 0x2ee   : > { %2295 = vmatmul.mubr.f32.gmra.mrb[88].mxu1 %v2006_v14 }
 0x2ef   : > { %5000 = vadd.xlane.f32.xlu0 %v4999_v20  ;;  %6435 = vmatprep.mubr.msk.f32.mxu1 %vm735_vm0, %v9969_v63  ;;  %v7741_v63 = vunpack.i.l.bf16 %v7740_v24  ;;  %v7750_v14 = vpop.permute.xlu1 %7749  ;;  %v12463_v24 = vld [vmem:[#allocation58_spill] sm:$0xff] }
 0x2f0   : > { %4997 = vadd.xlane.f32.xlu1 %v4996_v30  ;;  %v7751_v20 = vunpack.i.l.bf16 %v7750_v14  ;;  %v7752_v30 = vunpack.i.h.bf16 %v7750_v14 }
 0x2f2   : > { %2300 = vmatmul.mubr.f32.gmra.mrb[90].mxu1 %v2007_v60  ;;  %v5094_v60 = vsel %vm735_vm0, %v9913_v41, -inf }
 0x2f3   : > { %5068 = vmax.xlane.f32.xlu0 %v5067_v49  ;;  %6436 = vmatprep.mubr.msk.f32.mxu1 %vm735_vm0, %v9956_v46  ;;  %v2009_v46 = vsel %vm735_vm0, %v9502_v19, %v7741_v63  ;;  %v5085_v19 = vsel %vm735_vm0, %v9850_v8, -inf  ;;  %v5103_v63 = vsel %vm735_vm0, %v9930_v47, -inf }
 0x2f4   : > { %5065 = vmax.xlane.f32.xlu1 %v5064_v40 }
 0x2f6   : > { %2305 = vmatmul.mubr.f32.gmra.mrb[92].mxu1 %v2008_v39 }
 0x2f7   : > { %5074 = vmax.xlane.f32.xlu0 %v5073_v27  ;;  %6437 = vmatprep.mubr.msk.f32.mxu1 %vm735_vm0, %v9999_v26  ;;  %v2010_v26 = vsel %vm735_vm0, %v9493_v25, %v7742_v32  ;;  %v5091_v25 = vsel %vm735_vm0, %v9879_v61, -inf  ;;  %v5100_v27 = vsel %vm735_vm0, %v9943_v56, -inf }
 0x2f8   : > { %5071 = vmax.xlane.f32.xlu1 %v5070_v31 }
 0x2fa   : > { %2310 = vmatmul.mubr.f32.gmra.mrb[94].mxu1 %v2009_v46 }
 0x2fb   : > { %5080 = vmax.xlane.f32.xlu0 %v5079_v57  ;;  %6438 = vmatprep.mubr.msk.f32.mxu1 %vm735_vm0, %v9986_v0  ;;  %v4004_v57 = vld [vmem:[%s12305_s6] sm:$0xff] }
 0x2fc   : > { %5077 = vmax.xlane.f32.xlu1 %v5076_v23 }
 0x2fe   : > { %2315 = vmatmul.mubr.f32.gmra.mrb[96].mxu1 %v2010_v26 }
 0x2ff   : > { %5086 = vmax.xlane.f32.xlu0 %v5085_v19  ;;  %6439 = vmatprep.mubr.msk.f32.mxu1 %vm735_vm0, %v10029_v59  ;;  %v2012_v59 = vsel %vm735_vm0, %v9512_v51, %v7747_v15  ;;  %v5115_v19 = vsel %vm735_vm0, %v9990_v45, -inf  ;;  %v5112_v15 = vsel %vm735_vm0, %v10003_v54, -inf }
 0x300   : > { %v3093_v0 = vpop.xlane.xlu0 %3092  ;;  %5083 = vmax.xlane.f32.xlu1 %v5082_v21 }
 0x301   : > { %v3095_v40 = vmul.f32 0.015625, %v3093_v0 }
 0x302   : > { %2320 = vmatmul.mubr.f32.gmra.mrb[98].mxu1 %v2011_v17 }
 0x303   : > { %5092 = vmax.xlane.f32.xlu0 %v5091_v25  ;;  %6440 = vmatprep.mubr.msk.f32.mxu1 %vm735_vm0, %v10016_v52  ;;  %v2013_v52 = vsel %vm735_vm0, %v12463_v24, %v7751_v20  ;;  %v5121_v25 = vsel %vm735_vm0, %v10020_v44, -inf }
 0x304   : > { %v10110_v53 = vpop.xlane.xlu0 %3100  ;;  %5089 = vmax.xlane.f32.xlu1 %v5088_v7  ;;  %v5118_v7 = vsel %vm735_vm0, %v10033_v4, -inf }
 0x306   : > { %2325 = vmatmul.mubr.f32.gmra.mrb[100].mxu1 %v2012_v59 }
 0x307   : > { %5098 = vmax.xlane.f32.xlu0 %v5097_v55  ;;  %6441 = vmatprep.mubr.msk.f32.mxu1 %vm735_vm0, %v8310_v9  ;;  %v12464_v9 = vld [vmem:[#allocation55_spill] sm:$0xff] }
 0x308   : > { %v10119_v49 = vpop.xlane.xlu0 %4907  ;;  %5095 = vmax.xlane.f32.xlu1 %v5094_v60  ;;  %v2014_v32 = vsel %vm735_vm0, %v12464_v9, %v7752_v30  ;;  %v5127_v30 = vsel %vm735_vm0, %v10050_v35, -inf  ;;  %v5124_v60 = vsel %vm735_vm0, %v10060_v29, -inf }
 0x309   : > { %v3090_v51 = vpop.xlane.xlu1 %3089 }
 0x30a   : > { %v3094_v39 = vmul.f32 0.015625, %v3090_v51  ;;  %2330 = vmatmul.mubr.f32.gmra.mrb[102].mxu1 %v2013_v52 }
 0x30b   : > { %5104 = vmax.xlane.f32.xlu0 %v5103_v63  ;;  %6442 = vmatprep.mubr.msk.f32.mxu1 %vm735_vm0, %v10046_v36  ;;  %v5109_v36 = vsel %vm735_vm0, %v9960_v33, -inf }
 0x30c   : > { %v10129_v31 = vpack.c.bf16 %v3095_v40, %v3094_v39  ;;  %v10131_v46 = vpop.xlane.xlu0 %4913  ;;  %5101 = vmax.xlane.f32.xlu1 %v5100_v27 }
 0x30d   : > { %v10136_v38 = vpop.xlane.xlu1 %3097 }
 0x30e   : > { %2335 = vmatmul.mubr.f32.gmra.mrb[104].mxu1 %v2014_v32  ;;  %7453 = vmatprep.subr.bf16.mxu0 %v10129_v31 }
 0x30f   : > { %5110 = vmax.xlane.f32.xlu0 %v5109_v36  ;;  %7232 = vmatprep.mubr.f32.mxu1 %v4004_v57 }
 0x310   : > { %v10143_v23 = vpop.xlane.xlu0 %4916  ;;  %5107 = vmax.xlane.f32.xlu1 %v5106_v28 }
 0x311   : > { %v10145_v26 = vpop.xlane.xlu1 %4910 }
 0x313   : > { %5116 = vmax.xlane.f32.xlu0 %v5115_v19 }
 0x314   : > { %v3953_v21 = vpop.xlane.xlu0 %3952  ;;  %5113 = vmax.xlane.f32.xlu1 %v5112_v15 }
 0x315   : > { %v3973_v17 = vmul.f32 0.015625, %v3953_v21  ;;  %v3950_v0 = vpop.xlane.xlu1 %3949 }
 0x316   : > { %v3972_v14 = vmul.f32 0.015625, %v3950_v0 }
 0x317   : > { %5122 = vmax.xlane.f32.xlu0 %v5121_v25 }
 0x318   : > { %v7460_v20 = vpack.c.bf16 %v3973_v17, %v3972_v14  ;;  %v10155_v59 = vpop.xlane.xlu0 %4922  ;;  %5119 = vmax.xlane.f32.xlu1 %v5118_v7 }
 0x319   : > { %v10157_v55 = vpop.xlane.xlu1 %4919 }
 0x31a   : > { %7461 = vmatprep.subr.bf16.mxu1 %v7460_v20 }
 0x31b   : > { %5128 = vmax.xlane.f32.xlu0 %v5127_v30  ;;  %7463 = vmatpush3.bf16.msra.mxu1 %v7460_v20 }
 0x31c   : > { %v3959_v24 = vpop.xlane.xlu0 %3958  ;;  %5125 = vmax.xlane.f32.xlu1 %v5124_v60 }
 0x31d   : > { %v3975_v52 = vmul.f32 0.015625, %v3959_v24  ;;  %v3956_v51 = vpop.xlane.xlu1 %3955 }
 0x31e   : > { %v3974_v40 = vmul.f32 0.015625, %v3956_v51 }
 0x320   : > { %v7464_v39 = vpack.c.bf16 %v3975_v52, %v3974_v40  ;;  %v10163_v63 = vpop.xlane.xlu0 %4928 }
 0x321   : > { %v10165_v27 = vpop.xlane.xlu1 %4925 }
 0x322   : > { %7465 = vmatprep.subr.bf16.mxu1 %v7464_v39 }
 0x323   : > { %7467 = vmatpush3.bf16.msra.mxu1 %v7464_v39 }
 0x324   : > { %v3965_v9 = vpop.xlane.xlu0 %3964 }
 0x325   : > { %v3977_v32 = vmul.f32 0.015625, %v3965_v9  ;;  %v3962_v57 = vpop.xlane.xlu1 %3961 }
 0x326   : > { %v3976_v36 = vmul.f32 0.015625, %v3962_v57 }
 0x328   : > { %v7468_v28 = vpack.c.bf16 %v3977_v32, %v3976_v36  ;;  %v10167_v19 = vpop.xlane.xlu0 %4934 }
 0x329   : > { %v10169_v15 = vpop.xlane.xlu1 %4931 }
 0x32a   : > { %7469 = vmatprep.subr.bf16.mxu1 %v7468_v28 }
 0x32b   : > { %7471 = vmatpush3.bf16.msra.mxu1 %v7468_v28 }
 0x32c   : > { %v3971_v21 = vpop.xlane.xlu0 %3970 }
 0x32d   : > { %v3979_v17 = vmul.f32 0.015625, %v3971_v21  ;;  %v3968_v0 = vpop.xlane.xlu1 %3967 }
 0x32e   : > { %v3978_v14 = vmul.f32 0.015625, %v3968_v0 }
 0x330   : > { %v7472_v25 = vpack.c.bf16 %v3979_v17, %v3978_v14  ;;  %v10171_v7 = vpop.xlane.xlu0 %4940 }
 0x331   : > { %v10173_v20 = vpop.xlane.xlu1 %4937 }
 0x332   : > { %7473 = vmatprep.subr.bf16.mxu1 %v7472_v25 }
 0x333   : > { %7475 = vmatpush3.bf16.msra.mxu1 %v7472_v25 }
 0x334   : > { %v3985_v30 = vpop.xlane.xlu0 %3984 }
 0x335   : > { %v3982_v60 = vpop.xlane.xlu1 %3981 }
 0x336   : > { %v7476_v24 = vpack.c.bf16 %v3985_v30, %v3982_v60 }
 0x338   : > { %v10175_v52 = vpop.xlane.xlu0 %4946  ;;  %7477 = vmatprep.subr.bf16.mxu1 %v7476_v24 }
 0x339   : > { %7479 = vmatpush3.bf16.msra.mxu1 %v7476_v24  ;;  %v10177_v51 = vpop.xlane.xlu1 %4943 }
 0x33c   : > { %v3991_v40 = vpop.xlane.xlu0 %3990 }
 0x33d   : > { %v3988_v39 = vpop.xlane.xlu1 %3987 }
 0x33e   : > { %v7480_v9 = vpack.c.bf16 %v3991_v40, %v3988_v39  ;;  %v4005_v40 = vld [vmem:[%s12305_s6 + $0x8] sm:$0xff]  ;;  %v12465_v39 = vmov 0.0|0.0  }
 0x340   : > { %v10179_v32 = vpop.xlane.xlu0 %4952  ;;  %7481 = vmatprep.subr.bf16.mxu1 %v7480_v9 }
 0x341   : > { %7483 = vmatpush3.bf16.msra.mxu1 %v7480_v9  ;;  %v10181_v57 = vpop.xlane.xlu1 %4949 }
 0x344   : > { %v3997_v36 = vpop.xlane.xlu0 %3996 }
 0x345   : > { %v3994_v28 = vpop.xlane.xlu1 %3993 }
 0x346   : > { %v7484_v21 = vpack.c.bf16 %v3997_v36, %v3994_v28 }
 0x348   : > { %v10183_v17 = vpop.xlane.xlu0 %4958  ;;  %7485 = vmatprep.subr.bf16.mxu1 %v7484_v21 }
 0x349   : > { %7487 = vmatpush3.bf16.msra.mxu1 %v7484_v21  ;;  %v10185_v0 = vpop.xlane.xlu1 %4955 }
 0x34c   : > { %v4003_v14 = vpop.xlane.xlu0 %4002 }
 0x34d   : > { %v4000_v25 = vpop.xlane.xlu1 %3999 }
 0x34e   : > { %v7488_v30 = vpack.c.bf16 %v4003_v14, %v4000_v25 }
 0x350   : > { %v10187_v60 = vpop.xlane.xlu0 %4964  ;;  %7489 = vmatprep.subr.bf16.mxu1 %v7488_v30 }
 0x351   : > { %7491 = vmatpush3.bf16.msra.mxu1 %v7488_v30  ;;  %v10189_v24 = vpop.xlane.xlu1 %4961 }
 0x352   : > { %7588 = vmatprep.subr.bf16.mxu1 %v12465_v39 }
 0x354   : > { %v10195_v9 = vpop.xlane.xlu0 %4970  ;;  %7233 = vmatmul.mubr.f32.vlgmr.msra.gmra.mrb[106].mxu1 %v4005_v40 }
 0x355   : > { %v10197_v36 = vpop.xlane.xlu1 %4967 }
 0x358   : > { %v5039_v28 = vpop.xlane.xlu0 %5038 }
 0x359   : > { %v5036_v21 = vpop.xlane.xlu1 %5035 }
 0x35a   : > { %v10199_v14 = vpack.c.bf16 %v5039_v28, %v5036_v21  ;;  %v12466_v28 = vld [vmem:[#allocation2_spill] sm:$0xff] }
 0x35c   : > { %v10201_v25 = vpop.xlane.xlu0 %4976  ;;  %7604 = vmatpush1.bf16.msra.mxu1 %v10199_v14 }
 0x35d   : > { %v10204_v30 = vpop.xlane.xlu1 %4973  ;;  %7589 = vmatprep.subr.bf16.mxu1 %v12465_v39 }
 0x360   : > { %v5045_v35 = vpop.xlane.xlu0 %5044 }
 0x361   : > { %v5042_v44 = vpop.xlane.xlu1 %5041 }
 0x362   : > { %v10207_v45 = vpack.c.bf16 %v5045_v35, %v5042_v44 }
 0x364   : > { %v10209_v33 = vpop.xlane.xlu0 %4982  ;;  %7605 = vmatpush1.bf16.msra.mxu1 %v10207_v45 }
 0x365   : > { %v2181_v40 = vpop.f32.mrb[42].mxu1  ;;  %v10212_v47 = vpop.xlane.xlu1 %4979  ;;  %7590 = vmatprep.subr.bf16.mxu1 %v12465_v39 }
 0x366   : > { %v2182_v21 = vadd.f32 %v2181_v40, %v12466_v28  ;;  %v2183_v29 = vpop.f32.mrb[43].mxu1 }
 0x368   : > { %v2340_v13 = vmax.f32 %v2182_v21, 0.0  ;;  %v5051_v4 = vpop.xlane.xlu0 %5050 }
 0x369   : > { %v2186_v61 = vpop.f32.mrb[44].mxu1  ;;  %v5048_v54 = vpop.xlane.xlu1 %5047 }
 0x36a   : > { %v2372_v8 = vmin.f32 %v2340_v13, 6.0  ;;  %v2187_v44 = vadd.f32 %v2186_v61, %v12466_v28  ;;  %v10217_v35 = vpack.c.bf16 %v5051_v4, %v5048_v54  ;;  %v2188_v3 = vpop.f32.mrb[45].mxu1  ;;  %v7456_v61 = vpack.c.bf16 %v10110_v53, %v10136_v38 }
 0x36c   : > { %v2341_v6 = vmax.f32 %v2187_v44, 0.0  ;;  %7096 = vmatprep.mubr.msk.f32.mxu0 %vm735_vm0, %v2372_v8  ;;  %v10220_v56 = vpop.xlane.xlu0 %4988  ;;  %7606 = vmatpush1.bf16.msra.mxu1 %v10217_v35 }
 0x36d   : > { %v10223_v37 = vpop.xlane.xlu1 %4985  ;;  %v2191_v29 = vpop.f32.mrb[46].mxu1  ;;  %7591 = vmatprep.subr.bf16.mxu1 %v12465_v39 }
 0x36e   : > { %v2373_v40 = vmin.f32 %v2341_v6, 6.0  ;;  %v2192_v13 = vadd.f32 %v2191_v29, %v12466_v28  ;;  %v2193_v21 = vpop.f32.mrb[47].mxu1 }
 0x370   : > { %v2342_v3 = vmax.f32 %v2192_v13, 0.0  ;;  %7097 = vmatmul.mubr.msk.f32.vlgmr.msra.gmra.mrb[40].mxu0 %vm735_vm0, %v2373_v40  ;;  %v5057_v8 = vpop.xlane.xlu0 %5056 }
 0x371   : > { %7455 = vmatpush3.bf16.msra.mxu0 %v10129_v31  ;;  %v2196_v54 = vpop.f32.mrb[48].mxu1  ;;  %v5054_v4 = vpop.xlane.xlu1 %5053 }
 0x372   : > { %v2374_v44 = vmin.f32 %v2342_v3, 6.0  ;;  %v2197_v41 = vadd.f32 %v2196_v54, %v12466_v28  ;;  %7457 = vmatprep.subr.bf16.mxu0 %v7456_v61  ;;  %v10232_v12 = vpack.c.bf16 %v5057_v8, %v5054_v4  ;;  %v2198_v6 = vpop.f32.mrb[49].mxu1 }
 0x374   : > { %v2343_v29 = vmax.f32 %v2197_v41, 0.0  ;;  %v10234_v21 = vpop.xlane.xlu0 %4994  ;;  %7607 = vmatpush1.bf16.msra.mxu1 %v10232_v12  ;;  %7099 = vmatprep.mubr.msk.f32.mxu0 %vm735_vm0, %v2374_v44 }
 0x375   : > { %7459 = vmatpush3.bf16.msra.mxu0 %v7456_v61  ;;  %v10238_v53 = vpop.xlane.xlu1 %4991  ;;  %v2201_v31 = vpop.f32.mrb[50].mxu1  ;;  %7592 = vmatprep.subr.bf16.mxu1 %v12465_v39 }
 0x376   : > { %v2375_v38 = vmin.f32 %v2343_v29, 6.0  ;;  %v2202_v40 = vadd.f32 %v2201_v31, %v12466_v28  ;;  %v2203_v13 = vpop.f32.mrb[51].mxu1  ;;  %7492 = vmatprep.subr.bf16.mxu0 %v12465_v39 }
 0x378   : > { %v2344_v3 = vmax.f32 %v2202_v40, 0.0  ;;  %7100 = vmatmul.mubr.msk.f32.gmra.mrb[42].mxu0 %vm735_vm0, %v2375_v38  ;;  %v5063_v41 = vpop.xlane.xlu0 %5062 }
 0x379   : > { %v2206_v8 = vpop.f32.mrb[52].mxu1  ;;  %v5060_v54 = vpop.xlane.xlu1 %5059 }
 0x37a   : > { %v2376_v4 = vmin.f32 %v2344_v3, 6.0  ;;  %v2207_v61 = vadd.f32 %v2206_v8, %v12466_v28  ;;  %v10245_v44 = vpack.c.bf16 %v5063_v41, %v5060_v54  ;;  %v2208_v6 = vpop.f32.mrb[53].mxu1 }
 0x37c   : > { %v2345_v43 = vmax.f32 %v2207_v61, 0.0  ;;  %v10247_v11 = vpop.xlane.xlu0 %5000  ;;  %7608 = vmatpush1.bf16.msra.mxu1 %v10245_v44  ;;  %7102 = vmatprep.mubr.msk.f32.mxu0 %vm735_vm0, %v2376_v4 }
 0x37d   : > { %v10251_v29 = vpop.xlane.xlu1 %4997  ;;  %v2211_v31 = vpop.f32.mrb[54].mxu1  ;;  %7593 = vmatprep.subr.bf16.mxu1 %v12465_v39 }
 0x37e   : > { %v2377_v38 = vmin.f32 %v2345_v43, 6.0  ;;  %v2212_v40 = vadd.f32 %v2211_v31, %v12466_v28  ;;  %v2213_v13 = vpop.f32.mrb[55].mxu1 }
 0x380   : > { %v2346_v3 = vmax.f32 %v2212_v40, 0.0  ;;  %7103 = vmatmul.mubr.msk.f32.gmra.mrb[44].mxu0 %vm735_vm0, %v2377_v38  ;;  %v5069_v41 = vpop.xlane.xlu0 %5068 }
 0x381   : > { %v2216_v8 = vpop.f32.mrb[56].mxu1  ;;  %v5066_v54 = vpop.xlane.xlu1 %5065 }
 0x382   : > { %v2378_v61 = vmin.f32 %v2346_v3, 6.0  ;;  %v2217_v6 = vadd.f32 %v2216_v8, %v12466_v28  ;;  %v10257_v18 = vpack.c.bf16 %v5069_v41, %v5066_v54  ;;  %v2218_v4 = vpop.f32.mrb[57].mxu1 }
 0x384   : > { %v2347_v2 = vmax.f32 %v2217_v6, 0.0  ;;  %v5075_v50 = vpop.xlane.xlu0 %5074  ;;  %7609 = vmatpush1.bf16.msra.mxu1 %v10257_v18  ;;  %7105 = vmatprep.mubr.msk.f32.mxu0 %vm735_vm0, %v2378_v61 }
 0x385   : > { %v5072_v43 = vpop.xlane.xlu1 %5071  ;;  %v2221_v31 = vpop.f32.mrb[58].mxu1  ;;  %7594 = vmatprep.subr.bf16.mxu1 %v12465_v39 }
 0x386   : > { %v2379_v38 = vmin.f32 %v2347_v2, 6.0  ;;  %v10262_v40 = vpack.c.bf16 %v5075_v50, %v5072_v43  ;;  %v2222_v13 = vadd.f32 %v2221_v31, %v12466_v28  ;;  %v2223_v3 = vpop.f32.mrb[59].mxu1 }
 0x388   : > { %v2348_v8 = vmax.f32 %v2222_v13, 0.0  ;;  %7106 = vmatmul.mubr.msk.f32.gmra.mrb[46].mxu0 %vm735_vm0, %v2379_v38  ;;  %v5081_v41 = vpop.xlane.xlu0 %5080  ;;  %7610 = vmatpush1.bf16.msra.mxu1 %v10262_v40 }
 0x389   : > { %v2226_v54 = vpop.f32.mrb[60].mxu1  ;;  %v5078_v6 = vpop.xlane.xlu1 %5077  ;;  %7595 = vmatprep.subr.bf16.mxu1 %v12465_v39 }
 0x38a   : > { %v2380_v61 = vmin.f32 %v2348_v8, 6.0  ;;  %v2227_v4 = vadd.f32 %v2226_v54, %v12466_v28  ;;  %v10269_v42 = vpack.c.bf16 %v5081_v41, %v5078_v6  ;;  %v2228_v2 = vpop.f32.mrb[61].mxu1 }
 0x38c   : > { %v2349_v50 = vmax.f32 %v2227_v4, 0.0  ;;  %v5087_v43 = vpop.xlane.xlu0 %5086  ;;  %7611 = vmatpush1.bf16.msra.mxu1 %v10269_v42  ;;  %7108 = vmatprep.mubr.msk.f32.mxu0 %vm735_vm0, %v2380_v61 }
 0x38d   : > { %v5084_v31 = vpop.xlane.xlu1 %5083  ;;  %v2231_v38 = vpop.f32.mrb[62].mxu1  ;;  %7596 = vmatprep.subr.bf16.mxu1 %v12465_v39 }
 0x38e   : > { %v2381_v13 = vmin.f32 %v2349_v50, 6.0  ;;  %v10274_v3 = vpack.c.bf16 %v5087_v43, %v5084_v31  ;;  %v2232_v8 = vadd.f32 %v2231_v38, %v12466_v28  ;;  %v2233_v62 = vpop.f32.mrb[63].mxu1 }
 0x390   : > { %v2350_v54 = vmax.f32 %v2232_v8, 0.0  ;;  %7109 = vmatmul.mubr.msk.f32.gmra.mrb[48].mxu0 %vm735_vm0, %v2381_v13  ;;  %v5093_v41 = vpop.xlane.xlu0 %5092  ;;  %7612 = vmatpush1.bf16.msra.mxu1 %v10274_v3 }
 0x391   : > { %v2236_v6 = vpop.f32.mrb[64].mxu1  ;;  %v5090_v4 = vpop.xlane.xlu1 %5089  ;;  %7597 = vmatprep.subr.bf16.mxu1 %v12465_v39 }
 0x392   : > { %v2382_v61 = vmin.f32 %v2350_v54, 6.0  ;;  %v2237_v2 = vadd.f32 %v2236_v6, %v12466_v28  ;;  %v10281_v48 = vpack.c.bf16 %v5093_v41, %v5090_v4  ;;  %v2238_v50 = vpop.f32.mrb[65].mxu1 }
 0x394   : > { %v2351_v43 = vmax.f32 %v2237_v2, 0.0  ;;  %v5099_v31 = vpop.xlane.xlu0 %5098  ;;  %7613 = vmatpush1.bf16.msra.mxu1 %v10281_v48  ;;  %7111 = vmatprep.mubr.msk.f32.mxu0 %vm735_vm0, %v2382_v61 }
 0x395   : > { %v5096_v62 = vpop.xlane.xlu1 %5095  ;;  %v2241_v38 = vpop.f32.mrb[66].mxu1  ;;  %7598 = vmatprep.subr.bf16.mxu1 %v12465_v39 }
 0x396   : > { %v2383_v13 = vmin.f32 %v2351_v43, 6.0  ;;  %v10286_v8 = vpack.c.bf16 %v5099_v31, %v5096_v62  ;;  %v2242_v54 = vadd.f32 %v2241_v38, %v12466_v28  ;;  %v2243_v10 = vpop.f32.mrb[67].mxu1 }
 0x398   : > { %v2352_v6 = vmax.f32 %v2242_v54, 0.0  ;;  %7112 = vmatmul.mubr.msk.f32.gmra.mrb[50].mxu0 %vm735_vm0, %v2383_v13  ;;  %v5105_v41 = vpop.xlane.xlu0 %5104  ;;  %7614 = vmatpush1.bf16.msra.mxu1 %v10286_v8 }
 0x399   : > { %v2246_v4 = vpop.f32.mrb[68].mxu1  ;;  %v5102_v2 = vpop.xlane.xlu1 %5101  ;;  %7599 = vmatprep.subr.bf16.mxu1 %v12465_v39 }
 0x39a   : > { %v2384_v61 = vmin.f32 %v2352_v6, 6.0  ;;  %v2247_v50 = vadd.f32 %v2246_v4, %v12466_v28  ;;  %v10293_v34 = vpack.c.bf16 %v5105_v41, %v5102_v2  ;;  %v2248_v43 = vpop.f32.mrb[69].mxu1 }
 0x39c   : > { %v2353_v31 = vmax.f32 %v2247_v50, 0.0  ;;  %v5111_v62 = vpop.xlane.xlu0 %5110  ;;  %7615 = vmatpush1.bf16.msra.mxu1 %v10293_v34  ;;  %7114 = vmatprep.mubr.msk.f32.mxu0 %vm735_vm0, %v2384_v61 }
 0x39d   : > { %v5108_v10 = vpop.xlane.xlu1 %5107  ;;  %v2251_v38 = vpop.f32.mrb[70].mxu1  ;;  %7600 = vmatprep.subr.bf16.mxu1 %v12465_v39 }
 0x39e   : > { %v2385_v13 = vmin.f32 %v2353_v31, 6.0  ;;  %v10298_v54 = vpack.c.bf16 %v5111_v62, %v5108_v10  ;;  %v2252_v6 = vadd.f32 %v2251_v38, %v12466_v28  ;;  %v2253_v58 = vpop.f32.mrb[71].mxu1 }
 0x3a0   : > { %v2354_v4 = vmax.f32 %v2252_v6, 0.0  ;;  %7115 = vmatmul.mubr.msk.f32.gmra.mrb[52].mxu0 %vm735_vm0, %v2385_v13  ;;  %v5117_v41 = vpop.xlane.xlu0 %5116  ;;  %7616 = vmatpush1.bf16.msra.mxu1 %v10298_v54 }
 0x3a1   : > { %v2256_v2 = vpop.f32.mrb[72].mxu1  ;;  %v5114_v50 = vpop.xlane.xlu1 %5113  ;;  %7601 = vmatprep.subr.bf16.mxu1 %v12465_v39 }
 0x3a2   : > { %v2386_v61 = vmin.f32 %v2354_v4, 6.0  ;;  %v2257_v43 = vadd.f32 %v2256_v2, %v12466_v28  ;;  %v10305_v16 = vpack.c.bf16 %v5117_v41, %v5114_v50  ;;  %v2258_v31 = vpop.f32.mrb[73].mxu1 }
 0x3a4   : > { %v2355_v62 = vmax.f32 %v2257_v43, 0.0  ;;  %v5123_v10 = vpop.xlane.xlu0 %5122  ;;  %7617 = vmatpush1.bf16.msra.mxu1 %v10305_v16  ;;  %7117 = vmatprep.mubr.msk.f32.mxu0 %vm735_vm0, %v2386_v61 }
 0x3a5   : > { %v5120_v58 = vpop.xlane.xlu1 %5119  ;;  %v2261_v38 = vpop.f32.mrb[74].mxu1  ;;  %7602 = vmatprep.subr.bf16.mxu1 %v12465_v39 }
 0x3a6   : > { %v2387_v13 = vmin.f32 %v2355_v62, 6.0  ;;  %v10310_v6 = vpack.c.bf16 %v5123_v10, %v5120_v58  ;;  %v2262_v4 = vadd.f32 %v2261_v38, %v12466_v28  ;;  %v2263_v22 = vpop.f32.mrb[75].mxu1 }
 0x3a8   : > { %v2356_v2 = vmax.f32 %v2262_v4, 0.0  ;;  %7118 = vmatmul.mubr.msk.f32.gmra.mrb[54].mxu0 %vm735_vm0, %v2387_v13  ;;  %v5129_v41 = vpop.xlane.xlu0 %5128  ;;  %7618 = vmatpush1.bf16.msra.mxu1 %v10310_v6 }
 0x3a9   : > { %v2266_v50 = vpop.f32.mrb[76].mxu1  ;;  %v5126_v43 = vpop.xlane.xlu1 %5125  ;;  %7603 = vmatprep.subr.bf16.mxu1 %v12465_v39 }
 0x3aa   : > { %v2388_v61 = vmin.f32 %v2356_v2, 6.0  ;;  %v2267_v31 = vadd.f32 %v2266_v50, %v12466_v28  ;;  %v10317_v1 = vpack.c.bf16 %v5129_v41, %v5126_v43  ;;  %v2268_v62 = vpop.f32.mrb[77].mxu1 }
 0x3ac   : > { %12467 = vst [vmem:[#allocation58_spill] sm:$0xff] %v10317_v1  ;;  %v2357_v10 = vmax.f32 %v2267_v31, 0.0  ;;  %7619 = vmatpush1.bf16.msra.mxu1 %v10317_v1  ;;  %7120 = vmatprep.mubr.msk.f32.mxu0 %vm735_vm0, %v2388_v61 }
 0x3ad   : > { %v2271_v22 = vpop.f32.mrb[78].mxu1 }
 0x3ae   : > { %v2389_v58 = vmin.f32 %v2357_v10, 6.0  ;;  %v2272_v38 = vadd.f32 %v2271_v22, %v12466_v28  ;;  %v2273_v13 = vpop.f32.mrb[79].mxu1 }
 0x3b0   : > { %v2358_v4 = vmax.f32 %v2272_v38, 0.0  ;;  %7121 = vmatmul.mubr.msk.f32.gmra.mrb[56].mxu0 %vm735_vm0, %v2389_v58 }
 0x3b1   : > { %v2276_v5 = vpop.f32.mrb[80].mxu1 }
 0x3b2   : > { %v2390_v2 = vmin.f32 %v2358_v4, 6.0  ;;  %v2277_v50 = vadd.f32 %v2276_v5, %v12466_v28  ;;  %v2278_v41 = vpop.f32.mrb[81].mxu1 }
 0x3b4   : > { %v2359_v43 = vmax.f32 %v2277_v50, 0.0  ;;  %7123 = vmatprep.mubr.msk.f32.mxu0 %vm735_vm0, %v2390_v2 }
 0x3b5   : > { %v2281_v31 = vpop.f32.mrb[82].mxu1 }
 0x3b6   : > { %v2391_v62 = vmin.f32 %v2359_v43, 6.0  ;;  %v2282_v61 = vadd.f32 %v2281_v31, %v12466_v28  ;;  %v2283_v1 = vpop.f32.mrb[83].mxu1 }
 0x3b8   : > { %v2360_v10 = vmax.f32 %v2282_v61, 0.0  ;;  %7124 = vmatmul.mubr.msk.f32.gmra.mrb[58].mxu0 %vm735_vm0, %v2391_v62 }
 0x3b9   : > { %v2286_v22 = vpop.f32.mrb[84].mxu1 }
 0x3ba   : > { %v2392_v38 = vmin.f32 %v2360_v10, 6.0  ;;  %v2287_v58 = vadd.f32 %v2286_v22, %v12466_v28  ;;  %v2288_v13 = vpop.f32.mrb[85].mxu1 }
 0x3bc   : > { %v2361_v4 = vmax.f32 %v2287_v58, 0.0  ;;  %7126 = vmatprep.mubr.msk.f32.mxu0 %vm735_vm0, %v2392_v38 }
 0x3bd   : > { %v2291_v5 = vpop.f32.mrb[86].mxu1 }
 0x3be   : > { %v2393_v50 = vmin.f32 %v2361_v4, 6.0  ;;  %v2292_v2 = vadd.f32 %v2291_v5, %v12466_v28  ;;  %v2293_v41 = vpop.f32.mrb[87].mxu1 }
 0x3c0   : > { %v2362_v43 = vmax.f32 %v2292_v2, 0.0  ;;  %7127 = vmatmul.mubr.msk.f32.gmra.mrb[60].mxu0 %vm735_vm0, %v2393_v50 }
 0x3c1   : > { %v2296_v1 = vpop.f32.mrb[88].mxu1 }
 0x3c2   : > { %v2394_v31 = vmin.f32 %v2362_v43, 6.0  ;;  %v2297_v62 = vadd.f32 %v2296_v1, %v12466_v28  ;;  %v2298_v61 = vpop.f32.mrb[89].mxu1 }
 0x3c4   : > { %v2363_v10 = vmax.f32 %v2297_v62, 0.0  ;;  %7129 = vmatprep.mubr.msk.f32.mxu0 %vm735_vm0, %v2394_v31 }
 0x3c5   : > { %v2301_v22 = vpop.f32.mrb[90].mxu1 }
 0x3c6   : > { %v2395_v58 = vmin.f32 %v2363_v10, 6.0  ;;  %v2302_v38 = vadd.f32 %v2301_v22, %v12466_v28  ;;  %v2303_v13 = vpop.f32.mrb[91].mxu1 }
 0x3c8   : > { %v2364_v4 = vmax.f32 %v2302_v38, 0.0  ;;  %7130 = vmatmul.mubr.msk.f32.gmra.mrb[62].mxu0 %vm735_vm0, %v2395_v58 }
 0x3c9   : > { %v2306_v5 = vpop.f32.mrb[92].mxu1 }
 0x3ca   : > { %v2396_v2 = vmin.f32 %v2364_v4, 6.0  ;;  %v2307_v50 = vadd.f32 %v2306_v5, %v12466_v28  ;;  %v2308_v41 = vpop.f32.mrb[93].mxu1 }
 0x3cc   : > { %v2365_v43 = vmax.f32 %v2307_v50, 0.0  ;;  %7132 = vmatprep.mubr.msk.f32.mxu0 %vm735_vm0, %v2396_v2 }
 0x3cd   : > { %v2311_v1 = vpop.f32.mrb[94].mxu1 }
 0x3ce   : > { %v2397_v62 = vmin.f32 %v2365_v43, 6.0  ;;  %v2312_v31 = vadd.f32 %v2311_v1, %v12466_v28  ;;  %v2313_v61 = vpop.f32.mrb[95].mxu1 }
 0x3d0   : > { %v2366_v10 = vmax.f32 %v2312_v31, 0.0  ;;  %7133 = vmatmul.mubr.msk.f32.gmra.mrb[64].mxu0 %vm735_vm0, %v2397_v62 }
 0x3d1   : > { %v2316_v22 = vpop.f32.mrb[96].mxu1 }
 0x3d2   : > { %v2398_v38 = vmin.f32 %v2366_v10, 6.0  ;;  %v2317_v58 = vadd.f32 %v2316_v22, %v12466_v28  ;;  %v2318_v13 = vpop.f32.mrb[97].mxu1 }
 0x3d4   : > { %v2367_v4 = vmax.f32 %v2317_v58, 0.0  ;;  %7135 = vmatprep.mubr.msk.f32.mxu0 %vm735_vm0, %v2398_v38 }
 0x3d5   : > { %v2321_v5 = vpop.f32.mrb[98].mxu1 }
 0x3d6   : > { %v2399_v50 = vmin.f32 %v2367_v4, 6.0  ;;  %v2322_v2 = vadd.f32 %v2321_v5, %v12466_v28  ;;  %v2323_v41 = vpop.f32.mrb[99].mxu1 }
 0x3d8   : > { %v2368_v43 = vmax.f32 %v2322_v2, 0.0  ;;  %7136 = vmatmul.mubr.msk.f32.gmra.mrb[66].mxu0 %vm735_vm0, %v2399_v50 }
 0x3d9   : > { %v2326_v1 = vpop.f32.mrb[100].mxu1 }
 0x3da   : > { %v2400_v31 = vmin.f32 %v2368_v43, 6.0  ;;  %v2327_v62 = vadd.f32 %v2326_v1, %v12466_v28  ;;  %v2328_v61 = vpop.f32.mrb[101].mxu1 }
 0x3db   : > { %v5002_v61 = vmul.f32 0.015625, %v10119_v49  ;;  %v3105_v49 = vld [vmem:[%s12304_s5 + $0x18] sm:$0xff] }
 0x3dc   : > { %v2369_v10 = vmax.f32 %v2327_v62, 0.0  ;;  %7138 = vmatprep.mubr.msk.f32.mxu0 %vm735_vm0, %v2400_v31  ;;  %v3102_v31 = vld [vmem:[%s12304_s5] sm:$0xff]  ;;  %v5003_v62 = vmul.f32 0.015625, %v10145_v26  ;;  %v5004_v26 = vmul.f32 0.015625, %v10131_v46  ;;  %v3107_v46 = vld [vmem:[%s12304_s5 + $0x28] sm:$0xff] }
 0x3dd   : > { %v2331_v22 = vpop.f32.mrb[102].mxu1 }
 0x3de   : > { %v2401_v58 = vmin.f32 %v2369_v10, 6.0  ;;  %v2332_v38 = vadd.f32 %v2331_v22, %v12466_v28  ;;  %v2333_v13 = vpop.f32.mrb[103].mxu1  ;;  %v3104_v10 = vld [vmem:[%s12304_s5 + $0x10] sm:$0xff]  ;;  %v5005_v22 = vmul.f32 0.015625, %v10143_v23  ;;  %v5007_v23 = vmul.f32 0.015625, %v10155_v59 }
 0x3df   : > { %v5009_v59 = vmul.f32 0.015625, %v10163_v63  ;;  %v5011_v63 = vmul.f32 0.015625, %v10167_v19  ;;  %v5013_v19 = vmul.f32 0.015625, %v10171_v7  ;;  %v5015_v7 = vmul.f32 0.015625, %v10175_v52 }
 0x3e0   : > { %v2370_v4 = vmax.f32 %v2332_v38, 0.0  ;;  %7139 = vmatmul.mubr.msk.f32.gmra.mrb[68].mxu0 %vm735_vm0, %v2401_v58  ;;  %v7493_v58 = vpack.c.bf16 %v5003_v62, %v5002_v61  ;;  %v3106_v38 = vld [vmem:[%s12304_s5 + $0x20] sm:$0xff]  ;;  %v7496_v13 = vpack.c.bf16 %v5005_v22, %v5004_v26  ;;  %v3113_v61 = vld [vmem:[%s12304_s5 + $0x58] sm:$0xff]  ;;  %v3115_v22 = vld [vmem:[%s12304_s5 + $0x68] sm:$0xff]  ;;  %v5017_v52 = vmul.f32 0.015625, %v10179_v32 }
 0x3e1   : > { %v2336_v5 = vpop.f32.mrb[104].mxu1  ;;  %v5019_v32 = vmul.f32 0.015625, %v10183_v17  ;;  %v5021_v17 = vmul.f32 0.015625, %v10187_v60  ;;  %v5023_v60 = vmul.f32 0.015625, %v10195_v9  ;;  %v5025_v9 = vmul.f32 0.015625, %v10201_v25 }
 0x3e2   : > { %v2402_v2 = vmin.f32 %v2370_v4, 6.0  ;;  %v2337_v50 = vadd.f32 %v2336_v5, %v12466_v28  ;;  %v2338_v41 = vpop.f32.mrb[105].mxu1  ;;  %v3103_v28 = vld [vmem:[%s12304_s5 + $0x8] sm:$0xff]  ;;  %v5006_v4 = vmul.f32 0.015625, %v10157_v55  ;;  %v3108_v5 = vld [vmem:[%s12304_s5 + $0x30] sm:$0xff]  ;;  %v5008_v55 = vmul.f32 0.015625, %v10165_v27 }
 0x3e3   : > { %v3110_v41 = vld [vmem:[%s12304_s5 + $0x40] sm:$0xff]  ;;  %v5010_v27 = vmul.f32 0.015625, %v10169_v15  ;;  %v5012_v15 = vmul.f32 0.015625, %v10173_v20  ;;  %v5014_v20 = vmul.f32 0.015625, %v10177_v51  ;;  %v5016_v51 = vmul.f32 0.015625, %v10181_v57 }
 0x3e4   : > { %v2371_v43 = vmax.f32 %v2337_v50, 0.0  ;;  %7141 = vmatprep.mubr.msk.f32.mxu0 %vm735_vm0, %v2402_v2  ;;  %v7499_v2 = vpack.c.bf16 %v5007_v23, %v5006_v4  ;;  %v3109_v50 = vld [vmem:[%s12304_s5 + $0x38] sm:$0xff]  ;;  %v5018_v57 = vmul.f32 0.015625, %v10185_v0  ;;  %v3119_v23 = vld [vmem:[%s12304_s5 + $0x88] sm:$0xff]  ;;  %v3120_v4 = vld [vmem:[%s12304_s5 + $0x90] sm:$0xff]  ;;  %v5020_v0 = vmul.f32 0.015625, %v10189_v24 }
 0x3e5   : > { %v7505_v62 = vpack.c.bf16 %v5011_v63, %v5010_v27  ;;  %v7511_v26 = vpack.c.bf16 %v5015_v7, %v5014_v20  ;;  %v5022_v24 = vmul.f32 0.015625, %v10197_v36  ;;  %v5024_v36 = vmul.f32 0.015625, %v10204_v30  ;;  %v3126_v63 = vld [vmem:[%s12304_s5 + $0xc0] sm:$0xff]  ;;  %v3133_v20 = vld [vmem:[%s12304_s5 + $0xf8] sm:$0xff] }
 0x3e6   : > { %v2403_v1 = vmin.f32 %v2371_v43, 6.0  ;;  %v7502_v43 = vpack.c.bf16 %v5009_v59, %v5008_v55  ;;  %v7520_v59 = vpack.c.bf16 %v5021_v17, %v5020_v0  ;;  %v3123_v55 = vld [vmem:[%s12304_s5 + $0xa8] sm:$0xff]  ;;  %v5027_v25 = vmul.f32 0.015625, %v10209_v33  ;;  %v5146_v17 = vld [vmem:[%s12306_s7 + $0x80] sm:$0xff] }
 0x3e7   : > { %v7526_v27 = vpack.c.bf16 %v5025_v9, %v5024_v36  ;;  %v5026_v30 = vmul.f32 0.015625, %v10212_v47  ;;  %v5029_v33 = vmul.f32 0.015625, %v10220_v56  ;;  %v5028_v47 = vmul.f32 0.015625, %v10223_v37  ;;  %v5151_v0 = vld [vmem:[%s12306_s7 + $0xa8] sm:$0xff] }
 0x3e8   : > { %7142 = vmatmul.mubr.msk.f32.gmra.mrb[70].mxu0 %vm735_vm0, %v2403_v1  ;;  %v3111_v1 = vld [vmem:[%s12304_s5 + $0x48] sm:$0xff]  ;;  %v5031_v56 = vmul.f32 0.015625, %v10234_v21  ;;  %v5030_v37 = vmul.f32 0.015625, %v10238_v53  ;;  %v5033_v21 = vmul.f32 0.015625, %v10247_v11  ;;  %v5032_v53 = vmul.f32 0.015625, %v10251_v29  ;;  %v5130_v11 = vld [vmem:[%s12306_s7] sm:$0xff] }
 0x3e9   : > { %7152 = vmatprep.mubr.msk.f32.mxu0 %vm3134_vm3, %v3102_v31  ;;  %v3112_v31 = vld [vmem:[%s12304_s5 + $0x50] sm:$0xff]  ;;  %v5135_v29 = vld [vmem:[%s12306_s7 + $0x28] sm:$0xff] }
 0x3ea   : > { %v7535_v7 = vpack.c.bf16 %v5031_v56, %v5030_v37  ;;  %v5166_v56 = vld [vmem:[%s12306_s7 + $0x120] sm:$0xff] }
 0x3eb   : > { %v4024_v37 = vld [vmem:[%s12305_s6 + $0xa0] sm:$0xff] }
 0x3ec   : > { %7153 = vmatmul.mubr.msk.f32.vlgmr.msra.gmra.mrb[72].mxu0 %vm3134_vm3, %v3103_v28  ;;  %v3114_v28 = vld [vmem:[%s12304_s5 + $0x60] sm:$0xff] }
 0x3ed   : > { %7494 = vmatpush1.bf16.msra.mxu0 %v7493_v58  ;;  %7155 = vmatprep.mubr.msk.f32.mxu0 %vm3134_vm3, %v3104_v10  ;;  %v7508_v10 = vpack.c.bf16 %v5013_v19, %v5012_v15  ;;  %v3116_v58 = vld [vmem:[%s12304_s5 + $0x70] sm:$0xff]  ;;  %v3129_v19 = vld [vmem:[%s12304_s5 + $0xd8] sm:$0xff]  ;;  %v3130_v15 = vld [vmem:[%s12304_s5 + $0xe0] sm:$0xff] }
 0x3ee   : > { %7495 = vmatprep.subr.bf16.mxu0 %v12465_v39 }
 0x3f0   : > { %7156 = vmatmul.mubr.msk.f32.gmra.mrb[74].mxu0 %vm3134_vm3, %v3105_v49  ;;  %v3117_v49 = vld [vmem:[%s12304_s5 + $0x78] sm:$0xff] }
 0x3f1   : > { %7497 = vmatpush1.bf16.msra.mxu0 %v7496_v13  ;;  %7158 = vmatprep.mubr.msk.f32.mxu0 %vm3134_vm3, %v3106_v38  ;;  %v3118_v38 = vld [vmem:[%s12304_s5 + $0x80] sm:$0xff]  ;;  %v7514_v13 = vpack.c.bf16 %v5017_v52, %v5016_v51  ;;  %v4006_v52 = vld [vmem:[%s12305_s6 + $0x10] sm:$0xff]  ;;  %v5139_v51 = vld [vmem:[%s12306_s7 + $0x48] sm:$0xff] }
 0x3f2   : > { %7498 = vmatprep.subr.bf16.mxu0 %v12465_v39  ;;  %7235 = vmatprep.mubr.f32.mxu1 %v4006_v52  ;;  %v5179_v52 = vld [vmem:[%s12306_s7 + $0x188] sm:$0xff] }
 0x3f4   : > { %7159 = vmatmul.mubr.msk.f32.gmra.mrb[76].mxu0 %vm3134_vm3, %v3107_v46  ;;  %v7517_v46 = vpack.c.bf16 %v5019_v32, %v5018_v57  ;;  %v5143_v32 = vld [vmem:[%s12306_s7 + $0x68] sm:$0xff]  ;;  %v4010_v57 = vld [vmem:[%s12305_s6 + $0x30] sm:$0xff] }
 0x3f5   : > { %7500 = vmatpush1.bf16.msra.mxu0 %v7499_v2  ;;  %7161 = vmatprep.mubr.msk.f32.mxu0 %vm3134_vm3, %v3108_v5  ;;  %v3121_v5 = vld [vmem:[%s12304_s5 + $0x98] sm:$0xff]  ;;  %v3122_v2 = vld [vmem:[%s12304_s5 + $0xa0] sm:$0xff] }
 0x3f6   : > { %7501 = vmatprep.subr.bf16.mxu0 %v12465_v39 }
 0x3f8   : > { %7162 = vmatmul.mubr.msk.f32.gmra.mrb[78].mxu0 %vm3134_vm3, %v3109_v50  ;;  %v3124_v50 = vld [vmem:[%s12304_s5 + $0xb0] sm:$0xff] }
 0x3f9   : > { %7503 = vmatpush1.bf16.msra.mxu0 %v7502_v43  ;;  %7164 = vmatprep.mubr.msk.f32.mxu0 %vm3134_vm3, %v3110_v41  ;;  %v7523_v41 = vpack.c.bf16 %v5023_v60, %v5022_v24  ;;  %v3125_v43 = vld [vmem:[%s12304_s5 + $0xb8] sm:$0xff]  ;;  %v4017_v60 = vld [vmem:[%s12305_s6 + $0x68] sm:$0xff]  ;;  %v5154_v24 = vld [vmem:[%s12306_s7 + $0xc0] sm:$0xff] }
 0x3fa   : > { %7504 = vmatprep.subr.bf16.mxu0 %v12465_v39 }
 0x3fc   : > { %7165 = vmatmul.mubr.msk.f32.gmra.mrb[80].mxu0 %vm3134_vm3, %v3111_v1  ;;  %v3127_v1 = vld [vmem:[%s12304_s5 + $0xc8] sm:$0xff] }
 0x3fd   : > { %7506 = vmatpush1.bf16.msra.mxu0 %v7505_v62  ;;  %7167 = vmatprep.mubr.msk.f32.mxu0 %vm3134_vm3, %v3112_v31  ;;  %v3128_v31 = vld [vmem:[%s12304_s5 + $0xd0] sm:$0xff]  ;;  %v7529_v62 = vpack.c.bf16 %v5027_v25, %v5026_v30  ;;  %v5163_v30 = vld [vmem:[%s12306_s7 + $0x108] sm:$0xff] }
 0x3fe   : > { %7507 = vmatprep.subr.bf16.mxu0 %v12465_v39 }
 0x400   : > { %7168 = vmatmul.mubr.msk.f32.gmra.mrb[82].mxu0 %vm3134_vm3, %v3113_v61  ;;  %v7532_v61 = vpack.c.bf16 %v5029_v33, %v5028_v47  ;;  %v4022_v33 = vld [vmem:[%s12305_s6 + $0x90] sm:$0xff]  ;;  %v5167_v47 = vld [vmem:[%s12306_s7 + $0x128] sm:$0xff] }
 0x401   : > { %7509 = vmatpush1.bf16.msra.mxu0 %v7508_v10  ;;  %7170 = vmatprep.mubr.msk.f32.mxu0 %vm3134_vm3, %v3114_v28  ;;  %v3131_v28 = vld [vmem:[%s12304_s5 + $0xe8] sm:$0xff]  ;;  %v3132_v10 = vld [vmem:[%s12304_s5 + $0xf0] sm:$0xff] }
 0x402   : > { %7510 = vmatprep.subr.bf16.mxu0 %v12465_v39 }
 0x404   : > { %7171 = vmatmul.mubr.msk.f32.gmra.mrb[84].mxu0 %vm3134_vm3, %v3115_v22  ;;  %v5131_v22 = vld [vmem:[%s12306_s7 + $0x8] sm:$0xff] }
 0x405   : > { %7512 = vmatpush1.bf16.msra.mxu0 %v7511_v26  ;;  %7173 = vmatprep.mubr.msk.f32.mxu0 %vm3134_vm3, %v3116_v58  ;;  %v7538_v58 = vpack.c.bf16 %v5033_v21, %v5032_v53  ;;  %v5134_v26 = vld [vmem:[%s12306_s7 + $0x20] sm:$0xff] }
 0x406   : > { %7513 = vmatprep.subr.bf16.mxu0 %v12465_v39  ;;  %v5170_v21 = vld [vmem:[%s12306_s7 + $0x140] sm:$0xff] }
 0x408   : > { %7174 = vmatmul.mubr.msk.f32.gmra.mrb[86].mxu0 %vm3134_vm3, %v3117_v49  ;;  %v4008_v49 = vld [vmem:[%s12305_s6 + $0x20] sm:$0xff] }
 0x409   : > { %7515 = vmatpush1.bf16.msra.mxu0 %v7514_v13  ;;  %7176 = vmatprep.mubr.msk.f32.mxu0 %vm3134_vm3, %v3118_v38  ;;  %v4009_v38 = vld [vmem:[%s12305_s6 + $0x28] sm:$0xff]  ;;  %v5138_v13 = vld [vmem:[%s12306_s7 + $0x40] sm:$0xff] }
 0x40a   : > { %7516 = vmatprep.subr.bf16.mxu0 %v12465_v39 }
 0x40c   : > { %7177 = vmatmul.mubr.msk.f32.gmra.mrb[88].mxu0 %vm3134_vm3, %v3119_v23  ;;  %v5147_v23 = vld [vmem:[%s12306_s7 + $0x88] sm:$0xff] }
 0x40d   : > { %7518 = vmatpush1.bf16.msra.mxu0 %v7517_v46  ;;  %7179 = vmatprep.mubr.msk.f32.mxu0 %vm3134_vm3, %v3120_v4  ;;  %v4012_v4 = vld [vmem:[%s12305_s6 + $0x40] sm:$0xff]  ;;  %v4013_v46 = vld [vmem:[%s12305_s6 + $0x48] sm:$0xff] }
 0x40e   : > { %7519 = vmatprep.subr.bf16.mxu0 %v12465_v39 }
 0x410   : > { %7180 = vmatmul.mubr.msk.f32.gmra.mrb[90].mxu0 %vm3134_vm3, %v3121_v5  ;;  %v4014_v5 = vld [vmem:[%s12305_s6 + $0x50] sm:$0xff] }
 0x411   : > { %7521 = vmatpush1.bf16.msra.mxu0 %v7520_v59  ;;  %7182 = vmatprep.mubr.msk.f32.mxu0 %vm3134_vm3, %v3122_v2  ;;  %v5155_v2 = vld [vmem:[%s12306_s7 + $0xc8] sm:$0xff]  ;;  %v4016_v59 = vld [vmem:[%s12305_s6 + $0x60] sm:$0xff] }
 0x412   : > { %7522 = vmatprep.subr.bf16.mxu0 %v12465_v39 }
 0x414   : > { %7183 = vmatmul.mubr.msk.f32.gmra.mrb[92].mxu0 %vm3134_vm3, %v3123_v55  ;;  %v4018_v55 = vld [vmem:[%s12305_s6 + $0x70] sm:$0xff] }
 0x415   : > { %7524 = vmatpush1.bf16.msra.mxu0 %v7523_v41  ;;  %7185 = vmatprep.mubr.msk.f32.mxu0 %vm3134_vm3, %v3124_v50  ;;  %v5159_v50 = vld [vmem:[%s12306_s7 + $0xe8] sm:$0xff] }
 0x416   : > { %7525 = vmatprep.subr.bf16.mxu0 %v12465_v39 }
 0x418   : > { %7186 = vmatmul.mubr.msk.f32.gmra.mrb[94].mxu0 %vm3134_vm3, %v3125_v43  ;;  %v4019_v43 = vld [vmem:[%s12305_s6 + $0x78] sm:$0xff] }
 0x419   : > { %7527 = vmatpush1.bf16.msra.mxu0 %v7526_v27  ;;  %7188 = vmatprep.mubr.msk.f32.mxu0 %vm3134_vm3, %v3126_v63  ;;  %v5158_v27 = vld [vmem:[%s12306_s7 + $0xe0] sm:$0xff] }
 0x41a   : > { %7528 = vmatprep.subr.bf16.mxu0 %v12465_v39 }
 0x41c   : > { %7189 = vmatmul.mubr.msk.f32.gmra.mrb[96].mxu0 %vm3134_vm3, %v3127_v1 }
 0x41d   : > { %7530 = vmatpush1.bf16.msra.mxu0 %v7529_v62  ;;  %7191 = vmatprep.mubr.msk.f32.mxu0 %vm3134_vm3, %v3128_v31  ;;  %v4021_v31 = vld [vmem:[%s12305_s6 + $0x88] sm:$0xff]  ;;  %v5162_v62 = vld [vmem:[%s12306_s7 + $0x100] sm:$0xff] }
 0x41e   : > { %7531 = vmatprep.subr.bf16.mxu0 %v12465_v39 }
 0x420   : > { %7192 = vmatmul.mubr.msk.f32.gmra.mrb[98].mxu0 %vm3134_vm3, %v3129_v19 }
 0x421   : > { %7533 = vmatpush1.bf16.msra.mxu0 %v7532_v61  ;;  %7194 = vmatprep.mubr.msk.f32.mxu0 %vm3134_vm3, %v3130_v15  ;;  %v4023_v61 = vld [vmem:[%s12305_s6 + $0x98] sm:$0xff] }
 0x422   : > { %7534 = vmatprep.subr.bf16.mxu0 %v12465_v39 }
 0x424   : > { %7195 = vmatmul.mubr.msk.f32.gmra.mrb[100].mxu0 %vm3134_vm3, %v3131_v28 }
 0x425   : > { %7536 = vmatpush1.bf16.msra.mxu0 %v7535_v7  ;;  %7197 = vmatprep.mubr.msk.f32.mxu0 %vm3134_vm3, %v3132_v10  ;;  %v4025_v7 = vld [vmem:[%s12305_s6 + $0xa8] sm:$0xff] }
 0x426   : > { %7537 = vmatprep.subr.bf16.mxu0 %v12465_v39 }
 0x428   : > { %7198 = vmatmul.mubr.msk.f32.gmra.mrb[102].mxu0 %vm3134_vm3, %v3133_v20  ;;  %v5175_v20 = vld [vmem:[%s12306_s7 + $0x168] sm:$0xff] }
 0x429   : > { %7539 = vmatpush1.bf16.msra.mxu0 %v7538_v58  ;;  %5322 = vmatprep.mubr.f32.mxu0 %v5131_v22 }
 0x42a   : > { %7540 = vmatprep.subr.bf16.mxu0 %v12465_v39 }
 0x42c   : > { %5323 = vmatmul.mubr.f32.vlgmr.msra.gmra.mrb[104].mxu0 %v5130_v11 }
 0x42d   : > { %7542 = vmatpush1.bf16.msra.mxu0 %v10199_v14  ;;  %5327 = vmatprep.mubr.f32.mxu0 %v5135_v29  ;;  %v4007_v14 = vld [vmem:[%s12305_s6 + $0x18] sm:$0xff]  ;;  %v5174_v29 = vld [vmem:[%s12306_s7 + $0x160] sm:$0xff] }
 0x42e   : > { %7543 = vmatprep.subr.bf16.mxu0 %v12465_v39  ;;  %7236 = vmatmul.mubr.f32.gmra.mrb[108].mxu1 %v4007_v14  ;;  %v4026_v14 = vld [vmem:[%s12305_s6 + $0xb0] sm:$0xff] }
 0x42f   : > { %7238 = vmatprep.mubr.f32.mxu1 %v4008_v49  ;;  %v5183_v49 = vld [vmem:[%s12306_s7 + $0x1a8] sm:$0xff] }
 0x430   : > { %5328 = vmatmul.mubr.f32.gmra.mrb[106].mxu0 %v5134_v26 }
 0x431   : > { %7545 = vmatpush1.bf16.msra.mxu0 %v10207_v45  ;;  %5332 = vmatprep.mubr.f32.mxu0 %v5139_v51  ;;  %v5142_v45 = vld [vmem:[%s12306_s7 + $0x60] sm:$0xff] }
 0x432   : > { %7546 = vmatprep.subr.bf16.mxu0 %v12465_v39  ;;  %7239 = vmatmul.mubr.f32.gmra.mrb[110].mxu1 %v4009_v38  ;;  %v4028_v38 = vld [vmem:[%s12305_s6 + $0xc0] sm:$0xff] }
 0x433   : > { %7241 = vmatprep.mubr.f32.mxu1 %v4010_v57  ;;  %v4029_v57 = vld [vmem:[%s12305_s6 + $0xc8] sm:$0xff] }
 0x434   : > { %5333 = vmatmul.mubr.f32.gmra.mrb[108].mxu0 %v5138_v13 }
 0x435   : > { %7548 = vmatpush1.bf16.msra.mxu0 %v10217_v35  ;;  %5337 = vmatprep.mubr.f32.mxu0 %v5143_v32  ;;  %v4011_v35 = vld [vmem:[%s12305_s6 + $0x38] sm:$0xff] }
 0x436   : > { %7549 = vmatprep.subr.bf16.mxu0 %v12465_v39  ;;  %7242 = vmatmul.mubr.f32.gmra.mrb[112].mxu1 %v4011_v35  ;;  %v5182_v35 = vld [vmem:[%s12306_s7 + $0x1a0] sm:$0xff] }
 0x437   : > { %7244 = vmatprep.mubr.f32.mxu1 %v4012_v4 }
 0x438   : > { %5338 = vmatmul.mubr.f32.gmra.mrb[110].mxu0 %v5142_v45 }
 0x439   : > { %7551 = vmatpush1.bf16.msra.mxu0 %v10232_v12  ;;  %5342 = vmatprep.mubr.f32.mxu0 %v5147_v23  ;;  %v5150_v12 = vld [vmem:[%s12306_s7 + $0xa0] sm:$0xff] }
 0x43a   : > { %7552 = vmatprep.subr.bf16.mxu0 %v12465_v39  ;;  %7245 = vmatmul.mubr.f32.gmra.mrb[114].mxu1 %v4013_v46  ;;  %v5187_v46 = vld [vmem:[%s12306_s7 + $0x1c8] sm:$0xff] }
 0x43b   : > { %7247 = vmatprep.mubr.f32.mxu1 %v4014_v5  ;;  %v5191_v5 = vld [vmem:[%s12306_s7 + $0x1e8] sm:$0xff] }
 0x43c   : > { %5343 = vmatmul.mubr.f32.gmra.mrb[112].mxu0 %v5146_v17 }
 0x43d   : > { %7554 = vmatpush1.bf16.msra.mxu0 %v10245_v44  ;;  %5347 = vmatprep.mubr.f32.mxu0 %v5151_v0  ;;  %v4015_v44 = vld [vmem:[%s12305_s6 + $0x58] sm:$0xff]  ;;  %v4030_v0 = vld [vmem:[%s12305_s6 + $0xd0] sm:$0xff] }
 0x43e   : > { %7555 = vmatprep.subr.bf16.mxu0 %v12465_v39  ;;  %7248 = vmatmul.mubr.f32.gmra.mrb[116].mxu1 %v4015_v44 }
 0x43f   : > { %7250 = vmatprep.mubr.f32.mxu1 %v4016_v59 }
 0x440   : > { %5348 = vmatmul.mubr.f32.gmra.mrb[114].mxu0 %v5150_v12  ;;  %v4031_v12 = vld [vmem:[%s12305_s6 + $0xd8] sm:$0xff] }
 0x441   : > { %7557 = vmatpush1.bf16.msra.mxu0 %v10257_v18  ;;  %5352 = vmatprep.mubr.f32.mxu0 %v5155_v2  ;;  %v12468_v18 = vld [vmem:[#allocation3_spill] sm:$0xff] }
 0x442   : > { %7558 = vmatprep.subr.bf16.mxu0 %v12465_v39  ;;  %7251 = vmatmul.mubr.f32.gmra.mrb[118].mxu1 %v4017_v60  ;;  %v5190_v60 = vld [vmem:[%s12306_s7 + $0x1e0] sm:$0xff] }
 0x443   : > { %v7098_v41 = vpop.f32.mrb[40].mxu0  ;;  %7253 = vmatprep.mubr.f32.mxu1 %v4018_v55  ;;  %v4033_v55 = vld [vmem:[%s12305_s6 + $0xe8] sm:$0xff] }
 0x444   : > { %v10623_v9 = vadd.f32 %v7098_v41, %v12468_v18  ;;  %v2570_v36 = vpop.f32.mrb[41].mxu0  ;;  %5353 = vmatmul.mubr.f32.gmra.mrb[116].mxu0 %v5154_v24  ;;  %v4032_v24 = vld [vmem:[%s12305_s6 + $0xe0] sm:$0xff] }
 0x445   : > { %v10629_v63 = vadd.f32 %v2570_v36, %v12468_v18  ;;  %7560 = vmatpush1.bf16.msra.mxu0 %v10262_v40  ;;  %5357 = vmatprep.mubr.f32.mxu0 %v5159_v50  ;;  %v4020_v40 = vld [vmem:[%s12305_s6 + $0x80] sm:$0xff] }
 0x446   : > { %7561 = vmatprep.subr.bf16.mxu0 %v12465_v39  ;;  %v2733_v25 = vsel %vm2729_vm4, %v10623_v9, -inf  ;;  %7254 = vmatmul.mubr.f32.gmra.mrb[120].mxu1 %v4019_v43  ;;  %v12469_v36 = vld [vmem:[#allocation58_spill] sm:$0xff]  ;;  %v4034_v43 = vld [vmem:[%s12305_s6 + $0xf0] sm:$0xff] }
 0x447   : > { %2734 = vmax.xlane.f32.xlu1 %v2733_v25  ;;  %v2730_v1 = vsel %vm2729_vm4, %v10629_v63, -inf  ;;  %7256 = vmatprep.mubr.f32.mxu1 %v4020_v40  ;;  %v4035_v25 = vld [vmem:[%s12305_s6 + $0xf8] sm:$0xff] }
 0x448   : > { %2731 = vmax.xlane.f32.xlu0 %v2730_v1  ;;  %5358 = vmatmul.mubr.f32.gmra.mrb[118].mxu0 %v5158_v27  ;;  %v5199_v27 = vld [vmem:[%s12306_s7 + $0x228] sm:$0xff] }
 0x449   : > { %7563 = vmatpush1.bf16.msra.mxu0 %v10269_v42  ;;  %5362 = vmatprep.mubr.f32.mxu0 %v5163_v30  ;;  %v5153_v30 = vld [vmem:[%s12306_s7 + $0xb8] sm:$0xff] }
 0x44a   : > { %7564 = vmatprep.subr.bf16.mxu0 %v12465_v39  ;;  %7257 = vmatmul.mubr.f32.gmra.mrb[122].mxu1 %v4021_v31 }
 0x44b   : > { %v7101_v19 = vpop.f32.mrb[42].mxu0  ;;  %7259 = vmatprep.mubr.f32.mxu1 %v4022_v33 }
 0x44c   : > { %v10661_v42 = vadd.f32 %v7101_v19, %v12468_v18  ;;  %v2580_v15 = vpop.f32.mrb[43].mxu0  ;;  %5363 = vmatmul.mubr.f32.gmra.mrb[120].mxu0 %v5162_v62  ;;  %v5152_v62 = vld [vmem:[%s12306_s7 + $0xb0] sm:$0xff] }
 0x44d   : > { %7566 = vmatpush1.bf16.msra.mxu0 %v10274_v3  ;;  %5367 = vmatprep.mubr.f32.mxu0 %v5167_v47  ;;  %v10674_v28 = vadd.f32 %v2580_v15, %v12468_v18  ;;  %v5171_v3 = vld [vmem:[%s12306_s7 + $0x148] sm:$0xff]  ;;  %v5198_v47 = vld [vmem:[%s12306_s7 + $0x220] sm:$0xff] }
 0x44e   : > { %7567 = vmatprep.subr.bf16.mxu0 %v12465_v39  ;;  %v2739_v10 = vsel %vm2729_vm4, %v10661_v42, -inf  ;;  %7260 = vmatmul.mubr.f32.gmra.mrb[124].mxu1 %v4023_v61  ;;  %v5203_v15 = vld [vmem:[%s12306_s7 + $0x248] sm:$0xff] }
 0x44f   : > { %2740 = vmax.xlane.f32.xlu0 %v2739_v10  ;;  %7262 = vmatprep.mubr.f32.mxu1 %v4024_v37  ;;  %v2736_v53 = vsel %vm2729_vm4, %v10674_v28, -inf  ;;  %v5157_v37 = vld [vmem:[%s12306_s7 + $0xd8] sm:$0xff]  ;;  %v5207_v10 = vld [vmem:[%s12306_s7 + $0x268] sm:$0xff] }
 0x450   : > { %5368 = vmatmul.mubr.f32.gmra.mrb[122].mxu0 %v5166_v56  ;;  %v5202_v56 = vld [vmem:[%s12306_s7 + $0x240] sm:$0xff] }
 0x451   : > { %7569 = vmatpush1.bf16.msra.mxu0 %v10281_v48  ;;  %5372 = vmatprep.mubr.f32.mxu0 %v5171_v3  ;;  %v5156_v3 = vld [vmem:[%s12306_s7 + $0xd0] sm:$0xff] }
 0x452   : > { %7570 = vmatprep.subr.bf16.mxu0 %v12465_v39  ;;  %7263 = vmatmul.mubr.f32.gmra.mrb[126].mxu1 %v4025_v7  ;;  %v5161_v7 = vld [vmem:[%s12306_s7 + $0xf8] sm:$0xff] }
 0x453   : > { %v7104_v22 = vpop.f32.mrb[44].mxu0  ;;  %2737 = vmax.xlane.f32.xlu0 %v2736_v53  ;;  %7265 = vmatprep.mubr.f32.mxu1 %v4026_v14  ;;  %v5165_v14 = vld [vmem:[%s12306_s7 + $0x118] sm:$0xff] }
 0x454   : > { %v10696_v58 = vadd.f32 %v7104_v22, %v12468_v18  ;;  %v2590_v48 = vpop.f32.mrb[45].mxu0  ;;  %5373 = vmatmul.mubr.f32.gmra.mrb[124].mxu0 %v5170_v21  ;;  %v5160_v22 = vld [vmem:[%s12306_s7 + $0xf0] sm:$0xff] }
 0x455   : > { %v10699_v11 = vadd.f32 %v2590_v48, %v12468_v18  ;;  %7572 = vmatpush1.bf16.msra.mxu0 %v10286_v8  ;;  %5377 = vmatprep.mubr.f32.mxu0 %v5175_v20  ;;  %v5178_v8 = vld [vmem:[%s12306_s7 + $0x180] sm:$0xff] }
 0x456   : > { %7573 = vmatprep.subr.bf16.mxu0 %v12465_v39  ;;  %v2745_v26 = vsel %vm2729_vm4, %v10696_v58, -inf }
 0x457   : > { %2746 = vmax.xlane.f32.xlu0 %v2745_v26  ;;  %v2742_v51 = vsel %vm2729_vm4, %v10699_v11, -inf }
 0x458   : > { %2743 = vmax.xlane.f32.xlu1 %v2742_v51  ;;  %5378 = vmatmul.mubr.f32.gmra.mrb[126].mxu0 %v5174_v29  ;;  %v5206_v29 = vld [vmem:[%s12306_s7 + $0x260] sm:$0xff] }
 0x459   : > { %7575 = vmatpush1.bf16.msra.mxu0 %v10293_v34  ;;  %5382 = vmatprep.mubr.f32.mxu0 %v5179_v52  ;;  %v4027_v34 = vld [vmem:[%s12305_s6 + $0xb8] sm:$0xff]  ;;  %v5211_v52 = vld [vmem:[%s12306_s7 + $0x288] sm:$0xff] }
 0x45a   : > { %7576 = vmatprep.subr.bf16.mxu0 %v12465_v39  ;;  %7266 = vmatmul.mubr.f32.gmra.mrb[128].mxu1 %v4027_v34  ;;  %v5164_v34 = vld [vmem:[%s12306_s7 + $0x110] sm:$0xff] }
 0x45b   : > { %v7107_v13 = vpop.f32.mrb[46].mxu0  ;;  %7268 = vmatprep.mubr.f32.mxu1 %v4028_v38  ;;  %v5169_v38 = vld [vmem:[%s12306_s7 + $0x138] sm:$0xff] }
 0x45c   : > { %v10731_v32 = vadd.f32 %v7107_v13, %v12468_v18  ;;  %v2600_v45 = vpop.f32.mrb[47].mxu0  ;;  %5383 = vmatmul.mubr.f32.gmra.mrb[128].mxu0 %v5178_v8  ;;  %v5210_v8 = vld [vmem:[%s12306_s7 + $0x280] sm:$0xff] }
 0x45d   : > { %v10737_v23 = vadd.f32 %v2600_v45, %v12468_v18  ;;  %7578 = vmatpush1.bf16.msra.mxu0 %v10298_v54  ;;  %5387 = vmatprep.mubr.f32.mxu0 %v5183_v49  ;;  %v5186_v54 = vld [vmem:[%s12306_s7 + $0x1c0] sm:$0xff]  ;;  %v5215_v49 = vld [vmem:[%s12306_s7 + $0x2a8] sm:$0xff] }
 0x45e   : > { %7579 = vmatprep.subr.bf16.mxu0 %v12465_v39  ;;  %v2751_v4 = vsel %vm2729_vm4, %v10731_v32, -inf  ;;  %7269 = vmatmul.mubr.f32.gmra.mrb[130].mxu1 %v4029_v57 }
 0x45f   : > { %2752 = vmax.xlane.f32.xlu0 %v2751_v4  ;;  %v2748_v17 = vsel %vm2729_vm4, %v10737_v23, -inf  ;;  %7271 = vmatprep.mubr.f32.mxu1 %v4030_v0 }
 0x460   : > { %2749 = vmax.xlane.f32.xlu1 %v2748_v17  ;;  %5388 = vmatmul.mubr.f32.gmra.mrb[130].mxu0 %v5182_v35  ;;  %v5168_v35 = vld [vmem:[%s12306_s7 + $0x130] sm:$0xff] }
 0x461   : > { %7581 = vmatpush1.bf16.msra.mxu0 %v10305_v16  ;;  %5392 = vmatprep.mubr.f32.mxu0 %v5187_v46  ;;  %v5214_v46 = vld [vmem:[%s12306_s7 + $0x2a0] sm:$0xff] }
 0x462   : > { %7582 = vmatprep.subr.bf16.mxu0 %v12465_v39  ;;  %7272 = vmatmul.mubr.f32.gmra.mrb[132].mxu1 %v4031_v12  ;;  %v5218_v12 = vld [vmem:[%s12306_s7 + $0x2c0] sm:$0xff] }
 0x463   : > { %v7110_v16 = vpop.f32.mrb[48].mxu0  ;;  %7274 = vmatprep.mubr.f32.mxu1 %v4032_v24 }
 0x464   : > { %v10766_v2 = vadd.f32 %v7110_v16, %v12468_v18  ;;  %v2610_v44 = vpop.f32.mrb[49].mxu0  ;;  %5393 = vmatmul.mubr.f32.gmra.mrb[132].mxu0 %v5186_v54  ;;  %v5219_v54 = vld [vmem:[%s12306_s7 + $0x2c8] sm:$0xff] }
 0x465   : > { %v10769_v59 = vadd.f32 %v2610_v44, %v12468_v18  ;;  %7584 = vmatpush1.bf16.msra.mxu0 %v10310_v6  ;;  %5397 = vmatprep.mubr.f32.mxu0 %v5191_v5  ;;  %v5195_v6 = vld [vmem:[%s12306_s7 + $0x208] sm:$0xff]  ;;  %v5173_v5 = vld [vmem:[%s12306_s7 + $0x158] sm:$0xff]  ;;  %v5172_v44 = vld [vmem:[%s12306_s7 + $0x150] sm:$0xff] }
 0x466   : > { %7585 = vmatprep.subr.bf16.mxu0 %v12465_v39  ;;  %v2757_v50 = vsel %vm2729_vm4, %v10766_v2, -inf  ;;  %7275 = vmatmul.mubr.f32.gmra.mrb[134].mxu1 %v4033_v55  ;;  %v5194_v39 = vld [vmem:[%s12306_s7 + $0x200] sm:$0xff]  ;;  %v5223_v16 = vld [vmem:[%s12306_s7 + $0x2e8] sm:$0xff] }
 0x467   : > { %2758 = vmax.xlane.f32.xlu0 %v2757_v50  ;;  %v2754_v41 = vsel %vm2729_vm4, %v10769_v59, -inf  ;;  %7277 = vmatprep.mubr.f32.mxu1 %v4034_v43  ;;  %v5227_v43 = vld [vmem:[%s12306_s7 + $0x308] sm:$0xff] }
 0x468   : > { %2755 = vmax.xlane.f32.xlu1 %v2754_v41  ;;  %5398 = vmatmul.mubr.f32.gmra.mrb[134].mxu0 %v5190_v60  ;;  %v5177_v60 = vld [vmem:[%s12306_s7 + $0x178] sm:$0xff] }
 0x469   : > { %7587 = vmatpush1.bf16.msra.mxu0 %v12469_v36  ;;  %5402 = vmatprep.mubr.f32.mxu0 %v5195_v6  ;;  %v5176_v6 = vld [vmem:[%s12306_s7 + $0x170] sm:$0xff]  ;;  %v5222_v36 = vld [vmem:[%s12306_s7 + $0x2e0] sm:$0xff] }
 0x46a   : > { %7278 = vmatmul.mubr.f32.gmra.mrb[136].mxu1 %v4035_v25  ;;  %v5226_v25 = vld [vmem:[%s12306_s7 + $0x300] sm:$0xff] }
 0x46b   : > { %v7113_v1 = vpop.f32.mrb[50].mxu0  ;;  %5572 = vmatprep.mubr.f32.mxu1 %v5153_v30  ;;  %v5181_v30 = vld [vmem:[%s12306_s7 + $0x198] sm:$0xff] }
 0x46c   : > { %v10806_v40 = vadd.f32 %v7113_v1, %v12468_v18  ;;  %v2620_v31 = vpop.f32.mrb[51].mxu0  ;;  %5403 = vmatmul.mubr.f32.gmra.mrb[136].mxu0 %v5194_v39  ;;  %v5231_v1 = vld [vmem:[%s12306_s7 + $0x328] sm:$0xff] }
 0x46d   : > { %v10812_v33 = vadd.f32 %v2620_v31, %v12468_v18  ;;  %5407 = vmatprep.mubr.f32.mxu0 %v5199_v27  ;;  %v5180_v31 = vld [vmem:[%s12306_s7 + $0x190] sm:$0xff] }
 0x46e   : > { %v2763_v19 = vsel %vm2729_vm4, %v10806_v40, -inf  ;;  %5573 = vmatmul.mubr.f32.vlgmr.msra.gmra.mrb[138].mxu1 %v5152_v62  ;;  %v5185_v62 = vld [vmem:[%s12306_s7 + $0x1b8] sm:$0xff] }
 0x46f   : > { %2764 = vmax.xlane.f32.xlu0 %v2763_v19  ;;  %v2760_v61 = vsel %vm2729_vm4, %v10812_v33, -inf  ;;  %5577 = vmatprep.mubr.f32.mxu1 %v5157_v37  ;;  %v5230_v37 = vld [vmem:[%s12306_s7 + $0x320] sm:$0xff] }
 0x470   : > { %2761 = vmax.xlane.f32.xlu1 %v2760_v61  ;;  %5408 = vmatmul.mubr.f32.gmra.mrb[138].mxu0 %v5198_v47  ;;  %v5184_v61 = vld [vmem:[%s12306_s7 + $0x1b0] sm:$0xff] }
 0x471   : > { %5412 = vmatprep.mubr.f32.mxu0 %v5203_v15 }
 0x472   : > { %5578 = vmatmul.mubr.f32.gmra.mrb[140].mxu1 %v5156_v3  ;;  %v5235_v3 = vld [vmem:[%s12306_s7 + $0x348] sm:$0xff] }
 0x473   : > { %v7116_v21 = vpop.f32.mrb[52].mxu0  ;;  %5582 = vmatprep.mubr.f32.mxu1 %v5161_v7 }
 0x474   : > { %v10840_v53 = vadd.f32 %v7116_v21, %v12468_v18  ;;  %v2630_v20 = vpop.f32.mrb[53].mxu0  ;;  %5413 = vmatmul.mubr.f32.gmra.mrb[140].mxu0 %v5202_v56  ;;  %v5234_v21 = vld [vmem:[%s12306_s7 + $0x340] sm:$0xff] }
 0x475   : > { %v10846_v48 = vadd.f32 %v2630_v20, %v12468_v18  ;;  %5417 = vmatprep.mubr.f32.mxu0 %v5207_v10  ;;  %v5189_v20 = vld [vmem:[%s12306_s7 + $0x1d8] sm:$0xff] }
 0x476   : > { %v2769_v26 = vsel %vm2729_vm4, %v10840_v53, -inf  ;;  %5583 = vmatmul.mubr.f32.gmra.mrb[142].mxu1 %v5160_v22  ;;  %v5239_v22 = vld [vmem:[%s12306_s7 + $0x368] sm:$0xff] }
 0x477   : > { %2770 = vmax.xlane.f32.xlu0 %v2769_v26  ;;  %v2766_v51 = vsel %vm2729_vm4, %v10846_v48, -inf  ;;  %5587 = vmatprep.mubr.f32.mxu1 %v5165_v14  ;;  %v5193_v26 = vld [vmem:[%s12306_s7 + $0x1f8] sm:$0xff]  ;;  %v5192_v14 = vld [vmem:[%s12306_s7 + $0x1f0] sm:$0xff] }
 0x478   : > { %2767 = vmax.xlane.f32.xlu1 %v2766_v51  ;;  %5418 = vmatmul.mubr.f32.gmra.mrb[142].mxu0 %v5206_v29  ;;  %v5188_v29 = vld [vmem:[%s12306_s7 + $0x1d0] sm:$0xff] }
 0x479   : > { %5422 = vmatprep.mubr.f32.mxu0 %v5211_v52 }
 0x47a   : > { %5588 = vmatmul.mubr.f32.gmra.mrb[144].mxu1 %v5164_v34  ;;  %v5238_v34 = vld [vmem:[%s12306_s7 + $0x360] sm:$0xff] }
 0x47b   : > { %v7119_v13 = vpop.f32.mrb[54].mxu0  ;;  %5592 = vmatprep.mubr.f32.mxu1 %v5169_v38 }
 0x47c   : > { %v10874_v45 = vadd.f32 %v7119_v13, %v12468_v18  ;;  %v2640_v57 = vpop.f32.mrb[55].mxu0  ;;  %5423 = vmatmul.mubr.f32.gmra.mrb[144].mxu0 %v5210_v8  ;;  %v5243_v13 = vld [vmem:[%s12306_s7 + $0x388] sm:$0xff] }
 0x47d   : > { %v10880_v4 = vadd.f32 %v2640_v57, %v12468_v18  ;;  %5427 = vmatprep.mubr.f32.mxu0 %v5215_v49 }
 0x47e   : > { %v2775_v17 = vsel %vm2729_vm4, %v10874_v45, -inf  ;;  %5593 = vmatmul.mubr.f32.gmra.mrb[146].mxu1 %v5168_v35  ;;  %v5242_v35 = vld [vmem:[%s12306_s7 + $0x380] sm:$0xff] }
 0x47f   : > { %2776 = vmax.xlane.f32.xlu0 %v2775_v17  ;;  %v2772_v0 = vsel %vm2729_vm4, %v10880_v4, -inf  ;;  %5597 = vmatprep.mubr.f32.mxu1 %v5173_v5  ;;  %v5247_v17 = vld [vmem:[%s12306_s7 + $0x3a8] sm:$0xff] }
 0x480   : > { %2773 = vmax.xlane.f32.xlu1 %v2772_v0  ;;  %5428 = vmatmul.mubr.f32.gmra.mrb[146].mxu0 %v5214_v46  ;;  %v5197_v46 = vld [vmem:[%s12306_s7 + $0x218] sm:$0xff] }
 0x481   : > { %5432 = vmatprep.mubr.f32.mxu0 %v5219_v54  ;;  %v5196_v54 = vld [vmem:[%s12306_s7 + $0x210] sm:$0xff]  ;;  %v5201_v0 = vld [vmem:[%s12306_s7 + $0x238] sm:$0xff] }
 0x482   : > { %5598 = vmatmul.mubr.f32.gmra.mrb[148].mxu1 %v5172_v44  ;;  %v5200_v44 = vld [vmem:[%s12306_s7 + $0x230] sm:$0xff] }
 0x483   : > { %v7122_v24 = vpop.f32.mrb[56].mxu0  ;;  %5602 = vmatprep.mubr.f32.mxu1 %v5177_v60 }
 0x484   : > { %v10908_v55 = vadd.f32 %v7122_v24, %v12468_v18  ;;  %v2650_v50 = vpop.f32.mrb[57].mxu0  ;;  %5433 = vmatmul.mubr.f32.gmra.mrb[148].mxu0 %v5218_v12  ;;  %v5246_v24 = vld [vmem:[%s12306_s7 + $0x3a0] sm:$0xff] }
 0x485   : > { %v10914_v41 = vadd.f32 %v2650_v50, %v12468_v18  ;;  %5437 = vmatprep.mubr.f32.mxu0 %v5223_v16 }
 0x486   : > { %v2781_v39 = vsel %vm2729_vm4, %v10908_v55, -inf  ;;  %5603 = vmatmul.mubr.f32.gmra.mrb[150].mxu1 %v5176_v6  ;;  %v5251_v6 = vld [vmem:[%s12306_s7 + $0x3c8] sm:$0xff] }
 0x487   : > { %2782 = vmax.xlane.f32.xlu0 %v2781_v39  ;;  %v2778_v27 = vsel %vm2729_vm4, %v10914_v41, -inf  ;;  %5607 = vmatprep.mubr.f32.mxu1 %v5181_v30  ;;  %v5250_v39 = vld [vmem:[%s12306_s7 + $0x3c0] sm:$0xff]  ;;  %v5209_v30 = vld [vmem:[%s12306_s7 + $0x278] sm:$0xff] }
 0x488   : > { %2779 = vmax.xlane.f32.xlu1 %v2778_v27  ;;  %5438 = vmatmul.mubr.f32.gmra.mrb[150].mxu0 %v5222_v36  ;;  %v5255_v27 = vld [vmem:[%s12306_s7 + $0x3e8] sm:$0xff] }
 0x489   : > { %5442 = vmatprep.mubr.f32.mxu0 %v5227_v43  ;;  %v5205_v43 = vld [vmem:[%s12306_s7 + $0x258] sm:$0xff] }
 0x48a   : > { %5608 = vmatmul.mubr.f32.gmra.mrb[152].mxu1 %v5180_v31 }
 0x48b   : > { %v7125_v47 = vpop.f32.mrb[58].mxu0  ;;  %5612 = vmatprep.mubr.f32.mxu1 %v5185_v62 }
 0x48c   : > { %v10942_v19 = vadd.f32 %v7125_v47, %v12468_v18  ;;  %v2660_v15 = vpop.f32.mrb[59].mxu0  ;;  %5443 = vmatmul.mubr.f32.gmra.mrb[152].mxu0 %v5226_v25  ;;  %v5204_v25 = vld [vmem:[%s12306_s7 + $0x250] sm:$0xff] }
 0x48d   : > { %v10948_v56 = vadd.f32 %v2660_v15, %v12468_v18  ;;  %5447 = vmatprep.mubr.f32.mxu0 %v5231_v1  ;;  %v5208_v47 = vld [vmem:[%s12306_s7 + $0x270] sm:$0xff] }
 0x48e   : > { %v2787_v10 = vsel %vm2729_vm4, %v10942_v19, -inf  ;;  %5613 = vmatmul.mubr.f32.gmra.mrb[154].mxu1 %v5184_v61  ;;  %v5254_v61 = vld [vmem:[%s12306_s7 + $0x3e0] sm:$0xff] }
 0x48f   : > { %2788 = vmax.xlane.f32.xlu0 %v2787_v10  ;;  %v2784_v7 = vsel %vm2729_vm4, %v10948_v56, -inf  ;;  %5617 = vmatprep.mubr.f32.mxu1 %v5189_v20  ;;  %v5133_v10 = vld [vmem:[%s12306_s7 + $0x18] sm:$0xff] }
 0x490   : > { %2785 = vmax.xlane.f32.xlu1 %v2784_v7  ;;  %5448 = vmatmul.mubr.f32.gmra.mrb[154].mxu0 %v5230_v37  ;;  %v5132_v7 = vld [vmem:[%s12306_s7 + $0x10] sm:$0xff]  ;;  %v5137_v20 = vld [vmem:[%s12306_s7 + $0x38] sm:$0xff] }
 0x491   : > { %5452 = vmatprep.mubr.f32.mxu0 %v5235_v3 }
 0x492   : > { %5618 = vmatmul.mubr.f32.gmra.mrb[156].mxu1 %v5188_v29  ;;  %v5217_v29 = vld [vmem:[%s12306_s7 + $0x2b8] sm:$0xff] }
 0x493   : > { %v7128_v52 = vpop.f32.mrb[60].mxu0  ;;  %5622 = vmatprep.mubr.f32.mxu1 %v5193_v26 }
 0x494   : > { %v10976_v51 = vadd.f32 %v7128_v52, %v12468_v18  ;;  %v2670_v8 = vpop.f32.mrb[61].mxu0  ;;  %5453 = vmatmul.mubr.f32.gmra.mrb[156].mxu0 %v5234_v21  ;;  %v5213_v21 = vld [vmem:[%s12306_s7 + $0x298] sm:$0xff] }
 0x495   : > { %v10982_v49 = vadd.f32 %v2670_v8, %v12468_v18  ;;  %5457 = vmatprep.mubr.f32.mxu0 %v5239_v22  ;;  %v5212_v22 = vld [vmem:[%s12306_s7 + $0x290] sm:$0xff] }
 0x496   : > { %v2793_v38 = vsel %vm2729_vm4, %v10976_v51, -inf  ;;  %5623 = vmatmul.mubr.f32.gmra.mrb[158].mxu1 %v5192_v14  ;;  %v5216_v14 = vld [vmem:[%s12306_s7 + $0x2b0] sm:$0xff] }
 0x497   : > { %2794 = vmax.xlane.f32.xlu0 %v2793_v38  ;;  %v2790_v57 = vsel %vm2729_vm4, %v10982_v49, -inf  ;;  %5627 = vmatprep.mubr.f32.mxu1 %v5197_v46  ;;  %v5136_v38 = vld [vmem:[%s12306_s7 + $0x30] sm:$0xff] }
 0x498   : > { %2791 = vmax.xlane.f32.xlu1 %v2790_v57  ;;  %5458 = vmatmul.mubr.f32.gmra.mrb[158].mxu0 %v5238_v34  ;;  %v5141_v57 = vld [vmem:[%s12306_s7 + $0x58] sm:$0xff]  ;;  %v5140_v46 = vld [vmem:[%s12306_s7 + $0x50] sm:$0xff] }
 0x499   : > { %5462 = vmatprep.mubr.f32.mxu0 %v5243_v13 }
 0x49a   : > { %5628 = vmatmul.mubr.f32.gmra.mrb[160].mxu1 %v5196_v54  ;;  %v5145_v54 = vld [vmem:[%s12306_s7 + $0x78] sm:$0xff] }
 0x49b   : > { %v7131_v12 = vpop.f32.mrb[62].mxu0  ;;  %5632 = vmatprep.mubr.f32.mxu1 %v5201_v0  ;;  %v5220_v0 = vld [vmem:[%s12306_s7 + $0x2d0] sm:$0xff] }
 0x49c   : > { %v11010_v5 = vadd.f32 %v7131_v12, %v12468_v18  ;;  %v2680_v16 = vpop.f32.mrb[63].mxu0  ;;  %5463 = vmatmul.mubr.f32.gmra.mrb[160].mxu0 %v5242_v35  ;;  %v5225_v12 = vld [vmem:[%s12306_s7 + $0x2f8] sm:$0xff] }
 0x49d   : > { %v11016_v60 = vadd.f32 %v2680_v16, %v12468_v18  ;;  %5467 = vmatprep.mubr.f32.mxu0 %v5247_v17  ;;  %v5221_v17 = vld [vmem:[%s12306_s7 + $0x2d8] sm:$0xff] }
 0x49e   : > { %v2799_v50 = vsel %vm2729_vm4, %v11010_v5, -inf  ;;  %5633 = vmatmul.mubr.f32.gmra.mrb[162].mxu1 %v5200_v44 }
 0x49f   : > { %2800 = vmax.xlane.f32.xlu0 %v2799_v50  ;;  %v2796_v36 = vsel %vm2729_vm4, %v11016_v60, -inf  ;;  %5637 = vmatprep.mubr.f32.mxu1 %v5205_v43  ;;  %v5224_v50 = vld [vmem:[%s12306_s7 + $0x2f0] sm:$0xff]  ;;  %v5149_v43 = vld [vmem:[%s12306_s7 + $0x98] sm:$0xff] }
 0x4a0   : > { %2797 = vmax.xlane.f32.xlu1 %v2796_v36  ;;  %5468 = vmatmul.mubr.f32.gmra.mrb[162].mxu0 %v5246_v24  ;;  %v5144_v36 = vld [vmem:[%s12306_s7 + $0x70] sm:$0xff] }
 0x4a1   : > { %5472 = vmatprep.mubr.f32.mxu0 %v5251_v6 }
 0x4a2   : > { %5638 = vmatmul.mubr.f32.gmra.mrb[164].mxu1 %v5204_v25  ;;  %v5148_v25 = vld [vmem:[%s12306_s7 + $0x90] sm:$0xff] }
 0x4a3   : > { %v7134_v1 = vpop.f32.mrb[64].mxu0  ;;  %5642 = vmatprep.mubr.f32.mxu1 %v5209_v30  ;;  %v5229_v30 = vld [vmem:[%s12306_s7 + $0x318] sm:$0xff] }
 0x4a4   : > { %v11044_v31 = vadd.f32 %v7134_v1, %v12468_v18  ;;  %v2690_v62 = vpop.f32.mrb[65].mxu0  ;;  %5473 = vmatmul.mubr.f32.gmra.mrb[164].mxu0 %v5250_v39  ;;  %v5228_v1 = vld [vmem:[%s12306_s7 + $0x310] sm:$0xff] }
 0x4a5   : > { %v11050_v15 = vadd.f32 %v2690_v62, %v12468_v18  ;;  %5477 = vmatprep.mubr.f32.mxu0 %v5255_v27  ;;  %v5233_v62 = vld [vmem:[%s12306_s7 + $0x338] sm:$0xff] }
 0x4a6   : > { %v2805_v37 = vsel %vm2729_vm4, %v11044_v31, -inf  ;;  %5643 = vmatmul.mubr.f32.gmra.mrb[166].mxu1 %v5208_v47 }
 0x4a7   : > { %2806 = vmax.xlane.f32.xlu0 %v2805_v37  ;;  %v2802_v3 = vsel %vm2729_vm4, %v11050_v15, -inf  ;;  %5647 = vmatprep.mubr.f32.mxu1 %v5213_v21 }
 0x4a8   : > { %2803 = vmax.xlane.f32.xlu1 %v2802_v3  ;;  %5478 = vmatmul.mubr.f32.gmra.mrb[166].mxu0 %v5254_v61 }
 0x4a9   : > { %5547 = vmatprep.mubr.f32.mxu0 %v5133_v10  ;;  %v5232_v10 = vld [vmem:[%s12306_s7 + $0x330] sm:$0xff] }
 0x4aa   : > { %5648 = vmatmul.mubr.f32.gmra.mrb[168].mxu1 %v5212_v22  ;;  %v5236_v22 = vld [vmem:[%s12306_s7 + $0x350] sm:$0xff] }
 0x4ab   : > { %v7137_v26 = vpop.f32.mrb[66].mxu0  ;;  %5652 = vmatprep.mubr.f32.mxu1 %v5217_v29  ;;  %v5240_v29 = vld [vmem:[%s12306_s7 + $0x370] sm:$0xff] }
 0x4ac   : > { %v11078_v52 = vadd.f32 %v7137_v26, %v12468_v18  ;;  %v2700_v8 = vpop.f32.mrb[67].mxu0  ;;  %5548 = vmatmul.mubr.f32.vlgmr.msra.gmra.mrb[104].mxu0 %v5132_v7  ;;  %v5245_v26 = vld [vmem:[%s12306_s7 + $0x398] sm:$0xff] }
 0x4ad   : > { %v11084_v34 = vadd.f32 %v2700_v8, %v12468_v18  ;;  %5552 = vmatprep.mubr.f32.mxu0 %v5137_v20  ;;  %v5237_v20 = vld [vmem:[%s12306_s7 + $0x358] sm:$0xff]  ;;  %v5244_v8 = vld [vmem:[%s12306_s7 + $0x390] sm:$0xff] }
 0x4ae   : > { %v2811_v13 = vsel %vm2729_vm4, %v11078_v52, -inf  ;;  %5653 = vmatmul.mubr.f32.gmra.mrb[170].mxu1 %v5216_v14  ;;  %v5249_v14 = vld [vmem:[%s12306_s7 + $0x3b8] sm:$0xff] }
 0x4af   : > { %2812 = vmax.xlane.f32.xlu0 %v2811_v13  ;;  %v2808_v35 = vsel %vm2729_vm4, %v11084_v34, -inf  ;;  %5657 = vmatprep.mubr.f32.mxu1 %v5221_v17  ;;  %v5253_v13 = vld [vmem:[%s12306_s7 + $0x3d8] sm:$0xff] }
 0x4b0   : > { %2809 = vmax.xlane.f32.xlu1 %v2808_v35  ;;  %5553 = vmatmul.mubr.f32.gmra.mrb[106].mxu0 %v5136_v38  ;;  %v5248_v38 = vld [vmem:[%s12306_s7 + $0x3b0] sm:$0xff]  ;;  %v5257_v35 = vld [vmem:[%s12306_s7 + $0x3f8] sm:$0xff] }
 0x4b1   : > { %5557 = vmatprep.mubr.f32.mxu0 %v5141_v57  ;;  %v5252_v57 = vld [vmem:[%s12306_s7 + $0x3d0] sm:$0xff] }
 0x4b2   : > { %5658 = vmatmul.mubr.f32.gmra.mrb[172].mxu1 %v5220_v0  ;;  %v5256_v0 = vld [vmem:[%s12306_s7 + $0x3f0] sm:$0xff] }
 0x4b3   : > { %v7140_v16 = vpop.f32.mrb[68].mxu0  ;;  %5662 = vmatprep.mubr.f32.mxu1 %v5225_v12 }
 0x4b4   : > { %v11112_v44 = vadd.f32 %v7140_v16, %v12468_v18  ;;  %v2710_v24 = vpop.f32.mrb[69].mxu0  ;;  %5558 = vmatmul.mubr.f32.gmra.mrb[108].mxu0 %v5140_v46 }
 0x4b5   : > { %v11118_v6 = vadd.f32 %v2710_v24, %v12468_v18  ;;  %5562 = vmatprep.mubr.f32.mxu0 %v5145_v54 }
 0x4b6   : > { %v2817_v39 = vsel %vm2729_vm4, %v11112_v44, -inf  ;;  %5663 = vmatmul.mubr.f32.gmra.mrb[174].mxu1 %v5224_v50 }
 0x4b7   : > { %2818 = vmax.xlane.f32.xlu0 %v2817_v39  ;;  %v2814_v27 = vsel %vm2729_vm4, %v11118_v6, -inf  ;;  %5667 = vmatprep.mubr.f32.mxu1 %v5229_v30 }
 0x4b8   : > { %2815 = vmax.xlane.f32.xlu1 %v2814_v27  ;;  %5563 = vmatmul.mubr.f32.gmra.mrb[110].mxu0 %v5144_v36 }
 0x4b9   : > { %5567 = vmatprep.mubr.f32.mxu0 %v5149_v43 }
 0x4ba   : > { %5668 = vmatmul.mubr.f32.gmra.mrb[176].mxu1 %v5228_v1 }
 0x4bb   : > { %v7143_v47 = vpop.f32.mrb[70].mxu0  ;;  %5672 = vmatprep.mubr.f32.mxu1 %v5233_v62 }
 0x4bc   : > { %v11143_v61 = vadd.f32 %v7143_v47, %v12468_v18  ;;  %v2720_v37 = vpop.f32.mrb[71].mxu0  ;;  %5568 = vmatmul.mubr.f32.gmra.mrb[112].mxu0 %v5148_v25 }
 0x4bd   : > { %v11149_v3 = vadd.f32 %v2720_v37, %v12468_v18  ;;  %v5241_v18 = vld [vmem:[%s12306_s7 + $0x378] sm:$0xff] }
 0x4be   : > { %v2823_v7 = vsel %vm2729_vm4, %v11143_v61, -inf  ;;  %5673 = vmatmul.mubr.f32.gmra.mrb[178].mxu1 %v5232_v10 }
 0x4bf   : > { %2824 = vmax.xlane.f32.xlu0 %v2823_v7  ;;  %v2820_v21 = vsel %vm2729_vm4, %v11149_v3, -inf  ;;  %5677 = vmatprep.mubr.f32.mxu1 %v5237_v20  ;;  %v11188_v46 = vpop.f32.mrb[72].mxu0 }
 0x4c0   : > { %2821 = vmax.xlane.f32.xlu1 %v2820_v21  ;;  %v11190_v17 = vpop.f32.mrb[73].mxu0 }
 0x4c2   : > { %5678 = vmatmul.mubr.f32.gmra.mrb[180].mxu1 %v5236_v22 }
 0x4c3   : > { %5682 = vmatprep.mubr.f32.mxu1 %v5241_v18  ;;  %v11195_v12 = vpop.f32.mrb[74].mxu0 }
 0x4c4   : > { %v11198_v50 = vpop.f32.mrb[75].mxu0 }
 0x4c6   : > { %5683 = vmatmul.mubr.f32.gmra.mrb[182].mxu1 %v5240_v29 }
 0x4c7   : > { %5687 = vmatprep.mubr.f32.mxu1 %v5245_v26  ;;  %v11201_v39 = vpop.f32.mrb[76].mxu0 }
 0x4c8   : > { %v11203_v27 = vpop.f32.mrb[77].mxu0 }
 0x4ca   : > { %5688 = vmatmul.mubr.f32.gmra.mrb[184].mxu1 %v5244_v8 }
 0x4cb   : > { %5692 = vmatprep.mubr.f32.mxu1 %v5249_v14  ;;  %v11205_v30 = vpop.f32.mrb[78].mxu0 }
 0x4cc   : > { %v11207_v1 = vpop.f32.mrb[79].mxu0 }
 0x4ce   : > { %5693 = vmatmul.mubr.f32.gmra.mrb[186].mxu1 %v5248_v38 }
 0x4cf   : > { %5697 = vmatprep.mubr.f32.mxu1 %v5253_v13  ;;  %v11209_v62 = vpop.f32.mrb[80].mxu0 }
 0x4d2   : > { %5698 = vmatmul.mubr.f32.gmra.mrb[188].mxu1 %v5252_v57 }
 0x4d3   : > { %5702 = vmatprep.mubr.f32.mxu1 %v5257_v35 }
 0x4d4   : > { %v2735_v54 = vpop.xlane.xlu1 %2734 }
 0x4d5   : > { %v2827_v16 = vsub.f32 %v10623_v9, %v2735_v54  ;;  %v2732_v24 = vpop.xlane.xlu0 %2731  ;;  %v11211_v9 = vpop.f32.mrb[81].mxu0 }
 0x4d6   : > { %v2826_v36 = vsub.f32 %v10629_v63, %v2732_v24  ;;  %5703 = vmatmul.mubr.f32.gmra.mrb[190].mxu1 %v5256_v0  ;;  %v11213_v37 = vpop.f32.mrb[82].mxu0 }
 0x4d7   : > { %v2860_v43 = vmul.f32 1.442695, %v2827_v16  ;;  %v11216_v10 = vpop.f32.mrb[83].mxu0 }
 0x4d8   : > { %v2858_v25 = vmul.f32 1.442695, %v2826_v36  ;;  %v11218_v7 = vpop.f32.mrb[84].mxu0 }
 0x4d9   : > { %7767 = vpow2.f32 %v2860_v43  ;;  %v11220_v20 = vpop.f32.mrb[85].mxu0 }
 0x4da   : > { %7769 = vpow2.f32 %v2858_v25 }
 0x4db   : > { %v11222_v18 = vpop.f32.mrb[86].mxu0 }
 0x4dc   : > { %v2741_v47 = vpop.xlane.xlu0 %2740  ;;  %v11225_v26 = vpop.f32.mrb[87].mxu0 }
 0x4dd   : > { %v2829_v63 = vsub.f32 %v10661_v42, %v2741_v47 }
 0x4df   : > { %v2864_v21 = vmul.f32 1.442695, %v2829_v63  ;;  %v11227_v8 = vpop.f32.mrb[88].mxu0 }
 0x4e0   : > { %v2738_v22 = vpop.xlane.xlu0 %2737  ;;  %12470 = vst [vmem:[#allocation55_spill] sm:$0xff] %v11227_v8  ;;  %v11231_v38 = vpop.f32.mrb[89].mxu0 }
 0x4e1   : > { %7771 = vpow2.f32 %v2864_v21  ;;  %v2828_v29 = vsub.f32 %v10674_v28, %v2738_v22 }
 0x4e3   : > { %v11229_v14 = vpop.eup %7767  ;;  %v2862_v42 = vmul.f32 1.442695, %v2828_v29  ;;  %v11237_v54 = vpop.f32.mrb[90].mxu0 }
 0x4e4   : > { %v11233_v13 = vpop.eup %7769  ;;  %v2747_v57 = vpop.xlane.xlu0 %2746  ;;  %v2925_v35 = vsel %vm2729_vm4, %v11229_v14, 0.0  ;;  %12471 = vst [vmem:[#allocation2_spill] sm:$0xff] %v11237_v54 }
 0x4e5   : > { %7773 = vpow2.f32 %v2862_v42  ;;  %v2831_v28 = vsub.f32 %v10696_v58, %v2747_v57  ;;  %v2744_v0 = vpop.xlane.xlu1 %2743  ;;  %2926 = vadd.xlane.f32.xlu0 %v2925_v35  ;;  %v2922_v16 = vsel %vm2729_vm4, %v11233_v13, 0.0  ;;  %v11242_v24 = vpop.f32.mrb[91].mxu0 }
 0x4e6   : > { %v2830_v36 = vsub.f32 %v10699_v11, %v2744_v0  ;;  %2923 = vadd.xlane.f32.xlu1 %v2922_v16 }
 0x4e7   : > { %v2868_v43 = vmul.f32 1.442695, %v2831_v28  ;;  %v11245_v25 = vpop.f32.mrb[92].mxu0 }
 0x4e8   : > { %12472 = vst [vmem:[#allocation3_spill] sm:$0xff] %v11245_v25  ;;  %v2866_v47 = vmul.f32 1.442695, %v2830_v36  ;;  %v11247_v63 = vpop.f32.mrb[93].mxu0 }
 0x4e9   : > { %7775 = vpow2.f32 %v2868_v43 }
 0x4ea   : > { %7777 = vpow2.f32 %v2866_v47 }
 0x4eb   : > { %v11249_v21 = vpop.eup %7771  ;;  %v11251_v58 = vpop.f32.mrb[94].mxu0 }
 0x4ec   : > { %12473 = vst [vmem:[#allocation58_spill] sm:$0xff] %v11251_v58  ;;  %v2753_v22 = vpop.xlane.xlu0 %2752  ;;  %v2931_v29 = vsel %vm2729_vm4, %v11249_v21, 0.0  ;;  %v11255_v42 = vpop.f32.mrb[95].mxu0 }
 0x4ed   : > { %12474 = vst [vmem:[#allocation102_spill] sm:$0xff] %v11255_v42  ;;  %v2833_v11 = vsub.f32 %v10731_v32, %v2753_v22  ;;  %v2750_v57 = vpop.xlane.xlu1 %2749  ;;  %2932 = vadd.xlane.f32.xlu0 %v2931_v29 }
 0x4ee   : > { %v2832_v35 = vsub.f32 %v10737_v23, %v2750_v57 }
 0x4ef   : > { %v11259_v28 = vpop.eup %7773  ;;  %v2872_v0 = vmul.f32 1.442695, %v2833_v11  ;;  %v11261_v16 = vpop.f32.mrb[96].mxu0 }
 0x4f0   : > { %12475 = vst [vmem:[#allocation103_spill] sm:$0xff] %v11261_v16  ;;  %v2870_v36 = vmul.f32 1.442695, %v2832_v35  ;;  %v2928_v43 = vsel %vm2729_vm4, %v11259_v28, 0.0  ;;  %v11265_v47 = vpop.f32.mrb[97].mxu0 }
 0x4f1   : > { %12476 = vst [vmem:[#allocation104_spill] sm:$0xff] %v11265_v47  ;;  %7779 = vpow2.f32 %v2872_v0  ;;  %2929 = vadd.xlane.f32.xlu1 %v2928_v43 }
 0x4f2   : > { %7781 = vpow2.f32 %v2870_v36 }
 0x4f3   : > { %v11267_v58 = vpop.eup %7775  ;;  %v11269_v32 = vpop.f32.mrb[98].mxu0 }
 0x4f4   : > { %12477 = vst [vmem:[#allocation105_spill] sm:$0xff] %v11269_v32  ;;  %v11271_v22 = vpop.eup %7777  ;;  %v2759_v23 = vpop.xlane.xlu0 %2758  ;;  %v2937_v29 = vsel %vm2729_vm4, %v11267_v58, 0.0 }
 0x4f5   : > { %v11275_v11 = vpop.f32.mrb[99].mxu0  ;;  %v2835_v57 = vsub.f32 %v10766_v2, %v2759_v23  ;;  %v2756_v35 = vpop.xlane.xlu1 %2755  ;;  %2938 = vadd.xlane.f32.xlu0 %v2937_v29  ;;  %v2934_v0 = vsel %vm2729_vm4, %v11271_v22, 0.0 }
 0x4f6   : > { %12478 = vst [vmem:[#allocation106_spill] sm:$0xff] %v11275_v11  ;;  %v2834_v36 = vsub.f32 %v10769_v59, %v2756_v35  ;;  %2935 = vadd.xlane.f32.xlu1 %v2934_v0 }
 0x4f7   : > { %v2876_v43 = vmul.f32 1.442695, %v2835_v57  ;;  %v11281_v32 = vpop.f32.mrb[100].mxu0 }
 0x4f8   : > { %12479 = vst [vmem:[#allocation107_spill] sm:$0xff] %v11281_v32  ;;  %v2874_v16 = vmul.f32 1.442695, %v2834_v36  ;;  %v11283_v25 = vpop.f32.mrb[101].mxu0 }
 0x4f9   : > { %12480 = vst [vmem:[#allocation108_spill] sm:$0xff] %v11283_v25  ;;  %7783 = vpow2.f32 %v2876_v43 }
 0x4fa   : > { %7785 = vpow2.f32 %v2874_v16 }
 0x4fb   : > { %v11285_v54 = vpop.eup %7779  ;;  %v11287_v11 = vpop.f32.mrb[102].mxu0 }
 0x4fc   : > { %12481 = vst [vmem:[#allocation109_spill] sm:$0xff] %v11287_v11  ;;  %v11289_v2 = vpop.eup %7781  ;;  %v2765_v23 = vpop.xlane.xlu0 %2764  ;;  %v2943_v29 = vsel %vm2729_vm4, %v11285_v54, 0.0 }
 0x4fd   : > { %v11293_v59 = vpop.f32.mrb[103].mxu0  ;;  %v2837_v57 = vsub.f32 %v10806_v40, %v2765_v23  ;;  %v2762_v35 = vpop.xlane.xlu1 %2761  ;;  %2944 = vadd.xlane.f32.xlu0 %v2943_v29  ;;  %v2940_v0 = vsel %vm2729_vm4, %v11289_v2, 0.0 }
 0x4fe   : > { %12482 = vst [vmem:[#allocation110_spill] sm:$0xff] %v11293_v59  ;;  %v2836_v16 = vsub.f32 %v10812_v33, %v2762_v35  ;;  %2941 = vadd.xlane.f32.xlu1 %v2940_v0  ;;  %v8323_v35 = vmov 0  }
 0x4ff   : > { %v2880_v36 = vmul.f32 1.442695, %v2837_v57  ;;  %7754 = vset.pattern.permute.xlu1 %v8323_v35  ;;  %7753 = vset.pattern.permute.xlu0 %v8323_v35 }
 0x500   : > { %v2878_v43 = vmul.f32 1.442695, %v2836_v16 }
 0x501   : > { %7787 = vpow2.f32 %v2880_v36 }
 0x502   : > { %7789 = vpow2.f32 %v2878_v43 }
 0x503   : > { %v11299_v11 = vpop.eup %7783 }
 0x504   : > { %v11301_v32 = vpop.eup %7785  ;;  %v2771_v25 = vpop.xlane.xlu0 %2770  ;;  %v2949_v40 = vsel %vm2729_vm4, %v11299_v11, 0.0 }
 0x505   : > { %v2839_v23 = vsub.f32 %v10840_v53, %v2771_v25  ;;  %v2768_v29 = vpop.xlane.xlu1 %2767  ;;  %2950 = vadd.xlane.f32.xlu0 %v2949_v40  ;;  %v2946_v33 = vsel %vm2729_vm4, %v11301_v32, 0.0 }
 0x506   : > { %v2838_v57 = vsub.f32 %v10846_v48, %v2768_v29  ;;  %2947 = vadd.xlane.f32.xlu1 %v2946_v33 }
 0x507   : > { %v2884_v0 = vmul.f32 1.442695, %v2839_v23 }
 0x508   : > { %v2882_v16 = vmul.f32 1.442695, %v2838_v57 }
 0x509   : > { %7791 = vpow2.f32 %v2884_v0 }
 0x50a   : > { %7793 = vpow2.f32 %v2882_v16 }
 0x50b   : > { %v11309_v36 = vpop.eup %7787 }
 0x50c   : > { %12483 = vst [vmem:[#allocation111_spill] sm:$0xff] %v11309_v36  ;;  %v11311_v43 = vpop.eup %7789  ;;  %v2777_v53 = vpop.xlane.xlu0 %2776  ;;  %v2955_v25 = vsel %vm2729_vm4, %v11309_v36, 0.0 }
 0x50d   : > { %v2841_v40 = vsub.f32 %v10874_v45, %v2777_v53  ;;  %v2774_v59 = vpop.xlane.xlu1 %2773  ;;  %2956 = vadd.xlane.f32.xlu0 %v2955_v25  ;;  %v2952_v48 = vsel %vm2729_vm4, %v11311_v43, 0.0 }
 0x50e   : > { %v2840_v23 = vsub.f32 %v10880_v4, %v2774_v59  ;;  %2953 = vadd.xlane.f32.xlu1 %v2952_v48 }
 0x50f   : > { %v2888_v29 = vmul.f32 1.442695, %v2841_v40 }
 0x510   : > { %v2886_v33 = vmul.f32 1.442695, %v2840_v23 }
 0x511   : > { %7795 = vpow2.f32 %v2888_v29 }
 0x512   : > { %7797 = vpow2.f32 %v2886_v33 }
 0x513   : > { %v11319_v35 = vpop.eup %7791  ;;  %v11321_v57 = vpop.f32.mrb[114].mxu0 }
 0x514   : > { %12484 = vst [vmem:[#allocation112_spill] sm:$0xff] %v11319_v35  ;;  %v11323_v0 = vpop.eup %7793  ;;  %v2783_v16 = vpop.xlane.xlu0 %2782  ;;  %v2961_v45 = vsel %vm2729_vm4, %v11319_v35, 0.0 }
 0x515   : > { %v5351_v53 = vpop.f32.mrb[115].mxu0  ;;  %v2843_v25 = vsub.f32 %v10908_v55, %v2783_v16  ;;  %v2780_v47 = vpop.xlane.xlu1 %2779  ;;  %2962 = vadd.xlane.f32.xlu0 %v2961_v45  ;;  %v2958_v4 = vsel %vm2729_vm4, %v11323_v0, 0.0 }
 0x516   : > { %v2842_v59 = vsub.f32 %v10914_v41, %v2780_v47  ;;  %2959 = vadd.xlane.f32.xlu1 %v2958_v4  ;;  %v11344_v4 = vpop.f32.mrb[106].mxu1 }
 0x517   : > { %v2892_v40 = vmul.f32 1.442695, %v2843_v25  ;;  %v11331_v48 = vpop.f32.mrb[116].mxu0  ;;  %12486 = vst [vmem:[#allocation114_spill] sm:$0xff] %v11344_v4 }
 0x518   : > { %v2890_v23 = vmul.f32 1.442695, %v2842_v59  ;;  %v5356_v29 = vpop.f32.mrb[117].mxu0 }
 0x519   : > { %7799 = vpow2.f32 %v2892_v40  ;;  %v11347_v40 = vpop.f32.mrb[107].mxu1 }
 0x51a   : > { %7801 = vpow2.f32 %v2890_v23  ;;  %12487 = vst [vmem:[#allocation115_spill] sm:$0xff] %v11347_v40  ;;  %v11351_v8 = vpop.f32.mrb[108].mxu1 }
 0x51b   : > { %v11333_v33 = vpop.eup %7795  ;;  %v11335_v53 = vpop.f32.mrb[118].mxu0  ;;  %12488 = vst [vmem:[#allocation116_spill] sm:$0xff] %v11351_v8 }
 0x51c   : > { %12485 = vst [vmem:[#allocation113_spill] sm:$0xff] %v11333_v33  ;;  %v11337_v55 = vpop.eup %7797  ;;  %v2789_v16 = vpop.xlane.xlu0 %2788  ;;  %v2967_v45 = vsel %vm2729_vm4, %v11333_v33, 0.0 }
 0x51d   : > { %v5361_v35 = vpop.f32.mrb[119].mxu0  ;;  %v2845_v41 = vsub.f32 %v10942_v19, %v2789_v16  ;;  %v2786_v47 = vpop.xlane.xlu1 %2785  ;;  %2968 = vadd.xlane.f32.xlu0 %v2967_v45  ;;  %v2964_v25 = vsel %vm2729_vm4, %v11337_v55, 0.0 }
 0x51e   : > { %v2844_v59 = vsub.f32 %v10948_v56, %v2786_v47  ;;  %2965 = vadd.xlane.f32.xlu1 %v2964_v25  ;;  %v11353_v19 = vpop.f32.mrb[109].mxu1 }
 0x51f   : > { %v2896_v23 = vmul.f32 1.442695, %v2845_v41  ;;  %v11349_v29 = vpop.f32.mrb[120].mxu0  ;;  %12489 = vst [vmem:[#allocation117_spill] sm:$0xff] %v11353_v19  ;;  %v11355_v16 = vpop.f32.mrb[110].mxu1 }
 0x520   : > { %v2894_v35 = vmul.f32 1.442695, %v2844_v59  ;;  %v5366_v33 = vpop.f32.mrb[121].mxu0  ;;  %12490 = vst [vmem:[#allocation118_spill] sm:$0xff] %v11355_v16  ;;  %v11361_v56 = vpop.f32.mrb[111].mxu1 }
 0x521   : > { %7803 = vpow2.f32 %v2896_v23  ;;  %12492 = vst [vmem:[#allocation120_spill] sm:$0xff] %v11361_v56  ;;  %v11370_v16 = vpop.f32.mrb[112].mxu1 }
 0x522   : > { %7805 = vpow2.f32 %v2894_v35  ;;  %12494 = vst [vmem:[#allocation122_spill] sm:$0xff] %v11370_v16  ;;  %v11373_v56 = vpop.f32.mrb[113].mxu1 }
 0x523   : > { %v11357_v45 = vpop.eup %7799  ;;  %v11359_v4 = vpop.f32.mrb[122].mxu0  ;;  %12495 = vst [vmem:[#allocation123_spill] sm:$0xff] %v11373_v56 }
 0x524   : > { %12491 = vst [vmem:[#allocation119_spill] sm:$0xff] %v11357_v45  ;;  %v11363_v47 = vpop.eup %7801  ;;  %v2795_v41 = vpop.xlane.xlu0 %2794  ;;  %v2973_v25 = vsel %vm2729_vm4, %v11357_v45, 0.0 }
 0x525   : > { %12493 = vst [vmem:[#allocation121_spill] sm:$0xff] %v11363_v47  ;;  %v5371_v59 = vpop.f32.mrb[123].mxu0  ;;  %v2847_v33 = vsub.f32 %v10976_v51, %v2795_v41  ;;  %v2792_v23 = vpop.xlane.xlu1 %2791  ;;  %2974 = vadd.xlane.f32.xlu0 %v2973_v25  ;;  %v2970_v35 = vsel %vm2729_vm4, %v11363_v47, 0.0 }
 0x526   : > { %v2846_v8 = vsub.f32 %v10982_v49, %v2792_v23  ;;  %2971 = vadd.xlane.f32.xlu1 %v2970_v35  ;;  %v11377_v42 = vpop.f32.mrb[114].mxu1 }
 0x527   : > { %v2900_v19 = vmul.f32 1.442695, %v2847_v33  ;;  %v11375_v40 = vpop.f32.mrb[124].mxu0  ;;  %12496 = vst [vmem:[#allocation124_spill] sm:$0xff] %v11377_v42  ;;  %v11379_v51 = vpop.f32.mrb[115].mxu1 }
 0x528   : > { %v2898_v59 = vmul.f32 1.442695, %v2846_v8  ;;  %v5376_v45 = vpop.f32.mrb[125].mxu0  ;;  %12497 = vst [vmem:[#allocation125_spill] sm:$0xff] %v11379_v51  ;;  %v11381_v41 = vpop.f32.mrb[116].mxu1 }
 0x529   : > { %7807 = vpow2.f32 %v2900_v19  ;;  %12498 = vst [vmem:[#allocation126_spill] sm:$0xff] %v11381_v41  ;;  %v11383_v25 = vpop.f32.mrb[117].mxu1 }
 0x52a   : > { %7809 = vpow2.f32 %v2898_v59  ;;  %12499 = vst [vmem:[#allocation127_spill] sm:$0xff] %v11383_v25  ;;  %v11389_v23 = vpop.f32.mrb[118].mxu1 }
 0x52b   : > { %v11385_v16 = vpop.eup %7803  ;;  %v11387_v49 = vpop.f32.mrb[126].mxu0  ;;  %12501 = vst [vmem:[#allocation129_spill] sm:$0xff] %v11389_v23 }
 0x52c   : > { %12500 = vst [vmem:[#allocation128_spill] sm:$0xff] %v11385_v16  ;;  %v11391_v33 = vpop.eup %7805  ;;  %v2801_v35 = vpop.xlane.xlu0 %2800  ;;  %v2979_v8 = vsel %vm2729_vm4, %v11385_v16, 0.0 }
 0x52d   : > { %12502 = vst [vmem:[#allocation130_spill] sm:$0xff] %v11391_v33  ;;  %v5381_v45 = vpop.f32.mrb[127].mxu0  ;;  %v2849_v19 = vsub.f32 %v11010_v5, %v2801_v35  ;;  %v2798_v42 = vpop.xlane.xlu1 %2797  ;;  %2980 = vadd.xlane.f32.xlu0 %v2979_v8  ;;  %v2976_v59 = vsel %vm2729_vm4, %v11391_v33, 0.0 }
 0x52e   : > { %v11398_v41 = vpop.f32.mrb[119].mxu1  ;;  %v2848_v25 = vsub.f32 %v11016_v60, %v2798_v42  ;;  %2977 = vadd.xlane.f32.xlu1 %v2976_v59 }
 0x52f   : > { %12503 = vst [vmem:[#allocation131_spill] sm:$0xff] %v11398_v41  ;;  %v11401_v23 = vpop.f32.mrb[120].mxu1  ;;  %v2904_v51 = vmul.f32 1.442695, %v2849_v19  ;;  %v11403_v56 = vpop.f32.mrb[128].mxu0 }
 0x530   : > { %12504 = vst [vmem:[#allocation132_spill] sm:$0xff] %v11401_v23  ;;  %v11405_v36 = vpop.f32.mrb[121].mxu1  ;;  %v2902_v45 = vmul.f32 1.442695, %v2848_v25  ;;  %v5386_v16 = vpop.f32.mrb[129].mxu0 }
 0x531   : > { %12505 = vst [vmem:[#allocation133_spill] sm:$0xff] %v11405_v36  ;;  %v11407_v5 = vpop.f32.mrb[122].mxu1  ;;  %7811 = vpow2.f32 %v2904_v51 }
 0x532   : > { %12506 = vst [vmem:[#allocation134_spill] sm:$0xff] %v11407_v5  ;;  %v11409_v35 = vpop.f32.mrb[123].mxu1  ;;  %7813 = vpow2.f32 %v2902_v45 }
 0x533   : > { %12507 = vst [vmem:[#allocation135_spill] sm:$0xff] %v11409_v35  ;;  %v11411_v8 = vpop.f32.mrb[124].mxu1  ;;  %v11413_v41 = vpop.eup %7807 }
 0x534   : > { %12508 = vst [vmem:[#allocation136_spill] sm:$0xff] %v11411_v8  ;;  %12509 = vst [vmem:[#allocation137_spill] sm:$0xff] %v11413_v41  ;;  %v11415_v60 = vpop.f32.mrb[130].mxu0  ;;  %v11417_v42 = vpop.f32.mrb[125].mxu1  ;;  %v2985_v16 = vsel %vm2729_vm4, %v11413_v41, 0.0 }
 0x535   : > { %12510 = vst [vmem:[#allocation138_spill] sm:$0xff] %v11417_v42  ;;  %v11419_v19 = vpop.eup %7809  ;;  %v2807_v59 = vpop.xlane.xlu0 %2806  ;;  %2986 = vadd.xlane.f32.xlu0 %v2985_v16 }
 0x536   : > { %12511 = vst [vmem:[#allocation139_spill] sm:$0xff] %v11419_v19  ;;  %v5391_v25 = vpop.f32.mrb[131].mxu0  ;;  %v2851_v51 = vsub.f32 %v11044_v31, %v2807_v59  ;;  %v2804_v5 = vpop.xlane.xlu1 %2803  ;;  %v2982_v45 = vsel %vm2729_vm4, %v11419_v19, 0.0 }
 0x537   : > { %v11426_v8 = vpop.f32.mrb[126].mxu1  ;;  %v2850_v23 = vsub.f32 %v11050_v15, %v2804_v5  ;;  %2983 = vadd.xlane.f32.xlu1 %v2982_v45  ;;  %v11431_v36 = vpop.f32.mrb[132].mxu0 }
 0x538   : > { %12512 = vst [vmem:[#allocation140_spill] sm:$0xff] %v11426_v8  ;;  %v11429_v42 = vpop.f32.mrb[127].mxu1  ;;  %v2908_v35 = vmul.f32 1.442695, %v2851_v51  ;;  %v5396_v41 = vpop.f32.mrb[133].mxu0 }
 0x539   : > { %12513 = vst [vmem:[#allocation141_spill] sm:$0xff] %v11429_v42  ;;  %v11433_v33 = vpop.f32.mrb[128].mxu1  ;;  %v2906_v25 = vmul.f32 1.442695, %v2850_v23 }
 0x53a   : > { %12514 = vst [vmem:[#allocation142_spill] sm:$0xff] %v11433_v33  ;;  %7815 = vpow2.f32 %v2908_v35  ;;  %v11435_v31 = vpop.f32.mrb[129].mxu1 }
 0x53b   : > { %12515 = vst [vmem:[#allocation143_spill] sm:$0xff] %v11435_v31  ;;  %7817 = vpow2.f32 %v2906_v25  ;;  %v11437_v59 = vpop.f32.mrb[130].mxu1  ;;  %v11439_v16 = vpop.eup %7811 }
 0x53c   : > { %12516 = vst [vmem:[#allocation144_spill] sm:$0xff] %v11437_v59  ;;  %12517 = vst [vmem:[#allocation145_spill] sm:$0xff] %v11439_v16  ;;  %v11441_v8 = vpop.f32.mrb[134].mxu0  ;;  %v11443_v15 = vpop.f32.mrb[131].mxu1  ;;  %v2991_v45 = vsel %vm2729_vm4, %v11439_v16, 0.0 }
 0x53d   : > { %12518 = vst [vmem:[#allocation146_spill] sm:$0xff] %v11443_v15  ;;  %v11445_v5 = vpop.eup %7813  ;;  %v2813_v51 = vpop.xlane.xlu0 %2812  ;;  %2992 = vadd.xlane.f32.xlu0 %v2991_v45 }
 0x53e   : > { %12519 = vst [vmem:[#allocation147_spill] sm:$0xff] %v11445_v5  ;;  %v5401_v23 = vpop.f32.mrb[135].mxu0  ;;  %v2853_v41 = vsub.f32 %v11078_v52, %v2813_v51  ;;  %v2810_v35 = vpop.xlane.xlu1 %2809  ;;  %v2988_v25 = vsel %vm2729_vm4, %v11445_v5, 0.0 }
 0x53f   : > { %v11452_v59 = vpop.f32.mrb[132].mxu1  ;;  %v2852_v33 = vsub.f32 %v11084_v34, %v2810_v35  ;;  %2989 = vadd.xlane.f32.xlu1 %v2988_v25  ;;  %v11457_v42 = vpop.f32.mrb[136].mxu0 }
 0x540   : > { %12520 = vst [vmem:[#allocation148_spill] sm:$0xff] %v11452_v59  ;;  %v11455_v15 = vpop.f32.mrb[133].mxu1  ;;  %v2912_v31 = vmul.f32 1.442695, %v2853_v41  ;;  %v5406_v16 = vpop.f32.mrb[137].mxu0 }
 0x541   : > { %12521 = vst [vmem:[#allocation149_spill] sm:$0xff] %v11455_v15  ;;  %v11459_v19 = vpop.f32.mrb[134].mxu1  ;;  %v2910_v23 = vmul.f32 1.442695, %v2852_v33 }
 0x542   : > { %12522 = vst [vmem:[#allocation150_spill] sm:$0xff] %v11459_v19  ;;  %v11461_v52 = vpop.f32.mrb[135].mxu1  ;;  %7819 = vpow2.f32 %v2912_v31 }
 0x543   : > { %12523 = vst [vmem:[#allocation151_spill] sm:$0xff] %v11461_v52  ;;  %v11463_v51 = vpop.f32.mrb[136].mxu1  ;;  %7821 = vpow2.f32 %v2910_v23  ;;  %v11469_v34 = vpop.f32.mrb[138].mxu0 }
 0x544   : > { %12524 = vst [vmem:[#allocation152_spill] sm:$0xff] %v11463_v51  ;;  %v11465_v45 = vpop.f32.mrb[137].mxu1  ;;  %v11467_v59 = vpop.eup %7815 }
 0x545   : > { %12525 = vst [vmem:[#allocation153_spill] sm:$0xff] %v11465_v45  ;;  %v5574_v35 = vpop.f32.mrb[138].mxu1  ;;  %v11471_v41 = vpop.eup %7817  ;;  %v2997_v33 = vsel %vm2729_vm4, %v11467_v59, 0.0 }
 0x546   : > { %v2819_v25 = vpop.xlane.xlu0 %2818  ;;  %v5411_v16 = vpop.f32.mrb[139].mxu0  ;;  %v11476_v19 = vadd.f32 %v5574_v35, %v11321_v57  ;;  %2998 = vadd.xlane.f32.xlu0 %v2997_v33  ;;  %v2994_v51 = vsel %vm2729_vm4, %v11471_v41, 0.0 }
 0x547   : > { %v2855_v31 = vsub.f32 %v11112_v44, %v2819_v25  ;;  %v2816_v23 = vpop.xlane.xlu1 %2815  ;;  %v5576_v45 = vpop.f32.mrb[139].mxu1  ;;  %2995 = vadd.xlane.f32.xlu1 %v2994_v51 }
 0x548   : > { %12526 = vst [vmem:[#allocation154_spill] sm:$0xff] %v11476_v19  ;;  %v2854_v52 = vsub.f32 %v11118_v6, %v2816_v23  ;;  %v5579_v15 = vpop.f32.mrb[140].mxu1  ;;  %v11482_v47 = vpop.f32.mrb[140].mxu0 }
 0x549   : > { %v2916_v5 = vmul.f32 1.442695, %v2855_v31  ;;  %v11485_v16 = vadd.f32 %v5579_v15, %v11331_v48  ;;  %v5581_v57 = vpop.f32.mrb[141].mxu1  ;;  %v5416_v19 = vpop.f32.mrb[141].mxu0 }
 0x54a   : > { %v2914_v35 = vmul.f32 1.442695, %v2854_v52  ;;  %v5584_v44 = vpop.f32.mrb[142].mxu1 }
 0x54b   : > { %7823 = vpow2.f32 %v2916_v5  ;;  %v11489_v33 = vpop.f32.mrb[142].mxu0  ;;  %v11492_v6 = vadd.f32 %v5584_v44, %v11335_v53  ;;  %v5586_v51 = vpop.f32.mrb[143].mxu1 }
 0x54c   : > { %7825 = vpow2.f32 %v2914_v35  ;;  %v11487_v25 = vpop.eup %7819  ;;  %v2825_v31 = vpop.xlane.xlu0 %2824 }
 0x54d   : > { %12527 = vst [vmem:[#allocation155_spill] sm:$0xff] %v11487_v25  ;;  %12528 = vst [vmem:[#allocation156_spill] sm:$0xff] %v11492_v6  ;;  %v11494_v45 = vpop.eup %7821  ;;  %v3003_v48 = vsel %vm2729_vm4, %v11487_v25, 0.0  ;;  %v5421_v15 = vpop.f32.mrb[143].mxu0  ;;  %v2857_v19 = vsub.f32 %v11143_v61, %v2825_v31 }
 0x54e   : > { %v2822_v5 = vpop.xlane.xlu1 %2821  ;;  %3004 = vadd.xlane.f32.xlu0 %v3003_v48  ;;  %v3000_v52 = vsel %vm2729_vm4, %v11494_v45, 0.0  ;;  %v5589_v53 = vpop.f32.mrb[144].mxu1 }
 0x54f   : > { %v2856_v23 = vsub.f32 %v11149_v3, %v2822_v5  ;;  %3001 = vadd.xlane.f32.xlu1 %v3000_v52  ;;  %v2920_v57 = vmul.f32 1.442695, %v2857_v19  ;;  %v11502_v35 = vpop.f32.mrb[144].mxu0  ;;  %v11505_v44 = vadd.f32 %v5589_v53, %v11349_v29  ;;  %v5591_v51 = vpop.f32.mrb[145].mxu1 }
 0x550   : > { %v5426_v15 = vpop.f32.mrb[145].mxu0 }
 0x551   : > { %12529 = vst [vmem:[#allocation157_spill] sm:$0xff] %v11505_v44  ;;  %v2918_v6 = vmul.f32 1.442695, %v2856_v23  ;;  %7827 = vpow2.f32 %v2920_v57  ;;  %v5594_v61 = vpop.f32.mrb[146].mxu1 }
 0x552   : > { %v11512_v3 = vadd.f32 %v5594_v61, %v11359_v4  ;;  %v5596_v5 = vpop.f32.mrb[147].mxu1 }
 0x553   : > { %7829 = vpow2.f32 %v2918_v6  ;;  %v11509_v48 = vpop.f32.mrb[146].mxu0 }
 0x554   : > { %12531 = vst [vmem:[#allocation159_spill] sm:$0xff] %v11512_v3  ;;  %v5431_v52 = vpop.f32.mrb[147].mxu0 }
 0x555   : > { %v11507_v31 = vpop.eup %7823  ;;  %v5599_v6 = vpop.f32.mrb[148].mxu1 }
 0x556   : > { %12530 = vst [vmem:[#allocation158_spill] sm:$0xff] %v11507_v31  ;;  %v11514_v19 = vpop.eup %7825  ;;  %v3009_v29 = vsel %vm2729_vm4, %v11507_v31, 0.0  ;;  %v11523_v57 = vadd.f32 %v5599_v6, %v11375_v40  ;;  %v5601_v4 = vpop.f32.mrb[149].mxu1 }
 0x557   : > { %3010 = vadd.xlane.f32.xlu0 %v3009_v29  ;;  %v3006_v23 = vsel %vm2729_vm4, %v11514_v19, 0.0  ;;  %v11520_v53 = vpop.f32.mrb[148].mxu0  ;;  %v3457_v4 = vsub.f32 0.0, %v11188_v46 }
 0x558   : > { %3007 = vadd.xlane.f32.xlu1 %v3006_v23  ;;  %12532 = vst [vmem:[#allocation160_spill] sm:$0xff] %v11523_v57  ;;  %v5436_v51 = vpop.f32.mrb[149].mxu0 }
 0x559   : > { %v5604_v15 = vpop.f32.mrb[150].mxu1 }
 0x55a   : > { %v11530_v52 = vadd.f32 %v5604_v15, %v11387_v49  ;;  %v5606_v29 = vpop.f32.mrb[151].mxu1 }
 0x55b   : > { %v11525_v61 = vpop.eup %7827  ;;  %v11527_v5 = vpop.f32.mrb[150].mxu0  ;;  %v3456_v29 = vsub.f32 0.0, %v11190_v17 }
 0x55c   : > { %12533 = vst [vmem:[#allocation161_spill] sm:$0xff] %v11525_v61  ;;  %12534 = vst [vmem:[#allocation162_spill] sm:$0xff] %v11530_v52  ;;  %v3015_v23 = vsel %vm2729_vm4, %v11525_v61, 0.0  ;;  %v5441_v31 = vpop.f32.mrb[151].mxu0  ;;  %v3490_v61 = vmul.f32 1.442695, %v3457_v4 }
 0x55d   : > { %v11532_v3 = vpop.eup %7829  ;;  %3016 = vadd.xlane.f32.xlu0 %v3015_v23  ;;  %v5609_v6 = vpop.f32.mrb[152].mxu1  ;;  %v3488_v25 = vmul.f32 1.442695, %v3456_v29 }
 0x55e   : > { %12535 = vst [vmem:[#allocation163_spill] sm:$0xff] %v11532_v3  ;;  %v3012_v40 = vsel %vm2729_vm4, %v11532_v3, 0.0  ;;  %v11542_v49 = vadd.f32 %v5609_v6, %v11403_v56  ;;  %v5611_v15 = vpop.f32.mrb[153].mxu1  ;;  %7831 = vpow2.f32 %v3490_v61 }
 0x55f   : > { %3013 = vadd.xlane.f32.xlu1 %v3012_v40  ;;  %v11539_v51 = vpop.f32.mrb[152].mxu0  ;;  %7833 = vpow2.f32 %v3488_v25 }
 0x560   : > { %12536 = vst [vmem:[#allocation164_spill] sm:$0xff] %v11542_v49  ;;  %v5446_v52 = vpop.f32.mrb[153].mxu0 }
 0x561   : > { %v5614_v57 = vpop.f32.mrb[154].mxu1 }
 0x562   : > { %v11548_v23 = vadd.f32 %v5614_v57, %v11415_v60  ;;  %v5616_v40 = vpop.f32.mrb[155].mxu1 }
 0x563   : > { %v11545_v31 = vpop.f32.mrb[154].mxu0 }
 0x564   : > { %12537 = vst [vmem:[#allocation165_spill] sm:$0xff] %v11548_v23  ;;  %v5451_v44 = vpop.f32.mrb[155].mxu0 }
 0x565   : > { %v5619_v46 = vpop.f32.mrb[156].mxu1  ;;  %v3459_v44 = vsub.f32 0.0, %v11195_v12 }
 0x566   : > { %v11553_v56 = vadd.f32 %v5619_v46, %v11431_v36  ;;  %v5621_v6 = vpop.f32.mrb[157].mxu1 }
 0x567   : > { %v11550_v3 = vpop.f32.mrb[156].mxu0 }
 0x568   : > { %12538 = vst [vmem:[#allocation166_spill] sm:$0xff] %v11553_v56  ;;  %v5456_v17 = vpop.f32.mrb[157].mxu0  ;;  %v7832_v25 = vpop.eup %7831  ;;  %v3494_v56 = vmul.f32 1.442695, %v3459_v44 }
 0x569   : > { %v5624_v52 = vpop.f32.mrb[158].mxu1  ;;  %v7834_v6 = vpop.eup %7833  ;;  %v3553_v12 = vadd.f32 1.0, %v7832_v25 }
 0x56a   : > { %v11558_v15 = vadd.f32 %v5624_v52, %v11441_v8  ;;  %v5626_v60 = vpop.f32.mrb[159].mxu1  ;;  %v3552_v49 = vadd.f32 1.0, %v7834_v6 }
 0x56b   : > { %v11555_v4 = vpop.f32.mrb[158].mxu0 }
 0x56c   : > { %12539 = vst [vmem:[#allocation167_spill] sm:$0xff] %v11558_v15  ;;  %v5461_v57 = vpop.f32.mrb[159].mxu0 }
 0x56d   : > { %v5629_v29 = vpop.f32.mrb[160].mxu1 }
 0x56e   : > { %v11564_v40 = vadd.f32 %v5629_v29, %v11457_v42  ;;  %v5631_v36 = vpop.f32.mrb[161].mxu1  ;;  %v3458_v42 = vsub.f32 0.0, %v11198_v50 }
 0x56f   : > { %v11561_v61 = vpop.f32.mrb[160].mxu0 }
 0x570   : > { %v5466_v46 = vpop.f32.mrb[161].mxu0 }
 0x571   : > { %v5634_v23 = vpop.f32.mrb[162].mxu1 }
 0x572   : > { %v2927_v17 = vpop.xlane.xlu0 %2926  ;;  %v11569_v60 = vadd.f32 %v5634_v23, %v11469_v34  ;;  %v5636_v15 = vpop.f32.mrb[163].mxu1  ;;  %v3492_v34 = vmul.f32 1.442695, %v3458_v42 }
 0x573   : > { %7835 = vrcp.f32 %v2927_v17  ;;  %v2924_v8 = vpop.xlane.xlu1 %2923  ;;  %v11566_v52 = vpop.f32.mrb[162].mxu0 }
 0x574   : > { %12540 = vst [vmem:[#allocation168_spill] sm:$0xff] %v11569_v60  ;;  %v5471_v57 = vpop.f32.mrb[163].mxu0  ;;  %7837 = vrcp.f32 %v2924_v8 }
 0x575   : > { %v5639_v29 = vpop.f32.mrb[164].mxu1  ;;  %7839 = vpow2.f32 %v3494_v56 }
 0x576   : > { %v11575_v44 = vadd.f32 %v5639_v29, %v11482_v47  ;;  %v5641_v46 = vpop.f32.mrb[165].mxu1  ;;  %7841 = vrcp.f32 %v3553_v12 }
 0x577   : > { %v11572_v36 = vpop.f32.mrb[164].mxu0  ;;  %7843 = vrcp.f32 %v3552_v49 }
 0x578   : > { %v5476_v17 = vpop.f32.mrb[165].mxu0 }
 0x579   : > { %v5644_v25 = vpop.f32.mrb[166].mxu1 }
 0x57a   : > { %v2933_v23 = vpop.xlane.xlu0 %2932  ;;  %v11580_v15 = vadd.f32 %v5644_v25, %v11489_v33  ;;  %v5646_v50 = vpop.f32.mrb[167].mxu1 }
 0x57b   : > { %v11577_v57 = vpop.f32.mrb[166].mxu0  ;;  %7845 = vrcp.f32 %v2933_v23 }
 0x57c   : > { %12541 = vst [vmem:[#allocation169_spill] sm:$0xff] %v11580_v15  ;;  %v5481_v6 = vpop.f32.mrb[167].mxu0  ;;  %7847 = vpow2.f32 %v3492_v34 }
 0x57d   : > { %v7836_v56 = vpop.eup %7835  ;;  %v5649_v29 = vpop.f32.mrb[168].mxu1 }
 0x57e   : > { %v2930_v8 = vpop.xlane.xlu1 %2929  ;;  %v3051_v47 = vmul.f32 %v7836_v56, %v11229_v14  ;;  %v7838_v12 = vpop.eup %7837  ;;  %v11586_v42 = vadd.f32 %v5649_v29, %v11502_v35  ;;  %v3461_v14 = vsub.f32 0.0, %v11201_v39  ;;  %v3460_v39 = vsub.f32 0.0, %v11203_v27 }
 0x57f   : > { %7849 = vrcp.f32 %v2930_v8  ;;  %v11583_v49 = vpop.f32.mrb[104].mxu0  ;;  %v5651_v46 = vpop.f32.mrb[169].mxu1  ;;  %v3050_v23 = vmul.f32 %v7838_v12, %v11233_v13 }
 0x580   : > { %12542 = vst [vmem:[#allocation170_spill] sm:$0xff] %v11586_v42  ;;  %5902 = vrot.lane.b32.xlu1 %v3051_v47, %s8324_s18  ;;  %4519 = vrot.lane.b32.xlu0 %v3051_v47, %s8325_s22  ;;  %v5551_v33 = vpop.f32.mrb[105].mxu0  ;;  %v7840_v17 = vpop.eup %7839 }
 0x581   : > { %v7842_v34 = vpop.eup %7841  ;;  %v5654_v25 = vpop.f32.mrb[170].mxu1  ;;  %v3555_v46 = vadd.f32 1.0, %v7840_v17  ;;  %v3498_v33 = vmul.f32 1.442695, %v3461_v14  ;;  %v3496_v17 = vmul.f32 1.442695, %v3460_v39 }
 0x582   : > { %v7844_v50 = vpop.eup %7843  ;;  %v11595_v35 = vadd.f32 %v5654_v25, %v11509_v48  ;;  %v5656_v29 = vpop.f32.mrb[171].mxu1  ;;  %v3681_v12 = vmul.f32 %v7842_v34, %v3051_v47 }
 0x583   : > { %v2936_v6 = vpop.xlane.xlu1 %2935  ;;  %v11592_v56 = vpop.f32.mrb[106].mxu0  ;;  %v3680_v13 = vmul.f32 %v7844_v50, %v3050_v23 }
 0x584   : > { %12543 = vst [vmem:[#allocation171_spill] sm:$0xff] %v11595_v35  ;;  %7851 = vrcp.f32 %v2936_v6  ;;  %4517 = vrot.lane.b32.xlu1 %v3050_v23, %s8325_s22  ;;  %5900 = vrot.lane.b32.xlu0 %v3050_v23, %s8324_s18  ;;  %v5556_v8 = vpop.f32.mrb[107].mxu0  ;;  %v3466_v23 = vsub.f32 0.0, %v11216_v10 }
 0x585   : > { %v5659_v15 = vpop.f32.mrb[172].mxu1  ;;  %v7846_v60 = vpop.eup %7845  ;;  %7853 = vrcp.f32 %v3555_v46 }
 0x586   : > { %v11603_v48 = vadd.f32 %v5659_v15, %v11520_v53  ;;  %v5661_v25 = vpop.f32.mrb[173].mxu1  ;;  %v7848_v6 = vpop.eup %7847  ;;  %7855 = vpow2.f32 %v3498_v33  ;;  %v3053_v47 = vmul.f32 %v7846_v60, %v11249_v21  ;;  %v3508_v46 = vmul.f32 1.442695, %v3466_v23 }
 0x587   : > { %v11600_v42 = vpop.f32.mrb[108].mxu0  ;;  %v3554_v14 = vadd.f32 1.0, %v7848_v6  ;;  %v2939_v21 = vpop.xlane.xlu0 %2938 }
 0x588   : > { %3714 = vperm.xlu1 %7754, %v3680_v13   ;;  %3719 = vperm.xlu0 %7753, %v3681_v12   ;;  %v5561_v35 = vpop.f32.mrb[109].mxu0  ;;  %v3463_v12 = vsub.f32 0.0, %v11205_v30 }
 0x589   : > { %v7850_v8 = vpop.eup %7849  ;;  %v5664_v34 = vpop.f32.mrb[174].mxu1 }
 0x58a   : > { %v3052_v27 = vmul.f32 %v7850_v8, %v11259_v28  ;;  %v11611_v15 = vadd.f32 %v5664_v34, %v11527_v5  ;;  %v5666_v29 = vpop.f32.mrb[175].mxu1  ;;  %v3502_v34 = vmul.f32 1.442695, %v3463_v12 }
 0x58b   : > { %v2942_v50 = vpop.xlane.xlu1 %2941  ;;  %v11608_v53 = vpop.f32.mrb[110].mxu0 }
 0x58c   : > { %7857 = vrcp.f32 %v2942_v50  ;;  %5904 = vrot.lane.b32.xlu0 %v3052_v27, %s8324_s18  ;;  %4523 = vrot.lane.b32.xlu1 %v3053_v47, %s8325_s22  ;;  %v5566_v35 = vpop.f32.mrb[111].mxu0 }
 0x58d   : > { %7859 = vpow2.f32 %v3496_v17  ;;  %v5669_v60 = vpop.f32.mrb[176].mxu1 }
 0x58e   : > { %v7852_v28 = vpop.eup %7851  ;;  %7861 = vrcp.f32 %v3554_v14  ;;  %v11621_v5 = vadd.f32 %v5669_v60, %v11539_v51  ;;  %v5671_v33 = vpop.f32.mrb[177].mxu1  ;;  %v3462_v14 = vsub.f32 0.0, %v11207_v1 }
 0x58f   : > { %v11616_v10 = vmul.f32 %v7852_v28, %v11271_v22  ;;  %v11618_v39 = vpop.f32.mrb[112].mxu0  ;;  %7863 = vrcp.f32 %v2939_v21  ;;  %v7854_v6 = vpop.eup %7853  ;;  %v3468_v28 = vsub.f32 0.0, %v11220_v20 }
 0x590   : > { %5906 = vrot.lane.b32.xlu1 %v3053_v47, %s8324_s18  ;;  %v5571_v13 = vpop.f32.mrb[113].mxu0  ;;  %7865 = vpow2.f32 %v3508_v46  ;;  %v7856_v51 = vpop.eup %7855  ;;  %v3683_v23 = vmul.f32 %v7854_v6, %v3053_v47  ;;  %v3500_v1 = vmul.f32 1.442695, %v3462_v14 }
 0x591   : > { %4525 = vrot.lane.b32.xlu0 %v11616_v10, %s8325_s22  ;;  %v5674_v25 = vpop.f32.mrb[178].mxu1  ;;  %v3557_v29 = vadd.f32 1.0, %v7856_v51  ;;  %v3512_v20 = vmul.f32 1.442695, %v3468_v28 }
 0x592   : > { %v11628_v8 = vadd.f32 %v5674_v25, %v11545_v31  ;;  %v5676_v17 = vpop.f32.mrb[179].mxu1 }
 0x593   : > { %v2948_v22 = vpop.xlane.xlu1 %2947  ;;  %v2945_v17 = vpop.xlane.xlu0 %2944 }
 0x594   : > { %7867 = vrcp.f32 %v2948_v22  ;;  %4521 = vrot.lane.b32.xlu1 %v3052_v27, %s8325_s22 }
 0x595   : > { %5908 = vrot.lane.b32.xlu0 %v11616_v10, %s8324_s18  ;;  %v5679_v50 = vpop.f32.mrb[180].mxu1  ;;  %7869 = vpow2.f32 %v3502_v34 }
 0x596   : > { %v7858_v30 = vpop.eup %7857  ;;  %v11639_v21 = vadd.f32 %v5679_v50, %v11550_v3  ;;  %v5681_v60 = vpop.f32.mrb[181].mxu1  ;;  %7871 = vrcp.f32 %v3557_v29 }
 0x597   : > { %v7860_v35 = vpop.eup %7859  ;;  %v11636_v31 = vmul.f32 %v7858_v30, %v11289_v2 }
 0x598   : > { %3729 = vperm.xlu1 %7754, %v3683_v23   ;;  %v7862_v46 = vpop.eup %7861  ;;  %v3556_v47 = vadd.f32 1.0, %v7860_v35  ;;  %v3465_v23 = vsub.f32 0.0, %v11209_v62  ;;  %v3470_v35 = vsub.f32 0.0, %v11225_v26 }
 0x599   : > { %4529 = vrot.lane.b32.xlu0 %v11636_v31, %s8325_s22  ;;  %v3682_v33 = vmul.f32 %v7862_v46, %v3052_v27  ;;  %v5684_v13 = vpop.f32.mrb[182].mxu1  ;;  %v7864_v12 = vpop.eup %7863 }
 0x59a   : > { %v11644_v2 = vadd.f32 %v5684_v13, %v11555_v4  ;;  %v5686_v3 = vpop.f32.mrb[183].mxu1  ;;  %v7866_v6 = vpop.eup %7865  ;;  %v3055_v27 = vmul.f32 %v7864_v12, %v11267_v58  ;;  %v3506_v60 = vmul.f32 1.442695, %v3465_v23  ;;  %v3516_v13 = vmul.f32 1.442695, %v3470_v35 }
 0x59b   : > { %v2954_v25 = vpop.xlane.xlu1 %2953  ;;  %v3562_v30 = vadd.f32 1.0, %v7866_v6 }
 0x59c   : > { %7873 = vrcp.f32 %v2954_v25  ;;  %3724 = vperm.xlu1 %7754, %v3682_v33  }
 0x59d   : > { %7875 = vpow2.f32 %v3500_v1  ;;  %5912 = vrot.lane.b32.xlu0 %v11636_v31, %s8324_s18  ;;  %v5689_v51 = vpop.f32.mrb[184].mxu1  ;;  %v3464_v1 = vsub.f32 0.0, %v11211_v9 }
 0x59e   : > { %v7868_v22 = vpop.eup %7867  ;;  %7877 = vrcp.f32 %v3556_v47  ;;  %v11653_v4 = vadd.f32 %v5689_v51, %v11561_v61  ;;  %v5691_v14 = vpop.f32.mrb[185].mxu1 }
 0x59f   : > { %7879 = vpow2.f32 %v3512_v20  ;;  %v11650_v34 = vmul.f32 %v7868_v22, %v11301_v32  ;;  %v7870_v58 = vpop.eup %7869  ;;  %v3504_v6 = vmul.f32 1.442695, %v3464_v1 }
 0x5a0   : > { %4527 = vrot.lane.b32.xlu1 %v3055_v27, %s8325_s22  ;;  %7881 = vrcp.f32 %v2945_v17  ;;  %v7872_v28 = vpop.eup %7871  ;;  %v3559_v46 = vadd.f32 1.0, %v7870_v58 }
 0x5a1   : > { %4533 = vrot.lane.b32.xlu0 %v11650_v34, %s8325_s22  ;;  %v5694_v50 = vpop.f32.mrb[186].mxu1  ;;  %7883 = vrcp.f32 %v3562_v30  ;;  %v3685_v47 = vmul.f32 %v7872_v28, %v3055_v27  ;;  %v2951_v30 = vpop.xlane.xlu0 %2950 }
 0x5a2   : > { %v11661_v32 = vadd.f32 %v5694_v50, %v11566_v52  ;;  %v5696_v61 = vpop.f32.mrb[187].mxu1 }
 0x5a3   : > { %v2960_v29 = vpop.xlane.xlu1 %2959 }
 0x5a4   : > { %5910 = vrot.lane.b32.xlu1 %v3055_v27, %s8324_s18  ;;  %7885 = vrcp.f32 %v2960_v29 }
 0x5a5   : > { %5916 = vrot.lane.b32.xlu0 %v11650_v34, %s8324_s18  ;;  %v5699_v26 = vpop.f32.mrb[188].mxu1  ;;  %7887 = vpow2.f32 %v3506_v60 }
 0x5a6   : > { %v7874_v62 = vpop.eup %7873  ;;  %v11669_v12 = vadd.f32 %v5699_v26, %v11572_v36  ;;  %v5701_v20 = vpop.f32.mrb[189].mxu1  ;;  %7889 = vrcp.f32 %v3559_v46 }
 0x5a7   : > { %v7876_v33 = vpop.eup %7875  ;;  %v3060_v52 = vmul.f32 %v7874_v62, %v11311_v43  ;;  %7891 = vpow2.f32 %v3516_v13 }
 0x5a8   : > { %v7878_v25 = vpop.eup %7877  ;;  %3739 = vperm.xlu1 %7754, %v3685_v47   ;;  %v3558_v27 = vadd.f32 1.0, %v7876_v33  ;;  %7893 = vpow2.f32 %v3504_v6  ;;  %v3469_v6 = vsub.f32 0.0, %v11218_v7 }
 0x5a9   : > { %v7880_v3 = vpop.eup %7879  ;;  %4537 = vrot.lane.b32.xlu0 %v3060_v52, %s8325_s22  ;;  %v3684_v9 = vmul.f32 %v7878_v25, %v11616_v10  ;;  %v5704_v22 = vpop.f32.mrb[190].mxu1  ;;  %v3472_v10 = vsub.f32 0.0, %v11231_v38 }
 0x5aa   : > { %v7882_v17 = vpop.eup %7881  ;;  %v11674_v43 = vadd.f32 %v5704_v22, %v11577_v57  ;;  %v5706_v36 = vpop.f32.mrb[191].mxu1  ;;  %v3564_v51 = vadd.f32 1.0, %v7880_v3  ;;  %7895 = vrcp.f32 %v3558_v27  ;;  %v3467_v57 = vsub.f32 0.0, %v11213_v37 }
 0x5ab   : > { %v7884_v14 = vpop.eup %7883  ;;  %v3057_v23 = vmul.f32 %v7882_v17, %v11285_v54  ;;  %v2966_v50 = vpop.xlane.xlu1 %2965  ;;  %v3520_v61 = vmul.f32 1.442695, %v3472_v10 }
 0x5ac   : > { %3734 = vperm.xlu1 %7754, %v3684_v9   ;;  %v3690_v58 = vmul.f32 %v7884_v14, %v3060_v52  ;;  %7897 = vrcp.f32 %v3564_v51  ;;  %v3510_v38 = vmul.f32 1.442695, %v3467_v57  ;;  %v2957_v9 = vpop.xlane.xlu0 %2956 }
 0x5ad   : > { %5920 = vrot.lane.b32.xlu0 %v3060_v52, %s8324_s18  ;;  %7899 = vrcp.f32 %v2951_v30  ;;  %v3474_v52 = vsub.f32 0.0, %v11242_v24  ;;  %v3514_v24 = vmul.f32 1.442695, %v3469_v6 }
 0x5ae   : > { %v7886_v35 = vpop.eup %7885  ;;  %7901 = vrcp.f32 %v2966_v50 }
 0x5af   : > { %v7888_v29 = vpop.eup %7887  ;;  %v3062_v28 = vmul.f32 %v7886_v35, %v11323_v0  ;;  %7903 = vpow2.f32 %v3520_v61  ;;  %v3524_v17 = vmul.f32 1.442695, %v3474_v52  ;;  %v3471_v35 = vsub.f32 0.0, %v11222_v18 }
 0x5b0   : > { %4531 = vrot.lane.b32.xlu1 %v3057_v23, %s8325_s22  ;;  %v7890_v60 = vpop.eup %7889  ;;  %v3561_v46 = vadd.f32 1.0, %v7888_v29  ;;  %7905 = vpow2.f32 %v3510_v38  ;;  %v2963_v57 = vpop.xlane.xlu0 %2962 }
 0x5b1   : > { %3764 = vperm.xlu0 %7753, %v3690_v58   ;;  %v7892_v54 = vpop.eup %7891  ;;  %v3687_v62 = vmul.f32 %v7890_v60, %v3057_v23  ;;  %v12544_v60 = vld [vmem:[#allocation121_spill] sm:$0xff]  ;;  %v3518_v38 = vmul.f32 1.442695, %v3471_v35 }
 0x5b2   : > { %v7894_v1 = vpop.eup %7893  ;;  %v3566_v47 = vadd.f32 1.0, %v7892_v54  ;;  %7907 = vrcp.f32 %v3561_v46 }
 0x5b3   : > { %v3560_v13 = vadd.f32 1.0, %v7894_v1  ;;  %v2972_v20 = vpop.xlane.xlu1 %2971 }
 0x5b4   : > { %5914 = vrot.lane.b32.xlu1 %v3057_v23, %s8324_s18  ;;  %v7896_v26 = vpop.eup %7895  ;;  %7909 = vrcp.f32 %v3566_v47 }
 0x5b5   : > { %4541 = vrot.lane.b32.xlu0 %v3062_v28, %s8325_s22  ;;  %v3686_v0 = vmul.f32 %v7896_v26, %v11636_v31  ;;  %7911 = vrcp.f32 %v2972_v20  ;;  %v12546_v26 = vld [vmem:[#allocation102_spill] sm:$0xff]  ;;  %v12547_v20 = vld [vmem:[#allocation55_spill] sm:$0xff] }
 0x5b6   : > { %v7898_v37 = vpop.eup %7897  ;;  %7913 = vrcp.f32 %v3560_v13 }
 0x5b7   : > { %v7900_v33 = vpop.eup %7899  ;;  %v3692_v25 = vmul.f32 %v7898_v37, %v3062_v28  ;;  %7915 = vrcp.f32 %v2957_v9  ;;  %v3478_v37 = vsub.f32 0.0, %v12546_v26 }
 0x5b8   : > { %3749 = vperm.xlu1 %7754, %v3687_v62   ;;  %v7902_v3 = vpop.eup %7901  ;;  %v3059_v22 = vmul.f32 %v7900_v33, %v11299_v11  ;;  %7917 = vpow2.f32 %v3524_v17  ;;  %v12545_v62 = vld [vmem:[#allocation111_spill] sm:$0xff]  ;;  %v12548_v17 = vld [vmem:[#allocation130_spill] sm:$0xff] }
 0x5b9   : > { %5924 = vrot.lane.b32.xlu0 %v3062_v28, %s8324_s18  ;;  %v3064_v31 = vmul.f32 %v7902_v3, %v11337_v55  ;;  %v7904_v27 = vpop.eup %7903  ;;  %7919 = vpow2.f32 %v3514_v24  ;;  %v3476_v55 = vsub.f32 0.0, %v11247_v63  ;;  %v2969_v3 = vpop.xlane.xlu0 %2968 }
 0x5ba   : > { %v7906_v36 = vpop.eup %7905  ;;  %v3568_v51 = vadd.f32 1.0, %v7904_v27 }
 0x5bb   : > { %v3563_v30 = vadd.f32 1.0, %v7906_v36  ;;  %v2978_v23 = vpop.xlane.xlu1 %2977  ;;  %v3528_v28 = vmul.f32 1.442695, %v3476_v55  ;;  %v12549_v36 = vld [vmem:[#allocation112_spill] sm:$0xff] }
 0x5bc   : > { %3744 = vperm.xlu1 %7754, %v3686_v0   ;;  %v7908_v7 = vpop.eup %7907  ;;  %7921 = vrcp.f32 %v3568_v51 }
 0x5bd   : > { %3774 = vperm.xlu0 %7753, %v3692_v25   ;;  %v3689_v14 = vmul.f32 %v7908_v7, %v3059_v22  ;;  %7923 = vrcp.f32 %v2978_v23  ;;  %v3473_v25 = vsub.f32 0.0, %v12547_v20  ;;  %v12550_v23 = vld [vmem:[#allocation104_spill] sm:$0xff] }
 0x5be   : > { %v7910_v11 = vpop.eup %7909  ;;  %7925 = vrcp.f32 %v3563_v30 }
 0x5bf   : > { %v3694_v10 = vmul.f32 %v7910_v11, %v3064_v31  ;;  %v7912_v50 = vpop.eup %7911  ;;  %7927 = vrcp.f32 %v2963_v57  ;;  %v3522_v24 = vmul.f32 1.442695, %v3473_v25 }
 0x5c0   : > { %4535 = vrot.lane.b32.xlu1 %v3059_v22, %s8325_s22  ;;  %v7914_v58 = vpop.eup %7913  ;;  %v3066_v54 = vmul.f32 %v7912_v50, %v12544_v60  ;;  %7929 = vpow2.f32 %v3528_v28 }
 0x5c1   : > { %4545 = vrot.lane.b32.xlu0 %v3064_v31, %s8325_s22  ;;  %v3688_v29 = vmul.f32 %v7914_v58, %v11650_v34  ;;  %v7916_v61 = vpop.eup %7915  ;;  %7931 = vpow2.f32 %v3518_v38  ;;  %v12552_v38 = vld [vmem:[#allocation139_spill] sm:$0xff] }
 0x5c2   : > { %v7918_v63 = vpop.eup %7917  ;;  %v3061_v46 = vmul.f32 %v7916_v61, %v12545_v62  ;;  %v12551_v61 = vld [vmem:[#allocation2_spill] sm:$0xff] }
 0x5c3   : > { %v7920_v1 = vpop.eup %7919  ;;  %v3570_v18 = vadd.f32 1.0, %v7918_v63  ;;  %v3475_v28 = vsub.f32 0.0, %v12551_v61 }
 0x5c4   : > { %5918 = vrot.lane.b32.xlu1 %v3059_v22, %s8324_s18  ;;  %v3565_v47 = vadd.f32 1.0, %v7920_v1  ;;  %v2984_v0 = vpop.xlane.xlu1 %2983  ;;  %v3532_v22 = vmul.f32 1.442695, %v3478_v37 }
 0x5c5   : > { %5928 = vrot.lane.b32.xlu0 %v3064_v31, %s8324_s18  ;;  %7933 = vrcp.f32 %v3570_v18  ;;  %v3526_v18 = vmul.f32 1.442695, %v3475_v28  ;;  %v12558_v28 = vld [vmem:[#allocation108_spill] sm:$0xff] }
 0x5c6   : > { %v7922_v34 = vpop.eup %7921  ;;  %7935 = vrcp.f32 %v2984_v0 }
 0x5c7   : > { %v3696_v33 = vmul.f32 %v7922_v34, %v3066_v54  ;;  %v7924_v13 = vpop.eup %7923  ;;  %7937 = vrcp.f32 %v3565_v47  ;;  %v12553_v34 = vld [vmem:[#allocation113_spill] sm:$0xff] }
 0x5c8   : > { %3759 = vperm.xlu1 %7754, %v3689_v14   ;;  %v7926_v52 = vpop.eup %7925  ;;  %v3068_v31 = vmul.f32 %v7924_v13, %v12548_v17  ;;  %7939 = vrcp.f32 %v2969_v3  ;;  %v2975_v14 = vpop.xlane.xlu0 %2974 }
 0x5c9   : > { %3784 = vperm.xlu0 %7753, %v3694_v10   ;;  %v3691_v6 = vmul.f32 %v7926_v52, %v3061_v46  ;;  %v7928_v9 = vpop.eup %7927  ;;  %7941 = vpow2.f32 %v3532_v22  ;;  %v3480_v10 = vsub.f32 0.0, %v12550_v23  ;;  %v12554_v52 = vld [vmem:[#allocation106_spill] sm:$0xff]  ;;  %v12557_v23 = vld [vmem:[#allocation119_spill] sm:$0xff] }
 0x5ca   : > { %v7930_v27 = vpop.eup %7929  ;;  %v3063_v51 = vmul.f32 %v7928_v9, %v12549_v36  ;;  %7943 = vpow2.f32 %v3522_v24  ;;  %v3482_v20 = vsub.f32 0.0, %v12554_v52  ;;  %v12555_v9 = vld [vmem:[#allocation3_spill] sm:$0xff] }
 0x5cb   : > { %v7932_v7 = vpop.eup %7931  ;;  %v3572_v11 = vadd.f32 1.0, %v7930_v27  ;;  %v3536_v63 = vmul.f32 1.442695, %v3480_v10  ;;  %v3477_v22 = vsub.f32 0.0, %v12555_v9 }
 0x5cc   : > { %3754 = vperm.xlu1 %7754, %v3688_v29   ;;  %v3567_v55 = vadd.f32 1.0, %v7932_v7  ;;  %v2990_v50 = vpop.xlane.xlu1 %2989  ;;  %v2981_v29 = vpop.xlane.xlu0 %2980  ;;  %v3540_v36 = vmul.f32 1.442695, %v3482_v20 }
 0x5cd   : > { %4549 = vrot.lane.b32.xlu0 %v3066_v54, %s8325_s22  ;;  %7945 = vrcp.f32 %v3572_v11  ;;  %v3530_v11 = vmul.f32 1.442695, %v3477_v22 }
 0x5ce   : > { %7947 = vrcp.f32 %v2990_v50 }
 0x5cf   : > { %v7934_v30 = vpop.eup %7933  ;;  %7949 = vrcp.f32 %v3567_v55 }
 0x5d0   : > { %4539 = vrot.lane.b32.xlu1 %v3061_v46, %s8325_s22  ;;  %v3698_v58 = vmul.f32 %v7934_v30, %v3068_v31  ;;  %v7936_v35 = vpop.eup %7935  ;;  %7951 = vrcp.f32 %v2975_v14  ;;  %v11714_v1 = vpop.xlane.xlu0 %2986 }
 0x5d1   : > { %5932 = vrot.lane.b32.xlu0 %v3066_v54, %s8324_s18  ;;  %v7938_v57 = vpop.eup %7937  ;;  %v3070_v62 = vmul.f32 %v7936_v35, %v12552_v38  ;;  %7953 = vpow2.f32 %v3536_v63  ;;  %v12559_v38 = vld [vmem:[#allocation58_spill] sm:$0xff] }
 0x5d2   : > { %v3693_v60 = vmul.f32 %v7938_v57, %v3063_v51  ;;  %v7940_v54 = vpop.eup %7939  ;;  %7955 = vpow2.f32 %v3526_v18  ;;  %v12560_v18 = vld [vmem:[#allocation115_spill] sm:$0xff] }
 0x5d3   : > { %v3065_v47 = vmul.f32 %v7940_v54, %v12553_v34  ;;  %v4261_v34 = vsub.f32 0.0, %v12560_v18  ;;  %v12565_v18 = vld [vmem:[#allocation137_spill] sm:$0xff] }
 0x5d4   : > { %5922 = vrot.lane.b32.xlu1 %v3061_v46, %s8324_s18  ;;  %v7942_v46 = vpop.eup %7941  ;;  %v11719_v0 = vpop.xlane.xlu0 %2992 }
 0x5d5   : > { %3794 = vperm.xlu0 %7753, %v3696_v33   ;;  %v7944_v26 = vpop.eup %7943  ;;  %v3574_v37 = vadd.f32 1.0, %v7942_v46  ;;  %v2996_v25 = vpop.xlane.xlu1 %2995 }
 0x5d6   : > { %v3569_v13 = vadd.f32 1.0, %v7944_v26 }
 0x5d7   : > { %v7946_v33 = vpop.eup %7945  ;;  %7957 = vrcp.f32 %v3574_v37 }
 0x5d8   : > { %3769 = vperm.xlu1 %7754, %v3691_v6   ;;  %v3700_v3 = vmul.f32 %v7946_v33, %v3070_v62  ;;  %v7948_v6 = vpop.eup %7947  ;;  %7959 = vrcp.f32 %v2996_v25 }
 0x5d9   : > { %4553 = vrot.lane.b32.xlu0 %v3068_v31, %s8325_s22  ;;  %v7950_v17 = vpop.eup %7949  ;;  %7961 = vrcp.f32 %v3569_v13 }
 0x5da   : > { %v3695_v27 = vmul.f32 %v7950_v17, %v3065_v47  ;;  %v7952_v24 = vpop.eup %7951  ;;  %7963 = vrcp.f32 %v2981_v29  ;;  %v12561_v17 = vld [vmem:[#allocation128_spill] sm:$0xff] }
 0x5db   : > { %v7954_v14 = vpop.eup %7953  ;;  %v3067_v10 = vmul.f32 %v7952_v24, %v12557_v23  ;;  %7965 = vpow2.f32 %v3540_v36  ;;  %v5708_v24 = vsub.f32 0.0, %v11583_v49  ;;  %v12562_v23 = vld [vmem:[#allocation103_spill] sm:$0xff] }
 0x5dc   : > { %4543 = vrot.lane.b32.xlu1 %v3063_v51, %s8325_s22  ;;  %v3002_v55 = vpop.xlane.xlu1 %3001  ;;  %v7956_v50 = vpop.eup %7955  ;;  %7967 = vpow2.f32 %v3530_v11 }
 0x5dd   : > { %5936 = vrot.lane.b32.xlu0 %v3068_v31, %s8324_s18  ;;  %v11725_v31 = vpop.xlane.xlu0 %2998  ;;  %v3571_v29 = vadd.f32 1.0, %v7956_v50 }
 0x5e0   : > { %5926 = vrot.lane.b32.xlu1 %v3063_v51, %s8324_s18  ;;  %v12556_v51 = vld [vmem:[#allocation147_spill] sm:$0xff] }
 0x5e1   : > { %3804 = vperm.xlu0 %7753, %v3698_v58   ;;  %v3072_v7 = vmul.f32 %v7948_v6, %v12556_v51  ;;  %v11728_v30 = vpop.xlane.xlu0 %3004  ;;  %v3576_v58 = vadd.f32 1.0, %v7954_v14  ;;  %v7958_v61 = vpop.eup %7957  ;;  %v5740_v51 = vmul.f32 1.442695, %v5708_v24 }
 0x5e2   : > { %v7960_v63 = vpop.eup %7959 }
 0x5e3   : > { %v3702_v54 = vmul.f32 %v7958_v61, %v3072_v7  ;;  %7969 = vrcp.f32 %v3576_v58  ;;  %v7962_v46 = vpop.eup %7961  ;;  %v3074_v52 = vmul.f32 %v7960_v63, %v11471_v41  ;;  %v12564_v63 = vld [vmem:[#allocation4_spill] sm:$0xff] }
 0x5e4   : > { %3779 = vperm.xlu1 %7754, %v3693_v60   ;;  %v3484_v60 = vsub.f32 0.0, %v12558_v28  ;;  %7971 = vrcp.f32 %v3002_v55  ;;  %v3697_v37 = vmul.f32 %v7962_v46, %v3067_v10  ;;  %v7964_v33 = vpop.eup %7963 }
 0x5e5   : > { %4557 = vrot.lane.b32.xlu0 %v3070_v62, %s8325_s22  ;;  %v11733_v35 = vpop.xlane.xlu0 %3010  ;;  %v3008_v57 = vpop.xlane.xlu1 %3007  ;;  %7973 = vrcp.f32 %v3571_v29 }
 0x5e6   : > { %v3544_v13 = vmul.f32 1.442695, %v3484_v60  ;;  %v7966_v25 = vpop.eup %7965  ;;  %7975 = vrcp.f32 %v11714_v1  ;;  %v12563_v60 = vld [vmem:[#allocation5_spill] sm:$0xff] }
 0x5e7   : > { %v7968_v22 = vpop.eup %7967  ;;  %v3578_v41 = vadd.f32 1.0, %v7966_v25  ;;  %v12567_v25 = vld [vmem:[#allocation117_spill] sm:$0xff] }
 0x5e8   : > { %4547 = vrot.lane.b32.xlu1 %v3065_v47, %s8325_s22  ;;  %7977 = vpow2.f32 %v3544_v13  ;;  %v3573_v36 = vadd.f32 1.0, %v7968_v22 }
 0x5e9   : > { %5940 = vrot.lane.b32.xlu0 %v3070_v62, %s8324_s18  ;;  %v3479_v62 = vsub.f32 0.0, %v12559_v38 }
 0x5eb   : > { %v3534_v20 = vmul.f32 1.442695, %v3479_v62 }
 0x5ec   : > { %5930 = vrot.lane.b32.xlu1 %v3065_v47, %s8324_s18  ;;  %v11740_v47 = vpop.xlane.xlu0 %3016  ;;  %v11742_v26 = vpop.xlane.xlu1 %3013 }
 0x5ed   : > { %3814 = vperm.xlu0 %7753, %v3700_v3   ;;  %v4293_v3 = vmul.f32 1.442695, %v4261_v34  ;;  %7979 = vpow2.f32 %v3534_v20  ;;  %v7970_v1 = vpop.eup %7969 }
 0x5ee   : > { %v3704_v14 = vmul.f32 %v7970_v1, %v3074_v52  ;;  %v7972_v55 = vpop.eup %7971 }
 0x5ef   : > { %7981 = vpow2.f32 %v4293_v3  ;;  %v7974_v49 = vpop.eup %7973  ;;  %v3076_v28 = vmul.f32 %v7972_v55, %v11494_v45  ;;  %v12566_v45 = vld [vmem:[#allocation110_spill] sm:$0xff] }
 0x5f0   : > { %3789 = vperm.xlu1 %7754, %v3695_v27   ;;  %v3069_v27 = vmul.f32 %v7964_v33, %v12561_v17  ;;  %7983 = vrcp.f32 %v3578_v41  ;;  %v7976_v58 = vpop.eup %7975  ;;  %v3486_v33 = vsub.f32 0.0, %v12566_v45  ;;  %v12568_v17 = vld [vmem:[#allocation105_spill] sm:$0xff]  ;;  %v12571_v45 = vld [vmem:[#allocation6_spill] sm:$0xff] }
 0x5f1   : > { %4561 = vrot.lane.b32.xlu0 %v3072_v7, %s8325_s22  ;;  %7985 = vrcp.f32 %v3573_v36  ;;  %v3071_v34 = vmul.f32 %v7976_v58, %v12565_v18 }
 0x5f2   : > { %v11746_v6 = vpop.permute.xlu1 %5902  ;;  %v11748_v9 = vpop.permute.xlu0 %4519  ;;  %7987 = vrcp.f32 %v3008_v57  ;;  %v3699_v50 = vmul.f32 %v7974_v49, %v3069_v27  ;;  %v3548_v36 = vmul.f32 1.442695, %v3486_v33  ;;  %v12572_v33 = vld [vmem:[#allocation107_spill] sm:$0xff] }
 0x5f3   : > { %7989 = vpow2.f32 %v5740_v51  ;;  %v7978_v57 = vpop.eup %7977 }
 0x5f4   : > { %4551 = vrot.lane.b32.xlu1 %v3067_v10, %s8325_s22  ;;  %7991 = vrcp.f32 %v11719_v0  ;;  %v3580_v20 = vadd.f32 1.0, %v7978_v57  ;;  %v4263_v0 = vsub.f32 0.0, %v12567_v25 }
 0x5f5   : > { %5944 = vrot.lane.b32.xlu0 %v3072_v7, %s8324_s18 }
 0x5f6   : > { %v11756_v7 = vpop.permute.xlu1 %4517  ;;  %v11758_v11 = vpop.permute.xlu0 %5900  ;;  %v4297_v49 = vmul.f32 1.442695, %v4263_v0 }
 0x5f7   : > { %v7980_v62 = vpop.eup %7979 }
 0x5f8   : > { %5934 = vrot.lane.b32.xlu1 %v3067_v10, %s8324_s18  ;;  %v3481_v10 = vsub.f32 0.0, %v12562_v23  ;;  %v3575_v3 = vadd.f32 1.0, %v7980_v62  ;;  %v12570_v62 = vld [vmem:[#allocation145_spill] sm:$0xff] }
 0x5f9   : > { %3824 = vperm.xlu0 %7753, %v3702_v54  }
 0x5fa   : > { %v3538_v46 = vmul.f32 1.442695, %v3481_v10  ;;  %v12569_v10 = vld [vmem:[#allocation120_spill] sm:$0xff] }
 0x5fc   : > { %3799 = vperm.xlu1 %7754, %v3697_v37   ;;  %v7982_v37 = vpop.eup %7981  ;;  %7993 = vpow2.f32 %v3538_v46 }
 0x5fd   : > { %4565 = vrot.lane.b32.xlu0 %v3074_v52, %s8325_s22  ;;  %v7984_v22 = vpop.eup %7983  ;;  %v4357_v24 = vadd.f32 1.0, %v7982_v37  ;;  %7995 = vrcp.f32 %v3580_v20  ;;  %v3485_v20 = vsub.f32 0.0, %v12572_v33 }
 0x5fe   : > { %v7986_v41 = vpop.eup %7985  ;;  %7997 = vrcp.f32 %v3575_v3  ;;  %v5712_v3 = vsub.f32 0.0, %v11618_v39 }
 0x5ff   : > { %v7988_v55 = vpop.eup %7987  ;;  %7999 = vrcp.f32 %v4357_v24 }
 0x600   : > { %4555 = vrot.lane.b32.xlu1 %v3069_v27, %s8325_s22  ;;  %v7990_v23 = vpop.eup %7989  ;;  %8001 = vpow2.f32 %v3548_v36  ;;  %v5748_v39 = vmul.f32 1.442695, %v5712_v3 }
 0x601   : > { %5948 = vrot.lane.b32.xlu0 %v3074_v52, %s8324_s18  ;;  %8003 = vpow2.f32 %v4297_v49 }
 0x602   : > { %8005 = vrcp.f32 %v11725_v31 }
 0x604   : > { %5938 = vrot.lane.b32.xlu1 %v3069_v27, %s8324_s18  ;;  %v3483_v27 = vsub.f32 0.0, %v12568_v17 }
 0x605   : > { %3834 = vperm.xlu0 %7753, %v3704_v14   ;;  %v3706_v14 = vmul.f32 %v7984_v22, %v3076_v28 }
 0x606   : > { %v3542_v58 = vmul.f32 1.442695, %v3483_v27 }
 0x607   : > { %v3715_v61 = vpop.permute.xlu1 %3714  ;;  %v3720_v29 = vpop.permute.xlu0 %3719 }
 0x608   : > { %v3872_v54 = vmul.f32 %v3715_v61, %v12563_v60  ;;  %v3873_v38 = vmul.f32 %v3720_v29, %v12564_v63  ;;  %3809 = vperm.xlu1 %7754, %v3699_v50   ;;  %v4265_v50 = vsub.f32 0.0, %v12569_v10  ;;  %v3701_v61 = vmul.f32 %v7986_v41, %v3071_v34  ;;  %v7992_v29 = vpop.eup %7991  ;;  %v12573_v41 = vld [vmem:[#allocation7_spill] sm:$0xff] }
 0x609   : > { %4569 = vrot.lane.b32.xlu0 %v3076_v28, %s8325_s22  ;;  %v5710_v60 = vsub.f32 0.0, %v11600_v42  ;;  %v3078_v63 = vmul.f32 %v7988_v55, %v11514_v19  ;;  %8007 = vpow2.f32 %v3542_v58  ;;  %v3073_v46 = vmul.f32 %v7992_v29, %v12570_v62  ;;  %v7994_v37 = vpop.eup %7993  ;;  %v12574_v55 = vld [vmem:[#allocation123_spill] sm:$0xff] }
 0x60a   : > { %3904 = vst.msk [vmem:[%s11765_s23] sm:$0xff] %vm735_vm0, %v3872_v54  ;;  %3905 = vst.msk [vmem:[%s11765_s23 + $0x8] sm:$0xff] %vm735_vm0, %v3873_v38  ;;  %v5804_v38 = vadd.f32 1.0, %v7990_v23  ;;  %v4301_v57 = vmul.f32 1.442695, %v4265_v50  ;;  %v7996_v31 = vpop.eup %7995  ;;  %v3577_v0 = vadd.f32 1.0, %v7994_v37 }
 0x60b   : > { %v11778_v13 = vpop.permute.xlu1 %4523  ;;  %v11780_v52 = vpop.permute.xlu0 %5904  ;;  %v5744_v18 = vmul.f32 1.442695, %v5710_v60  ;;  %v3708_v27 = vmul.f32 %v7996_v31, %v3078_v63  ;;  %v3546_v23 = vmul.f32 1.442695, %v3485_v20  ;;  %v5714_v31 = vsub.f32 0.0, %v11485_v16 }
 0x60c   : > { %4559 = vrot.lane.b32.xlu1 %v3071_v34, %s8325_s22  ;;  %8009 = vrcp.f32 %v5804_v38  ;;  %v7998_v25 = vpop.eup %7997  ;;  %v12575_v38 = vld [vmem:[#allocation114_spill] sm:$0xff] }
 0x60d   : > { %5952 = vrot.lane.b32.xlu0 %v3076_v28, %s8324_s18  ;;  %8011 = vpow2.f32 %v4301_v57  ;;  %v8000_v24 = vpop.eup %7999  ;;  %v3703_v10 = vmul.f32 %v7998_v25, %v3073_v46  ;;  %v4262_v57 = vsub.f32 0.0, %v12575_v38  ;;  %v5752_v16 = vmul.f32 1.442695, %v5714_v31 }
 0x60e   : > { %8013 = vrcp.f32 %v11742_v26  ;;  %v4267_v26 = vsub.f32 0.0, %v12574_v55  ;;  %v4613_v58 = vmul.f32 %v8000_v24, %v11756_v7  ;;  %v12578_v55 = vld [vmem:[#allocation8_spill] sm:$0xff] }
 0x60f   : > { %v11786_v1 = vpop.permute.xlu1 %5906  ;;  %v11788_v51 = vpop.permute.xlu0 %4525  ;;  %8015 = vpow2.f32 %v5744_v18  ;;  %v12576_v18 = vld [vmem:[#allocation125_spill] sm:$0xff] }
 0x610   : > { %5942 = vrot.lane.b32.xlu1 %v3071_v34, %s8324_s18  ;;  %8017 = vrcp.f32 %v3577_v0  ;;  %v4305_v62 = vmul.f32 1.442695, %v4267_v26 }
 0x611   : > { %3844 = vperm.xlu0 %7753, %v3706_v14   ;;  %v8002_v14 = vpop.eup %8001  ;;  %8019 = vrcp.f32 %v11728_v30  ;;  %v4295_v30 = vmul.f32 1.442695, %v4262_v57 }
 0x612   : > { %v8004_v49 = vpop.eup %8003  ;;  %8021 = vpow2.f32 %v3546_v23  ;;  %v12579_v23 = vld [vmem:[#allocation109_spill] sm:$0xff] }
 0x613   : > { %v11793_v54 = vpop.permute.xlu1 %4521  ;;  %v11795_v28 = vpop.permute.xlu0 %5908  ;;  %v4359_v37 = vadd.f32 1.0, %v8004_v49  ;;  %8023 = vpow2.f32 %v5748_v39 }
 0x614   : > { %3819 = vperm.xlu1 %7754, %v3701_v61   ;;  %v8006_v50 = vpop.eup %8005 }
 0x615   : > { %4573 = vrot.lane.b32.xlu0 %v3078_v63, %s8325_s22  ;;  %v8008_v60 = vpop.eup %8007  ;;  %v3075_v7 = vmul.f32 %v8006_v50, %v11467_v59 }
 0x617   : > { %v3730_v42 = vpop.permute.xlu1 %3729  ;;  %v11801_v34 = vpop.permute.xlu0 %4529 }
 0x618   : > { %v3875_v19 = vmul.f32 %v3730_v42, %v12571_v45  ;;  %4563 = vrot.lane.b32.xlu1 %v3073_v46, %s8325_s22  ;;  %v4269_v42 = vsub.f32 0.0, %v12576_v18 }
 0x619   : > { %5956 = vrot.lane.b32.xlu0 %v3078_v63, %s8324_s18  ;;  %v3582_v63 = vadd.f32 1.0, %v8002_v14 }
 0x61a   : > { %3907 = vst.msk [vmem:[%s11765_s23 + $0x18] sm:$0xff] %vm735_vm0, %v3875_v19  ;;  %v3579_v19 = vadd.f32 1.0, %v8008_v60 }
 0x61b   : > { %v3725_v22 = vpop.permute.xlu1 %3724  ;;  %v11811_v17 = vpop.permute.xlu0 %5912  ;;  %8025 = vrcp.f32 %v3582_v63 }
 0x61c   : > { %v3874_v36 = vmul.f32 %v3725_v22, %v12573_v41  ;;  %5946 = vrot.lane.b32.xlu1 %v3073_v46, %s8324_s18  ;;  %v8010_v46 = vpop.eup %8009  ;;  %8027 = vpow2.f32 %v4305_v62  ;;  %v4309_v22 = vmul.f32 1.442695, %v4269_v42  ;;  %v12577_v41 = vld [vmem:[#allocation163_spill] sm:$0xff]  ;;  %v12581_v62 = vld [vmem:[#allocation9_spill] sm:$0xff] }
 0x61d   : > { %3854 = vperm.xlu0 %7753, %v3708_v27   ;;  %v8012_v45 = vpop.eup %8011  ;;  %v5996_v33 = vmul.f32 %v8010_v46, %v11758_v11  ;;  %8029 = vrcp.f32 %v4359_v37  ;;  %v5709_v27 = vsub.f32 0.0, %v11592_v56  ;;  %v3487_v56 = vsub.f32 0.0, %v12579_v23  ;;  %v12582_v46 = vld [vmem:[#allocation127_spill] sm:$0xff] }
 0x61e   : > { %3906 = vst.msk [vmem:[%s11765_s23 + $0x10] sm:$0xff] %vm735_vm0, %v3874_v36  ;;  %v8014_v0 = vpop.eup %8013  ;;  %v4361_v59 = vadd.f32 1.0, %v8012_v45  ;;  %8031 = vrcp.f32 %v3579_v19  ;;  %v4271_v37 = vsub.f32 0.0, %v12582_v46  ;;  %v12583_v19 = vld [vmem:[#allocation155_spill] sm:$0xff] }
 0x61f   : > { %v11819_v61 = vpop.permute.xlu1 %4527  ;;  %v11821_v29 = vpop.permute.xlu0 %4533  ;;  %v3080_v36 = vmul.f32 %v8014_v0, %v12577_v41  ;;  %8033 = vpow2.f32 %v4295_v30  ;;  %v3550_v45 = vmul.f32 1.442695, %v3487_v56 }
 0x620   : > { %3829 = vperm.xlu1 %7754, %v3703_v10   ;;  %v8016_v3 = vpop.eup %8015  ;;  %8035 = vpow2.f32 %v4309_v22  ;;  %v5742_v10 = vmul.f32 1.442695, %v5709_v27  ;;  %v4313_v41 = vmul.f32 1.442695, %v4271_v37 }
 0x621   : > { %4647 = vperm.xlu0 %7753, %v4613_v58   ;;  %v5806_v14 = vadd.f32 1.0, %v8016_v3  ;;  %v8018_v49 = vpop.eup %8017  ;;  %8037 = vrcp.f32 %v4361_v59  ;;  %v12580_v58 = vld [vmem:[#allocation157_spill] sm:$0xff]  ;;  %v12584_v59 = vld [vmem:[#allocation116_spill] sm:$0xff] }
 0x622   : > { %v3705_v50 = vmul.f32 %v8018_v49, %v3075_v7  ;;  %v8020_v39 = vpop.eup %8019  ;;  %8039 = vpow2.f32 %v5752_v16  ;;  %v5716_v60 = vsub.f32 0.0, %v12580_v58  ;;  %v4264_v27 = vsub.f32 0.0, %v12584_v59  ;;  %v12586_v49 = vld [vmem:[#allocation118_spill] sm:$0xff] }
 0x623   : > { %v11829_v20 = vpop.permute.xlu1 %5910  ;;  %v11831_v25 = vpop.permute.xlu0 %5916  ;;  %8041 = vrcp.f32 %v5806_v14  ;;  %v3077_v31 = vmul.f32 %v8020_v39, %v12583_v19  ;;  %v12585_v14 = vld [vmem:[#allocation15_spill] sm:$0xff]  ;;  %v4266_v23 = vsub.f32 0.0, %v12586_v49  ;;  %v5711_v59 = vsub.f32 0.0, %v11608_v53 }
 0x624   : > { %4567 = vrot.lane.b32.xlu1 %v3075_v7, %s8325_s22  ;;  %v8022_v57 = vpop.eup %8021  ;;  %8043 = vrcp.f32 %v11733_v35  ;;  %v5756_v0 = vmul.f32 1.442695, %v5716_v60 }
 0x625   : > { %6030 = vperm.xlu0 %7753, %v5996_v33   ;;  %v8024_v42 = vpop.eup %8023  ;;  %8045 = vpow2.f32 %v5742_v10 }
 0x626   : > { %v5808_v16 = vadd.f32 1.0, %v8024_v42  ;;  %8047 = vpow2.f32 %v3550_v45  ;;  %v4303_v45 = vmul.f32 1.442695, %v4266_v23 }
 0x627   : > { %v3740_v11 = vpop.permute.xlu1 %3739  ;;  %v11835_v24 = vpop.permute.xlu0 %4537  ;;  %8049 = vpow2.f32 %v5756_v0 }
 0x628   : > { %v3877_v26 = vmul.f32 %v3740_v11, %v12578_v55  ;;  %5950 = vrot.lane.b32.xlu1 %v3075_v7, %s8324_s18  ;;  %v8026_v7 = vpop.eup %8025  ;;  %8051 = vrcp.f32 %v5808_v16  ;;  %v12589_v16 = vld [vmem:[#allocation10_spill] sm:$0xff] }
 0x629   : > { %4577 = vrot.lane.b32.xlu0 %v3080_v36, %s8325_s22  ;;  %v8028_v33 = vpop.eup %8027  ;;  %v3710_v3 = vmul.f32 %v8026_v7, %v3080_v36  ;;  %8053 = vpow2.f32 %v4313_v41 }
 0x62a   : > { %3909 = vst.msk [vmem:[%s11765_s23 + $0x28] sm:$0xff] %vm735_vm0, %v3877_v26  ;;  %v8030_v22 = vpop.eup %8029  ;;  %v4363_v56 = vadd.f32 1.0, %v8028_v33 }
 0x62b   : > { %v3735_v63 = vpop.permute.xlu1 %3734  ;;  %v11845_v38 = vpop.permute.xlu0 %5920  ;;  %v4615_v58 = vmul.f32 %v8030_v22, %v11793_v54 }
 0x62c   : > { %v3876_v18 = vmul.f32 %v3735_v63, %v12581_v62  ;;  %3839 = vperm.xlu1 %7754, %v3705_v50   ;;  %v8032_v11 = vpop.eup %8031  ;;  %v12587_v50 = vld [vmem:[#allocation160_spill] sm:$0xff]  ;;  %v4299_v62 = vmul.f32 1.442695, %v4264_v27  ;;  %8055 = vrcp.f32 %v4363_v56 }
 0x62d   : > { %5960 = vrot.lane.b32.xlu0 %v3080_v36, %s8324_s18  ;;  %v8034_v26 = vpop.eup %8033  ;;  %v3581_v36 = vadd.f32 1.0, %v8022_v57  ;;  %v5718_v39 = vsub.f32 0.0, %v12587_v50  ;;  %v12588_v57 = vld [vmem:[#allocation131_spill] sm:$0xff]  ;;  %v3707_v54 = vmul.f32 %v8032_v11, %v3077_v31  ;;  %v12590_v11 = vld [vmem:[#allocation158_spill] sm:$0xff] }
 0x62e   : > { %3908 = vst.msk [vmem:[%s11765_s23 + $0x20] sm:$0xff] %vm735_vm0, %v3876_v18  ;;  %v8036_v10 = vpop.eup %8035  ;;  %v4358_v46 = vadd.f32 1.0, %v8034_v26  ;;  %v4273_v37 = vsub.f32 0.0, %v12588_v57  ;;  %v12591_v26 = vld [vmem:[#allocation164_spill] sm:$0xff]  ;;  %v12592_v50 = vld [vmem:[#allocation11_spill] sm:$0xff] }
 0x62f   : > { %v11854_v30 = vpop.permute.xlu1 %4531  ;;  %v8038_v63 = vpop.eup %8037  ;;  %8057 = vrcp.f32 %v3581_v36  ;;  %v5760_v33 = vmul.f32 1.442695, %v5718_v39  ;;  %v5720_v49 = vsub.f32 0.0, %v12591_v26  ;;  %v5746_v36 = vmul.f32 1.442695, %v5711_v59 }
 0x630   : > { %4571 = vrot.lane.b32.xlu1 %v3077_v31, %s8325_s22  ;;  %v3765_v35 = vpop.permute.xlu0 %3764  ;;  %v8040_v42 = vpop.eup %8039  ;;  %8059 = vpow2.f32 %v4299_v62  ;;  %v4617_v53 = vmul.f32 %v8038_v63, %v11788_v51  ;;  %v12593_v62 = vld [vmem:[#allocation133_spill] sm:$0xff] }
 0x631   : > { %v3882_v55 = vmul.f32 %v3765_v35, %v12585_v14  ;;  %3864 = vperm.xlu0 %7753, %v3710_v3   ;;  %v8042_v7 = vpop.eup %8041  ;;  %v5810_v27 = vadd.f32 1.0, %v8040_v42  ;;  %8061 = vrcp.f32 %v4358_v46  ;;  %v4317_v14 = vmul.f32 1.442695, %v4273_v37  ;;  %v12594_v46 = vld [vmem:[#allocation17_spill] sm:$0xff] }
 0x632   : > { %v8044_v19 = vpop.eup %8043  ;;  %v5998_v0 = vmul.f32 %v8042_v7, %v11780_v52  ;;  %8063 = vpow2.f32 %v4303_v45  ;;  %v4275_v42 = vsub.f32 0.0, %v12593_v62  ;;  %v5764_v63 = vmul.f32 1.442695, %v5720_v49  ;;  %v12598_v49 = vld [vmem:[#allocation166_spill] sm:$0xff] }
 0x633   : > { %3914 = vst.msk [vmem:[%s11765_s23 + $0x50] sm:$0xff] %vm735_vm0, %v3882_v55  ;;  %v11864_v60 = vpop.permute.xlu1 %5914  ;;  %v8046_v22 = vpop.eup %8045  ;;  %v3079_v52 = vmul.f32 %v8044_v19, %v12590_v11  ;;  %8065 = vpow2.f32 %v5760_v33  ;;  %v12595_v19 = vld [vmem:[#allocation122_spill] sm:$0xff] }
 0x634   : > { %5954 = vrot.lane.b32.xlu1 %v3077_v31, %s8324_s18  ;;  %v11867_v18 = vpop.permute.xlu0 %4541  ;;  %v4365_v31 = vadd.f32 1.0, %v8036_v10  ;;  %v5805_v55 = vadd.f32 1.0, %v8046_v22  ;;  %v8048_v56 = vpop.eup %8047  ;;  %8067 = vrcp.f32 %v5810_v27  ;;  %v4268_v33 = vsub.f32 0.0, %v12595_v19  ;;  %v12596_v27 = vld [vmem:[#allocation154_spill] sm:$0xff] }
 0x635   : > { %4657 = vperm.xlu0 %7753, %v4615_v58   ;;  %v8050_v58 = vpop.eup %8049  ;;  %8069 = vpow2.f32 %v4317_v14  ;;  %v4321_v59 = vmul.f32 1.442695, %v4275_v42  ;;  %v3583_v26 = vadd.f32 1.0, %v8048_v56 }
 0x636   : > { %v8052_v37 = vpop.eup %8051  ;;  %8071 = vrcp.f32 %v4365_v31 }
 0x637   : > { %v3750_v3 = vpop.permute.xlu1 %3749  ;;  %v8054_v51 = vpop.eup %8053  ;;  %8073 = vrcp.f32 %v5805_v55  ;;  %v6000_v7 = vmul.f32 %v8052_v37, %v11795_v28 }
 0x638   : > { %v3879_v35 = vmul.f32 %v3750_v3, %v12589_v16  ;;  %3849 = vperm.xlu1 %7754, %v3707_v54   ;;  %v11873_v41 = vpop.permute.xlu0 %5924  ;;  %v8056_v54 = vpop.eup %8055  ;;  %8075 = vpow2.f32 %v5746_v36  ;;  %v5713_v16 = vsub.f32 0.0, %v12596_v27  ;;  %v4367_v31 = vadd.f32 1.0, %v8054_v51  ;;  %v12602_v27 = vld [vmem:[#allocation25_spill] sm:$0xff] }
 0x639   : > { %6040 = vperm.xlu0 %7753, %v5998_v0   ;;  %v5812_v0 = vadd.f32 1.0, %v8050_v58  ;;  %v8058_v22 = vpop.eup %8057  ;;  %8077 = vrcp.f32 %v11740_v47 }
 0x63a   : > { %3911 = vst.msk [vmem:[%s11765_s23 + $0x38] sm:$0xff] %vm735_vm0, %v3879_v35  ;;  %v8060_v28 = vpop.eup %8059  ;;  %v12597_v35 = vld [vmem:[#allocation124_spill] sm:$0xff]  ;;  %v3709_v11 = vmul.f32 %v8058_v22, %v3079_v52  ;;  %8079 = vpow2.f32 %v5764_v63  ;;  %v5750_v58 = vmul.f32 1.442695, %v5713_v16 }
 0x63b   : > { %v3745_v23 = vpop.permute.xlu1 %3744  ;;  %v4270_v14 = vsub.f32 0.0, %v12597_v35  ;;  %v8062_v55 = vpop.eup %8061  ;;  %8081 = vrcp.f32 %v5812_v0  ;;  %v4360_v22 = vadd.f32 1.0, %v8060_v28 }
 0x63c   : > { %v3878_v39 = vmul.f32 %v3745_v23, %v12592_v50  ;;  %4575 = vrot.lane.b32.xlu1 %v3079_v52, %s8325_s22  ;;  %v3775_v10 = vpop.permute.xlu0 %3774  ;;  %v4619_v23 = vmul.f32 %v8056_v54, %v11801_v34  ;;  %v8064_v50 = vpop.eup %8063  ;;  %8083 = vpow2.f32 %v4321_v59  ;;  %v4614_v56 = vmul.f32 %v8062_v55, %v11748_v9  ;;  %v12599_v34 = vld [vmem:[#allocation135_spill] sm:$0xff]  ;;  %v12600_v54 = vld [vmem:[#allocation12_spill] sm:$0xff] }
 0x63d   : > { %v3884_v57 = vmul.f32 %v3775_v10, %v12594_v46  ;;  %4667 = vperm.xlu0 %7753, %v4617_v53   ;;  %v5722_v53 = vsub.f32 0.0, %v12598_v49  ;;  %v8066_v10 = vpop.eup %8065  ;;  %v4311_v62 = vmul.f32 1.442695, %v4270_v14  ;;  %8085 = vrcp.f32 %v4367_v31  ;;  %v12601_v9 = vld [vmem:[#allocation156_spill] sm:$0xff] }
 0x63e   : > { %3910 = vst.msk [vmem:[%s11765_s23 + $0x30] sm:$0xff] %vm735_vm0, %v3878_v39  ;;  %v4307_v39 = vmul.f32 1.442695, %v4268_v33  ;;  %8087 = vrcp.f32 %v3583_v26  ;;  %v4277_v46 = vsub.f32 0.0, %v12599_v34  ;;  %v5715_v59 = vsub.f32 0.0, %v12601_v9 }
 0x63f   : > { %3916 = vst.msk [vmem:[%s11765_s23 + $0x60] sm:$0xff] %vm735_vm0, %v3884_v57  ;;  %v11889_v45 = vpop.permute.xlu1 %4535  ;;  %v5768_v57 = vmul.f32 1.442695, %v5722_v53  ;;  %v5724_v55 = vsub.f32 0.0, %v11564_v40  ;;  %v4362_v49 = vadd.f32 1.0, %v8064_v50  ;;  %v12603_v53 = vld [vmem:[#allocation13_spill] sm:$0xff] }
 0x640   : > { %5958 = vrot.lane.b32.xlu1 %v3079_v52, %s8324_s18  ;;  %v11893_v3 = vpop.permute.xlu0 %4545  ;;  %v8068_v52 = vpop.eup %8067  ;;  %8089 = vpow2.f32 %v4307_v39 }
 0x641   : > { %6050 = vperm.xlu0 %7753, %v6000_v7   ;;  %v8070_v42 = vpop.eup %8069  ;;  %v6002_v37 = vmul.f32 %v8068_v52, %v11811_v17  ;;  %v5814_v7 = vadd.f32 1.0, %v8066_v10  ;;  %8091 = vpow2.f32 %v5750_v58  ;;  %v12604_v10 = vld [vmem:[#allocation138_spill] sm:$0xff]  ;;  %v5754_v52 = vmul.f32 1.442695, %v5715_v59 }
 0x642   : > { %v8072_v63 = vpop.eup %8071  ;;  %8093 = vpow2.f32 %v4311_v62  ;;  %v4369_v17 = vadd.f32 1.0, %v8070_v42  ;;  %v4279_v58 = vsub.f32 0.0, %v12604_v10  ;;  %v12605_v62 = vld [vmem:[#allocation161_spill] sm:$0xff]  ;;  %v5772_v42 = vmul.f32 1.442695, %v5724_v55 }
 0x643   : > { %v11900_v36 = vpop.permute.xlu1 %5918  ;;  %v8074_v0 = vpop.eup %8073  ;;  %8095 = vpow2.f32 %v5768_v57  ;;  %v4621_v28 = vmul.f32 %v8072_v63, %v11821_v29  ;;  %v5726_v59 = vsub.f32 0.0, %v11575_v44  ;;  %v12608_v55 = vld [vmem:[#allocation29_spill] sm:$0xff] }
 0x644   : > { %3859 = vperm.xlu1 %7754, %v3709_v11   ;;  %v11902_v47 = vpop.permute.xlu0 %5928  ;;  %v8076_v35 = vpop.eup %8075  ;;  %v5997_v14 = vmul.f32 %v8074_v0, %v11746_v6  ;;  %v4325_v11 = vmul.f32 1.442695, %v4277_v46  ;;  %8097 = vrcp.f32 %v5814_v7 }
 0x645   : > { %4677 = vperm.xlu0 %7753, %v4619_v23   ;;  %v8078_v31 = vpop.eup %8077  ;;  %8099 = vrcp.f32 %v4360_v22  ;;  %v5807_v29 = vadd.f32 1.0, %v8076_v35 }
 0x646   : > { %v8080_v6 = vpop.eup %8079  ;;  %8101 = vrcp.f32 %v4369_v17 }
 0x647   : > { %v3760_v51 = vpop.permute.xlu1 %3759  ;;  %v8082_v40 = vpop.eup %8081  ;;  %8103 = vpow2.f32 %v4325_v11  ;;  %v5816_v63 = vadd.f32 1.0, %v8080_v6  ;;  %v5776_v6 = vmul.f32 1.442695, %v5726_v59 }
 0x648   : > { %v3881_v19 = vmul.f32 %v3760_v51, %v12600_v54  ;;  %4652 = vperm.xlu1 %7754, %v4614_v56   ;;  %v3785_v33 = vpop.permute.xlu0 %3784  ;;  %v3081_v56 = vmul.f32 %v8078_v31, %v12605_v62  ;;  %v8084_v50 = vpop.eup %8083  ;;  %v6004_v34 = vmul.f32 %v8082_v40, %v11831_v25  ;;  %8105 = vrcp.f32 %v4362_v49 }
 0x649   : > { %v3886_v16 = vmul.f32 %v3785_v33, %v12602_v27  ;;  %6060 = vperm.xlu0 %7753, %v6002_v37   ;;  %v8086_v57 = vpop.eup %8085  ;;  %v12606_v37 = vld [vmem:[#allocation126_spill] sm:$0xff]  ;;  %8107 = vpow2.f32 %v5754_v52  ;;  %v12607_v33 = vld [vmem:[#allocation159_spill] sm:$0xff]  ;;  %v4371_v9 = vadd.f32 1.0, %v8084_v50 }
 0x64a   : > { %3913 = vst.msk [vmem:[%s11765_s23 + $0x48] sm:$0xff] %vm735_vm0, %v3881_v19  ;;  %v4272_v51 = vsub.f32 0.0, %v12606_v37  ;;  %v8088_v54 = vpop.eup %8087  ;;  %v4329_v19 = vmul.f32 1.442695, %v4279_v58  ;;  %v5717_v0 = vsub.f32 0.0, %v12607_v33  ;;  %8109 = vrcp.f32 %v5807_v29  ;;  %v12610_v29 = vld [vmem:[#allocation14_spill] sm:$0xff] }
 0x64b   : > { %3918 = vst.msk [vmem:[%s11765_s23 + $0x70] sm:$0xff] %vm735_vm0, %v3886_v16  ;;  %v3755_v26 = vpop.permute.xlu1 %3754  ;;  %v8090_v22 = vpop.eup %8089  ;;  %8111 = vpow2.f32 %v5772_v42  ;;  %v4623_v27 = vmul.f32 %v8086_v57, %v11835_v24  ;;  %v3711_v49 = vmul.f32 %v8088_v54, %v3081_v56 }
 0x64c   : > { %v3880_v23 = vmul.f32 %v3755_v26, %v12603_v53  ;;  %6035 = vperm.xlu1 %7754, %v5997_v14   ;;  %v11918_v39 = vpop.permute.xlu0 %4549  ;;  %v8092_v25 = vpop.eup %8091  ;;  %v4315_v17 = vmul.f32 1.442695, %v4272_v51  ;;  %8113 = vrcp.f32 %v5816_v63  ;;  %v5758_v11 = vmul.f32 1.442695, %v5717_v0  ;;  %v12609_v53 = vld [vmem:[#allocation141_spill] sm:$0xff] }
 0x64d   : > { %4687 = vperm.xlu0 %7753, %v4621_v28   ;;  %v8094_v35 = vpop.eup %8093  ;;  %8115 = vpow2.f32 %v4329_v19  ;;  %v5809_v44 = vadd.f32 1.0, %v8092_v25  ;;  %v12612_v19 = vld [vmem:[#allocation170_spill] sm:$0xff] }
 0x64e   : > { %3912 = vst.msk [vmem:[%s11765_s23 + $0x40] sm:$0xff] %vm735_vm0, %v3880_v23  ;;  %v8096_v31 = vpop.eup %8095  ;;  %8117 = vrcp.f32 %v4371_v9  ;;  %v4281_v23 = vsub.f32 0.0, %v12609_v53  ;;  %v5728_v33 = vsub.f32 0.0, %v12612_v19  ;;  %v12615_v53 = vld [vmem:[#allocation165_spill] sm:$0xff] }
 0x64f   : > { %v11925_v46 = vpop.permute.xlu1 %4539  ;;  %v8098_v26 = vpop.eup %8097  ;;  %8119 = vpow2.f32 %v4315_v17  ;;  %v5818_v40 = vadd.f32 1.0, %v8096_v31  ;;  %v12614_v31 = vld [vmem:[#allocation143_spill] sm:$0xff] }
 0x650   : > { %4579 = vrot.lane.b32.xlu1 %v3081_v56, %s8325_s22  ;;  %v11929_v7 = vpop.permute.xlu0 %5932  ;;  %v8100_v24 = vpop.eup %8099  ;;  %v6006_v10 = vmul.f32 %v8098_v26, %v11845_v38  ;;  %8121 = vpow2.f32 %v5758_v11  ;;  %v4366_v38 = vadd.f32 1.0, %v8094_v35  ;;  %v4333_v54 = vmul.f32 1.442695, %v4281_v23 }
 0x651   : > { %6070 = vperm.xlu0 %7753, %v6004_v34   ;;  %v8102_v52 = vpop.eup %8101  ;;  %v12611_v34 = vld [vmem:[#allocation162_spill] sm:$0xff]  ;;  %8123 = vrcp.f32 %v5809_v44  ;;  %v4616_v51 = vmul.f32 %v8100_v24, %v11778_v13  ;;  %v12613_v13 = vld [vmem:[#allocation129_spill] sm:$0xff]  ;;  %v4283_v11 = vsub.f32 0.0, %v12614_v31  ;;  %v5780_v26 = vmul.f32 1.442695, %v5728_v33 }
 0x652   : > { %v8104_v42 = vpop.eup %8103  ;;  %v5719_v57 = vsub.f32 0.0, %v12611_v34  ;;  %8125 = vpow2.f32 %v5776_v6  ;;  %v4625_v0 = vmul.f32 %v8102_v52, %v11867_v18  ;;  %v4274_v35 = vsub.f32 0.0, %v12613_v13  ;;  %v12616_v52 = vld [vmem:[#allocation33_spill] sm:$0xff] }
 0x653   : > { %v11934_v16 = vpop.permute.xlu1 %5922  ;;  %v8106_v37 = vpop.eup %8105  ;;  %v4373_v25 = vadd.f32 1.0, %v8104_v42  ;;  %8127 = vrcp.f32 %v5818_v40  ;;  %v5721_v23 = vsub.f32 0.0, %v12615_v53 }
 0x654   : > { %5962 = vrot.lane.b32.xlu1 %v3081_v56, %s8324_s18  ;;  %v3795_v14 = vpop.permute.xlu0 %3794  ;;  %v4364_v56 = vadd.f32 1.0, %v8090_v22  ;;  %v8108_v63 = vpop.eup %8107  ;;  %v5762_v17 = vmul.f32 1.442695, %v5719_v57 }
 0x655   : > { %v3888_v28 = vmul.f32 %v3795_v14, %v12608_v55  ;;  %4697 = vperm.xlu0 %7753, %v4623_v27   ;;  %v8110_v22 = vpop.eup %8109  ;;  %v5811_v55 = vadd.f32 1.0, %v8108_v63  ;;  %v12617_v63 = vld [vmem:[#allocation16_spill] sm:$0xff] }
 0x656   : > { %v8112_v27 = vpop.eup %8111  ;;  %8129 = vrcp.f32 %v4364_v56  ;;  %v5999_v18 = vmul.f32 %v8110_v22, %v11786_v1  ;;  %v5730_v56 = vsub.f32 0.0, %v11603_v48 }
 0x657   : > { %3920 = vst.msk [vmem:[%s11765_s23 + $0x80] sm:$0xff] %vm735_vm0, %v3888_v28  ;;  %v3770_v58 = vpop.permute.xlu1 %3769  ;;  %v8114_v14 = vpop.eup %8113  ;;  %8131 = vrcp.f32 %v4366_v38  ;;  %v5820_v6 = vadd.f32 1.0, %v8112_v27 }
 0x658   : > { %v3883_v62 = vmul.f32 %v3770_v58, %v12610_v29  ;;  %3869 = vperm.xlu1 %7754, %v3711_v49   ;;  %v11943_v50 = vpop.permute.xlu0 %4553  ;;  %v8116_v28 = vpop.eup %8115  ;;  %8133 = vpow2.f32 %v4333_v54  ;;  %v6008_v44 = vmul.f32 %v8114_v14, %v11873_v41  ;;  %v4319_v58 = vmul.f32 1.442695, %v4274_v35 }
 0x659   : > { %6080 = vperm.xlu0 %7753, %v6006_v10   ;;  %v8118_v24 = vpop.eup %8117  ;;  %8135 = vrcp.f32 %v4373_v25  ;;  %v4337_v29 = vmul.f32 1.442695, %v4283_v11  ;;  %v4618_v41 = vmul.f32 %v8106_v37, %v11819_v61  ;;  %v4375_v42 = vadd.f32 1.0, %v8116_v28  ;;  %v12618_v37 = vld [vmem:[#allocation132_spill] sm:$0xff]  ;;  %v12619_v25 = vld [vmem:[#allocation146_spill] sm:$0xff] }
 0x65a   : > { %3915 = vst.msk [vmem:[%s11765_s23 + $0x58] sm:$0xff] %vm735_vm0, %v3883_v62  ;;  %8137 = vpow2.f32 %v5762_v17  ;;  %v8120_v1 = vpop.eup %8119  ;;  %v4627_v34 = vmul.f32 %v8118_v24, %v11893_v3  ;;  %v4276_v33 = vsub.f32 0.0, %v12618_v37  ;;  %v4285_v27 = vsub.f32 0.0, %v12619_v25 }
 0x65b   : > { %v11951_v9 = vpop.permute.xlu1 %4543  ;;  %8139 = vrcp.f32 %v5811_v55  ;;  %v8122_v62 = vpop.eup %8121  ;;  %v5784_v13 = vmul.f32 1.442695, %v5730_v56 }
 0x65c   : > { %4662 = vperm.xlu1 %7754, %v4616_v51   ;;  %v11953_v59 = vpop.permute.xlu0 %5936  ;;  %8141 = vpow2.f32 %v5780_v26  ;;  %v8124_v38 = vpop.eup %8123  ;;  %v5766_v51 = vmul.f32 1.442695, %v5721_v23  ;;  %v5813_v3 = vadd.f32 1.0, %v8122_v62  ;;  %v5732_v23 = vsub.f32 0.0, %v11621_v5  ;;  %v12622_v62 = vld [vmem:[#allocation37_spill] sm:$0xff] }
 0x65d   : > { %4707 = vperm.xlu0 %7753, %v4625_v0   ;;  %8143 = vrcp.f32 %v5820_v6  ;;  %v8126_v61 = vpop.eup %8125  ;;  %v6001_v0 = vmul.f32 %v8124_v38, %v11829_v20  ;;  %v12620_v20 = vld [vmem:[#allocation167_spill] sm:$0xff] }
 0x65e   : > { %8145 = vpow2.f32 %v4319_v58  ;;  %v8128_v48 = vpop.eup %8127  ;;  %v5822_v31 = vadd.f32 1.0, %v8126_v61  ;;  %v5723_v28 = vsub.f32 0.0, %v12620_v20 }
 0x65f   : > { %v11959_v49 = vpop.permute.xlu1 %5926  ;;  %8147 = vpow2.f32 %v4337_v29  ;;  %v6010_v35 = vmul.f32 %v8128_v48, %v11902_v47  ;;  %v4341_v47 = vmul.f32 1.442695, %v4285_v27 }
 0x660   : > { %6045 = vperm.xlu1 %7754, %v5999_v18   ;;  %v3805_v10 = vpop.permute.xlu0 %3804  ;;  %v8130_v22 = vpop.eup %8129  ;;  %8149 = vrcp.f32 %v4375_v42  ;;  %v4323_v18 = vmul.f32 1.442695, %v4276_v33  ;;  %v12624_v33 = vld [vmem:[#allocation24_spill] sm:$0xff] }
 0x661   : > { %v3890_v40 = vmul.f32 %v3805_v10, %v12616_v52  ;;  %6090 = vperm.xlu0 %7753, %v6008_v44   ;;  %v8132_v14 = vpop.eup %8131  ;;  %8151 = vpow2.f32 %v5766_v51  ;;  %v4368_v44 = vadd.f32 1.0, %v8120_v1  ;;  %v4620_v24 = vmul.f32 %v8130_v22, %v11854_v30  ;;  %v12621_v1 = vld [vmem:[#allocation134_spill] sm:$0xff] }
 0x662   : > { %v8134_v55 = vpop.eup %8133  ;;  %8153 = vrcp.f32 %v5813_v3  ;;  %v5770_v30 = vmul.f32 1.442695, %v5723_v28  ;;  %v5788_v51 = vmul.f32 1.442695, %v5732_v23  ;;  %v12627_v23 = vld [vmem:[#allocation151_spill] sm:$0xff] }
 0x663   : > { %3922 = vst.msk [vmem:[%s11765_s23 + $0x90] sm:$0xff] %vm735_vm0, %v3890_v40  ;;  %v3780_v57 = vpop.permute.xlu1 %3779  ;;  %v8136_v26 = vpop.eup %8135  ;;  %8155 = vpow2.f32 %v5784_v13  ;;  %v4377_v52 = vadd.f32 1.0, %v8134_v55  ;;  %v4622_v13 = vmul.f32 %v8132_v14, %v11889_v45 }
 0x664   : > { %v3885_v54 = vmul.f32 %v3780_v57, %v12617_v63  ;;  %4672 = vperm.xlu1 %7754, %v4618_v41   ;;  %v11969_v19 = vpop.permute.xlu0 %4557  ;;  %v8138_v53 = vpop.eup %8137  ;;  %v4629_v6 = vmul.f32 %v8136_v26, %v11918_v39  ;;  %8157 = vrcp.f32 %v5822_v31  ;;  %v4278_v41 = vsub.f32 0.0, %v12621_v1  ;;  %v12623_v57 = vld [vmem:[#allocation149_spill] sm:$0xff] }
 0x665   : > { %4717 = vperm.xlu0 %7753, %v4627_v34   ;;  %v8140_v58 = vpop.eup %8139  ;;  %8159 = vpow2.f32 %v4323_v18  ;;  %v5815_v5 = vadd.f32 1.0, %v8138_v53  ;;  %v4287_v38 = vsub.f32 0.0, %v12623_v57  ;;  %v5734_v31 = vsub.f32 0.0, %v11639_v21 }
 0x666   : > { %3917 = vst.msk [vmem:[%s11765_s23 + $0x68] sm:$0xff] %vm735_vm0, %v3885_v54  ;;  %v8142_v29 = vpop.eup %8141  ;;  %8161 = vrcp.f32 %v4368_v44  ;;  %v6003_v39 = vmul.f32 %v8140_v58, %v11864_v60 }
 0x667   : > { %v11977_v17 = vpop.permute.xlu1 %4547  ;;  %v8144_v56 = vpop.eup %8143  ;;  %8163 = vpow2.f32 %v4341_v47  ;;  %v5824_v37 = vadd.f32 1.0, %v8142_v29  ;;  %v5792_v58 = vmul.f32 1.442695, %v5734_v31 }
 0x668   : > { %6055 = vperm.xlu1 %7754, %v6001_v0   ;;  %v11979_v11 = vpop.permute.xlu0 %5940  ;;  %v8146_v34 = vpop.eup %8145  ;;  %v6012_v63 = vmul.f32 %v8144_v56, %v11929_v7  ;;  %8165 = vrcp.f32 %v4377_v52  ;;  %v4327_v0 = vmul.f32 1.442695, %v4278_v41  ;;  %v12625_v7 = vld [vmem:[#allocation168_spill] sm:$0xff]  ;;  %v12629_v56 = vld [vmem:[#allocation41_spill] sm:$0xff] }
 0x669   : > { %6100 = vperm.xlu0 %7753, %v6010_v35   ;;  %v8148_v61 = vpop.eup %8147  ;;  %8167 = vpow2.f32 %v5770_v30  ;;  %v4370_v25 = vadd.f32 1.0, %v8146_v34  ;;  %v5725_v27 = vsub.f32 0.0, %v12625_v7  ;;  %v4345_v35 = vmul.f32 1.442695, %v4287_v38 }
 0x66a   : > { %v8150_v60 = vpop.eup %8149  ;;  %8169 = vrcp.f32 %v5815_v5  ;;  %v4379_v28 = vadd.f32 1.0, %v8148_v61 }
 0x66b   : > { %v11985_v10 = vpop.permute.xlu1 %5930  ;;  %v8152_v22 = vpop.eup %8151  ;;  %8171 = vpow2.f32 %v5788_v51  ;;  %v4631_v55 = vmul.f32 %v8150_v60, %v11943_v50  ;;  %v5774_v47 = vmul.f32 1.442695, %v5725_v27  ;;  %v5736_v51 = vsub.f32 0.0, %v11653_v4  ;;  %v12631_v4 = vld [vmem:[#allocation140_spill] sm:$0xff] }
 0x66c   : > { %4682 = vperm.xlu1 %7754, %v4620_v24   ;;  %v3815_v40 = vpop.permute.xlu0 %3814  ;;  %v8154_v20 = vpop.eup %8153  ;;  %8173 = vrcp.f32 %v5824_v37  ;;  %v12626_v24 = vld [vmem:[#allocation136_spill] sm:$0xff]  ;;  %v5817_v14 = vadd.f32 1.0, %v8152_v22 }
 0x66d   : > { %v3892_v42 = vmul.f32 %v3815_v40, %v12622_v62  ;;  %4727 = vperm.xlu0 %7753, %v4629_v6   ;;  %v8156_v44 = vpop.eup %8155  ;;  %8175 = vpow2.f32 %v4327_v0  ;;  %v4280_v45 = vsub.f32 0.0, %v12626_v24  ;;  %v6005_v21 = vmul.f32 %v8154_v20, %v11900_v36 }
 0x66e   : > { %v8158_v53 = vpop.eup %8157  ;;  %8177 = vrcp.f32 %v4370_v25  ;;  %v4289_v6 = vsub.f32 0.0, %v12627_v23  ;;  %v5826_v1 = vadd.f32 1.0, %v8156_v44 }
 0x66f   : > { %3924 = vst.msk [vmem:[%s11765_s23 + $0xa0] sm:$0xff] %vm735_vm0, %v3892_v42  ;;  %v3790_v54 = vpop.permute.xlu1 %3789  ;;  %v8160_v50 = vpop.eup %8159  ;;  %8179 = vpow2.f32 %v4345_v35  ;;  %v6014_v52 = vmul.f32 %v8158_v53, %v11953_v59  ;;  %v4331_v62 = vmul.f32 1.442695, %v4280_v45  ;;  %v12628_v42 = vld [vmem:[#allocation169_spill] sm:$0xff]  ;;  %v12632_v45 = vld [vmem:[#allocation171_spill] sm:$0xff] }
 0x670   : > { %v3887_v48 = vmul.f32 %v3790_v54, %v12624_v33  ;;  %6065 = vperm.xlu1 %7754, %v6003_v39   ;;  %v11995_v3 = vpop.permute.xlu0 %4561  ;;  %v8162_v29 = vpop.eup %8161  ;;  %8181 = vrcp.f32 %v4379_v28  ;;  %v5727_v36 = vsub.f32 0.0, %v12628_v42  ;;  %v4372_v34 = vadd.f32 1.0, %v8160_v50  ;;  %v12630_v33 = vld [vmem:[#allocation28_spill] sm:$0xff] }
 0x671   : > { %6110 = vperm.xlu0 %7753, %v6012_v63   ;;  %v8164_v30 = vpop.eup %8163  ;;  %8183 = vrcp.f32 %v5817_v14  ;;  %v4624_v59 = vmul.f32 %v8162_v29, %v11925_v46  ;;  %v4349_v38 = vmul.f32 1.442695, %v4289_v6  ;;  %v5729_v14 = vsub.f32 0.0, %v12632_v45  ;;  %v12633_v29 = vld [vmem:[#allocation153_spill] sm:$0xff] }
 0x672   : > { %3919 = vst.msk [vmem:[%s11765_s23 + $0x78] sm:$0xff] %vm735_vm0, %v3887_v48  ;;  %v8166_v39 = vpop.eup %8165  ;;  %8185 = vpow2.f32 %v5774_v47  ;;  %v4381_v37 = vadd.f32 1.0, %v8164_v30  ;;  %v5778_v0 = vmul.f32 1.442695, %v5727_v36 }
 0x673   : > { %v12003_v18 = vpop.permute.xlu1 %4551  ;;  %v8168_v57 = vpop.eup %8167  ;;  %8187 = vpow2.f32 %v5792_v58  ;;  %v4633_v63 = vmul.f32 %v8166_v39, %v11969_v19  ;;  %v4282_v19 = vsub.f32 0.0, %v12631_v4  ;;  %v5782_v36 = vmul.f32 1.442695, %v5729_v14 }
 0x674   : > { %4692 = vperm.xlu1 %7754, %v4622_v13   ;;  %v12005_v26 = vpop.permute.xlu0 %5944  ;;  %v8170_v61 = vpop.eup %8169  ;;  %8189 = vrcp.f32 %v5826_v1  ;;  %v5819_v25 = vadd.f32 1.0, %v8168_v57  ;;  %v5796_v13 = vmul.f32 1.442695, %v5736_v51  ;;  %v4291_v1 = vsub.f32 0.0, %v12633_v29  ;;  %v12639_v29 = vld [vmem:[#allocation36_spill] sm:$0xff] }
 0x675   : > { %4737 = vperm.xlu0 %7753, %v4631_v55   ;;  %v8172_v46 = vpop.eup %8171  ;;  %8191 = vpow2.f32 %v4331_v62  ;;  %v6007_v7 = vmul.f32 %v8170_v61, %v11934_v16  ;;  %v4335_v16 = vmul.f32 1.442695, %v4282_v19  ;;  %v12635_v62 = vld [vmem:[#allocation142_spill] sm:$0xff] }
 0x676   : > { %v8174_v22 = vpop.eup %8173  ;;  %8193 = vrcp.f32 %v4372_v34  ;;  %v5828_v20 = vadd.f32 1.0, %v8172_v46  ;;  %v4284_v42 = vsub.f32 0.0, %v12635_v62  ;;  %v4353_v61 = vmul.f32 1.442695, %v4291_v1 }
 0x677   : > { %v12011_v40 = vpop.permute.xlu1 %5934  ;;  %v8176_v27 = vpop.eup %8175  ;;  %8195 = vpow2.f32 %v4349_v38  ;;  %v6016_v35 = vmul.f32 %v8174_v22, %v11979_v11  ;;  %v12636_v38 = vld [vmem:[#allocation32_spill] sm:$0xff] }
 0x678   : > { %6075 = vperm.xlu1 %7754, %v6005_v21   ;;  %v3825_v41 = vpop.permute.xlu0 %3824  ;;  %v8178_v55 = vpop.eup %8177  ;;  %8197 = vrcp.f32 %v4381_v37  ;;  %v4374_v11 = vadd.f32 1.0, %v8176_v27 }
 0x679   : > { %v3894_v5 = vmul.f32 %v3825_v41, %v12629_v56  ;;  %6120 = vperm.xlu0 %7753, %v6014_v52   ;;  %v8180_v44 = vpop.eup %8179  ;;  %8199 = vpow2.f32 %v5778_v0  ;;  %v4626_v53 = vmul.f32 %v8178_v55, %v11951_v9  ;;  %v12634_v41 = vld [vmem:[#allocation45_spill] sm:$0xff] }
 0x67a   : > { %v8182_v24 = vpop.eup %8181  ;;  %8201 = vrcp.f32 %v5819_v25  ;;  %v4383_v6 = vadd.f32 1.0, %v8180_v44 }
 0x67b   : > { %3926 = vst.msk [vmem:[%s11765_s23 + $0xb0] sm:$0xff] %vm735_vm0, %v3894_v5  ;;  %v3800_v54 = vpop.permute.xlu1 %3799  ;;  %v8184_v47 = vpop.eup %8183  ;;  %8203 = vpow2.f32 %v5796_v13  ;;  %v4635_v21 = vmul.f32 %v8182_v24, %v11995_v3 }
 0x67c   : > { %v3889_v48 = vmul.f32 %v3800_v54, %v12630_v33  ;;  %4702 = vperm.xlu1 %7754, %v4624_v59   ;;  %v12021_v60 = vpop.permute.xlu0 %4565  ;;  %v8186_v23 = vpop.eup %8185  ;;  %8205 = vrcp.f32 %v5828_v20  ;;  %v6009_v3 = vmul.f32 %v8184_v47, %v11959_v49  ;;  %v5738_v49 = vsub.f32 0.0, %v11669_v12 }
 0x67d   : > { %4747 = vperm.xlu0 %7753, %v4633_v63   ;;  %v8188_v52 = vpop.eup %8187  ;;  %8207 = vpow2.f32 %v4335_v16  ;;  %v5821_v5 = vadd.f32 1.0, %v8186_v23  ;;  %v4339_v33 = vmul.f32 1.442695, %v4284_v42 }
 0x67e   : > { %3921 = vst.msk [vmem:[%s11765_s23 + $0x88] sm:$0xff] %vm735_vm0, %v3889_v48  ;;  %v8190_v9 = vpop.eup %8189  ;;  %8209 = vrcp.f32 %v4374_v11  ;;  %v5830_v57 = vadd.f32 1.0, %v8188_v52  ;;  %v5800_v27 = vmul.f32 1.442695, %v5738_v49 }
 0x67f   : > { %v12028_v31 = vpop.permute.xlu1 %4555  ;;  %v8192_v56 = vpop.eup %8191  ;;  %v6018_v39 = vmul.f32 %v8190_v9, %v12005_v26  ;;  %8211 = vrcp.f32 %v4383_v6  ;;  %v5731_v26 = vsub.f32 0.0, %v11611_v15  ;;  %v12640_v9 = vld [vmem:[#allocation148_spill] sm:$0xff] }
 0x680   : > { %6085 = vperm.xlu1 %7754, %v6007_v7   ;;  %v12030_v28 = vpop.permute.xlu0 %5948  ;;  %v8194_v59 = vpop.eup %8193  ;;  %8213 = vpow2.f32 %v5782_v36  ;;  %v4376_v0 = vadd.f32 1.0, %v8192_v56  ;;  %v4288_v62 = vsub.f32 0.0, %v12640_v9 }
 0x681   : > { %6130 = vperm.xlu0 %7753, %v6016_v35   ;;  %v8196_v54 = vpop.eup %8195  ;;  %v4628_v48 = vmul.f32 %v8194_v59, %v11977_v17  ;;  %8215 = vrcp.f32 %v5821_v5  ;;  %v12637_v17 = vld [vmem:[#allocation144_spill] sm:$0xff]  ;;  %v5786_v35 = vmul.f32 1.442695, %v5731_v26 }
 0x682   : > { %v8198_v37 = vpop.eup %8197  ;;  %v4385_v25 = vadd.f32 1.0, %v8196_v54  ;;  %8217 = vrcp.f32 %v5830_v57  ;;  %v4286_v13 = vsub.f32 0.0, %v12637_v17  ;;  %v4347_v57 = vmul.f32 1.442695, %v4288_v62 }
 0x683   : > { %v12035_v50 = vpop.permute.xlu1 %5938  ;;  %v8200_v46 = vpop.eup %8199  ;;  %v4637_v22 = vmul.f32 %v8198_v37, %v12021_v60  ;;  %8219 = vpow2.f32 %v4353_v61 }
 0x684   : > { %4712 = vperm.xlu1 %7754, %v4626_v53   ;;  %v3835_v58 = vpop.permute.xlu0 %3834  ;;  %v8202_v19 = vpop.eup %8201  ;;  %8221 = vpow2.f32 %v4339_v33  ;;  %v5823_v60 = vadd.f32 1.0, %v8200_v46  ;;  %v12638_v53 = vld [vmem:[#allocation49_spill] sm:$0xff] }
 0x685   : > { %v3896_v30 = vmul.f32 %v3835_v58, %v12634_v41  ;;  %4757 = vperm.xlu0 %7753, %v4635_v21   ;;  %v8204_v7 = vpop.eup %8203  ;;  %v6011_v55 = vmul.f32 %v8202_v19, %v11985_v10  ;;  %8223 = vrcp.f32 %v4376_v0  ;;  %v4343_v21 = vmul.f32 1.442695, %v4286_v13  ;;  %v12642_v19 = vld [vmem:[#allocation150_spill] sm:$0xff]  ;;  %v12643_v13 = vld [vmem:[#allocation40_spill] sm:$0xff] }
 0x686   : > { %v8206_v15 = vpop.eup %8205  ;;  %8225 = vrcp.f32 %v4385_v25  ;;  %v5832_v16 = vadd.f32 1.0, %v8204_v7  ;;  %v5733_v10 = vsub.f32 0.0, %v11628_v8  ;;  %v4290_v25 = vsub.f32 0.0, %v12642_v19 }
 0x687   : > { %3928 = vst.msk [vmem:[%s11765_s23 + $0xc0] sm:$0xff] %vm735_vm0, %v3896_v30  ;;  %v3810_v34 = vpop.permute.xlu1 %3809  ;;  %v6020_v20 = vmul.f32 %v8206_v15, %v12030_v28  ;;  %v8208_v24 = vpop.eup %8207  ;;  %8227 = vpow2.f32 %v5800_v27 }
 0x688   : > { %v3891_v51 = vmul.f32 %v3810_v34, %v12636_v38  ;;  %6095 = vperm.xlu1 %7754, %v6009_v3   ;;  %v4570_v63 = vpop.permute.xlu0 %4569  ;;  %v8210_v14 = vpop.eup %8209  ;;  %8229 = vpow2.f32 %v5786_v35  ;;  %v4378_v23 = vadd.f32 1.0, %v8208_v24  ;;  %v5735_v38 = vsub.f32 0.0, %v11644_v2  ;;  %v12641_v2 = vld [vmem:[#allocation53_spill] sm:$0xff] }
 0x689   : > { %6140 = vperm.xlu0 %7753, %v6018_v39   ;;  %v8212_v11 = vpop.eup %8211  ;;  %v4630_v28 = vmul.f32 %v8210_v14, %v12003_v18  ;;  %8231 = vrcp.f32 %v5823_v60  ;;  %v5790_v18 = vmul.f32 1.442695, %v5733_v10  ;;  %v12645_v10 = vld [vmem:[#allocation70_spill] sm:$0xff] }
 0x68a   : > { %3923 = vst.msk [vmem:[%s11765_s23 + $0x98] sm:$0xff] %vm735_vm0, %v3891_v51  ;;  %v4639_v6 = vmul.f32 %v8212_v11, %v4570_v63  ;;  %v8214_v52 = vpop.eup %8213  ;;  %8233 = vrcp.f32 %v5832_v16  ;;  %v5794_v46 = vmul.f32 1.442695, %v5735_v38  ;;  %v4351_v16 = vmul.f32 1.442695, %v4290_v25 }
 0x68b   : > { %v12051_v4 = vpop.permute.xlu1 %4559  ;;  %v8216_v30 = vpop.eup %8215  ;;  %8235 = vpow2.f32 %v4343_v21  ;;  %v5825_v3 = vadd.f32 1.0, %v8214_v52 }
 0x68c   : > { %4722 = vperm.xlu1 %7754, %v4628_v48   ;;  %v5953_v12 = vpop.permute.xlu0 %5952  ;;  %v8218_v8 = vpop.eup %8217  ;;  %v6013_v42 = vmul.f32 %v8216_v30, %v12011_v40  ;;  %8237 = vrcp.f32 %v4378_v23 }
 0x68d   : > { %4767 = vperm.xlu0 %7753, %v4637_v22   ;;  %v8220_v36 = vpop.eup %8219  ;;  %v6022_v56 = vmul.f32 %v8218_v8, %v5953_v12  ;;  %8239 = vpow2.f32 %v5790_v18  ;;  %v12646_v18 = vld [vmem:[#allocation152_spill] sm:$0xff] }
 0x68e   : > { %v8222_v39 = vpop.eup %8221  ;;  %v4387_v63 = vadd.f32 1.0, %v8220_v36  ;;  %8241 = vrcp.f32 %v5825_v3  ;;  %v12647_v36 = vld [vmem:[#allocation44_spill] sm:$0xff] }
 0x68f   : > { %v12056_v44 = vpop.permute.xlu1 %5942  ;;  %v8224_v59 = vpop.eup %8223  ;;  %v4380_v61 = vadd.f32 1.0, %v8222_v39  ;;  %8243 = vpow2.f32 %v4347_v57 }
 0x690   : > { %6105 = vperm.xlu1 %7754, %v6011_v55   ;;  %v3845_v45 = vpop.permute.xlu0 %3844  ;;  %v8226_v51 = vpop.eup %8225  ;;  %v4632_v40 = vmul.f32 %v8224_v59, %v12028_v31  ;;  %8245 = vrcp.f32 %v4387_v63  ;;  %v5739_v63 = vsub.f32 0.0, %v11674_v43  ;;  %v12649_v43 = vld [vmem:[#allocation21_spill] sm:$0xff] }
 0x691   : > { %v3898_v47 = vmul.f32 %v3845_v45, %v12638_v53  ;;  %6150 = vperm.xlu0 %7753, %v6020_v20   ;;  %v8228_v54 = vpop.eup %8227  ;;  %8247 = vrcp.f32 %v4380_v61  ;;  %v12644_v20 = vld [vmem:[#allocation19_spill] sm:$0xff] }
 0x692   : > { %v8230_v33 = vpop.eup %8229  ;;  %v5834_v31 = vadd.f32 1.0, %v8228_v54  ;;  %8249 = vpow2.f32 %v5794_v46  ;;  %v12648_v61 = vld [vmem:[#allocation59_spill] sm:$0xff]  ;;  %v5802_v46 = vmul.f32 1.442695, %v5739_v63 }
 0x693   : > { %3930 = vst.msk [vmem:[%s11765_s23 + $0xd0] sm:$0xff] %vm735_vm0, %v3898_v47  ;;  %v3820_v58 = vpop.permute.xlu1 %3819  ;;  %v8232_v48 = vpop.eup %8231  ;;  %v5827_v7 = vadd.f32 1.0, %v8230_v33  ;;  %v12660_v63 = vld [vmem:[#allocation79_spill] sm:$0xff] }
 0x694   : > { %v3893_v1 = vmul.f32 %v3820_v58, %v12639_v29  ;;  %4732 = vperm.xlu1 %7754, %v4630_v28   ;;  %v4574_v41 = vpop.permute.xlu0 %4573  ;;  %v8234_v22 = vpop.eup %8233  ;;  %v6015_v12 = vmul.f32 %v8232_v48, %v12035_v50  ;;  %v5737_v50 = vsub.f32 0.0, %v11661_v32  ;;  %8251 = vrcp.f32 %v5834_v31 }
 0x695   : > { %4777 = vperm.xlu0 %7753, %v4639_v6   ;;  %v4641_v49 = vmul.f32 %v8226_v51, %v4574_v41  ;;  %v8236_v17 = vpop.eup %8235  ;;  %8253 = vrcp.f32 %v5827_v7 }
 0x696   : > { %3925 = vst.msk [vmem:[%s11765_s23 + $0xa8] sm:$0xff] %vm735_vm0, %v3893_v1  ;;  %v8238_v60 = vpop.eup %8237  ;;  %v4382_v14 = vadd.f32 1.0, %v8236_v17  ;;  %8255 = vpow2.f32 %v4351_v16  ;;  %v5798_v23 = vmul.f32 1.442695, %v5737_v50  ;;  %v12651_v17 = vld [vmem:[#allocation71_spill] sm:$0xff] }
 0x697   : > { %v12068_v5 = vpop.permute.xlu1 %4563  ;;  %v4634_v45 = vmul.f32 %v8238_v60, %v12051_v4  ;;  %v8240_v47 = vpop.eup %8239 }
 0x698   : > { %6115 = vperm.xlu1 %7754, %v6013_v42   ;;  %v5957_v34 = vpop.permute.xlu0 %5956  ;;  %v8242_v21 = vpop.eup %8241  ;;  %8257 = vrcp.f32 %v4382_v14  ;;  %v5829_v4 = vadd.f32 1.0, %v8240_v47  ;;  %v4292_v42 = vsub.f32 0.0, %v12646_v18  ;;  %v12657_v18 = vld [vmem:[#allocation77_spill] sm:$0xff] }
 0x699   : > { %6160 = vperm.xlu0 %7753, %v6022_v56   ;;  %v6024_v27 = vmul.f32 %v8234_v22, %v5957_v34  ;;  %v6017_v32 = vmul.f32 %v8242_v21, %v12056_v44  ;;  %v8244_v6 = vpop.eup %8243  ;;  %8259 = vpow2.f32 %v5798_v23  ;;  %v12653_v21 = vld [vmem:[#allocation75_spill] sm:$0xff] }
 0x69a   : > { %v8246_v52 = vpop.eup %8245  ;;  %v4384_v62 = vadd.f32 1.0, %v8244_v6  ;;  %8261 = vrcp.f32 %v5829_v4  ;;  %v4355_v51 = vmul.f32 1.442695, %v4292_v42  ;;  %v12654_v6 = vld [vmem:[#allocation52_spill] sm:$0xff] }
 0x69b   : > { %v12072_v37 = vpop.permute.xlu1 %5946  ;;  %v8248_v1 = vpop.eup %8247 }
 0x69c   : > { %4742 = vperm.xlu1 %7754, %v4632_v40   ;;  %v3855_v26 = vpop.permute.xlu0 %3854  ;;  %v4636_v30 = vmul.f32 %v8248_v1, %v12068_v5  ;;  %v8250_v9 = vpop.eup %8249  ;;  %8263 = vrcp.f32 %v4384_v62  ;;  %v12655_v1 = vld [vmem:[#allocation27_spill] sm:$0xff]  ;;  %v12656_v62 = vld [vmem:[#allocation18_spill] sm:$0xff] }
 0x69d   : > { %v3900_v0 = vmul.f32 %v3855_v26, %v12641_v2  ;;  %4787 = vperm.xlu0 %7753, %v4641_v49   ;;  %v5831_v5 = vadd.f32 1.0, %v8250_v9 }
 0x69e   : > { %v8252_v44 = vpop.eup %8251 }
 0x69f   : > { %3932 = vst.msk [vmem:[%s11765_s23 + $0xe0] sm:$0xff] %vm735_vm0, %v3900_v0  ;;  %v3830_v15 = vpop.permute.xlu1 %3829  ;;  %v8254_v39 = vpop.eup %8253  ;;  %8265 = vrcp.f32 %v5831_v5 }
 0x6a0   : > { %v3895_v35 = vmul.f32 %v3830_v15, %v12643_v13  ;;  %6125 = vperm.xlu1 %7754, %v6015_v12   ;;  %v4648_v55 = vpop.permute.xlu0 %4647  ;;  %v6019_v59 = vmul.f32 %v8254_v39, %v12072_v37  ;;  %v8256_v38 = vpop.eup %8255  ;;  %8267 = vpow2.f32 %v4355_v51  ;;  %v12650_v12 = vld [vmem:[#allocation48_spill] sm:$0xff] }
 0x6a1   : > { %v4805_v24 = vmul.f32 %v4648_v55, %v12644_v20  ;;  %6170 = vperm.xlu0 %7753, %v6024_v27   ;;  %v4386_v26 = vadd.f32 1.0, %v8256_v38 }
 0x6a2   : > { %3927 = vst.msk [vmem:[%s11765_s23 + $0xb8] sm:$0xff] %vm735_vm0, %v3895_v35  ;;  %v8258_v54 = vpop.eup %8257 }
 0x6a3   : > { %6507 = vst.msk [vmem:[%s11765_s23 + $0x100] sm:$0xff] %vm735_vm0, %v4805_v24  ;;  %v4568_v53 = vpop.permute.xlu1 %4567  ;;  %v8260_v48 = vpop.eup %8259  ;;  %8269 = vrcp.f32 %v4386_v26  ;;  %v12652_v24 = vld [vmem:[#allocation23_spill] sm:$0xff] }
 0x6a4   : > { %4752 = vperm.xlu1 %7754, %v4634_v45   ;;  %v6031_v11 = vpop.permute.xlu0 %6030  ;;  %v4638_v33 = vmul.f32 %v8258_v54, %v4568_v53  ;;  %v8262_v0 = vpop.eup %8261  ;;  %v5833_v25 = vadd.f32 1.0, %v8260_v48  ;;  %8271 = vpow2.f32 %v5802_v46  ;;  %v12661_v26 = vld [vmem:[#allocation35_spill] sm:$0xff]  ;;  %v12662_v46 = vld [vmem:[#allocation57_spill] sm:$0xff] }
 0x6a5   : > { %v6188_v28 = vmul.f32 %v6031_v11, %v12645_v10 }
 0x6a6   : > { %v8264_v15 = vpop.eup %8263  ;;  %8273 = vrcp.f32 %v5833_v25  ;;  %v12664_v25 = vld [vmem:[#allocation20_spill] sm:$0xff] }
 0x6a7   : > { %6539 = vst.msk [vmem:[%s11765_s23 + $0x200] sm:$0xff] %vm735_vm0, %v6188_v28  ;;  %v5951_v58 = vpop.permute.xlu1 %5950 }
 0x6a8   : > { %6135 = vperm.xlu1 %7754, %v6017_v32   ;;  %v4578_v29 = vpop.permute.xlu0 %4577  ;;  %v6021_v19 = vmul.f32 %v8262_v0, %v5951_v58 }
 0x6a9   : > { %v4643_v41 = vmul.f32 %v8246_v52, %v4578_v29  ;;  %v8266_v20 = vpop.eup %8265 }
 0x6aa   : > { %v8268_v50 = vpop.eup %8267 }
 0x6ab   : > { %v3840_v8 = vpop.permute.xlu1 %3839  ;;  %4797 = vperm.xlu0 %7753, %v4643_v41   ;;  %v4388_v11 = vadd.f32 1.0, %v8268_v50 }
 0x6ac   : > { %v3897_v3 = vmul.f32 %v3840_v8, %v12647_v36  ;;  %4762 = vperm.xlu1 %7754, %v4636_v30   ;;  %v5961_v56 = vpop.permute.xlu0 %5960 }
 0x6ad   : > { %v6026_v34 = vmul.f32 %v8252_v44, %v5961_v56  ;;  %v8270_v47 = vpop.eup %8269  ;;  %8275 = vrcp.f32 %v4388_v11 }
 0x6ae   : > { %3929 = vst.msk [vmem:[%s11765_s23 + $0xc8] sm:$0xff] %vm735_vm0, %v3897_v3  ;;  %v8272_v28 = vpop.eup %8271  ;;  %v12658_v3 = vld [vmem:[#allocation73_spill] sm:$0xff] }
 0x6af   : > { %v4572_v57 = vpop.permute.xlu1 %4571  ;;  %6180 = vperm.xlu0 %7753, %v6026_v34   ;;  %v5835_v29 = vadd.f32 1.0, %v8272_v28  ;;  %v12659_v34 = vld [vmem:[#allocation31_spill] sm:$0xff] }
 0x6b0   : > { %6145 = vperm.xlu1 %7754, %v6019_v59   ;;  %v3865_v40 = vpop.permute.xlu0 %3864  ;;  %v4640_v35 = vmul.f32 %v8264_v15, %v4572_v57  ;;  %v8274_v52 = vpop.eup %8273 }
 0x6b1   : > { %v3902_v49 = vmul.f32 %v3865_v40, %v12648_v61  ;;  %8277 = vrcp.f32 %v5835_v29 }
 0x6b3   : > { %3934 = vst.msk [vmem:[%s11765_s23 + $0xf0] sm:$0xff] %vm735_vm0, %v3902_v49  ;;  %v5955_v37 = vpop.permute.xlu1 %5954 }
 0x6b4   : > { %4772 = vperm.xlu1 %7754, %v4638_v33   ;;  %v4658_v2 = vpop.permute.xlu0 %4657  ;;  %v6023_v45 = vmul.f32 %v8266_v20, %v5955_v37 }
 0x6b5   : > { %v4807_v22 = vmul.f32 %v4658_v2, %v12649_v43  ;;  %v12663_v43 = vld [vmem:[#allocation81_spill] sm:$0xff] }
 0x6b7   : > { %6509 = vst.msk [vmem:[%s11765_s23 + $0x110] sm:$0xff] %vm735_vm0, %v4807_v22  ;;  %v3850_v31 = vpop.permute.xlu1 %3849  ;;  %v8276_v5 = vpop.eup %8275 }
 0x6b8   : > { %v3899_v7 = vmul.f32 %v3850_v31, %v12650_v12  ;;  %6155 = vperm.xlu1 %7754, %v6021_v19   ;;  %v6041_v27 = vpop.permute.xlu0 %6040 }
 0x6b9   : > { %v6190_v13 = vmul.f32 %v6041_v27, %v12651_v17  ;;  %v12666_v17 = vld [vmem:[#allocation72_spill] sm:$0xff] }
 0x6ba   : > { %3931 = vst.msk [vmem:[%s11765_s23 + $0xd8] sm:$0xff] %vm735_vm0, %v3899_v7  ;;  %v12665_v7 = vld [vmem:[#allocation39_spill] sm:$0xff] }
 0x6bb   : > { %6541 = vst.msk [vmem:[%s11765_s23 + $0x210] sm:$0xff] %vm735_vm0, %v6190_v13  ;;  %v4576_v55 = vpop.permute.xlu1 %4575  ;;  %v8278_v54 = vpop.eup %8277 }
 0x6bc   : > { %4782 = vperm.xlu1 %7754, %v4640_v35   ;;  %v4668_v60 = vpop.permute.xlu0 %4667  ;;  %v4642_v23 = vmul.f32 %v8270_v47, %v4576_v55  ;;  %v12667_v55 = vld [vmem:[#allocation83_spill] sm:$0xff]  ;;  %v12670_v47 = vld [vmem:[#allocation74_spill] sm:$0xff] }
 0x6bd   : > { %v4809_v16 = vmul.f32 %v4668_v60, %v12652_v24  ;;  %v12668_v24 = vld [vmem:[#allocation22_spill] sm:$0xff] }
 0x6bf   : > { %6511 = vst.msk [vmem:[%s11765_s23 + $0x120] sm:$0xff] %vm735_vm0, %v4809_v16  ;;  %v5959_v14 = vpop.permute.xlu1 %5958 }
 0x6c0   : > { %6165 = vperm.xlu1 %7754, %v6023_v45   ;;  %v6051_v53 = vpop.permute.xlu0 %6050  ;;  %v6025_v30 = vmul.f32 %v8274_v52, %v5959_v14  ;;  %v12669_v45 = vld [vmem:[#allocation43_spill] sm:$0xff] }
 0x6c1   : > { %v6192_v10 = vmul.f32 %v6051_v53, %v12653_v21 }
 0x6c3   : > { %6543 = vst.msk [vmem:[%s11765_s23 + $0x220] sm:$0xff] %vm735_vm0, %v6192_v10  ;;  %v3860_v32 = vpop.permute.xlu1 %3859  ;;  %v12671_v10 = vld [vmem:[#allocation85_spill] sm:$0xff] }
 0x6c4   : > { %v3901_v4 = vmul.f32 %v3860_v32, %v12654_v6  ;;  %4792 = vperm.xlu1 %7754, %v4642_v23   ;;  %v4678_v58 = vpop.permute.xlu0 %4677  ;;  %v12672_v32 = vld [vmem:[#allocation26_spill] sm:$0xff] }
 0x6c5   : > { %v4811_v41 = vmul.f32 %v4678_v58, %v12655_v1  ;;  %v12673_v58 = vld [vmem:[#allocation47_spill] sm:$0xff]  ;;  %v12674_v1 = vld [vmem:[#allocation76_spill] sm:$0xff] }
 0x6c6   : > { %3933 = vst.msk [vmem:[%s11765_s23 + $0xe8] sm:$0xff] %vm735_vm0, %v3901_v4 }
 0x6c7   : > { %6513 = vst.msk [vmem:[%s11765_s23 + $0x130] sm:$0xff] %vm735_vm0, %v4811_v41  ;;  %v4653_v9 = vpop.permute.xlu1 %4652 }
 0x6c8   : > { %v4806_v8 = vmul.f32 %v4653_v9, %v12656_v62  ;;  %6175 = vperm.xlu1 %7754, %v6025_v30   ;;  %v6061_v44 = vpop.permute.xlu0 %6060  ;;  %v12675_v9 = vld [vmem:[#allocation87_spill] sm:$0xff] }
 0x6c9   : > { %v6194_v42 = vmul.f32 %v6061_v44, %v12657_v18  ;;  %v12676_v44 = vld [vmem:[#allocation30_spill] sm:$0xff] }
 0x6ca   : > { %6508 = vst.msk [vmem:[%s11765_s23 + $0x108] sm:$0xff] %vm735_vm0, %v4806_v8 }
 0x6cb   : > { %6545 = vst.msk [vmem:[%s11765_s23 + $0x230] sm:$0xff] %vm735_vm0, %v6194_v42  ;;  %v6036_v36 = vpop.permute.xlu1 %6035 }
 0x6cc   : > { %v6189_v56 = vmul.f32 %v6036_v36, %v12658_v3  ;;  %v4688_v39 = vpop.permute.xlu0 %4687  ;;  %v12677_v36 = vld [vmem:[#allocation51_spill] sm:$0xff] }
 0x6cd   : > { %v4813_v59 = vmul.f32 %v4688_v39, %v12659_v34  ;;  %v12678_v39 = vld [vmem:[#allocation78_spill] sm:$0xff] }
 0x6ce   : > { %6540 = vst.msk [vmem:[%s11765_s23 + $0x208] sm:$0xff] %vm735_vm0, %v6189_v56 }
 0x6cf   : > { %6515 = vst.msk [vmem:[%s11765_s23 + $0x140] sm:$0xff] %vm735_vm0, %v4813_v59  ;;  %v4580_v57 = vpop.permute.xlu1 %4579 }
 0x6d0   : > { %v4644_v38 = vmul.f32 %v8276_v5, %v4580_v57  ;;  %v6071_v51 = vpop.permute.xlu0 %6070  ;;  %v12679_v5 = vld [vmem:[#allocation89_spill] sm:$0xff] }
 0x6d1   : > { %v6196_v40 = vmul.f32 %v6071_v51, %v12660_v63  ;;  %v12680_v51 = vld [vmem:[#allocation34_spill] sm:$0xff] }
 0x6d2   : > { %4802 = vperm.xlu1 %7754, %v4644_v38  }
 0x6d3   : > { %6547 = vst.msk [vmem:[%s11765_s23 + $0x240] sm:$0xff] %vm735_vm0, %v6196_v40  ;;  %v5963_v61 = vpop.permute.xlu1 %5962 }
 0x6d4   : > { %v6027_v49 = vmul.f32 %v8278_v54, %v5963_v61  ;;  %v4698_v33 = vpop.permute.xlu0 %4697  ;;  %v12681_v54 = vld [vmem:[#allocation56_spill] sm:$0xff] }
 0x6d5   : > { %v4815_v37 = vmul.f32 %v4698_v33, %v12661_v26  ;;  %v12682_v33 = vld [vmem:[#allocation80_spill] sm:$0xff] }
 0x6d6   : > { %6185 = vperm.xlu1 %7754, %v6027_v49  }
 0x6d7   : > { %6517 = vst.msk [vmem:[%s11765_s23 + $0x150] sm:$0xff] %vm735_vm0, %v4815_v37  ;;  %v3870_v48 = vpop.permute.xlu1 %3869 }
 0x6d8   : > { %v3903_v2 = vmul.f32 %v3870_v48, %v12662_v46  ;;  %v6081_v0 = vpop.permute.xlu0 %6080  ;;  %v12683_v48 = vld [vmem:[#allocation91_spill] sm:$0xff] }
 0x6d9   : > { %v6198_v22 = vmul.f32 %v6081_v0, %v12663_v43  ;;  %v12684_v0 = vld [vmem:[#allocation38_spill] sm:$0xff] }
 0x6da   : > { %3935 = vst.msk [vmem:[%s11765_s23 + $0xf8] sm:$0xff] %vm735_vm0, %v3903_v2 }
 0x6db   : > { %6549 = vst.msk [vmem:[%s11765_s23 + $0x250] sm:$0xff] %vm735_vm0, %v6198_v22  ;;  %v4663_v19 = vpop.permute.xlu1 %4662 }
 0x6dc   : > { %v4808_v31 = vmul.f32 %v4663_v19, %v12664_v25  ;;  %v4708_v12 = vpop.permute.xlu0 %4707  ;;  %v12685_v19 = vld [vmem:[#allocation61_spill] sm:$0xff] }
 0x6dd   : > { %v4817_v27 = vmul.f32 %v4708_v12, %v12665_v7  ;;  %v12686_v12 = vld [vmem:[#allocation82_spill] sm:$0xff] }
 0x6de   : > { %6510 = vst.msk [vmem:[%s11765_s23 + $0x118] sm:$0xff] %vm735_vm0, %v4808_v31 }
 0x6df   : > { %6519 = vst.msk [vmem:[%s11765_s23 + $0x160] sm:$0xff] %vm735_vm0, %v4817_v27  ;;  %v6046_v15 = vpop.permute.xlu1 %6045 }
 0x6e0   : > { %v6191_v13 = vmul.f32 %v6046_v15, %v12666_v17  ;;  %v6091_v35 = vpop.permute.xlu0 %6090  ;;  %v12687_v15 = vld [vmem:[#allocation93_spill] sm:$0xff] }
 0x6e1   : > { %v6200_v60 = vmul.f32 %v6091_v35, %v12667_v55  ;;  %v12688_v35 = vld [vmem:[#allocation42_spill] sm:$0xff] }
 0x6e2   : > { %6542 = vst.msk [vmem:[%s11765_s23 + $0x218] sm:$0xff] %vm735_vm0, %v6191_v13 }
 0x6e3   : > { %6551 = vst.msk [vmem:[%s11765_s23 + $0x260] sm:$0xff] %vm735_vm0, %v6200_v60  ;;  %v4673_v20 = vpop.permute.xlu1 %4672 }
 0x6e4   : > { %v4810_v16 = vmul.f32 %v4673_v20, %v12668_v24  ;;  %v4718_v50 = vpop.permute.xlu0 %4717  ;;  %v12689_v20 = vld [vmem:[#allocation63_spill] sm:$0xff] }
 0x6e5   : > { %v4819_v14 = vmul.f32 %v4718_v50, %v12669_v45  ;;  %v12690_v50 = vld [vmem:[#allocation84_spill] sm:$0xff] }
 0x6e6   : > { %6512 = vst.msk [vmem:[%s11765_s23 + $0x128] sm:$0xff] %vm735_vm0, %v4810_v16 }
 0x6e7   : > { %6521 = vst.msk [vmem:[%s11765_s23 + $0x170] sm:$0xff] %vm735_vm0, %v4819_v14  ;;  %v6056_v53 = vpop.permute.xlu1 %6055 }
 0x6e8   : > { %v6193_v11 = vmul.f32 %v6056_v53, %v12670_v47  ;;  %v6101_v21 = vpop.permute.xlu0 %6100  ;;  %v12691_v53 = vld [vmem:[#allocation95_spill] sm:$0xff] }
 0x6e9   : > { %v6202_v28 = vmul.f32 %v6101_v21, %v12671_v10  ;;  %v12692_v21 = vld [vmem:[#allocation46_spill] sm:$0xff] }
 0x6ea   : > { %6544 = vst.msk [vmem:[%s11765_s23 + $0x228] sm:$0xff] %vm735_vm0, %v6193_v11 }
 0x6eb   : > { %6553 = vst.msk [vmem:[%s11765_s23 + $0x270] sm:$0xff] %vm735_vm0, %v6202_v28  ;;  %v4683_v23 = vpop.permute.xlu1 %4682 }
 0x6ec   : > { %v4812_v6 = vmul.f32 %v4683_v23, %v12672_v32  ;;  %v4728_v4 = vpop.permute.xlu0 %4727  ;;  %v12693_v23 = vld [vmem:[#allocation65_spill] sm:$0xff] }
 0x6ed   : > { %v4821_v52 = vmul.f32 %v4728_v4, %v12673_v58  ;;  %v12694_v4 = vld [vmem:[#allocation86_spill] sm:$0xff] }
 0x6ee   : > { %6514 = vst.msk [vmem:[%s11765_s23 + $0x138] sm:$0xff] %vm735_vm0, %v4812_v6 }
 0x6ef   : > { %6523 = vst.msk [vmem:[%s11765_s23 + $0x180] sm:$0xff] %vm735_vm0, %v4821_v52  ;;  %v6066_v29 = vpop.permute.xlu1 %6065 }
 0x6f0   : > { %v6195_v41 = vmul.f32 %v6066_v29, %v12674_v1  ;;  %v6111_v30 = vpop.permute.xlu0 %6110  ;;  %v12695_v29 = vld [vmem:[#allocation97_spill] sm:$0xff] }
 0x6f1   : > { %v6204_v62 = vmul.f32 %v6111_v30, %v12675_v9  ;;  %v12696_v30 = vld [vmem:[#allocation50_spill] sm:$0xff] }
 0x6f2   : > { %6546 = vst.msk [vmem:[%s11765_s23 + $0x238] sm:$0xff] %vm735_vm0, %v6195_v41 }
 0x6f3   : > { %6555 = vst.msk [vmem:[%s11765_s23 + $0x280] sm:$0xff] %vm735_vm0, %v6204_v62  ;;  %v4693_v8 = vpop.permute.xlu1 %4692 }
 0x6f4   : > { %v4814_v18 = vmul.f32 %v4693_v8, %v12676_v44  ;;  %v4738_v42 = vpop.permute.xlu0 %4737  ;;  %v12697_v8 = vld [vmem:[#allocation67_spill] sm:$0xff] }
 0x6f5   : > { %v4823_v3 = vmul.f32 %v4738_v42, %v12677_v36  ;;  %v12698_v42 = vld [vmem:[#allocation88_spill] sm:$0xff] }
 0x6f6   : > { %6516 = vst.msk [vmem:[%s11765_s23 + $0x148] sm:$0xff] %vm735_vm0, %v4814_v18 }
 0x6f7   : > { %6525 = vst.msk [vmem:[%s11765_s23 + $0x190] sm:$0xff] %vm735_vm0, %v4823_v3  ;;  %v6076_v56 = vpop.permute.xlu1 %6075 }
 0x6f8   : > { %v6197_v34 = vmul.f32 %v6076_v56, %v12678_v39  ;;  %v6121_v59 = vpop.permute.xlu0 %6120  ;;  %v12699_v56 = vld [vmem:[#allocation99_spill] sm:$0xff] }
 0x6f9   : > { %v6206_v57 = vmul.f32 %v6121_v59, %v12679_v5  ;;  %v12700_v59 = vld [vmem:[#allocation54_spill] sm:$0xff] }
 0x6fa   : > { %6548 = vst.msk [vmem:[%s11765_s23 + $0x248] sm:$0xff] %vm735_vm0, %v6197_v34 }
 0x6fb   : > { %6557 = vst.msk [vmem:[%s11765_s23 + $0x290] sm:$0xff] %vm735_vm0, %v6206_v57  ;;  %v4703_v38 = vpop.permute.xlu1 %4702 }
 0x6fc   : > { %v4816_v63 = vmul.f32 %v4703_v38, %v12680_v51  ;;  %v4748_v40 = vpop.permute.xlu0 %4747  ;;  %v12701_v38 = vld [vmem:[#allocation90_spill] sm:$0xff] }
 0x6fd   : > { %v4825_v61 = vmul.f32 %v4748_v40, %v12681_v54  ;;  %v12702_v40 = vld [vmem:[#allocation69_spill] sm:$0xff] }
 0x6fe   : > { %6518 = vst.msk [vmem:[%s11765_s23 + $0x158] sm:$0xff] %vm735_vm0, %v4816_v63 }
 0x6ff   : > { %6527 = vst.msk [vmem:[%s11765_s23 + $0x1a0] sm:$0xff] %vm735_vm0, %v4825_v61  ;;  %v6086_v49 = vpop.permute.xlu1 %6085 }
 0x700   : > { %v6199_v26 = vmul.f32 %v6086_v49, %v12682_v33  ;;  %v6131_v37 = vpop.permute.xlu0 %6130  ;;  %v12703_v49 = vld [vmem:[#allocation60_spill] sm:$0xff] }
 0x701   : > { %v6208_v46 = vmul.f32 %v6131_v37, %v12683_v48  ;;  %v12704_v37 = vld [vmem:[#allocation101_spill] sm:$0xff] }
 0x702   : > { %6550 = vst.msk [vmem:[%s11765_s23 + $0x258] sm:$0xff] %vm735_vm0, %v6199_v26 }
 0x703   : > { %6559 = vst.msk [vmem:[%s11765_s23 + $0x2a0] sm:$0xff] %vm735_vm0, %v6208_v46  ;;  %v4713_v2 = vpop.permute.xlu1 %4712 }
 0x704   : > { %v4818_v43 = vmul.f32 %v4713_v2, %v12684_v0  ;;  %v4758_v22 = vpop.permute.xlu0 %4757  ;;  %v12705_v2 = vld [vmem:[#allocation92_spill] sm:$0xff] }
 0x705   : > { %v4827_v25 = vmul.f32 %v4758_v22, %v12685_v19  ;;  %v12706_v22 = vld [vmem:[#allocation62_spill] sm:$0xff] }
 0x706   : > { %6520 = vst.msk [vmem:[%s11765_s23 + $0x168] sm:$0xff] %vm735_vm0, %v4818_v43 }
 0x707   : > { %6529 = vst.msk [vmem:[%s11765_s23 + $0x1b0] sm:$0xff] %vm735_vm0, %v4827_v25  ;;  %v6096_v31 = vpop.permute.xlu1 %6095 }
 0x708   : > { %v6201_v7 = vmul.f32 %v6096_v31, %v12686_v12  ;;  %v6141_v27 = vpop.permute.xlu0 %6140  ;;  %v12707_v31 = vld [vmem:[#allocation94_spill] sm:$0xff] }
 0x709   : > { %v6210_v17 = vmul.f32 %v6141_v27, %v12687_v15  ;;  %v12708_v27 = vld [vmem:[#allocation64_spill] sm:$0xff] }
 0x70a   : > { %6552 = vst.msk [vmem:[%s11765_s23 + $0x268] sm:$0xff] %vm735_vm0, %v6201_v7 }
 0x70b   : > { %6561 = vst.msk [vmem:[%s11765_s23 + $0x2b0] sm:$0xff] %vm735_vm0, %v6210_v17  ;;  %v4723_v13 = vpop.permute.xlu1 %4722 }
 0x70c   : > { %v4820_v55 = vmul.f32 %v4723_v13, %v12688_v35  ;;  %v4768_v60 = vpop.permute.xlu0 %4767  ;;  %v12709_v13 = vld [vmem:[#allocation96_spill] sm:$0xff] }
 0x70d   : > { %v4829_v24 = vmul.f32 %v4768_v60, %v12689_v20  ;;  %v12710_v60 = vld [vmem:[#allocation66_spill] sm:$0xff] }
 0x70e   : > { %6522 = vst.msk [vmem:[%s11765_s23 + $0x178] sm:$0xff] %vm735_vm0, %v4820_v55 }
 0x70f   : > { %6531 = vst.msk [vmem:[%s11765_s23 + $0x1c0] sm:$0xff] %vm735_vm0, %v4829_v24  ;;  %v6106_v16 = vpop.permute.xlu1 %6105 }
 0x710   : > { %v6203_v45 = vmul.f32 %v6106_v16, %v12690_v50  ;;  %v6151_v14 = vpop.permute.xlu0 %6150  ;;  %v12711_v16 = vld [vmem:[#allocation98_spill] sm:$0xff] }
 0x711   : > { %v6212_v47 = vmul.f32 %v6151_v14, %v12691_v53  ;;  %v12712_v14 = vld [vmem:[#allocation68_spill] sm:$0xff] }
 0x712   : > { %6554 = vst.msk [vmem:[%s11765_s23 + $0x278] sm:$0xff] %vm735_vm0, %v6203_v45 }
 0x713   : > { %6563 = vst.msk [vmem:[%s11765_s23 + $0x2c0] sm:$0xff] %vm735_vm0, %v6212_v47  ;;  %v4733_v11 = vpop.permute.xlu1 %4732 }
 0x714   : > { %v4822_v10 = vmul.f32 %v4733_v11, %v12692_v21  ;;  %v4778_v28 = vpop.permute.xlu0 %4777  ;;  %v12713_v11 = vld [vmem:[#allocation100_spill] sm:$0xff] }
 0x715   : > { %v4831_v32 = vmul.f32 %v4778_v28, %v12693_v23 }
 0x716   : > { %6524 = vst.msk [vmem:[%s11765_s23 + $0x188] sm:$0xff] %vm735_vm0, %v4822_v10 }
 0x717   : > { %6533 = vst.msk [vmem:[%s11765_s23 + $0x1d0] sm:$0xff] %vm735_vm0, %v4831_v32  ;;  %v6116_v6 = vpop.permute.xlu1 %6115 }
 0x718   : > { %v6205_v58 = vmul.f32 %v6116_v6, %v12694_v4  ;;  %v6161_v52 = vpop.permute.xlu0 %6160 }
 0x719   : > { %v6214_v1 = vmul.f32 %v6161_v52, %v12695_v29 }
 0x71a   : > { %6556 = vst.msk [vmem:[%s11765_s23 + $0x288] sm:$0xff] %vm735_vm0, %v6205_v58 }
 0x71b   : > { %6565 = vst.msk [vmem:[%s11765_s23 + $0x2d0] sm:$0xff] %vm735_vm0, %v6214_v1  ;;  %v4743_v41 = vpop.permute.xlu1 %4742 }
 0x71c   : > { %v4824_v9 = vmul.f32 %v4743_v41, %v12696_v30  ;;  %v4788_v62 = vpop.permute.xlu0 %4787 }
 0x71d   : > { %v4833_v44 = vmul.f32 %v4788_v62, %v12697_v8 }
 0x71e   : > { %6526 = vst.msk [vmem:[%s11765_s23 + $0x198] sm:$0xff] %vm735_vm0, %v4824_v9 }
 0x71f   : > { %6535 = vst.msk [vmem:[%s11765_s23 + $0x1e0] sm:$0xff] %vm735_vm0, %v4833_v44  ;;  %v6126_v18 = vpop.permute.xlu1 %6125 }
 0x720   : > { %v6207_v36 = vmul.f32 %v6126_v18, %v12698_v42  ;;  %v6171_v3 = vpop.permute.xlu0 %6170 }
 0x721   : > { %v6216_v39 = vmul.f32 %v6171_v3, %v12699_v56 }
 0x722   : > { %6558 = vst.msk [vmem:[%s11765_s23 + $0x298] sm:$0xff] %vm735_vm0, %v6207_v36 }
 0x723   : > { %6567 = vst.msk [vmem:[%s11765_s23 + $0x2e0] sm:$0xff] %vm735_vm0, %v6216_v39  ;;  %v4753_v34 = vpop.permute.xlu1 %4752 }
 0x724   : > { %v4826_v5 = vmul.f32 %v4753_v34, %v12700_v59 }
 0x726   : > { %6528 = vst.msk [vmem:[%s11765_s23 + $0x1a8] sm:$0xff] %vm735_vm0, %v4826_v5 }
 0x727   : > { %v6136_v57 = vpop.permute.xlu1 %6135 }
 0x728   : > { %v6209_v51 = vmul.f32 %v6136_v57, %v12701_v38 }
 0x72a   : > { %6560 = vst.msk [vmem:[%s11765_s23 + $0x2a8] sm:$0xff] %vm735_vm0, %v6209_v51  ;;  %v4798_v63 = vpop.permute.xlu0 %4797 }
 0x72b   : > { %v4835_v54 = vmul.f32 %v4798_v63, %v12702_v40  ;;  %v4763_v61 = vpop.permute.xlu1 %4762 }
 0x72c   : > { %v4828_v33 = vmul.f32 %v4763_v61, %v12703_v49 }
 0x72d   : > { %6537 = vst.msk [vmem:[%s11765_s23 + $0x1f0] sm:$0xff] %vm735_vm0, %v4835_v54 }
 0x72e   : > { %6530 = vst.msk [vmem:[%s11765_s23 + $0x1b8] sm:$0xff] %vm735_vm0, %v4828_v33  ;;  %v6181_v26 = vpop.permute.xlu0 %6180 }
 0x72f   : > { %v6218_v48 = vmul.f32 %v6181_v26, %v12704_v37  ;;  %v6146_v46 = vpop.permute.xlu1 %6145 }
 0x730   : > { %v6211_v0 = vmul.f32 %v6146_v46, %v12705_v2 }
 0x731   : > { %6569 = vst.msk [vmem:[%s11765_s23 + $0x2f0] sm:$0xff] %vm735_vm0, %v6218_v48 }
 0x732   : > { %6562 = vst.msk [vmem:[%s11765_s23 + $0x2b8] sm:$0xff] %vm735_vm0, %v6211_v0 }
 0x733   : > { %v4773_v43 = vpop.permute.xlu1 %4772 }
 0x734   : > { %v4830_v19 = vmul.f32 %v4773_v43, %v12706_v22 }
 0x736   : > { %6532 = vst.msk [vmem:[%s11765_s23 + $0x1c8] sm:$0xff] %vm735_vm0, %v4830_v19 }
 0x737   : > { %v6156_v25 = vpop.permute.xlu1 %6155 }
 0x738   : > { %v6213_v12 = vmul.f32 %v6156_v25, %v12707_v31 }
 0x73a   : > { %6564 = vst.msk [vmem:[%s11765_s23 + $0x2c8] sm:$0xff] %vm735_vm0, %v6213_v12 }
 0x73b   : > { %v4783_v7 = vpop.permute.xlu1 %4782 }
 0x73c   : > { %v4832_v15 = vmul.f32 %v4783_v7, %v12708_v27 }
 0x73e   : > { %6534 = vst.msk [vmem:[%s11765_s23 + $0x1d8] sm:$0xff] %vm735_vm0, %v4832_v15 }
 0x73f   : > { %v6166_v17 = vpop.permute.xlu1 %6165 }
 0x740   : > { %v6215_v35 = vmul.f32 %v6166_v17, %v12709_v13 }
 0x742   : > { %6566 = vst.msk [vmem:[%s11765_s23 + $0x2d8] sm:$0xff] %vm735_vm0, %v6215_v35 }
 0x743   : > { %v4793_v55 = vpop.permute.xlu1 %4792 }
 0x744   : > { %v4834_v20 = vmul.f32 %v4793_v55, %v12710_v60 }
 0x746   : > { %6536 = vst.msk [vmem:[%s11765_s23 + $0x1e8] sm:$0xff] %vm735_vm0, %v4834_v20 }
 0x747   : > { %v6176_v24 = vpop.permute.xlu1 %6175 }
 0x748   : > { %v6217_v50 = vmul.f32 %v6176_v24, %v12711_v16 }
 0x74a   : > { %6568 = vst.msk [vmem:[%s11765_s23 + $0x2e8] sm:$0xff] %vm735_vm0, %v6217_v50 }
 0x751   : > { %v4803_v45 = vpop.permute.xlu1 %4802 }
 0x752   : > { %v4836_v53 = vmul.f32 %v4803_v45, %v12712_v14 }
 0x754   : > { %6538 = vst.msk [vmem:[%s11765_s23 + $0x1f8] sm:$0xff] %vm735_vm0, %v4836_v53 }
 0x755   : > { %v6186_v47 = vpop.permute.xlu1 %6185 }
 0x756   : > { %v6219_v21 = vmul.f32 %v6186_v47, %v12713_v11 }
 0x758   : > { %6570 = vst.msk [vmem:[%s11765_s23 + $0x2f8] sm:$0xff] %vm735_vm0, %v6219_v21 }
 0x759 PF: > { %s18_s27 = sadd.s32 1, %s8317_s27  }
 0x75a   : > { %p15_p4 = scmp.ge.s32.totalorder %s18_s27, 4  }
 0x75c   :  { %17 = sbr.rel (!%p15_p4) target bundleno = 1 (0x1), region = 90 }

</bundles_post_ra>
